<compile_context>
chip_gen: v5e
topology: v5e:2x2
jax: 0.10.0
libtpu: 0.0.40
codegen_flags: <defaults>
</compile_context>

<pallas_src>
import math
import jax
import jax.numpy as jnp
from jax import lax
from jax.experimental import pallas as pl
from jax.experimental.pallas import tpu as pltpu  # noqa: F401  (TPU backend)

EPS = 1e-15
NEG = -1e30                                  # pad-column bias -> exact 0 after softmax
PREC = jax.lax.Precision.HIGHEST             # faithful f32 matmuls (kernel + reference)

# ---------------- problem sizes (consistent with the module) ------------------
B = 2                       # batch
N = 32                      # nodes per graph (= average_nodes)
F_IN = 16                   # feat_in
C = 64                      # n_chan
K1 = math.ceil(0.4 * N)     # 13 super-nodes after pool1
K2 = math.ceil(0.4 * K1)    # 6  super-nodes after pool2
K1P, K2P = 16, 8            # 8-aligned padded cluster counts (extra clusters are dead)
NCLS = 4                    # n_classes
OUT_W = NCLS + 4            # logits + (mc1, o1, mc2, o2)

# ---------------- packed weight-slab row offsets (all multiples of 8) ---------
W1_OFF = 0                  # (2*F_IN, C) fused [w_rel1; w_root1]
W2_OFF = 32                 # (2*C,   C) fused conv2
W3_OFF = 160                # (2*C,   C) fused conv3
WL1_OFF = 288               # (C,     C) lin1
B1_ROW, B2_ROW, B3_ROW, BL1_ROW = 352, 360, 368, 376
WP1_OFF, WP2_OFF, WPL2_OFF = 384, 448, 512       # row-stacked projection weights
BP1_ROW, BP2_ROW, BPL2_ROW = 576, 584, 592       # projection biases (+NEG pad lanes)
W_ROWS = 600


# ---------------- shared helpers (used inside the kernel AND by the reference) -
def _mm(a, b):
    return jnp.dot(a, b, precision=PREC, preferred_element_type=jnp.float32)


def _fro(m):
    # Frobenius norm kept as a (1, 1) array (safer than rank-0 inside the kernel).
    return jnp.sqrt(jnp.sum(m * m, keepdims=True))


def _mincut_pool(x, adj, d_row, s_logits, mask, k_true):
    """dense_mincut_pool for one graph.

    x: (n, C) node features, adj: (n, n), d_row: (n, 1) unclamped row sums of adj,
    s_logits: (n, kp) where padded columns carry a NEG bias (=> exact-zero softmax),
    mask: (n, 1) node-validity mask or None, k_true: real number of clusters.
    """
    kp = s_logits.shape[-1]
    m = jnp.max(s_logits, axis=-1, keepdims=True)
    e = jnp.exp(s_logits - m)
    s = e / jnp.sum(e, axis=-1, keepdims=True)                  # softmax (exact)
    if mask is not None:
        x = x * mask
        s = s * mask

    st = s.T                                                    # one transpose, reused 3x
    out = _mm(st, x)                                            # s^T x      (kp, C)
    out_adj = _mm(_mm(st, adj), s)                              # s^T A s    (kp, kp)
    ss = _mm(st, s)                                             # s^T s      (kp, kp)

    r = lax.broadcasted_iota(jnp.int32, (kp, kp), 0)
    c = lax.broadcasted_iota(jnp.int32, (kp, kp), 1)
    diag = r == c
    eye_full = diag.astype(jnp.float32)
    eye_true = jnp.logical_and(diag, r < k_true).astype(jnp.float32)

    mincut_num = jnp.sum(out_adj * eye_full, keepdims=True)     # trace      (1, 1)
    mincut_den = jnp.sum(d_row * s * s, keepdims=True)          # trace(s^T D s)
    mincut_loss = -(mincut_num / mincut_den)                    # exact division

    ortho_loss = _fro(ss / _fro(ss) - eye_true * (1.0 / math.sqrt(k_true)))

    out_adj = out_adj * (1.0 - eye_full)                        # zero diagonal
    dn = jnp.sqrt(jnp.sum(out_adj, axis=-1, keepdims=True)) + EPS
    out_adj = out_adj / dn / jnp.reshape(dn, (1, kp))           # symmetric normalization
    return out, out_adj, mincut_loss, ortho_loss


# ---------------- the kernel (whole batch, no grid) ----------------------------
def net_kernel(x_ref, adj_ref, mask_ref, w_ref, out_ref):
    f32 = jnp.float32

    # ---- stage 1: SAGE conv1 + cluster projection, batched over both graphs --
    deg0, z1 = [], []
    for b in range(B):
        xb = x_ref[b]                                           # (N, F_IN)
        ab = adj_ref[b]                                         # (N, N)
        d = jnp.sum(ab, axis=-1, keepdims=True)                 # unclamped row sums
        agg = _mm(ab, xb) / jnp.maximum(d, 1.0)
        z1.append(jnp.concatenate([agg, xb], axis=-1))          # (N, 2*F_IN)
        deg0.append(d)
    z1 = jnp.concatenate(z1, axis=0)                            # (2N, 2*F_IN)

    w1 = w_ref[pl.ds(W1_OFF, 2 * F_IN), :]
    b1 = w_ref[pl.ds(B1_ROW, 1), :]
    mask_all = jnp.concatenate([mask_ref[0], mask_ref[1]], axis=0)   # (2N, 1)
    h1 = (_mm(z1, w1) + b1) * mask_all                          # (2N, C)

    wp1 = w_ref[pl.ds(WP1_OFF, C), :]                           # lanes 0:K1 = ws1
    bp1 = w_ref[pl.ds(BP1_ROW, 1), :]                           # lanes K1:K1P = NEG
    s1 = (_mm(h1, wp1) + bp1)[:, :K1P]                          # (2N, K1P)

    # ---- pool1 (per graph; cross terms forbid batching the pool matmuls) -----
    x1s, a1s, mc1s, o1s = [], [], [], []
    for b in range(B):
        lo = b * N
        xp, ap, mc, oo = _mincut_pool(h1[lo:lo + N], adj_ref[b], deg0[b],
                                      s1[lo:lo + N], mask_ref[b], K1)
        x1s.append(xp); a1s.append(ap); mc1s.append(mc); o1s.append(oo)

    # validity masks over the padded super-node rows (shared by both graphs)
    pad1 = (lax.broadcasted_iota(jnp.int32, (K1P, 1), 0) < K1).astype(f32)
    pad2 = (lax.broadcasted_iota(jnp.int32, (K2P, 1), 0) < K2).astype(f32)

    # ---- stage 2: SAGE conv2 + cluster projection, batched over both graphs --
    deg1, z2 = [], []
    for b in range(B):
        a1, x1 = a1s[b], x1s[b]
        d = jnp.sum(a1, axis=-1, keepdims=True)
        agg = _mm(a1, x1) / jnp.maximum(d, 1.0)
        z2.append(jnp.concatenate([agg, x1], axis=-1))          # (K1P, 2C)
        deg1.append(d)
    z2 = jnp.concatenate(z2, axis=0)                            # (2*K1P, 2C)

    w2 = w_ref[pl.ds(W2_OFF, 2 * C), :]
    b2 = w_ref[pl.ds(B2_ROW, 1), :]
    h2 = _mm(z2, w2) + b2                                       # (2*K1P, C)

    wp2 = w_ref[pl.ds(WP2_OFF, C), :]
    bp2 = w_ref[pl.ds(BP2_ROW, 1), :]
    s2 = (_mm(h2, wp2) + bp2)[:, :K2P]                          # (2*K1P, K2P)

    # ---- pool2 (pad1 plays the node-mask role for the dead padded rows) ------
    x2s, a2s, mc2s, o2s = [], [], [], []
    for b in range(B):
        lo = b * K1P
        xp, ap, mc, oo = _mincut_pool(h2[lo:lo + K1P], a1s[b], deg1[b],
                                      s2[lo:lo + K1P], pad1, K2)
        x2s.append(xp); a2s.append(ap); mc2s.append(mc); o2s.append(oo)

    # ---- stage 3: SAGE conv3 (batched) + masked mean readout ------------------
    z3 = []
    for b in range(B):
        a2, x2 = a2s[b], x2s[b]
        d = jnp.sum(a2, axis=-1, keepdims=True)
        agg = _mm(a2, x2) / jnp.maximum(d, 1.0)
        z3.append(jnp.concatenate([agg, x2], axis=-1))          # (K2P, 2C)
    z3 = jnp.concatenate(z3, axis=0)                            # (2*K2P, 2C)

    w3 = w_ref[pl.ds(W3_OFF, 2 * C), :]
    b3 = w_ref[pl.ds(B3_ROW, 1), :]
    h3 = (_mm(z3, w3) + b3) * jnp.concatenate([pad2, pad2], axis=0)   # (2*K2P, C)

    g = jnp.concatenate(
        [jnp.sum(h3[0:K2P], axis=0, keepdims=True) * (1.0 / K2),
         jnp.sum(h3[K2P:2 * K2P], axis=0, keepdims=True) * (1.0 / K2)],
        axis=0)                                                 # (B, C) graph readout

    # ---- MLP head + log-softmax (batched across the graphs, exact math) ------
    wl1 = w_ref[pl.ds(WL1_OFF, C), :]
    bl1 = w_ref[pl.ds(BL1_ROW, 1), :]
    g = jnp.maximum(_mm(g, wl1) + bl1, 0.0)

    wl2 = w_ref[pl.ds(WPL2_OFF, C), :]
    bl2 = w_ref[pl.ds(BPL2_ROW, 1), :]
    y = (_mm(g, wl2) + bl2)[:, :NCLS]                           # (B, NCLS)
    y = y - jnp.max(y, axis=-1, keepdims=True)
    y = y - jnp.log(jnp.sum(jnp.exp(y), axis=-1, keepdims=True))  # log_softmax

    # ---- single lane-packed store of all outputs ------------------------------
    losses = jnp.concatenate(
        [jnp.concatenate([mc1s[b], o1s[b], mc2s[b], o2s[b]], axis=-1)
         for b in range(B)], axis=0)                            # (B, 4)
    out_ref[...] = jnp.concatenate([y, losses], axis=-1)        # (B, OUT_W)


# ---------------- wrapper -------------------------------------------------------
@jax.jit
def net_forward(x, adj, mask_f, packed_w):
    """x:(B,N,F_IN) f32, adj:(B,N,N) f32, mask_f:(B,N,1) f32, packed_w:(W_ROWS,C) f32."""
    # TODO(synk): on v7x (2 TensorCores/chip) split the two independent graph chains
    # across cores with grid=(B,) + dimension_semantics=("parallel",); the single-call
    # static unroll below is the right shape for the single-TC v5e/v6e.
    out = pl.pallas_call(
        net_kernel,
        out_shape=jax.ShapeDtypeStruct((B, OUT_W), jnp.float32),
        cost_estimate=pl.CostEstimate(flops=2_500_000, transcendentals=2_500,
                                      bytes_accessed=175_000),
    )(x, adj, mask_f, packed_w)

    log_probs = out[:, :NCLS]
    loss_c = jnp.mean(out[:, NCLS]) + jnp.mean(out[:, NCLS + 2])      # mc1 + mc2
    loss_o = jnp.mean(out[:, NCLS + 1]) + jnp.mean(out[:, NCLS + 3])  # o1 + o2
    loss_x = jnp.float32(0.0)   # Embedded_Pool always contributes torch.tensor(0.0)
    return log_probs, loss_c, loss_o, loss_x


# ---------------- one-time parameter packing (NOT in the per-call path) ---------
def init_params(key):
    ks = jax.random.split(key, 17)
    nrm = lambda k, shp, s=0.1: (s * jax.random.normal(k, shp)).astype(jnp.float32)
    return dict(
        wr1=nrm(ks[0], (F_IN, C)), wo1=nrm(ks[1], (F_IN, C)), b1=nrm(ks[2], (1, C)),
        ws1=nrm(ks[3], (C, K1)),   bs1=nrm(ks[4], (1, K1)),
        wr2=nrm(ks[5], (C, C)),    wo2=nrm(ks[6], (C, C)),    b2=nrm(ks[7], (1, C)),
        ws2=nrm(ks[8], (C, K2)),   bs2=nrm(ks[9], (1, K2)),
        wr3=nrm(ks[10], (C, C)),   wo3=nrm(ks[11], (C, C)),   b3=nrm(ks[12], (1, C)),
        wl1=nrm(ks[13], (C, C)),   bl1=nrm(ks[14], (1, C)),
        wl2=nrm(ks[15], (C, NCLS)), bl2=nrm(ks[16], (1, NCLS)),
    )


def pack_params(p):
    """Pack all 17 parameters once into a single (W_ROWS, C) slab (8-aligned rows)."""
    f32 = jnp.float32

    def lane_pad(w):                          # (r, c<=C) -> (r, C)
        w = w.astype(f32)
        return jnp.pad(w, ((0, 0), (0, C - w.shape[1])))

    def bias_block(bvec, neg_upto=None):      # (1, c<=C) -> (8, C), bias in row 0
        w = bvec.shape[-1]
        row = jnp.zeros((1, C), f32).at[0, :w].set(bvec.astype(f32).reshape(-1))
        if neg_upto is not None:              # pad logits -> exact-zero softmax columns
            row = row.at[0, w:neg_upto].set(NEG)
        return jnp.concatenate([row, jnp.zeros((7, C), f32)], axis=0)

    slab = jnp.concatenate([
        jnp.concatenate([p["wr1"], p["wo1"]], axis=0),   # rows   0: 32  fused conv1
        jnp.concatenate([p["wr2"], p["wo2"]], axis=0),   # rows  32:160  fused conv2
        jnp.concatenate([p["wr3"], p["wo3"]], axis=0),   # rows 160:288  fused conv3
        p["wl1"],                                        # rows 288:352  lin1
        bias_block(p["b1"]),                             # row  352
        bias_block(p["b2"]),                             # row  360
        bias_block(p["b3"]),                             # row  368
        bias_block(p["bl1"]),                            # row  376
        lane_pad(p["ws1"]),                              # rows 384:448  pool1 projection
        lane_pad(p["ws2"]),                              # rows 448:512  pool2 projection
        lane_pad(p["wl2"]),                              # rows 512:576  lin2
        bias_block(p["bs1"], neg_upto=K1P),              # row  576
        bias_block(p["bs2"], neg_upto=K2P),              # row  584
        bias_block(p["bl2"]),                            # row  592
    ], axis=0).astype(f32)
    assert slab.shape == (W_ROWS, C)
    return slab


# ---------------- pure-JAX reference of the PyTorch forward (for checking) ------
def _ref_sage(x, adj, w_fused, b):
    agg = _mm(adj, x) / jnp.maximum(jnp.sum(adj, axis=-1, keepdims=True), 1.0)
    return _mm(jnp.concatenate([agg, x], axis=-1), w_fused) + b


def _ref_mincut(x, adj, s_logits, mask):
    s = jax.nn.softmax(s_logits, axis=-1)
    if mask is not None:
        x, s = x * mask, s * mask
    out = _mm(s.T, x)
    out_adj = _mm(_mm(s.T, adj), s)
    mincut_num = jnp.trace(out_adj)
    mincut_den = jnp.trace(_mm(_mm(s.T, jnp.diag(jnp.sum(adj, axis=-1))), s))
    mincut_loss = -(mincut_num / mincut_den)
    ss = _mm(s.T, s)
    k = s_logits.shape[-1]
    i_s = jnp.eye(k, dtype=jnp.float32)
    ortho_loss = jnp.linalg.norm(ss / jnp.linalg.norm(ss) - i_s / jnp.linalg.norm(i_s))
    out_adj = out_adj * (1.0 - i_s)
    d = jnp.sqrt(jnp.sum(out_adj, axis=-1))[:, None] + EPS
    out_adj = out_adj / d / d.T
    return out, out_adj, mincut_loss, ortho_loss


def net_reference(x, adj, mask_f, p):
    w1 = jnp.concatenate([p["wr1"], p["wo1"]], axis=0)
    w2 = jnp.concatenate([p["wr2"], p["wo2"]], axis=0)
    w3 = jnp.concatenate([p["wr3"], p["wo3"]], axis=0)
    lps, mc1s, o1s, mc2s, o2s = [], [], [], [], []
    for b in range(B):
        xb, ab, mb = x[b], adj[b], mask_f[b]
        h1 = _ref_sage(xb, ab, w1, p["b1"]) * mb
        x1, a1, mc1, o1 = _ref_mincut(h1, ab, _mm(h1, p["ws1"]) + p["bs1"], mb)
        h2 = _ref_sage(x1, a1, w2, p["b2"])
        x2, a2, mc2, o2 = _ref_mincut(h2, a1, _mm(h2, p["ws2"]) + p["bs2"], None)
        h3 = _ref_sage(x2, a2, w3, p["b3"])
        g = jnp.mean(h3, axis=0, keepdims=True)
        g = jax.nn.relu(_mm(g, p["wl1"]) + p["bl1"])
        y = _mm(g, p["wl2"]) + p["bl2"]
        lps.append(jax.nn.log_softmax(y, axis=-1))
        mc1s.append(mc1); o1s.append(o1); mc2s.append(mc2); o2s.append(o2)
    log_probs = jnp.concatenate(lps, axis=0)
    loss_c = jnp.mean(jnp.stack(mc1s)) + jnp.mean(jnp.stack(mc2s))
    loss_o = jnp.mean(jnp.stack(o1s)) + jnp.mean(jnp.stack(o2s))
    return log_probs, loss_c, loss_o, jnp.float32(0.0)


# ---------------- deterministic example inputs & run -----------------------------
if __name__ == "__main__":
    root = jax.random.PRNGKey(0)
    kx, ka, kprm = jax.random.split(root, 3)

    x = jax.random.normal(kx, (B, N, F_IN), dtype=jnp.float32)
    a = (jax.random.uniform(ka, (B, N, N)) < 0.3).astype(jnp.float32)
    adj = jnp.maximum(a, jnp.transpose(a, (0, 2, 1)))           # symmetric 0/1 adjacency
    valid = jnp.array([N, N - 5])
    mask_f = (jnp.arange(N)[None, :] < valid[:, None]).astype(jnp.float32).reshape(B, N, 1)

    params = init_params(kprm)
    packed_w = pack_params(params)        # one-time packing, outside the per-call path

    log_probs, loss_c, loss_o, loss_x = net_forward(x, adj, mask_f, packed_w)
    jax.block_until_ready((log_probs, loss_c, loss_o, loss_x))

    # structural sanity + comparison against the pure-JAX reference of the module
    ref_lp, ref_c, ref_o, _ = net_reference(x, adj, mask_f, params)
    assert bool(jnp.all(jnp.isfinite(log_probs)))
    assert bool(jnp.allclose(jnp.sum(jnp.exp(log_probs), axis=-1), 1.0, atol=1e-3))
    assert bool(jnp.allclose(log_probs, ref_lp, atol=1e-3, rtol=1e-3))
    assert bool(jnp.allclose(loss_c, ref_c, atol=1e-3, rtol=1e-3))
    assert bool(jnp.allclose(loss_o, ref_o, atol=1e-3, rtol=1e-3))
    print("KERNEL_OK")
</pallas_src>

<mosaic_0001>
module attributes {stable_mosaic.version = 11 : i64} {
  func.func @net_kernel(%arg0: memref<2x32x16xf32, #tpu.memory_space<vmem>>, %arg1: memref<2x32x32xf32, #tpu.memory_space<vmem>>, %arg2: memref<2x32x1xf32, #tpu.memory_space<vmem>>, %arg3: memref<600x64xf32, #tpu.memory_space<vmem>>, %arg4: memref<2x8xf32, #tpu.memory_space<vmem>>) attributes {dimension_semantics = [], scalar_prefetch = 0 : i64, scratch_operands = 0 : i64, tpu.core_type = #tpu.core_type<tc>} {
    %c0 = arith.constant 0 : index
    %c0_0 = arith.constant 0 : index
    %c0_1 = arith.constant 0 : index
    %0 = vector.load %arg0[%c0, %c0_0, %c0_1] : memref<2x32x16xf32, #tpu.memory_space<vmem>>, vector<1x32x16xf32>
    %1 = vector.shape_cast %0 : vector<1x32x16xf32> to vector<32x16xf32>
    %c0_2 = arith.constant 0 : index
    %c0_3 = arith.constant 0 : index
    %c0_4 = arith.constant 0 : index
    %2 = vector.load %arg1[%c0_2, %c0_3, %c0_4] : memref<2x32x32xf32, #tpu.memory_space<vmem>>, vector<1x32x32xf32>
    %3 = vector.shape_cast %2 : vector<1x32x32xf32> to vector<32x32xf32>
    %cst = arith.constant dense<0.000000e+00> : vector<32xf32>
    %4 = vector.multi_reduction <add>, %3, %cst [1] : vector<32x32xf32> to vector<32xf32>
    %5 = vector.shape_cast %4 : vector<32xf32> to vector<32x1xf32>
    %cst_5 = arith.constant dense<0.000000e+00> : vector<32x16xf32>
    %6 = tpu.matmul %3, %1, %cst_5 {dimension_numbers = #tpu.dot_dimension_numbers<[1], [0], [0], [1], [0, 0, 1, 1], [], []>, precision = #tpu.contract_precision<fp32>} : vector<32x32xf32>, vector<32x16xf32>, vector<32x16xf32> -> vector<32x16xf32>
    %cst_6 = arith.constant 1.000000e+00 : f32
    %7 = vector.broadcast %cst_6 : f32 to vector<32x1xf32>
    %8 = arith.maximumf %5, %7 : vector<32x1xf32>
    %9 = vector.broadcast %8 : vector<32x1xf32> to vector<32x16xf32>
    %10 = arith.divf %6, %9 : vector<32x16xf32>
    %11 = tpu.concatenate %10, %1 in 1 : vector<32x16xf32>, vector<32x16xf32> -> vector<32x32xf32>
    %c1 = arith.constant 1 : index
    %c0_7 = arith.constant 0 : index
    %c0_8 = arith.constant 0 : index
    %12 = vector.load %arg0[%c1, %c0_7, %c0_8] : memref<2x32x16xf32, #tpu.memory_space<vmem>>, vector<1x32x16xf32>
    %13 = vector.shape_cast %12 : vector<1x32x16xf32> to vector<32x16xf32>
    %c1_9 = arith.constant 1 : index
    %c0_10 = arith.constant 0 : index
    %c0_11 = arith.constant 0 : index
    %14 = vector.load %arg1[%c1_9, %c0_10, %c0_11] : memref<2x32x32xf32, #tpu.memory_space<vmem>>, vector<1x32x32xf32>
    %15 = vector.shape_cast %14 : vector<1x32x32xf32> to vector<32x32xf32>
    %cst_12 = arith.constant dense<0.000000e+00> : vector<32xf32>
    %16 = vector.multi_reduction <add>, %15, %cst_12 [1] : vector<32x32xf32> to vector<32xf32>
    %17 = vector.shape_cast %16 : vector<32xf32> to vector<32x1xf32>
    %cst_13 = arith.constant dense<0.000000e+00> : vector<32x16xf32>
    %18 = tpu.matmul %15, %13, %cst_13 {dimension_numbers = #tpu.dot_dimension_numbers<[1], [0], [0], [1], [0, 0, 1, 1], [], []>, precision = #tpu.contract_precision<fp32>} : vector<32x32xf32>, vector<32x16xf32>, vector<32x16xf32> -> vector<32x16xf32>
    %cst_14 = arith.constant 1.000000e+00 : f32
    %19 = vector.broadcast %cst_14 : f32 to vector<32x1xf32>
    %20 = arith.maximumf %17, %19 : vector<32x1xf32>
    %21 = vector.broadcast %20 : vector<32x1xf32> to vector<32x16xf32>
    %22 = arith.divf %18, %21 : vector<32x16xf32>
    %23 = tpu.concatenate %22, %13 in 1 : vector<32x16xf32>, vector<32x16xf32> -> vector<32x32xf32>
    %24 = tpu.concatenate %11, %23 in 0 : vector<32x32xf32>, vector<32x32xf32> -> vector<64x32xf32>
    %c0_15 = arith.constant 0 : index
    %c0_16 = arith.constant 0 : index
    %25 = vector.load %arg3[%c0_15, %c0_16] : memref<600x64xf32, #tpu.memory_space<vmem>>, vector<32x64xf32>
    %c352 = arith.constant 352 : index
    %c0_17 = arith.constant 0 : index
    %26 = vector.load %arg3[%c352, %c0_17] : memref<600x64xf32, #tpu.memory_space<vmem>>, vector<1x64xf32>
    %c0_18 = arith.constant 0 : index
    %c0_19 = arith.constant 0 : index
    %c0_20 = arith.constant 0 : index
    %27 = vector.load %arg2[%c0_18, %c0_19, %c0_20] : memref<2x32x1xf32, #tpu.memory_space<vmem>>, vector<1x32x1xf32>
    %28 = vector.shape_cast %27 : vector<1x32x1xf32> to vector<32x1xf32>
    %c1_21 = arith.constant 1 : index
    %c0_22 = arith.constant 0 : index
    %c0_23 = arith.constant 0 : index
    %29 = vector.load %arg2[%c1_21, %c0_22, %c0_23] : memref<2x32x1xf32, #tpu.memory_space<vmem>>, vector<1x32x1xf32>
    %30 = vector.shape_cast %29 : vector<1x32x1xf32> to vector<32x1xf32>
    %31 = tpu.concatenate %28, %30 in 0 : vector<32x1xf32>, vector<32x1xf32> -> vector<64x1xf32>
    %cst_24 = arith.constant dense<0.000000e+00> : vector<64x64xf32>
    %32 = tpu.matmul %24, %25, %cst_24 {dimension_numbers = #tpu.dot_dimension_numbers<[1], [0], [0], [1], [0, 0, 1, 1], [], []>, precision = #tpu.contract_precision<fp32>} : vector<64x32xf32>, vector<32x64xf32>, vector<64x64xf32> -> vector<64x64xf32>
    %33 = vector.broadcast %26 : vector<1x64xf32> to vector<64x64xf32>
    %34 = arith.addf %32, %33 : vector<64x64xf32>
    %35 = vector.broadcast %31 : vector<64x1xf32> to vector<64x64xf32>
    %36 = arith.mulf %34, %35 : vector<64x64xf32>
    %c384 = arith.constant 384 : index
    %c0_25 = arith.constant 0 : index
    %37 = vector.load %arg3[%c384, %c0_25] : memref<600x64xf32, #tpu.memory_space<vmem>>, vector<64x64xf32>
    %c576 = arith.constant 576 : index
    %c0_26 = arith.constant 0 : index
    %38 = vector.load %arg3[%c576, %c0_26] : memref<600x64xf32, #tpu.memory_space<vmem>>, vector<1x64xf32>
    %cst_27 = arith.constant dense<0.000000e+00> : vector<64x64xf32>
    %39 = tpu.matmul %36, %37, %cst_27 {dimension_numbers = #tpu.dot_dimension_numbers<[1], [0], [0], [1], [0, 0, 1, 1], [], []>, precision = #tpu.contract_precision<fp32>} : vector<64x64xf32>, vector<64x64xf32>, vector<64x64xf32> -> vector<64x64xf32>
    %40 = vector.broadcast %38 : vector<1x64xf32> to vector<64x64xf32>
    %41 = arith.addf %39, %40 : vector<64x64xf32>
    %42 = vector.extract_strided_slice %41 {offsets = [0, 0], sizes = [64, 16], strides = [1, 1]} : vector<64x64xf32> to vector<64x16xf32>
    %43 = vector.extract_strided_slice %36 {offsets = [0, 0], sizes = [32, 64], strides = [1, 1]} : vector<64x64xf32> to vector<32x64xf32>
    %c0_28 = arith.constant 0 : index
    %c0_29 = arith.constant 0 : index
    %c0_30 = arith.constant 0 : index
    %44 = vector.load %arg1[%c0_28, %c0_29, %c0_30] : memref<2x32x32xf32, #tpu.memory_space<vmem>>, vector<1x32x32xf32>
    %45 = vector.shape_cast %44 : vector<1x32x32xf32> to vector<32x32xf32>
    %46 = vector.extract_strided_slice %42 {offsets = [0, 0], sizes = [32, 16], strides = [1, 1]} : vector<64x16xf32> to vector<32x16xf32>
    %c0_31 = arith.constant 0 : index
    %c0_32 = arith.constant 0 : index
    %c0_33 = arith.constant 0 : index
    %47 = vector.load %arg2[%c0_31, %c0_32, %c0_33] : memref<2x32x1xf32, #tpu.memory_space<vmem>>, vector<1x32x1xf32>
    %48 = vector.shape_cast %47 : vector<1x32x1xf32> to vector<32x1xf32>
    %cst_34 = arith.constant dense<0xFF800000> : vector<32xf32>
    %49 = vector.multi_reduction <maximumf>, %46, %cst_34 [1] : vector<32x16xf32> to vector<32xf32>
    %50 = vector.shape_cast %49 : vector<32xf32> to vector<32x1xf32>
    %51 = vector.broadcast %50 : vector<32x1xf32> to vector<32x16xf32>
    %52 = arith.subf %46, %51 : vector<32x16xf32>
    %53 = math.exp %52 : vector<32x16xf32>
    %cst_35 = arith.constant dense<0.000000e+00> : vector<32xf32>
    %54 = vector.multi_reduction <add>, %53, %cst_35 [1] : vector<32x16xf32> to vector<32xf32>
    %55 = vector.shape_cast %54 : vector<32xf32> to vector<32x1xf32>
    %56 = vector.broadcast %55 : vector<32x1xf32> to vector<32x16xf32>
    %57 = arith.divf %53, %56 : vector<32x16xf32>
    %58 = vector.broadcast %48 : vector<32x1xf32> to vector<32x64xf32>
    %59 = arith.mulf %43, %58 : vector<32x64xf32>
    %60 = vector.broadcast %48 : vector<32x1xf32> to vector<32x16xf32>
    %61 = arith.mulf %57, %60 : vector<32x16xf32>
    %62 = tpu.transpose %61, [1, 0] : vector<32x16xf32> -> vector<16x32xf32>
    %cst_36 = arith.constant dense<0.000000e+00> : vector<16x64xf32>
    %63 = tpu.matmul %62, %59, %cst_36 {dimension_numbers = #tpu.dot_dimension_numbers<[1], [0], [0], [1], [0, 0, 1, 1], [], []>, precision = #tpu.contract_precision<fp32>} : vector<16x32xf32>, vector<32x64xf32>, vector<16x64xf32> -> vector<16x64xf32>
    %cst_37 = arith.constant dense<0.000000e+00> : vector<16x32xf32>
    %64 = tpu.matmul %62, %45, %cst_37 {dimension_numbers = #tpu.dot_dimension_numbers<[1], [0], [0], [1], [0, 0, 1, 1], [], []>, precision = #tpu.contract_precision<fp32>} : vector<16x32xf32>, vector<32x32xf32>, vector<16x32xf32> -> vector<16x32xf32>
    %cst_38 = arith.constant dense<0.000000e+00> : vector<16x16xf32>
    %65 = tpu.matmul %64, %61, %cst_38 {dimension_numbers = #tpu.dot_dimension_numbers<[1], [0], [0], [1], [0, 0, 1, 1], [], []>, precision = #tpu.contract_precision<fp32>} : vector<16x32xf32>, vector<32x16xf32>, vector<16x16xf32> -> vector<16x16xf32>
    %cst_39 = arith.constant dense<0.000000e+00> : vector<16x16xf32>
    %66 = tpu.matmul %62, %61, %cst_39 {dimension_numbers = #tpu.dot_dimension_numbers<[1], [0], [0], [1], [0, 0, 1, 1], [], []>, precision = #tpu.contract_precision<fp32>} : vector<16x32xf32>, vector<32x16xf32>, vector<16x16xf32> -> vector<16x16xf32>
    %67 = tpu.iota {dimensions = array<i32: 0>} : vector<16x16xi32>
    %68 = tpu.iota {dimensions = array<i32: 1>} : vector<16x16xi32>
    %69 = arith.cmpi eq, %67, %68 : vector<16x16xi32>
    %70 = arith.extui %69 : vector<16x16xi1> to vector<16x16xi32>
    %71 = arith.sitofp %70 : vector<16x16xi32> to vector<16x16xf32>
    %c13_i32 = arith.constant 13 : i32
    %72 = vector.broadcast %c13_i32 : i32 to vector<16x16xi32>
    %73 = arith.cmpi slt, %67, %72 : vector<16x16xi32>
    %74 = arith.andi %69, %73 : vector<16x16xi1>
    %75 = arith.extui %74 : vector<16x16xi1> to vector<16x16xi32>
    %76 = arith.sitofp %75 : vector<16x16xi32> to vector<16x16xf32>
    %77 = arith.mulf %65, %71 : vector<16x16xf32>
    %78 = vector.shape_cast %77 : vector<16x16xf32> to vector<1x16x16xf32>
    %cst_40 = arith.constant dense<0.000000e+00> : vector<1xf32>
    %79 = vector.multi_reduction <add>, %78, %cst_40 [1, 2] : vector<1x16x16xf32> to vector<1xf32>
    %80 = vector.shape_cast %79 : vector<1xf32> to vector<1x1x1xf32>
    %81 = vector.extract %80[0, 0, 0] : f32 from vector<1x1x1xf32>
    %82 = vector.broadcast %81 : f32 to vector<1x1xf32>
    %83 = vector.broadcast %5 : vector<32x1xf32> to vector<32x16xf32>
    %84 = arith.mulf %83, %61 : vector<32x16xf32>
    %85 = arith.mulf %84, %61 : vector<32x16xf32>
    %86 = vector.shape_cast %85 : vector<32x16xf32> to vector<1x32x16xf32>
    %cst_41 = arith.constant dense<0.000000e+00> : vector<1xf32>
    %87 = vector.multi_reduction <add>, %86, %cst_41 [1, 2] : vector<1x32x16xf32> to vector<1xf32>
    %88 = vector.shape_cast %87 : vector<1xf32> to vector<1x1x1xf32>
    %89 = vector.extract %88[0, 0, 0] : f32 from vector<1x1x1xf32>
    %90 = vector.broadcast %89 : f32 to vector<1x1xf32>
    %91 = arith.divf %82, %90 : vector<1x1xf32>
    %cst_42 = arith.constant 0.000000e+00 : f32
    %92 = vector.broadcast %cst_42 : f32 to vector<1x1xf32>
    %93 = arith.subf %92, %91 : vector<1x1xf32>
    %94 = arith.mulf %66, %66 : vector<16x16xf32>
    %95 = vector.shape_cast %94 : vector<16x16xf32> to vector<1x16x16xf32>
    %cst_43 = arith.constant dense<0.000000e+00> : vector<1xf32>
    %96 = vector.multi_reduction <add>, %95, %cst_43 [1, 2] : vector<1x16x16xf32> to vector<1xf32>
    %97 = vector.shape_cast %96 : vector<1xf32> to vector<1x1x1xf32>
    %98 = vector.extract %97[0, 0, 0] : f32 from vector<1x1x1xf32>
    %99 = vector.broadcast %98 : f32 to vector<1x1xf32>
    %100 = math.sqrt %99 : vector<1x1xf32>
    %101 = vector.broadcast %100 : vector<1x1xf32> to vector<16x16xf32>
    %102 = arith.divf %66, %101 : vector<16x16xf32>
    %cst_44 = arith.constant 0.277350098 : f32
    %103 = vector.broadcast %cst_44 : f32 to vector<16x16xf32>
    %104 = arith.mulf %76, %103 : vector<16x16xf32>
    %105 = arith.subf %102, %104 : vector<16x16xf32>
    %106 = arith.mulf %105, %105 : vector<16x16xf32>
    %107 = vector.shape_cast %106 : vector<16x16xf32> to vector<1x16x16xf32>
    %cst_45 = arith.constant dense<0.000000e+00> : vector<1xf32>
    %108 = vector.multi_reduction <add>, %107, %cst_45 [1, 2] : vector<1x16x16xf32> to vector<1xf32>
    %109 = vector.shape_cast %108 : vector<1xf32> to vector<1x1x1xf32>
    %110 = vector.extract %109[0, 0, 0] : f32 from vector<1x1x1xf32>
    %111 = vector.broadcast %110 : f32 to vector<1x1xf32>
    %112 = math.sqrt %111 : vector<1x1xf32>
    %cst_46 = arith.constant 1.000000e+00 : f32
    %113 = vector.broadcast %cst_46 : f32 to vector<16x16xf32>
    %114 = arith.subf %113, %71 : vector<16x16xf32>
    %115 = arith.mulf %65, %114 : vector<16x16xf32>
    %cst_47 = arith.constant dense<0.000000e+00> : vector<16xf32>
    %116 = vector.multi_reduction <add>, %115, %cst_47 [1] : vector<16x16xf32> to vector<16xf32>
    %117 = vector.shape_cast %116 : vector<16xf32> to vector<16x1xf32>
    %118 = math.sqrt %117 : vector<16x1xf32>
    %cst_48 = arith.constant 1.000000e-15 : f32
    %119 = vector.broadcast %cst_48 : f32 to vector<16x1xf32>
    %120 = arith.addf %118, %119 : vector<16x1xf32>
    %121 = vector.broadcast %120 : vector<16x1xf32> to vector<16x16xf32>
    %122 = arith.divf %115, %121 : vector<16x16xf32>
    %123 = vector.shape_cast %120 : vector<16x1xf32> to vector<1x16xf32>
    %124 = vector.broadcast %123 : vector<1x16xf32> to vector<16x16xf32>
    %125 = arith.divf %122, %124 : vector<16x16xf32>
    %126 = vector.extract_strided_slice %36 {offsets = [32, 0], sizes = [32, 64], strides = [1, 1]} : vector<64x64xf32> to vector<32x64xf32>
    %c1_49 = arith.constant 1 : index
    %c0_50 = arith.constant 0 : index
    %c0_51 = arith.constant 0 : index
    %127 = vector.load %arg1[%c1_49, %c0_50, %c0_51] : memref<2x32x32xf32, #tpu.memory_space<vmem>>, vector<1x32x32xf32>
    %128 = vector.shape_cast %127 : vector<1x32x32xf32> to vector<32x32xf32>
    %129 = vector.extract_strided_slice %42 {offsets = [32, 0], sizes = [32, 16], strides = [1, 1]} : vector<64x16xf32> to vector<32x16xf32>
    %c1_52 = arith.constant 1 : index
    %c0_53 = arith.constant 0 : index
    %c0_54 = arith.constant 0 : index
    %130 = vector.load %arg2[%c1_52, %c0_53, %c0_54] : memref<2x32x1xf32, #tpu.memory_space<vmem>>, vector<1x32x1xf32>
    %131 = vector.shape_cast %130 : vector<1x32x1xf32> to vector<32x1xf32>
    %cst_55 = arith.constant dense<0xFF800000> : vector<32xf32>
    %132 = vector.multi_reduction <maximumf>, %129, %cst_55 [1] : vector<32x16xf32> to vector<32xf32>
    %133 = vector.shape_cast %132 : vector<32xf32> to vector<32x1xf32>
    %134 = vector.broadcast %133 : vector<32x1xf32> to vector<32x16xf32>
    %135 = arith.subf %129, %134 : vector<32x16xf32>
    %136 = math.exp %135 : vector<32x16xf32>
    %cst_56 = arith.constant dense<0.000000e+00> : vector<32xf32>
    %137 = vector.multi_reduction <add>, %136, %cst_56 [1] : vector<32x16xf32> to vector<32xf32>
    %138 = vector.shape_cast %137 : vector<32xf32> to vector<32x1xf32>
    %139 = vector.broadcast %138 : vector<32x1xf32> to vector<32x16xf32>
    %140 = arith.divf %136, %139 : vector<32x16xf32>
    %141 = vector.broadcast %131 : vector<32x1xf32> to vector<32x64xf32>
    %142 = arith.mulf %126, %141 : vector<32x64xf32>
    %143 = vector.broadcast %131 : vector<32x1xf32> to vector<32x16xf32>
    %144 = arith.mulf %140, %143 : vector<32x16xf32>
    %145 = tpu.transpose %144, [1, 0] : vector<32x16xf32> -> vector<16x32xf32>
    %cst_57 = arith.constant dense<0.000000e+00> : vector<16x64xf32>
    %146 = tpu.matmul %145, %142, %cst_57 {dimension_numbers = #tpu.dot_dimension_numbers<[1], [0], [0], [1], [0, 0, 1, 1], [], []>, precision = #tpu.contract_precision<fp32>} : vector<16x32xf32>, vector<32x64xf32>, vector<16x64xf32> -> vector<16x64xf32>
    %cst_58 = arith.constant dense<0.000000e+00> : vector<16x32xf32>
    %147 = tpu.matmul %145, %128, %cst_58 {dimension_numbers = #tpu.dot_dimension_numbers<[1], [0], [0], [1], [0, 0, 1, 1], [], []>, precision = #tpu.contract_precision<fp32>} : vector<16x32xf32>, vector<32x32xf32>, vector<16x32xf32> -> vector<16x32xf32>
    %cst_59 = arith.constant dense<0.000000e+00> : vector<16x16xf32>
    %148 = tpu.matmul %147, %144, %cst_59 {dimension_numbers = #tpu.dot_dimension_numbers<[1], [0], [0], [1], [0, 0, 1, 1], [], []>, precision = #tpu.contract_precision<fp32>} : vector<16x32xf32>, vector<32x16xf32>, vector<16x16xf32> -> vector<16x16xf32>
    %cst_60 = arith.constant dense<0.000000e+00> : vector<16x16xf32>
    %149 = tpu.matmul %145, %144, %cst_60 {dimension_numbers = #tpu.dot_dimension_numbers<[1], [0], [0], [1], [0, 0, 1, 1], [], []>, precision = #tpu.contract_precision<fp32>} : vector<16x32xf32>, vector<32x16xf32>, vector<16x16xf32> -> vector<16x16xf32>
    %150 = tpu.iota {dimensions = array<i32: 0>} : vector<16x16xi32>
    %151 = tpu.iota {dimensions = array<i32: 1>} : vector<16x16xi32>
    %152 = arith.cmpi eq, %150, %151 : vector<16x16xi32>
    %153 = arith.extui %152 : vector<16x16xi1> to vector<16x16xi32>
    %154 = arith.sitofp %153 : vector<16x16xi32> to vector<16x16xf32>
    %c13_i32_61 = arith.constant 13 : i32
    %155 = vector.broadcast %c13_i32_61 : i32 to vector<16x16xi32>
    %156 = arith.cmpi slt, %150, %155 : vector<16x16xi32>
    %157 = arith.andi %152, %156 : vector<16x16xi1>
    %158 = arith.extui %157 : vector<16x16xi1> to vector<16x16xi32>
    %159 = arith.sitofp %158 : vector<16x16xi32> to vector<16x16xf32>
    %160 = arith.mulf %148, %154 : vector<16x16xf32>
    %161 = vector.shape_cast %160 : vector<16x16xf32> to vector<1x16x16xf32>
    %cst_62 = arith.constant dense<0.000000e+00> : vector<1xf32>
    %162 = vector.multi_reduction <add>, %161, %cst_62 [1, 2] : vector<1x16x16xf32> to vector<1xf32>
    %163 = vector.shape_cast %162 : vector<1xf32> to vector<1x1x1xf32>
    %164 = vector.extract %163[0, 0, 0] : f32 from vector<1x1x1xf32>
    %165 = vector.broadcast %164 : f32 to vector<1x1xf32>
    %166 = vector.broadcast %17 : vector<32x1xf32> to vector<32x16xf32>
    %167 = arith.mulf %166, %144 : vector<32x16xf32>
    %168 = arith.mulf %167, %144 : vector<32x16xf32>
    %169 = vector.shape_cast %168 : vector<32x16xf32> to vector<1x32x16xf32>
    %cst_63 = arith.constant dense<0.000000e+00> : vector<1xf32>
    %170 = vector.multi_reduction <add>, %169, %cst_63 [1, 2] : vector<1x32x16xf32> to vector<1xf32>
    %171 = vector.shape_cast %170 : vector<1xf32> to vector<1x1x1xf32>
    %172 = vector.extract %171[0, 0, 0] : f32 from vector<1x1x1xf32>
    %173 = vector.broadcast %172 : f32 to vector<1x1xf32>
    %174 = arith.divf %165, %173 : vector<1x1xf32>
    %cst_64 = arith.constant 0.000000e+00 : f32
    %175 = vector.broadcast %cst_64 : f32 to vector<1x1xf32>
    %176 = arith.subf %175, %174 : vector<1x1xf32>
    %177 = arith.mulf %149, %149 : vector<16x16xf32>
    %178 = vector.shape_cast %177 : vector<16x16xf32> to vector<1x16x16xf32>
    %cst_65 = arith.constant dense<0.000000e+00> : vector<1xf32>
    %179 = vector.multi_reduction <add>, %178, %cst_65 [1, 2] : vector<1x16x16xf32> to vector<1xf32>
    %180 = vector.shape_cast %179 : vector<1xf32> to vector<1x1x1xf32>
    %181 = vector.extract %180[0, 0, 0] : f32 from vector<1x1x1xf32>
    %182 = vector.broadcast %181 : f32 to vector<1x1xf32>
    %183 = math.sqrt %182 : vector<1x1xf32>
    %184 = vector.broadcast %183 : vector<1x1xf32> to vector<16x16xf32>
    %185 = arith.divf %149, %184 : vector<16x16xf32>
    %cst_66 = arith.constant 0.277350098 : f32
    %186 = vector.broadcast %cst_66 : f32 to vector<16x16xf32>
    %187 = arith.mulf %159, %186 : vector<16x16xf32>
    %188 = arith.subf %185, %187 : vector<16x16xf32>
    %189 = arith.mulf %188, %188 : vector<16x16xf32>
    %190 = vector.shape_cast %189 : vector<16x16xf32> to vector<1x16x16xf32>
    %cst_67 = arith.constant dense<0.000000e+00> : vector<1xf32>
    %191 = vector.multi_reduction <add>, %190, %cst_67 [1, 2] : vector<1x16x16xf32> to vector<1xf32>
    %192 = vector.shape_cast %191 : vector<1xf32> to vector<1x1x1xf32>
    %193 = vector.extract %192[0, 0, 0] : f32 from vector<1x1x1xf32>
    %194 = vector.broadcast %193 : f32 to vector<1x1xf32>
    %195 = math.sqrt %194 : vector<1x1xf32>
    %cst_68 = arith.constant 1.000000e+00 : f32
    %196 = vector.broadcast %cst_68 : f32 to vector<16x16xf32>
    %197 = arith.subf %196, %154 : vector<16x16xf32>
    %198 = arith.mulf %148, %197 : vector<16x16xf32>
    %cst_69 = arith.constant dense<0.000000e+00> : vector<16xf32>
    %199 = vector.multi_reduction <add>, %198, %cst_69 [1] : vector<16x16xf32> to vector<16xf32>
    %200 = vector.shape_cast %199 : vector<16xf32> to vector<16x1xf32>
    %201 = math.sqrt %200 : vector<16x1xf32>
    %cst_70 = arith.constant 1.000000e-15 : f32
    %202 = vector.broadcast %cst_70 : f32 to vector<16x1xf32>
    %203 = arith.addf %201, %202 : vector<16x1xf32>
    %204 = vector.broadcast %203 : vector<16x1xf32> to vector<16x16xf32>
    %205 = arith.divf %198, %204 : vector<16x16xf32>
    %206 = vector.shape_cast %203 : vector<16x1xf32> to vector<1x16xf32>
    %207 = vector.broadcast %206 : vector<1x16xf32> to vector<16x16xf32>
    %208 = arith.divf %205, %207 : vector<16x16xf32>
    %209 = tpu.iota {dimensions = array<i32: 0>} : vector<16x1xi32>
    %c13_i32_71 = arith.constant 13 : i32
    %210 = vector.broadcast %c13_i32_71 : i32 to vector<16x1xi32>
    %211 = arith.cmpi slt, %209, %210 : vector<16x1xi32>
    %212 = arith.extui %211 : vector<16x1xi1> to vector<16x1xi32>
    %213 = arith.sitofp %212 : vector<16x1xi32> to vector<16x1xf32>
    %214 = tpu.iota {dimensions = array<i32: 0>} : vector<8x1xi32>
    %c6_i32 = arith.constant 6 : i32
    %215 = vector.broadcast %c6_i32 : i32 to vector<8x1xi32>
    %216 = arith.cmpi slt, %214, %215 : vector<8x1xi32>
    %217 = arith.extui %216 : vector<8x1xi1> to vector<8x1xi32>
    %218 = arith.sitofp %217 : vector<8x1xi32> to vector<8x1xf32>
    %cst_72 = arith.constant dense<0.000000e+00> : vector<16xf32>
    %219 = vector.multi_reduction <add>, %125, %cst_72 [1] : vector<16x16xf32> to vector<16xf32>
    %220 = vector.shape_cast %219 : vector<16xf32> to vector<16x1xf32>
    %cst_73 = arith.constant dense<0.000000e+00> : vector<16x64xf32>
    %221 = tpu.matmul %125, %63, %cst_73 {dimension_numbers = #tpu.dot_dimension_numbers<[1], [0], [0], [1], [0, 0, 1, 1], [], []>, precision = #tpu.contract_precision<fp32>} : vector<16x16xf32>, vector<16x64xf32>, vector<16x64xf32> -> vector<16x64xf32>
    %cst_74 = arith.constant 1.000000e+00 : f32
    %222 = vector.broadcast %cst_74 : f32 to vector<16x1xf32>
    %223 = arith.maximumf %220, %222 : vector<16x1xf32>
    %224 = vector.broadcast %223 : vector<16x1xf32> to vector<16x64xf32>
    %225 = arith.divf %221, %224 : vector<16x64xf32>
    %226 = tpu.concatenate %225, %63 in 1 : vector<16x64xf32>, vector<16x64xf32> -> vector<16x128xf32>
    %cst_75 = arith.constant dense<0.000000e+00> : vector<16xf32>
    %227 = vector.multi_reduction <add>, %208, %cst_75 [1] : vector<16x16xf32> to vector<16xf32>
    %228 = vector.shape_cast %227 : vector<16xf32> to vector<16x1xf32>
    %cst_76 = arith.constant dense<0.000000e+00> : vector<16x64xf32>
    %229 = tpu.matmul %208, %146, %cst_76 {dimension_numbers = #tpu.dot_dimension_numbers<[1], [0], [0], [1], [0, 0, 1, 1], [], []>, precision = #tpu.contract_precision<fp32>} : vector<16x16xf32>, vector<16x64xf32>, vector<16x64xf32> -> vector<16x64xf32>
    %cst_77 = arith.constant 1.000000e+00 : f32
    %230 = vector.broadcast %cst_77 : f32 to vector<16x1xf32>
    %231 = arith.maximumf %228, %230 : vector<16x1xf32>
    %232 = vector.broadcast %231 : vector<16x1xf32> to vector<16x64xf32>
    %233 = arith.divf %229, %232 : vector<16x64xf32>
    %234 = tpu.concatenate %233, %146 in 1 : vector<16x64xf32>, vector<16x64xf32> -> vector<16x128xf32>
    %235 = tpu.concatenate %226, %234 in 0 : vector<16x128xf32>, vector<16x128xf32> -> vector<32x128xf32>
    %c32 = arith.constant 32 : index
    %c0_78 = arith.constant 0 : index
    %236 = vector.load %arg3[%c32, %c0_78] : memref<600x64xf32, #tpu.memory_space<vmem>>, vector<128x64xf32>
    %c360 = arith.constant 360 : index
    %c0_79 = arith.constant 0 : index
    %237 = vector.load %arg3[%c360, %c0_79] : memref<600x64xf32, #tpu.memory_space<vmem>>, vector<1x64xf32>
    %cst_80 = arith.constant dense<0.000000e+00> : vector<32x64xf32>
    %238 = tpu.matmul %235, %236, %cst_80 {dimension_numbers = #tpu.dot_dimension_numbers<[1], [0], [0], [1], [0, 0, 1, 1], [], []>, precision = #tpu.contract_precision<fp32>} : vector<32x128xf32>, vector<128x64xf32>, vector<32x64xf32> -> vector<32x64xf32>
    %239 = vector.broadcast %237 : vector<1x64xf32> to vector<32x64xf32>
    %240 = arith.addf %238, %239 : vector<32x64xf32>
    %c448 = arith.constant 448 : index
    %c0_81 = arith.constant 0 : index
    %241 = vector.load %arg3[%c448, %c0_81] : memref<600x64xf32, #tpu.memory_space<vmem>>, vector<64x64xf32>
    %c584 = arith.constant 584 : index
    %c0_82 = arith.constant 0 : index
    %242 = vector.load %arg3[%c584, %c0_82] : memref<600x64xf32, #tpu.memory_space<vmem>>, vector<1x64xf32>
    %cst_83 = arith.constant dense<0.000000e+00> : vector<32x64xf32>
    %243 = tpu.matmul %240, %241, %cst_83 {dimension_numbers = #tpu.dot_dimension_numbers<[1], [0], [0], [1], [0, 0, 1, 1], [], []>, precision = #tpu.contract_precision<fp32>} : vector<32x64xf32>, vector<64x64xf32>, vector<32x64xf32> -> vector<32x64xf32>
    %244 = vector.broadcast %242 : vector<1x64xf32> to vector<32x64xf32>
    %245 = arith.addf %243, %244 : vector<32x64xf32>
    %246 = vector.extract_strided_slice %245 {offsets = [0, 0], sizes = [32, 8], strides = [1, 1]} : vector<32x64xf32> to vector<32x8xf32>
    %247 = vector.extract_strided_slice %240 {offsets = [0, 0], sizes = [16, 64], strides = [1, 1]} : vector<32x64xf32> to vector<16x64xf32>
    %248 = vector.extract_strided_slice %246 {offsets = [0, 0], sizes = [16, 8], strides = [1, 1]} : vector<32x8xf32> to vector<16x8xf32>
    %cst_84 = arith.constant dense<0xFF800000> : vector<16xf32>
    %249 = vector.multi_reduction <maximumf>, %248, %cst_84 [1] : vector<16x8xf32> to vector<16xf32>
    %250 = vector.shape_cast %249 : vector<16xf32> to vector<16x1xf32>
    %251 = vector.broadcast %250 : vector<16x1xf32> to vector<16x8xf32>
    %252 = arith.subf %248, %251 : vector<16x8xf32>
    %253 = math.exp %252 : vector<16x8xf32>
    %cst_85 = arith.constant dense<0.000000e+00> : vector<16xf32>
    %254 = vector.multi_reduction <add>, %253, %cst_85 [1] : vector<16x8xf32> to vector<16xf32>
    %255 = vector.shape_cast %254 : vector<16xf32> to vector<16x1xf32>
    %256 = vector.broadcast %255 : vector<16x1xf32> to vector<16x8xf32>
    %257 = arith.divf %253, %256 : vector<16x8xf32>
    %258 = vector.broadcast %213 : vector<16x1xf32> to vector<16x64xf32>
    %259 = arith.mulf %247, %258 : vector<16x64xf32>
    %260 = vector.broadcast %213 : vector<16x1xf32> to vector<16x8xf32>
    %261 = arith.mulf %257, %260 : vector<16x8xf32>
    %262 = tpu.transpose %261, [1, 0] : vector<16x8xf32> -> vector<8x16xf32>
    %cst_86 = arith.constant dense<0.000000e+00> : vector<8x64xf32>
    %263 = tpu.matmul %262, %259, %cst_86 {dimension_numbers = #tpu.dot_dimension_numbers<[1], [0], [0], [1], [0, 0, 1, 1], [], []>, precision = #tpu.contract_precision<fp32>} : vector<8x16xf32>, vector<16x64xf32>, vector<8x64xf32> -> vector<8x64xf32>
    %cst_87 = arith.constant dense<0.000000e+00> : vector<8x16xf32>
    %264 = tpu.matmul %262, %125, %cst_87 {dimension_numbers = #tpu.dot_dimension_numbers<[1], [0], [0], [1], [0, 0, 1, 1], [], []>, precision = #tpu.contract_precision<fp32>} : vector<8x16xf32>, vector<16x16xf32>, vector<8x16xf32> -> vector<8x16xf32>
    %cst_88 = arith.constant dense<0.000000e+00> : vector<8x8xf32>
    %265 = tpu.matmul %264, %261, %cst_88 {dimension_numbers = #tpu.dot_dimension_numbers<[1], [0], [0], [1], [0, 0, 1, 1], [], []>, precision = #tpu.contract_precision<fp32>} : vector<8x16xf32>, vector<16x8xf32>, vector<8x8xf32> -> vector<8x8xf32>
    %cst_89 = arith.constant dense<0.000000e+00> : vector<8x8xf32>
    %266 = tpu.matmul %262, %261, %cst_89 {dimension_numbers = #tpu.dot_dimension_numbers<[1], [0], [0], [1], [0, 0, 1, 1], [], []>, precision = #tpu.contract_precision<fp32>} : vector<8x16xf32>, vector<16x8xf32>, vector<8x8xf32> -> vector<8x8xf32>
    %267 = tpu.iota {dimensions = array<i32: 0>} : vector<8x8xi32>
    %268 = tpu.iota {dimensions = array<i32: 1>} : vector<8x8xi32>
    %269 = arith.cmpi eq, %267, %268 : vector<8x8xi32>
    %270 = arith.extui %269 : vector<8x8xi1> to vector<8x8xi32>
    %271 = arith.sitofp %270 : vector<8x8xi32> to vector<8x8xf32>
    %c6_i32_90 = arith.constant 6 : i32
    %272 = vector.broadcast %c6_i32_90 : i32 to vector<8x8xi32>
    %273 = arith.cmpi slt, %267, %272 : vector<8x8xi32>
    %274 = arith.andi %269, %273 : vector<8x8xi1>
    %275 = arith.extui %274 : vector<8x8xi1> to vector<8x8xi32>
    %276 = arith.sitofp %275 : vector<8x8xi32> to vector<8x8xf32>
    %277 = arith.mulf %265, %271 : vector<8x8xf32>
    %278 = vector.shape_cast %277 : vector<8x8xf32> to vector<1x8x8xf32>
    %cst_91 = arith.constant dense<0.000000e+00> : vector<1xf32>
    %279 = vector.multi_reduction <add>, %278, %cst_91 [1, 2] : vector<1x8x8xf32> to vector<1xf32>
    %280 = vector.shape_cast %279 : vector<1xf32> to vector<1x1x1xf32>
    %281 = vector.extract %280[0, 0, 0] : f32 from vector<1x1x1xf32>
    %282 = vector.broadcast %281 : f32 to vector<1x1xf32>
    %283 = vector.broadcast %220 : vector<16x1xf32> to vector<16x8xf32>
    %284 = arith.mulf %283, %261 : vector<16x8xf32>
    %285 = arith.mulf %284, %261 : vector<16x8xf32>
    %286 = vector.shape_cast %285 : vector<16x8xf32> to vector<1x16x8xf32>
    %cst_92 = arith.constant dense<0.000000e+00> : vector<1xf32>
    %287 = vector.multi_reduction <add>, %286, %cst_92 [1, 2] : vector<1x16x8xf32> to vector<1xf32>
    %288 = vector.shape_cast %287 : vector<1xf32> to vector<1x1x1xf32>
    %289 = vector.extract %288[0, 0, 0] : f32 from vector<1x1x1xf32>
    %290 = vector.broadcast %289 : f32 to vector<1x1xf32>
    %291 = arith.divf %282, %290 : vector<1x1xf32>
    %cst_93 = arith.constant 0.000000e+00 : f32
    %292 = vector.broadcast %cst_93 : f32 to vector<1x1xf32>
    %293 = arith.subf %292, %291 : vector<1x1xf32>
    %294 = arith.mulf %266, %266 : vector<8x8xf32>
    %295 = vector.shape_cast %294 : vector<8x8xf32> to vector<1x8x8xf32>
    %cst_94 = arith.constant dense<0.000000e+00> : vector<1xf32>
    %296 = vector.multi_reduction <add>, %295, %cst_94 [1, 2] : vector<1x8x8xf32> to vector<1xf32>
    %297 = vector.shape_cast %296 : vector<1xf32> to vector<1x1x1xf32>
    %298 = vector.extract %297[0, 0, 0] : f32 from vector<1x1x1xf32>
    %299 = vector.broadcast %298 : f32 to vector<1x1xf32>
    %300 = math.sqrt %299 : vector<1x1xf32>
    %301 = vector.broadcast %300 : vector<1x1xf32> to vector<8x8xf32>
    %302 = arith.divf %266, %301 : vector<8x8xf32>
    %cst_95 = arith.constant 0.408248305 : f32
    %303 = vector.broadcast %cst_95 : f32 to vector<8x8xf32>
    %304 = arith.mulf %276, %303 : vector<8x8xf32>
    %305 = arith.subf %302, %304 : vector<8x8xf32>
    %306 = arith.mulf %305, %305 : vector<8x8xf32>
    %307 = vector.shape_cast %306 : vector<8x8xf32> to vector<1x8x8xf32>
    %cst_96 = arith.constant dense<0.000000e+00> : vector<1xf32>
    %308 = vector.multi_reduction <add>, %307, %cst_96 [1, 2] : vector<1x8x8xf32> to vector<1xf32>
    %309 = vector.shape_cast %308 : vector<1xf32> to vector<1x1x1xf32>
    %310 = vector.extract %309[0, 0, 0] : f32 from vector<1x1x1xf32>
    %311 = vector.broadcast %310 : f32 to vector<1x1xf32>
    %312 = math.sqrt %311 : vector<1x1xf32>
    %cst_97 = arith.constant 1.000000e+00 : f32
    %313 = vector.broadcast %cst_97 : f32 to vector<8x8xf32>
    %314 = arith.subf %313, %271 : vector<8x8xf32>
    %315 = arith.mulf %265, %314 : vector<8x8xf32>
    %cst_98 = arith.constant dense<0.000000e+00> : vector<8xf32>
    %316 = vector.multi_reduction <add>, %315, %cst_98 [1] : vector<8x8xf32> to vector<8xf32>
    %317 = vector.shape_cast %316 : vector<8xf32> to vector<8x1xf32>
    %318 = math.sqrt %317 : vector<8x1xf32>
    %cst_99 = arith.constant 1.000000e-15 : f32
    %319 = vector.broadcast %cst_99 : f32 to vector<8x1xf32>
    %320 = arith.addf %318, %319 : vector<8x1xf32>
    %321 = vector.broadcast %320 : vector<8x1xf32> to vector<8x8xf32>
    %322 = arith.divf %315, %321 : vector<8x8xf32>
    %323 = vector.shape_cast %320 : vector<8x1xf32> to vector<1x8xf32>
    %324 = vector.broadcast %323 : vector<1x8xf32> to vector<8x8xf32>
    %325 = arith.divf %322, %324 : vector<8x8xf32>
    %326 = vector.extract_strided_slice %240 {offsets = [16, 0], sizes = [16, 64], strides = [1, 1]} : vector<32x64xf32> to vector<16x64xf32>
    %327 = vector.extract_strided_slice %246 {offsets = [16, 0], sizes = [16, 8], strides = [1, 1]} : vector<32x8xf32> to vector<16x8xf32>
    %cst_100 = arith.constant dense<0xFF800000> : vector<16xf32>
    %328 = vector.multi_reduction <maximumf>, %327, %cst_100 [1] : vector<16x8xf32> to vector<16xf32>
    %329 = vector.shape_cast %328 : vector<16xf32> to vector<16x1xf32>
    %330 = vector.broadcast %329 : vector<16x1xf32> to vector<16x8xf32>
    %331 = arith.subf %327, %330 : vector<16x8xf32>
    %332 = math.exp %331 : vector<16x8xf32>
    %cst_101 = arith.constant dense<0.000000e+00> : vector<16xf32>
    %333 = vector.multi_reduction <add>, %332, %cst_101 [1] : vector<16x8xf32> to vector<16xf32>
    %334 = vector.shape_cast %333 : vector<16xf32> to vector<16x1xf32>
    %335 = vector.broadcast %334 : vector<16x1xf32> to vector<16x8xf32>
    %336 = arith.divf %332, %335 : vector<16x8xf32>
    %337 = vector.broadcast %213 : vector<16x1xf32> to vector<16x64xf32>
    %338 = arith.mulf %326, %337 : vector<16x64xf32>
    %339 = vector.broadcast %213 : vector<16x1xf32> to vector<16x8xf32>
    %340 = arith.mulf %336, %339 : vector<16x8xf32>
    %341 = tpu.transpose %340, [1, 0] : vector<16x8xf32> -> vector<8x16xf32>
    %cst_102 = arith.constant dense<0.000000e+00> : vector<8x64xf32>
    %342 = tpu.matmul %341, %338, %cst_102 {dimension_numbers = #tpu.dot_dimension_numbers<[1], [0], [0], [1], [0, 0, 1, 1], [], []>, precision = #tpu.contract_precision<fp32>} : vector<8x16xf32>, vector<16x64xf32>, vector<8x64xf32> -> vector<8x64xf32>
    %cst_103 = arith.constant dense<0.000000e+00> : vector<8x16xf32>
    %343 = tpu.matmul %341, %208, %cst_103 {dimension_numbers = #tpu.dot_dimension_numbers<[1], [0], [0], [1], [0, 0, 1, 1], [], []>, precision = #tpu.contract_precision<fp32>} : vector<8x16xf32>, vector<16x16xf32>, vector<8x16xf32> -> vector<8x16xf32>
    %cst_104 = arith.constant dense<0.000000e+00> : vector<8x8xf32>
    %344 = tpu.matmul %343, %340, %cst_104 {dimension_numbers = #tpu.dot_dimension_numbers<[1], [0], [0], [1], [0, 0, 1, 1], [], []>, precision = #tpu.contract_precision<fp32>} : vector<8x16xf32>, vector<16x8xf32>, vector<8x8xf32> -> vector<8x8xf32>
    %cst_105 = arith.constant dense<0.000000e+00> : vector<8x8xf32>
    %345 = tpu.matmul %341, %340, %cst_105 {dimension_numbers = #tpu.dot_dimension_numbers<[1], [0], [0], [1], [0, 0, 1, 1], [], []>, precision = #tpu.contract_precision<fp32>} : vector<8x16xf32>, vector<16x8xf32>, vector<8x8xf32> -> vector<8x8xf32>
    %346 = tpu.iota {dimensions = array<i32: 0>} : vector<8x8xi32>
    %347 = tpu.iota {dimensions = array<i32: 1>} : vector<8x8xi32>
    %348 = arith.cmpi eq, %346, %347 : vector<8x8xi32>
    %349 = arith.extui %348 : vector<8x8xi1> to vector<8x8xi32>
    %350 = arith.sitofp %349 : vector<8x8xi32> to vector<8x8xf32>
    %c6_i32_106 = arith.constant 6 : i32
    %351 = vector.broadcast %c6_i32_106 : i32 to vector<8x8xi32>
    %352 = arith.cmpi slt, %346, %351 : vector<8x8xi32>
    %353 = arith.andi %348, %352 : vector<8x8xi1>
    %354 = arith.extui %353 : vector<8x8xi1> to vector<8x8xi32>
    %355 = arith.sitofp %354 : vector<8x8xi32> to vector<8x8xf32>
    %356 = arith.mulf %344, %350 : vector<8x8xf32>
    %357 = vector.shape_cast %356 : vector<8x8xf32> to vector<1x8x8xf32>
    %cst_107 = arith.constant dense<0.000000e+00> : vector<1xf32>
    %358 = vector.multi_reduction <add>, %357, %cst_107 [1, 2] : vector<1x8x8xf32> to vector<1xf32>
    %359 = vector.shape_cast %358 : vector<1xf32> to vector<1x1x1xf32>
    %360 = vector.extract %359[0, 0, 0] : f32 from vector<1x1x1xf32>
    %361 = vector.broadcast %360 : f32 to vector<1x1xf32>
    %362 = vector.broadcast %228 : vector<16x1xf32> to vector<16x8xf32>
    %363 = arith.mulf %362, %340 : vector<16x8xf32>
    %364 = arith.mulf %363, %340 : vector<16x8xf32>
    %365 = vector.shape_cast %364 : vector<16x8xf32> to vector<1x16x8xf32>
    %cst_108 = arith.constant dense<0.000000e+00> : vector<1xf32>
    %366 = vector.multi_reduction <add>, %365, %cst_108 [1, 2] : vector<1x16x8xf32> to vector<1xf32>
    %367 = vector.shape_cast %366 : vector<1xf32> to vector<1x1x1xf32>
    %368 = vector.extract %367[0, 0, 0] : f32 from vector<1x1x1xf32>
    %369 = vector.broadcast %368 : f32 to vector<1x1xf32>
    %370 = arith.divf %361, %369 : vector<1x1xf32>
    %cst_109 = arith.constant 0.000000e+00 : f32
    %371 = vector.broadcast %cst_109 : f32 to vector<1x1xf32>
    %372 = arith.subf %371, %370 : vector<1x1xf32>
    %373 = arith.mulf %345, %345 : vector<8x8xf32>
    %374 = vector.shape_cast %373 : vector<8x8xf32> to vector<1x8x8xf32>
    %cst_110 = arith.constant dense<0.000000e+00> : vector<1xf32>
    %375 = vector.multi_reduction <add>, %374, %cst_110 [1, 2] : vector<1x8x8xf32> to vector<1xf32>
    %376 = vector.shape_cast %375 : vector<1xf32> to vector<1x1x1xf32>
    %377 = vector.extract %376[0, 0, 0] : f32 from vector<1x1x1xf32>
    %378 = vector.broadcast %377 : f32 to vector<1x1xf32>
    %379 = math.sqrt %378 : vector<1x1xf32>
    %380 = vector.broadcast %379 : vector<1x1xf32> to vector<8x8xf32>
    %381 = arith.divf %345, %380 : vector<8x8xf32>
    %cst_111 = arith.constant 0.408248305 : f32
    %382 = vector.broadcast %cst_111 : f32 to vector<8x8xf32>
    %383 = arith.mulf %355, %382 : vector<8x8xf32>
    %384 = arith.subf %381, %383 : vector<8x8xf32>
    %385 = arith.mulf %384, %384 : vector<8x8xf32>
    %386 = vector.shape_cast %385 : vector<8x8xf32> to vector<1x8x8xf32>
    %cst_112 = arith.constant dense<0.000000e+00> : vector<1xf32>
    %387 = vector.multi_reduction <add>, %386, %cst_112 [1, 2] : vector<1x8x8xf32> to vector<1xf32>
    %388 = vector.shape_cast %387 : vector<1xf32> to vector<1x1x1xf32>
    %389 = vector.extract %388[0, 0, 0] : f32 from vector<1x1x1xf32>
    %390 = vector.broadcast %389 : f32 to vector<1x1xf32>
    %391 = math.sqrt %390 : vector<1x1xf32>
    %cst_113 = arith.constant 1.000000e+00 : f32
    %392 = vector.broadcast %cst_113 : f32 to vector<8x8xf32>
    %393 = arith.subf %392, %350 : vector<8x8xf32>
    %394 = arith.mulf %344, %393 : vector<8x8xf32>
    %cst_114 = arith.constant dense<0.000000e+00> : vector<8xf32>
    %395 = vector.multi_reduction <add>, %394, %cst_114 [1] : vector<8x8xf32> to vector<8xf32>
    %396 = vector.shape_cast %395 : vector<8xf32> to vector<8x1xf32>
    %397 = math.sqrt %396 : vector<8x1xf32>
    %cst_115 = arith.constant 1.000000e-15 : f32
    %398 = vector.broadcast %cst_115 : f32 to vector<8x1xf32>
    %399 = arith.addf %397, %398 : vector<8x1xf32>
    %400 = vector.broadcast %399 : vector<8x1xf32> to vector<8x8xf32>
    %401 = arith.divf %394, %400 : vector<8x8xf32>
    %402 = vector.shape_cast %399 : vector<8x1xf32> to vector<1x8xf32>
    %403 = vector.broadcast %402 : vector<1x8xf32> to vector<8x8xf32>
    %404 = arith.divf %401, %403 : vector<8x8xf32>
    %cst_116 = arith.constant dense<0.000000e+00> : vector<8xf32>
    %405 = vector.multi_reduction <add>, %325, %cst_116 [1] : vector<8x8xf32> to vector<8xf32>
    %406 = vector.shape_cast %405 : vector<8xf32> to vector<8x1xf32>
    %cst_117 = arith.constant dense<0.000000e+00> : vector<8x64xf32>
    %407 = tpu.matmul %325, %263, %cst_117 {dimension_numbers = #tpu.dot_dimension_numbers<[1], [0], [0], [1], [0, 0, 1, 1], [], []>, precision = #tpu.contract_precision<fp32>} : vector<8x8xf32>, vector<8x64xf32>, vector<8x64xf32> -> vector<8x64xf32>
    %cst_118 = arith.constant 1.000000e+00 : f32
    %408 = vector.broadcast %cst_118 : f32 to vector<8x1xf32>
    %409 = arith.maximumf %406, %408 : vector<8x1xf32>
    %410 = vector.broadcast %409 : vector<8x1xf32> to vector<8x64xf32>
    %411 = arith.divf %407, %410 : vector<8x64xf32>
    %412 = tpu.concatenate %411, %263 in 1 : vector<8x64xf32>, vector<8x64xf32> -> vector<8x128xf32>
    %cst_119 = arith.constant dense<0.000000e+00> : vector<8xf32>
    %413 = vector.multi_reduction <add>, %404, %cst_119 [1] : vector<8x8xf32> to vector<8xf32>
    %414 = vector.shape_cast %413 : vector<8xf32> to vector<8x1xf32>
    %cst_120 = arith.constant dense<0.000000e+00> : vector<8x64xf32>
    %415 = tpu.matmul %404, %342, %cst_120 {dimension_numbers = #tpu.dot_dimension_numbers<[1], [0], [0], [1], [0, 0, 1, 1], [], []>, precision = #tpu.contract_precision<fp32>} : vector<8x8xf32>, vector<8x64xf32>, vector<8x64xf32> -> vector<8x64xf32>
    %cst_121 = arith.constant 1.000000e+00 : f32
    %416 = vector.broadcast %cst_121 : f32 to vector<8x1xf32>
    %417 = arith.maximumf %414, %416 : vector<8x1xf32>
    %418 = vector.broadcast %417 : vector<8x1xf32> to vector<8x64xf32>
    %419 = arith.divf %415, %418 : vector<8x64xf32>
    %420 = tpu.concatenate %419, %342 in 1 : vector<8x64xf32>, vector<8x64xf32> -> vector<8x128xf32>
    %421 = tpu.concatenate %412, %420 in 0 : vector<8x128xf32>, vector<8x128xf32> -> vector<16x128xf32>
    %c160 = arith.constant 160 : index
    %c0_122 = arith.constant 0 : index
    %422 = vector.load %arg3[%c160, %c0_122] : memref<600x64xf32, #tpu.memory_space<vmem>>, vector<128x64xf32>
    %c368 = arith.constant 368 : index
    %c0_123 = arith.constant 0 : index
    %423 = vector.load %arg3[%c368, %c0_123] : memref<600x64xf32, #tpu.memory_space<vmem>>, vector<1x64xf32>
    %cst_124 = arith.constant dense<0.000000e+00> : vector<16x64xf32>
    %424 = tpu.matmul %421, %422, %cst_124 {dimension_numbers = #tpu.dot_dimension_numbers<[1], [0], [0], [1], [0, 0, 1, 1], [], []>, precision = #tpu.contract_precision<fp32>} : vector<16x128xf32>, vector<128x64xf32>, vector<16x64xf32> -> vector<16x64xf32>
    %425 = vector.broadcast %423 : vector<1x64xf32> to vector<16x64xf32>
    %426 = arith.addf %424, %425 : vector<16x64xf32>
    %427 = tpu.concatenate %218, %218 in 0 : vector<8x1xf32>, vector<8x1xf32> -> vector<16x1xf32>
    %428 = vector.broadcast %427 : vector<16x1xf32> to vector<16x64xf32>
    %429 = arith.mulf %426, %428 : vector<16x64xf32>
    %430 = vector.extract_strided_slice %429 {offsets = [0, 0], sizes = [8, 64], strides = [1, 1]} : vector<16x64xf32> to vector<8x64xf32>
    %cst_125 = arith.constant dense<0.000000e+00> : vector<64xf32>
    %431 = vector.multi_reduction <add>, %430, %cst_125 [0] : vector<8x64xf32> to vector<64xf32>
    %432 = vector.shape_cast %431 : vector<64xf32> to vector<1x64xf32>
    %cst_126 = arith.constant 0.166666672 : f32
    %433 = vector.broadcast %cst_126 : f32 to vector<1x64xf32>
    %434 = arith.mulf %432, %433 : vector<1x64xf32>
    %435 = vector.extract_strided_slice %429 {offsets = [8, 0], sizes = [8, 64], strides = [1, 1]} : vector<16x64xf32> to vector<8x64xf32>
    %cst_127 = arith.constant dense<0.000000e+00> : vector<64xf32>
    %436 = vector.multi_reduction <add>, %435, %cst_127 [0] : vector<8x64xf32> to vector<64xf32>
    %437 = vector.shape_cast %436 : vector<64xf32> to vector<1x64xf32>
    %cst_128 = arith.constant 0.166666672 : f32
    %438 = vector.broadcast %cst_128 : f32 to vector<1x64xf32>
    %439 = arith.mulf %437, %438 : vector<1x64xf32>
    %440 = tpu.concatenate %434, %439 in 0 : vector<1x64xf32>, vector<1x64xf32> -> vector<2x64xf32>
    %c288 = arith.constant 288 : index
    %c0_129 = arith.constant 0 : index
    %441 = vector.load %arg3[%c288, %c0_129] : memref<600x64xf32, #tpu.memory_space<vmem>>, vector<64x64xf32>
    %c376 = arith.constant 376 : index
    %c0_130 = arith.constant 0 : index
    %442 = vector.load %arg3[%c376, %c0_130] : memref<600x64xf32, #tpu.memory_space<vmem>>, vector<1x64xf32>
    %cst_131 = arith.constant dense<0.000000e+00> : vector<2x64xf32>
    %443 = tpu.matmul %440, %441, %cst_131 {dimension_numbers = #tpu.dot_dimension_numbers<[1], [0], [0], [1], [0, 0, 1, 1], [], []>, precision = #tpu.contract_precision<fp32>} : vector<2x64xf32>, vector<64x64xf32>, vector<2x64xf32> -> vector<2x64xf32>
    %444 = vector.broadcast %442 : vector<1x64xf32> to vector<2x64xf32>
    %445 = arith.addf %443, %444 : vector<2x64xf32>
    %cst_132 = arith.constant 0.000000e+00 : f32
    %446 = vector.broadcast %cst_132 : f32 to vector<2x64xf32>
    %447 = arith.maximumf %445, %446 : vector<2x64xf32>
    %c512 = arith.constant 512 : index
    %c0_133 = arith.constant 0 : index
    %448 = vector.load %arg3[%c512, %c0_133] : memref<600x64xf32, #tpu.memory_space<vmem>>, vector<64x64xf32>
    %c592 = arith.constant 592 : index
    %c0_134 = arith.constant 0 : index
    %449 = vector.load %arg3[%c592, %c0_134] : memref<600x64xf32, #tpu.memory_space<vmem>>, vector<1x64xf32>
    %cst_135 = arith.constant dense<0.000000e+00> : vector<2x64xf32>
    %450 = tpu.matmul %447, %448, %cst_135 {dimension_numbers = #tpu.dot_dimension_numbers<[1], [0], [0], [1], [0, 0, 1, 1], [], []>, precision = #tpu.contract_precision<fp32>} : vector<2x64xf32>, vector<64x64xf32>, vector<2x64xf32> -> vector<2x64xf32>
    %451 = vector.broadcast %449 : vector<1x64xf32> to vector<2x64xf32>
    %452 = arith.addf %450, %451 : vector<2x64xf32>
    %453 = vector.extract_strided_slice %452 {offsets = [0, 0], sizes = [2, 4], strides = [1, 1]} : vector<2x64xf32> to vector<2x4xf32>
    %cst_136 = arith.constant dense<0xFF800000> : vector<2xf32>
    %454 = vector.multi_reduction <maximumf>, %453, %cst_136 [1] : vector<2x4xf32> to vector<2xf32>
    %455 = vector.shape_cast %454 : vector<2xf32> to vector<2x1xf32>
    %456 = vector.broadcast %455 : vector<2x1xf32> to vector<2x4xf32>
    %457 = arith.subf %453, %456 : vector<2x4xf32>
    %458 = math.exp %457 : vector<2x4xf32>
    %cst_137 = arith.constant dense<0.000000e+00> : vector<2xf32>
    %459 = vector.multi_reduction <add>, %458, %cst_137 [1] : vector<2x4xf32> to vector<2xf32>
    %460 = vector.shape_cast %459 : vector<2xf32> to vector<2x1xf32>
    %461 = math.log %460 : vector<2x1xf32>
    %462 = vector.broadcast %461 : vector<2x1xf32> to vector<2x4xf32>
    %463 = arith.subf %457, %462 : vector<2x4xf32>
    %464 = tpu.concatenate %93, %112, %293, %312 in 1 : vector<1x1xf32>, vector<1x1xf32>, vector<1x1xf32>, vector<1x1xf32> -> vector<1x4xf32>
    %465 = tpu.concatenate %176, %195, %372, %391 in 1 : vector<1x1xf32>, vector<1x1xf32>, vector<1x1xf32>, vector<1x1xf32> -> vector<1x4xf32>
    %466 = tpu.concatenate %464, %465 in 0 : vector<1x4xf32>, vector<1x4xf32> -> vector<2x4xf32>
    %467 = tpu.concatenate %463, %466 in 1 : vector<2x4xf32>, vector<2x4xf32> -> vector<2x8xf32>
    %c0_138 = arith.constant 0 : index
    %c0_139 = arith.constant 0 : index
    %468 = vector.load %arg4[%c0_138, %c0_139] : memref<2x8xf32, #tpu.memory_space<vmem>>, vector<2x8xf32>
    tpu.vector_store %arg4[%c0_138, %c0_139], %467 {strides = array<i32>} : memref<2x8xf32, #tpu.memory_space<vmem>>, vector<2x8xf32>,
    return
  }
}

</mosaic_0001>

<bundles_post_ra>
// kernel: net_forward.1
= control target key start
LH: loop header
LB: loop body
LE: loop exit
PB: predicated region body
PF: predicated region fallthrough
CT: control target
= control target key end

     0   :  { %vm25_vm0 = vcmask 261120   ;;  %s8886_s16 = smov 16   ;;  %vm408_vm7 = vcmask 130048   ;;  %s8890_s20 = smov 4   ;;  %s12513_s1 = inlined_call_operand.vmem [shape: f32[2,32,32], index: 1, kind: input, shape index: {}]   ;;  %s12514_s0 = inlined_call_operand.vmem [shape: f32[2,32,16], index: 0, kind: input, shape index: {}]   ;;  %s12515_s3 = inlined_call_operand.vmem [shape: f32[600,64], index: 3, kind: input, shape index: {}]   ;;  %s12516_s2 = inlined_call_operand.vmem [shape: f32[2,32,1], index: 2, kind: input, shape index: {}]   ;;  %s12517_s4 = inlined_call_operand.vmem [shape: f32[2,8], index: 4, kind: output, shape index: {}]  }
   0x1   :  { %v8919_v0 = vld [vmem:[%s12513_s1 + $0x10] sm:$0xff]  ;;  %v21_v1 = vld [vmem:[%s12513_s1] sm:$0xff]  ;;  %v8927_v2 = vld [vmem:[%s12514_s0 + $0x18] sm:$0xff] }
   0x2   :  { %v32_v3 = vsel %vm25_vm0, %v8919_v0, 0.0  ;;  %v26_v4 = vsel %vm25_vm0, %v21_v1, 0.0  ;;  %v8933_v5 = vand.u32 4294901760, %v8927_v2  ;;  %v8938_v6 = vld [vmem:[%s12514_s0 + $0x10] sm:$0xff]  ;;  %v8943_v7 = vld [vmem:[%s12513_s1 + $0x18] sm:$0xff]  ;;  %v8948_v8 = vld [vmem:[%s12514_s0 + $0x8] sm:$0xff] }
   0x3   :  { %33 = vadd.xlane.f32.xlu1 %v32_v3  ;;  %27 = vadd.xlane.f32.xlu0 %v26_v4  ;;  %v8951_v9 = vand.u32 4294901760, %v8938_v6  ;;  %v35_v10 = vsel %vm25_vm0, %v8943_v7, 0.0  ;;  %v8956_v11 = vand.u32 4294901760, %v8948_v8  ;;  %v8961_v12 = vld [vmem:[%s12514_s0] sm:$0xff]  ;;  %v39_v13 = vsel %vm25_vm0, %v21_v1, 0  ;;  %v8978_v17 = vld [vmem:[%s12514_s0 + $0x38] sm:$0xff] }
   0x4   :  { %63 = vmatpush.msra.mxu0 %v8933_v5  ;;  %v8967_v14 = vsub.f32 %v8927_v2, %v8933_v5  ;;  %214 = vmatpush.msra.mxu3 %v8933_v5  ;;  %v8971_v15 = vand.u32 4294901760, %v8961_v12  ;;  %v8973_v16 = vand.u32 4294901760, %v39_v13  ;;  %v22_v20 = vld [vmem:[%s12513_s1 + $0x8] sm:$0xff]  ;;  %v8992_v21 = vand.u32 4294901760, %v8978_v17  ;;  %v9013_v29 = vld [vmem:[%s12514_s0 + $0x30] sm:$0xff]  ;;  %v9049_v46 = vld [vmem:[%s12514_s0 + $0x20] sm:$0xff] }
   0x5   :  { %36 = vadd.xlane.f32.xlu2 %v35_v10  ;;  %v8982_v18 = vsub.f32 %v8938_v6, %v8951_v9  ;;  %v8986_v19 = vsub.f32 %v8948_v8, %v8956_v11  ;;  %v29_v25 = vsel %vm25_vm0, %v22_v20, 0.0  ;;  %v42_v33 = vsel %vm25_vm0, %v22_v20, 0  ;;  %v9039_v42 = vld [vmem:[%s12514_s0 + $0x28] sm:$0xff]  ;;  %v8672_v52 = vld [vmem:[%s12513_s1 + $0x20] sm:$0xff] }
   0x6   :  { %65 = vmatpush.msra.mxu0 %v8951_v9  ;;  %170 = vmatpush.msra.mxu2 %v8967_v14  ;;  %v117_v22 = vand.u32 4294901760, %v8967_v14  ;;  %v71_v23 = vsub.f32 %v39_v13, %v8973_v16  ;;  %v9000_v24 = vsub.f32 %v8961_v12, %v8971_v15  ;;  %v9008_v28 = vsub.f32 %v8978_v17, %v8992_v21 }
   0x7   :  { %216 = vmatpush.msra.mxu3 %v8951_v9  ;;  %v123_v26 = vand.u32 4294901760, %v8982_v18  ;;  %v129_v27 = vand.u32 4294901760, %v8986_v19  ;;  %v9026_v37 = vand.u32 4294901760, %v42_v33  ;;  %v9034_v41 = vand.u32 4294901760, %v9013_v29 }
   0x8   :  { %67 = vmatpush.msra.mxu0 %v8956_v11  ;;  %173 = vmatpush.msra.mxu2 %v8982_v18  ;;  %v118_v30 = vsub.f32 %v8967_v14, %v117_v22  ;;  %v72_v31 = vand.u32 4294901760, %v71_v23  ;;  %v135_v32 = vand.u32 4294901760, %v9000_v24  ;;  %v514_v36 = vand.u32 4294901760, %v9008_v28 }
   0x9   :  { %218 = vmatpush.msra.mxu3 %v8956_v11  ;;  %v124_v34 = vsub.f32 %v8982_v18, %v123_v26  ;;  %v130_v35 = vsub.f32 %v8986_v19, %v129_v27  ;;  %v79_v45 = vsub.f32 %v42_v33, %v9026_v37  ;;  %v9054_v49 = vsub.f32 %v9013_v29, %v9034_v41 }
   0xa   :  { %69 = vmatpush.msra.mxu0 %v8971_v15  ;;  %v119_v38 = vand.u32 4294901760, %v118_v30  ;;  %176 = vmatpush.msra.mxu2 %v8986_v19  ;;  %v73_v39 = vsub.f32 %v71_v23, %v72_v31  ;;  %v136_v40 = vsub.f32 %v9000_v24, %v135_v32  ;;  %v515_v44 = vsub.f32 %v9008_v28, %v514_v36 }
   0xb   :  { %30 = vadd.xlane.f32.xlu0 %v29_v25  ;;  %v125_v43 = vand.u32 4294901760, %v124_v34  ;;  %220 = vmatpush.msra.mxu3 %v8971_v15  ;;  %v131_v48 = vand.u32 4294901760, %v130_v35  ;;  %v45_v50 = vsel %vm25_vm0, %v8919_v0, 0  ;;  %v80_v53 = vand.u32 4294901760, %v79_v45 }
   0xc   :  { %120 = vmatpush.msra.mxu1 %v119_v38  ;;  %v74_v47 = vand.u32 4294901760, %v73_v39  ;;  %179 = vmatpush.msra.mxu2 %v9000_v24  ;;  %v516_v51 = vand.u32 4294901760, %v515_v44  ;;  %v9061_v54 = vand.u32 4294901760, %v45_v50  ;;  %v9064_v55 = vand.u32 4294901760, %v9039_v42 }
   0xd   :  { %182 = vmatmul.f32.vlgmr.msra.gmra.mxu2 %v71_v23  ;;  %224 = vmatmul.f32.vlgmr.msra.gmra.mxu3 %v72_v31  ;;  %v137_v56 = vand.u32 4294901760, %v136_v40  ;;  %v520_v57 = vand.u32 4294901760, %v9054_v49  ;;  %v48_v58 = vsel %vm25_vm0, %v8943_v7, 0  ;;  %v9070_v59 = vand.u32 4294901760, %v9049_v46 }
   0xe   :  { %75 = vmatmul.f32.vlgmr.msra.gmra.mxu0 %v74_v47  ;;  %126 = vmatpush.msra.mxu1 %v125_v43  ;;  %v81_v60 = vsub.f32 %v79_v45, %v80_v53  ;;  %v87_v61 = vsub.f32 %v45_v50, %v9061_v54  ;;  %v9076_v62 = vsub.f32 %v9039_v42, %v9064_v55  ;;  %v423_v63 = vsel %vm25_vm0, %v8672_v52, 0.0 }
   0xf   :  { %460 = vmatpush.msrb.mxu2 %v8992_v21  ;;  %261 = vmatpush.msrb.mxu0 %v117_v22  ;;  %v521_v0 = vsub.f32 %v9054_v49, %v520_v57  ;;  %v9082_v1 = vsub.f32 %v9049_v46, %v9070_v59  ;;  %v9086_v4 = vand.u32 4294901760, %v48_v58  ;;  %v436_v23 = vsel %vm25_vm0, %v8672_v52, 0 }
  0x10   :  { %132 = vmatpush.msra.mxu1 %v131_v48  ;;  %517 = vmatpush.msrb.mxu3 %v516_v51  ;;  %v526_v3 = vand.u32 4294901760, %v9076_v62  ;;  %v82_v7 = vand.u32 4294901760, %v81_v60  ;;  %v88_v13 = vand.u32 4294901760, %v87_v61  ;;  %v812_v51 = vld [vmem:[%s12515_s3 + $0x18] sm:$0xff] }
  0x11   :  { %462 = vmatpush.msrb.mxu2 %v9034_v41  ;;  %265 = vmatpush.msrb.mxu0 %v123_v26  ;;  %v522_v10 = vand.u32 4294901760, %v521_v0  ;;  %v532_v14 = vand.u32 4294901760, %v9082_v1  ;;  %v95_v26 = vsub.f32 %v48_v58, %v9086_v4  ;;  %v860_v52 = vand.u32 4294901760, %v812_v51 }
  0x12   :  { %138 = vmatpush.msra.mxu1 %v137_v56  ;;  %v527_v18 = vsub.f32 %v9076_v62, %v526_v3  ;;  %v89_v25 = vsub.f32 %v87_v61, %v88_v13 }
  0x13   :  { %140 = vmatmul.f32.vlgmr.msra.gmra.mxu1 %v8973_v16  ;;  %424 = vadd.xlane.f32.xlu0 %v423_v63  ;;  %v533_v20 = vsub.f32 %v9082_v1, %v532_v14  ;;  %v96_v31 = vand.u32 4294901760, %v95_v26 }
  0x14   :  { %304 = vmatpush.msrb.mxu1 %v8933_v5  ;;  %523 = vmatpush.msrb.mxu3 %v522_v10  ;;  %v528_v22 = vand.u32 4294901760, %v527_v18  ;;  %v9102_v5 = vand.u32 4294901760, %v436_v23 }
  0x15   :  { %187 = vmatmul.f32.gmra.mxu2 %v79_v45  ;;  %230 = vmatmul.f32.gmra.mxu3 %v80_v53  ;;  %v534_v30 = vand.u32 4294901760, %v533_v20  ;;  %v97_v19 = vsub.f32 %v95_v26, %v96_v31  ;;  %v946_v53 = vsub.f32 %v812_v51, %v860_v52 }
  0x16   :  { %83 = vmatmul.f32.gmra.mxu0 %v82_v7  ;;  %306 = vmatpush.msrb.mxu1 %v8951_v9  ;;  %v90_v9 = vand.u32 4294901760, %v89_v25 }
  0x17   :  { %464 = vmatpush.msrb.mxu2 %v9064_v55  ;;  %269 = vmatpush.msrb.mxu0 %v129_v27 }
  0x18   :  { %529 = vmatpush.msrb.mxu3 %v528_v22  ;;  %308 = vmatpush.msrb.mxu1 %v8956_v11  ;;  %v9114_v11 = vld [vmem:[%s12513_s1 + $0x28] sm:$0xff] }
  0x19   :  { %466 = vmatpush.msrb.mxu2 %v9070_v59  ;;  %273 = vmatpush.msrb.mxu0 %v135_v32  ;;  %v439_v24 = vsel %vm25_vm0, %v9114_v11, 0 }
  0x1a   :  { %535 = vmatpush.msrb.mxu3 %v534_v30  ;;  %310 = vmatpush.msrb.mxu1 %v8971_v15  ;;  %v9120_v15 = vsub.f32 %v436_v23, %v9102_v5  ;;  %v9130_v27 = vand.u32 4294901760, %v439_v24 }
  0x1b   :  { %144 = vmatmul.f32.gmra.mxu1 %v9026_v37  ;;  %658 = vmatpush.msra.mxu2 %v514_v36  ;;  %v8675_v36 = vld [vmem:[%s12513_s1 + $0x38] sm:$0xff] }
  0x1c   :  { %396 = vrot.lane.b32.xlu1 %v8961_v12, %s8886_s16  ;;  %567 = vmatpush.msra.mxu0 %v9008_v28  ;;  %v469_v12 = vand.u32 4294901760, %v9120_v15  ;;  %v476_v32 = vsub.f32 %v439_v24, %v9130_v27  ;;  %v445_v39 = vsel %vm25_vm0, %v8675_v36, 0  ;;  %v432_v50 = vsel %vm25_vm0, %v8675_v36, 0.0 }
  0x1d   :  { %192 = vmatmul.f32.gmra.mxu2 %v87_v61  ;;  %236 = vmatmul.f32.gmra.mxu3 %v88_v13  ;;  %v491_v43 = vand.u32 4294901760, %v445_v39  ;;  %v809_v61 = vld [vmem:[%s12515_s3] sm:$0xff] }
  0x1e   :  { %91 = vmatmul.f32.gmra.mxu0 %v90_v9  ;;  %398 = vrot.lane.b32.xlu2 %v8948_v8, %s8886_s16  ;;  %v98_v8 = vand.u32 4294901760, %v97_v19  ;;  %v470_v28 = vsub.f32 %v9120_v15, %v469_v12  ;;  %v477_v34 = vand.u32 4294901760, %v476_v32  ;;  %v866_v0 = vand.u32 4294901760, %v809_v61 }
  0x1f   :  { %701 = vmatpush.msra.mxu3 %v8992_v21  ;;  %611 = vmatpush.msra.mxu1 %v8992_v21  ;;  %v8674_v21 = vld [vmem:[%s12513_s1 + $0x30] sm:$0xff]  ;;  %v492_v45 = vsub.f32 %v445_v39, %v491_v43 }
  0x20   :  { %662 = vmatpush.msra.mxu2 %v520_v57  ;;  %570 = vmatpush.msra.mxu0 %v9054_v49  ;;  %v442_v33 = vsel %vm25_vm0, %v8674_v21, 0  ;;  %v478_v38 = vsub.f32 %v476_v32, %v477_v34 }
  0x21   :  { %703 = vmatpush.msra.mxu3 %v9034_v41  ;;  %613 = vmatpush.msra.mxu1 %v9034_v41  ;;  %v483_v35 = vand.u32 4294901760, %v442_v33  ;;  %v493_v48 = vand.u32 4294901760, %v492_v45 }
  0x22   :  { %666 = vmatpush.msra.mxu2 %v526_v3  ;;  %573 = vmatpush.msra.mxu0 %v9076_v62  ;;  %v479_v40 = vand.u32 4294901760, %v478_v38 }
  0x23   :  { %148 = vmatmul.f32.gmra.mxu1 %v9061_v54  ;;  %705 = vmatpush.msra.mxu3 %v9064_v55  ;;  %v494_v49 = vsub.f32 %v492_v45, %v493_v48 }
  0x24   :  { %402 = vrot.lane.b32.xlu1 %v8927_v2, %s8886_s16  ;;  %615 = vmatpush.msra.mxu1 %v9064_v55  ;;  %v471_v2 = vand.u32 4294901760, %v470_v28 }
  0x25   :  { %197 = vmatmul.f32.gmra.mxu2 %v95_v26  ;;  %242 = vmatmul.f32.gmra.mxu3 %v96_v31 }
  0x26   :  { %99 = vmatmul.f32.gmra.mxu0 %v98_v8  ;;  %670 = vmatpush.msra.mxu2 %v532_v14  ;;  %v964_v14 = vsub.f32 %v809_v61, %v866_v0 }
  0x27   :  { %400 = vrot.lane.b32.xlu0 %v8938_v6, %s8886_s16  ;;  %576 = vmatpush.msra.mxu0 %v9082_v1  ;;  %v484_v6 = vsub.f32 %v442_v33, %v483_v35 }
  0x28   :  { %707 = vmatpush.msra.mxu3 %v9070_v59  ;;  %617 = vmatpush.msra.mxu1 %v9070_v59  ;;  %v965_v23 = vand.u32 4294901760, %v964_v14 }
  0x29   :  { %v485_v41 = vand.u32 4294901760, %v484_v6 }
  0x2a   :  { %v966_v26 = vsub.f32 %v964_v14, %v965_v23 }
  0x2b   :  { %152 = vmatmul.f32.gmra.mxu1 %v9086_v4  ;;  %v486_v44 = vsub.f32 %v484_v6, %v485_v41 }
  0x2c   :  { %v967_v31 = vand.u32 4294901760, %v966_v26 }
  0x2d   :  { %472 = vmatmul.f32.vlgmr.msrb.gmra.mxu2 %v471_v2  ;;  %537 = vmatmul.f32.vlgmr.msrb.gmra.mxu3 %v9102_v5  ;;  %v487_v47 = vand.u32 4294901760, %v486_v44 }
  0x2e   :  { %275 = vmatmul.f32.vlgmr.msrb.gmra.mxu0 %v8973_v16  ;;  %1080 = vmatpush.msrb.mxu3 %v860_v52 }
  0x2f   :  { %793 = vrot.lane.b32.xlu0 %v9049_v46, %s8886_s16  ;;  %v495_v46 = vand.u32 4294901760, %v494_v49  ;;  %861 = vmatpush.msrb.mxu0 %v860_v52 }
  0x30   :  { %1016 = vmatpush.msrb.mxu2 %v946_v53 }
  0x33   :  { %312 = vmatmul.f32.vlgmr.msrb.gmra.mxu1 %v8973_v16  ;;  %v426_v16 = vsel %vm25_vm0, %v9114_v11, 0.0 }
  0x35   :  { %480 = vmatmul.f32.gmra.mxu2 %v479_v40  ;;  %541 = vmatmul.f32.gmra.mxu3 %v9130_v27 }
  0x36   :  { %279 = vmatmul.f32.gmra.mxu0 %v9026_v37 }
  0x3b   :  { %316 = vmatmul.f32.gmra.mxu1 %v9026_v37  ;;  %v429_v37 = vsel %vm25_vm0, %v8674_v21, 0.0 }
  0x3d   :  { %488 = vmatmul.f32.gmra.mxu2 %v487_v47  ;;  %545 = vmatmul.f32.gmra.mxu3 %v483_v35 }
  0x3e   :  { %283 = vmatmul.f32.gmra.mxu0 %v9061_v54 }
  0x43   :  { %320 = vmatmul.f32.gmra.mxu1 %v9061_v54  ;;  %v811_v54 = vld [vmem:[%s12515_s3 + $0x10] sm:$0xff] }
  0x45   :  { %496 = vmatmul.f32.gmra.mxu2 %v495_v46  ;;  %549 = vmatmul.f32.gmra.mxu3 %v491_v43 }
  0x46   :  { %287 = vmatmul.f32.gmra.mxu0 %v9086_v4 }
  0x47   :  { %427 = vadd.xlane.f32.xlu2 %v426_v16 }
  0x4b   :  { %324 = vmatmul.f32.gmra.mxu1 %v9086_v4 }
  0x4d   :  { %672 = vmatmul.f32.vlgmr.msra.gmra.mxu2 %v9102_v5  ;;  %709 = vmatmul.f32.vlgmr.msra.gmra.mxu3 %v9102_v5 }
  0x4e   :  { %579 = vmatmul.f32.vlgmr.msra.gmra.mxu0 %v9120_v15  ;;  %430 = vadd.xlane.f32.xlu1 %v429_v37 }
  0x53   :  { %621 = vmatmul.f32.vlgmr.msra.gmra.mxu1 %v469_v12 }
  0x55   :  { %676 = vmatmul.f32.gmra.mxu2 %v9130_v27  ;;  %713 = vmatmul.f32.gmra.mxu3 %v9130_v27 }
  0x56   :  { %584 = vmatmul.f32.gmra.mxu0 %v476_v32 }
  0x59   :  { %433 = vadd.xlane.f32.xlu0 %v432_v50 }
  0x5b   :  { %627 = vmatmul.f32.gmra.mxu1 %v477_v34 }
  0x5d   :  { %680 = vmatmul.f32.gmra.mxu2 %v483_v35  ;;  %717 = vmatmul.f32.gmra.mxu3 %v483_v35 }
  0x5e   :  { %589 = vmatmul.f32.gmra.mxu0 %v484_v6 }
  0x5f   :  { %795 = vrot.lane.b32.xlu2 %v9039_v42, %s8886_s16  ;;  %v947_v42 = vand.u32 4294901760, %v946_v53 }
  0x61   :  { %v948_v56 = vsub.f32 %v946_v53, %v947_v42 }
  0x63   :  { %633 = vmatmul.f32.gmra.mxu1 %v485_v41  ;;  %v949_v60 = vand.u32 4294901760, %v948_v56 }
  0x65   :  { %684 = vmatmul.f32.gmra.mxu2 %v491_v43  ;;  %721 = vmatmul.f32.gmra.mxu3 %v491_v43 }
  0x66   :  { %594 = vmatmul.f32.gmra.mxu0 %v492_v45  ;;  %950 = vmatpush.msrb.mxu1 %v949_v60 }
  0x67   :  { %797 = vrot.lane.b32.xlu1 %v9013_v29, %s8886_s16  ;;  %v862_v29 = vand.u32 4294901760, %v811_v54 }
  0x69   :  { %863 = vmatpush.msrb.mxu0 %v862_v29  ;;  %v952_v58 = vsub.f32 %v811_v54, %v862_v29  ;;  %1082 = vmatpush.msrb.mxu3 %v862_v29 }
  0x6b   :  { %639 = vmatmul.f32.gmra.mxu1 %v493_v48  ;;  %v953_v62 = vand.u32 4294901760, %v952_v58  ;;  %1019 = vmatpush.msrb.mxu2 %v952_v58 }
  0x6d   :  { %799 = vrot.lane.b32.xlu0 %v8978_v17, %s8886_s16  ;;  %v810_v17 = vld [vmem:[%s12515_s3 + $0x8] sm:$0xff]  ;;  %v954_v7 = vsub.f32 %v952_v58, %v953_v62 }
  0x6e   :  { %v864_v59 = vand.u32 4294901760, %v810_v17 }
  0x6f   :  { %v955_v20 = vand.u32 4294901760, %v954_v7 }
  0x70   :  { %865 = vmatpush.msrb.mxu0 %v864_v59  ;;  %v958_v63 = vsub.f32 %v810_v17, %v864_v59  ;;  %1084 = vmatpush.msrb.mxu3 %v864_v59 }
  0x71   :  { %956 = vmatpush.msrb.mxu1 %v955_v20 }
  0x72   :  { %v959_v10 = vand.u32 4294901760, %v958_v63  ;;  %1022 = vmatpush.msrb.mxu2 %v958_v63  ;;  %867 = vmatpush.msrb.mxu0 %v866_v0 }
  0x73   :  { %1086 = vmatpush.msrb.mxu3 %v866_v0 }
  0x74   :  { %1151 = vmatpush.msra.mxu0 %v947_v42  ;;  %v960_v22 = vsub.f32 %v958_v63, %v959_v10  ;;  %1025 = vmatpush.msrb.mxu2 %v964_v14 }
  0x76   :  { %v9200_v57 = vpop.xlane.xlu0 %27  ;;  %1155 = vmatpush.msra.mxu0 %v953_v62  ;;  %v961_v25 = vand.u32 4294901760, %v960_v22  ;;  %v9221_v12 = vpop.xlane.xlu1 %33 }
  0x77   :  { %v9208_v13 = vmax.f32 %v9200_v57, 1.0  ;;  %v9229_v32 = vmax.f32 %v9221_v12, 1.0 }
  0x78   :  { %1159 = vmatpush.msra.mxu0 %v959_v10  ;;  %962 = vmatpush.msrb.mxu1 %v961_v25  ;;  %v9237_v36 = vpop.xlane.xlu2 %36 }
  0x79   :  { %8734 = vrcp.f32 %v9208_v13  ;;  %v9246_v41 = vmax.f32 %v9237_v36, 1.0  ;;  %vm337_vm1 = vweird.f32 %v9208_v13  ;;  %v341_v45 = vand.u32 2147483647, %v9208_v13 }
  0x7a   :  { %1163 = vmatpush.msra.mxu0 %v965_v23  ;;  %968 = vmatpush.msrb.mxu1 %v967_v31  ;;  %v343_v47 = vand.u32 2147483648, %v9208_v13  ;;  %vm367_vm10 = vweird.f32 %v9229_v32 }
  0x7b   :  { %vm342_vm4 = vcmp.eq.f32.partialorder %v341_v45, 8.507059e+37  ;;  %vm382_vm14 = vweird.f32 %v9246_v41 }
  0x7c   :  { %1210 = vmatpush.msra.mxu1 %v860_v52  ;;  %v344_v52 = vor.u32 1.1754944e-38, %v343_v47 }
  0x7e   :  { %v9211_v30 = vpop.xlane.xlu0 %30  ;;  %1212 = vmatpush.msra.mxu1 %v862_v29 }
  0x7f   :  { %v9216_v15 = vmax.f32 %v9211_v30, 1.0  ;;  %v8735_v24 = vpop.eup %8734 }
  0x80   :  { %v333_v27 = vmul.f32 %v8735_v24, %v9208_v13  ;;  %1214 = vmatpush.msra.mxu1 %v864_v59  ;;  %vm338_vm2 = vweird.f32 %v8735_v24 }
  0x81   :  { %8736 = vrcp.f32 %v9216_v15  ;;  %vm9255_vm3 = vmor %vm337_vm1, %vm338_vm2  ;;  %vm352_vm5 = vweird.f32 %v9216_v15  ;;  %v356_v63 = vand.u32 2147483647, %v9216_v15 }
  0x82   :  { %1216 = vmatpush.msra.mxu1 %v866_v0  ;;  %v334_v2 = vsub.f32 1.0, %v333_v27  ;;  %8738 = vrcp.f32 %v9229_v32  ;;  %v358_v0 = vand.u32 2147483648, %v9216_v15 }
  0x83   :  { %8740 = vrcp.f32 %v9246_v41  ;;  %vm9291_vm9 = vcmp.eq.f32.partialorder %v356_v63, 8.507059e+37 }
  0x84   :  { %v335_v38 = vmul.f32 %v8735_v24, %v334_v2 }
  0x86   :  { %v336_v49 = vadd.f32 %v8735_v24, %v335_v38  ;;  %v9272_v61 = vpop.xlane.xlu0 %424 }
  0x87   :  { %v9233_v34 = vpop.eup %8736 }
  0x88   :  { %v348_v6 = vmul.f32 %v9233_v34, %v9216_v15  ;;  %v9253_v16 = vpop.eup %8738  ;;  %vm353_vm6 = vweird.f32 %v9233_v34 }
  0x89   :  { %v363_v53 = vmul.f32 %v9253_v16, %v9229_v32  ;;  %vm9279_vm8 = vmor %vm352_vm5, %vm353_vm6  ;;  %vm368_vm11 = vweird.f32 %v9253_v16 }
  0x8a   :  { %v349_v46 = vsub.f32 1.0, %v348_v6  ;;  %vm9325_vm12 = vmor %vm367_vm10, %vm368_vm11 }
  0x8b   :  { %v9195_v55 = vpop.f32.mrf.mxu0 }
  0x8c   :  { %v350_v29 = vmul.f32 %v9233_v34, %v349_v46 }
  0x8e   :  { %v397_v42 = vpop.permute.xlu1 %396  ;;  %v351_v13 = vadd.f32 %v9233_v34, %v350_v29 }
  0x90   :  { %v141_v1 = vpop.f32.mrf.mxu1  ;;  %v183_v3 = vpop.f32.mrf.mxu2  ;;  %v355_v15 = vsel %vm9279_vm8, %v9233_v34, %v351_v13 }
  0x91   :  { %v9205_v4 = vpop.f32.mrf.mxu3  ;;  %v142_v35 = vadd.f32 %v141_v1, %v9195_v55  ;;  %v340_v55 = vsel %vm9255_vm3, %v8735_v24, %v336_v49  ;;  %v9276_v1 = vpop.eup %8740 }
  0x92   :  { %v345_v62 = vsel %vm342_vm4, %v344_v52, %v340_v55  ;;  %v378_v25 = vmul.f32 %v9276_v1, %v9246_v41  ;;  %vm383_vm15 = vweird.f32 %v9276_v1 }
  0x93   :  { %v84_v18 = vpop.f32.mrf.mxu0  ;;  %v184_v43 = vadd.f32 %v183_v3, %v142_v35  ;;  %v364_v3 = vsub.f32 1.0, %v363_v53  ;;  %vm9372_vm1 = vmor %vm382_vm14, %vm383_vm15 }
  0x94   :  { %v379_v6 = vsub.f32 1.0, %v378_v25 }
  0x95   :  { %v226_v50 = vadd.f32 %v9205_v4, %v184_v43  ;;  %v399_v4 = vpop.permute.xlu2 %398 }
  0x96   :  { %v9313_v43 = vpop.permute.xlu1 %402 }
  0x98   :  { %v145_v5 = vpop.f32.mrf.mxu1  ;;  %v188_v9 = vpop.f32.mrf.mxu2 }
  0x99   :  { %v9213_v11 = vpop.f32.mrf.mxu3  ;;  %v146_v51 = vadd.f32 %v145_v5, %v84_v18  ;;  %v9284_v18 = vmax.f32 %v9272_v61, 1.0  ;;  %v359_v5 = vor.u32 1.1754944e-38, %v358_v0  ;;  %v401_v45 = vpop.permute.xlu0 %400 }
  0x9b   :  { %v9218_v19 = vpop.f32.mrf.mxu0  ;;  %v189_v58 = vadd.f32 %v188_v9, %v146_v51  ;;  %8742 = vrcp.f32 %v9284_v18  ;;  %v360_v47 = vsel %vm9291_vm9, %v359_v5, %v355_v15  ;;  %vm734_vm3 = vweird.f32 %v9284_v18 }
  0x9d   :  { %v232_v20 = vadd.f32 %v9213_v11, %v189_v58  ;;  %v380_v58 = vmul.f32 %v9276_v1, %v379_v6 }
  0x9f   :  { %v381_v26 = vadd.f32 %v9276_v1, %v380_v58 }
  0xa0   :  { %v149_v8 = vpop.f32.mrf.mxu1  ;;  %v9224_v21 = vpop.f32.mrf.mxu2 }
  0xa1   :  { %v9226_v28 = vpop.f32.mrf.mxu3  ;;  %v150_v22 = vadd.f32 %v149_v8, %v9218_v19  ;;  %v365_v19 = vmul.f32 %v9253_v16, %v364_v3  ;;  %v371_v8 = vand.u32 2147483647, %v9229_v32  ;;  %v386_v3 = vand.u32 2147483647, %v9246_v41  ;;  %v9368_v5 = vpop.permute.xlu0 %793 }
  0xa3   :  { %v9231_v33 = vpop.f32.mrf.mxu0  ;;  %v194_v2 = vadd.f32 %v9224_v21, %v150_v22  ;;  %vm9329_vm13 = vcmp.eq.f32.partialorder %v371_v8, 8.507059e+37  ;;  %vm9381_vm2 = vcmp.eq.f32.partialorder %v386_v3, 8.507059e+37  ;;  %v740_v3 = vand.u32 2147483648, %v9284_v18 }
  0xa5   :  { %v238_v53 = vadd.f32 %v9226_v28, %v194_v2 }
  0xa8   :  { %v9241_v39 = vpop.f32.mrf.mxu1  ;;  %v9243_v40 = vpop.f32.mrf.mxu2 }
  0xa9   :  { %v9248_v44 = vpop.f32.mrf.mxu3 }
  0xab   :  { %v276_v48 = vpop.f32.mrf.mxu0 }
  0xac   :  { %v277_v54 = vadd.f32 %v276_v48, %v226_v50  ;;  %v373_v48 = vand.u32 2147483648, %v9229_v32  ;;  %v366_v50 = vadd.f32 %v9253_v16, %v365_v19 }
  0xae   :  { %v374_v32 = vor.u32 1.1754944e-38, %v373_v48  ;;  %v370_v28 = vsel %vm9325_vm12, %v9253_v16, %v366_v50 }
  0xb0   :  { %v313_v56 = vpop.f32.mrf.mxu1  ;;  %v9266_v17 = vpop.f32.mrf.mxu2  ;;  %v375_v14 = vsel %vm9329_vm13, %v374_v32, %v370_v28  ;;  %v738_v32 = vand.u32 2147483647, %v9284_v18 }
  0xb1   :  { %v314_v59 = vadd.f32 %v313_v56, %v277_v54  ;;  %v9268_v60 = vpop.f32.mrf.mxu3 }
  0xb2   :  { %vm739_vm6 = vcmp.eq.f32.partialorder %v738_v32, 8.507059e+37 }
  0xb3   :  { %v346_v7 = vmul.f32 %v345_v62, %v314_v59  ;;  %v280_v10 = vpop.f32.mrf.mxu0  ;;  %v9342_v59 = vpop.eup %8742 }
  0xb4   :  { %v281_v31 = vadd.f32 %v280_v10, %v232_v20  ;;  %v730_v13 = vmul.f32 %v9342_v59, %v9284_v18  ;;  %vm735_vm4 = vweird.f32 %v9342_v59 }
  0xb5   :  { %v409_v23 = vsel %vm408_vm7, %v346_v7, %v397_v42  ;;  %v154_v42 = vadd.f32 %v9241_v39, %v9231_v33  ;;  %vm9426_vm5 = vmor %vm734_vm3, %vm735_vm4 }
  0xb6   :  { %v825_v9 = vsel %vm25_vm0, %v409_v23, 0  ;;  %v731_v8 = vsub.f32 1.0, %v730_v13 }
  0xb7   :  { %v9299_v11 = vand.u32 4294901760, %v825_v9 }
  0xb8   :  { %v317_v24 = vpop.f32.mrf.mxu1  ;;  %v9302_v27 = vpop.f32.mrf.mxu2  ;;  %v732_v51 = vmul.f32 %v9342_v59, %v731_v8 }
  0xb9   :  { %v318_v35 = vadd.f32 %v317_v24, %v281_v31  ;;  %970 = vmatmul.f32.vlgmr.msrb.gmra.mxu1 %v9299_v11  ;;  %v9310_v34 = vpop.f32.mrf.mxu3  ;;  %v869_v38 = vsub.f32 %v825_v9, %v9299_v11 }
  0xba   :  { %v9318_v37 = vpop.xlane.xlu2 %427  ;;  %v543_v8 = vadd.f32 %v9310_v34, %v9302_v27 }
  0xbb   :  { %v361_v49 = vmul.f32 %v360_v47, %v318_v35  ;;  %v284_v46 = vpop.f32.mrf.mxu0  ;;  %1028 = vmatmul.f32.vlgmr.msrb.gmra.mxu2 %v869_v38  ;;  %v870_v21 = vand.u32 4294901760, %v869_v38  ;;  %v9338_v29 = vmax.f32 %v9318_v37, 1.0 }
  0xbc   :  { %v285_v62 = vadd.f32 %v284_v46, %v238_v53 }
  0xbd   :  { %v410_v54 = vsel %vm408_vm7, %v361_v49, %v399_v4  ;;  %1090 = vmatmul.f32.vlgmr.msrb.gmra.mxu3 %v870_v21  ;;  %v871_v55 = vsub.f32 %v869_v38, %v870_v21  ;;  %v199_v4 = vadd.f32 %v9243_v40, %v154_v42  ;;  %8744 = vrcp.f32 %v9338_v29 }
  0xbe   :  { %v828_v56 = vsel %vm25_vm0, %v410_v54, 0  ;;  %v388_v40 = vand.u32 2147483648, %v9246_v41  ;;  %vm749_vm8 = vweird.f32 %v9338_v29 }
  0xbf   :  { %v872_v33 = vand.u32 4294901760, %v871_v55  ;;  %v9347_v39 = vand.u32 4294901760, %v828_v56  ;;  %v244_v31 = vadd.f32 %v9248_v44, %v199_v4  ;;  %v385_v44 = vsel %vm9372_vm1, %v9276_v1, %v381_v26 }
  0xc0   :  { %v321_v63 = vpop.f32.mrf.mxu1  ;;  %v9349_v0 = vpop.f32.mrf.mxu2  ;;  %v389_v35 = vor.u32 1.1754944e-38, %v388_v40  ;;  %v741_v26 = vor.u32 1.1754944e-38, %v740_v3 }
  0xc1   :  { %v322_v7 = vadd.f32 %v321_v63, %v285_v62  ;;  %873 = vmatmul.f32.vlgmr.msrb.gmra.mxu0 %v872_v33  ;;  %974 = vmatmul.f32.gmra.mxu1 %v9347_v39  ;;  %v9355_v10 = vpop.f32.mrf.mxu3  ;;  %v877_v16 = vsub.f32 %v828_v56, %v9347_v39  ;;  %v9364_v20 = vpop.xlane.xlu1 %430  ;;  %v539_v56 = vadd.f32 %v9268_v60, %v9266_v17 }
  0xc2   :  { %v9379_v19 = vmax.f32 %v9364_v20, 1.0  ;;  %v390_v1 = vsel %vm9381_vm2, %v389_v35, %v385_v44  ;;  %v733_v63 = vadd.f32 %v9342_v59, %v732_v51  ;;  %v753_v44 = vand.u32 2147483647, %v9338_v29 }
  0xc3   :  { %v376_v22 = vmul.f32 %v375_v14, %v322_v7  ;;  %v288_v23 = vpop.f32.mrf.mxu0  ;;  %1033 = vmatmul.f32.gmra.mxu2 %v877_v16  ;;  %v878_v25 = vand.u32 4294901760, %v877_v16  ;;  %v9391_v47 = vpop.eup %8744 }
  0xc4   :  { %v289_v38 = vadd.f32 %v288_v23, %v244_v31  ;;  %8746 = vrcp.f32 %v9379_v19  ;;  %v745_v52 = vmul.f32 %v9391_v47, %v9338_v29  ;;  %v737_v31 = vsel %vm9426_vm5, %v9342_v59, %v733_v63 }
  0xc5   :  { %v411_v15 = vsel %vm408_vm7, %v376_v22, %v401_v45  ;;  %1096 = vmatmul.f32.gmra.mxu3 %v878_v25  ;;  %v879_v24 = vsub.f32 %v877_v16, %v878_v25  ;;  %vm750_vm9 = vweird.f32 %v9391_v47  ;;  %vm754_vm11 = vcmp.eq.f32.partialorder %v753_v44, 8.507059e+37 }
  0xc6   :  { %v831_v41 = vsel %vm25_vm0, %v411_v15, 0  ;;  %v746_v7 = vsub.f32 1.0, %v745_v52  ;;  %vm9448_vm10 = vmor %vm749_vm8, %vm750_vm9  ;;  %vm764_vm12 = vweird.f32 %v9379_v19  ;;  %vm1308_vm5 = vcmask 523264  }
  0xc7   :  { %v880_v6 = vand.u32 4294901760, %v879_v24  ;;  %v9389_v45 = vand.u32 4294901760, %v831_v41 }
  0xc8   :  { %v325_v48 = vpop.f32.mrf.mxu1  ;;  %v9393_v49 = vpop.f32.mrf.mxu2  ;;  %v747_v24 = vmul.f32 %v9391_v47, %v746_v7 }
  0xc9   :  { %v326_v46 = vadd.f32 %v325_v48, %v289_v38  ;;  %881 = vmatmul.f32.gmra.mxu0 %v880_v6  ;;  %978 = vmatmul.f32.gmra.mxu1 %v9389_v45  ;;  %v9397_v21 = vpop.f32.mrf.mxu3  ;;  %v885_v50 = vsub.f32 %v831_v41, %v9389_v45  ;;  %v742_v38 = vsel %vm739_vm6, %v741_v26, %v737_v31  ;;  %v755_v6 = vand.u32 2147483648, %v9338_v29 }
  0xca   :  { %v9420_v4 = vpop.eup %8746 }
  0xcb   :  { %v391_v53 = vmul.f32 %v390_v1, %v326_v46  ;;  %v580_v42 = vpop.f32.mrf.mxu0  ;;  %1038 = vmatmul.f32.gmra.mxu2 %v885_v50  ;;  %v886_v54 = vand.u32 4294901760, %v885_v50  ;;  %v760_v25 = vmul.f32 %v9420_v4, %v9379_v19  ;;  %v756_v29 = vor.u32 1.1754944e-38, %v755_v6 }
  0xcc   :  { %v9405_v55 = vpop.xlane.xlu0 %433  ;;  %v581_v17 = vadd.f32 %v580_v42, %v539_v56  ;;  %vm765_vm13 = vweird.f32 %v9420_v4 }
  0xcd   :  { %v412_v58 = vsel %vm408_vm7, %v391_v53, %v9313_v43  ;;  %1102 = vmatmul.f32.gmra.mxu3 %v886_v54  ;;  %v887_v62 = vsub.f32 %v885_v50, %v886_v54  ;;  %v9415_v28 = vmax.f32 %v9405_v55, 1.0  ;;  %v761_v41 = vsub.f32 1.0, %v760_v25  ;;  %vm9476_vm14 = vmor %vm764_vm12, %vm765_vm13 }
  0xce   :  { %v834_v33 = vsel %vm25_vm0, %v412_v58, 0  ;;  %v748_v50 = vadd.f32 %v9391_v47, %v747_v24 }
  0xcf   :  { %v888_v60 = vand.u32 4294901760, %v887_v62  ;;  %v9422_v16 = vand.u32 4294901760, %v834_v33  ;;  %8748 = vrcp.f32 %v9415_v28  ;;  %v762_v32 = vmul.f32 %v9420_v4, %v761_v41 }
  0xd0   :  { %v622_v43 = vpop.f32.mrf.mxu1  ;;  %v673_v13 = vpop.f32.mrf.mxu2  ;;  %vm779_vm1 = vweird.f32 %v9415_v28 }
  0xd1   :  { %v623_v40 = vadd.f32 %v622_v43, %v581_v17  ;;  %889 = vmatmul.f32.gmra.mxu0 %v888_v60  ;;  %982 = vmatmul.f32.gmra.mxu1 %v9422_v16  ;;  %v893_v22 = vsub.f32 %v834_v33, %v9422_v16  ;;  %v710_v23 = vpop.f32.mrf.mxu3  ;;  %v752_v33 = vsel %vm9448_vm10, %v9391_v47, %v748_v50  ;;  %v796_v60 = vpop.permute.xlu2 %795  ;;  %v768_v47 = vand.u32 2147483647, %v9379_v19 }
  0xd2   :  { %v757_v17 = vsel %vm754_vm11, %v756_v29, %v752_v33  ;;  %v763_v43 = vadd.f32 %v9420_v4, %v762_v32  ;;  %v785_v50 = vand.u32 2147483648, %v9415_v28 }
  0xd3   :  { %v585_v9 = vpop.f32.mrf.mxu0  ;;  %v674_v18 = vadd.f32 %v673_v13, %v623_v40  ;;  %1043 = vmatmul.f32.gmra.mxu2 %v893_v22  ;;  %v894_v15 = vand.u32 4294901760, %v893_v22  ;;  %v770_v13 = vand.u32 2147483648, %v9379_v19  ;;  %vm769_vm15 = vcmp.eq.f32.partialorder %v768_v47, 8.507059e+37 }
  0xd4   :  { %v586_v59 = vadd.f32 %v585_v9, %v543_v8  ;;  %v767_v24 = vsel %vm9476_vm14, %v9420_v4, %v763_v43 }
  0xd5   :  { %v711_v2 = vadd.f32 %v710_v23, %v674_v18  ;;  %1108 = vmatmul.f32.gmra.mxu3 %v894_v15  ;;  %v895_v35 = vsub.f32 %v893_v22, %v894_v15  ;;  %v9446_v1 = vpop.eup %8748  ;;  %v771_v19 = vor.u32 1.1754944e-38, %v770_v13  ;;  %v8887_v13 = vmov 0  }
  0xd6   :  { %v775_v56 = vmul.f32 %v9446_v1, %v9415_v28  ;;  %vm780_vm2 = vweird.f32 %v9446_v1  ;;  %8725 = vset.pattern.permute.xlu1 %v8887_v13  ;;  %8724 = vset.pattern.permute.xlu2 %v8887_v13 }
  0xd7   :  { %v743_v48 = vmul.f32 %v742_v38, %v711_v2  ;;  %v896_v46 = vand.u32 4294901760, %v895_v35  ;;  %v551_v38 = vadd.f32 %v9397_v21, %v9393_v49  ;;  %v772_v4 = vsel %vm769_vm15, %v771_v19, %v767_v24  ;;  %vm9497_vm3 = vmor %vm779_vm1, %vm780_vm2  ;;  %8726 = vset.pattern.permute.xlu0 %v8887_v13  ;;  %v817_v24 = vld [vmem:[%s12516_s2 + $0x18] sm:$0xff] }
  0xd8   :  { %v628_v27 = vpop.f32.mrf.mxu1  ;;  %v677_v34 = vpop.f32.mrf.mxu2  ;;  %v776_v14 = vsub.f32 1.0, %v775_v56  ;;  %v786_v56 = vor.u32 1.1754944e-38, %v785_v50  ;;  %v8679_v19 = vld [vmem:[%s12516_s2 + $0x38] sm:$0xff] }
  0xd9   :  { %v805_v52 = vsel %vm408_vm7, %v743_v48, %v9368_v5  ;;  %v629_v53 = vadd.f32 %v628_v27, %v586_v59  ;;  %897 = vmatmul.f32.gmra.mxu0 %v896_v46  ;;  %v714_v42 = vpop.f32.mrf.mxu3  ;;  %v547_v5 = vadd.f32 %v9355_v10, %v9349_v0  ;;  %v798_v48 = vpop.permute.xlu1 %797  ;;  %v783_v46 = vand.u32 2147483647, %v9415_v28 }
  0xda   :  { %v837_v54 = vsel %vm25_vm0, %v805_v52, 0  ;;  %v777_v41 = vmul.f32 %v9446_v1, %v776_v14 }
  0xdb   :  { %v590_v58 = vpop.f32.mrf.mxu0  ;;  %v678_v62 = vadd.f32 %v677_v34, %v629_v53  ;;  %v9461_v63 = vand.u32 4294901760, %v837_v54  ;;  %vm784_vm4 = vcmp.eq.f32.partialorder %v783_v46, 8.507059e+37 }
  0xdc   :  { %v591_v40 = vadd.f32 %v590_v58, %v547_v5  ;;  %v778_v21 = vadd.f32 %v9446_v1, %v777_v41  ;;  %v1304_v41 = vld [vmem:[%s12515_s3 + $0x1b0] sm:$0xff] }
  0xdd   :  { %v715_v3 = vadd.f32 %v714_v42, %v678_v62  ;;  %986 = vmatmul.f32.gmra.mxu1 %v9461_v63  ;;  %v901_v7 = vsub.f32 %v837_v54, %v9461_v63 }
  0xde   :  { %v782_v33 = vsel %vm9497_vm3, %v9446_v1, %v778_v21 }
  0xdf   :  { %v758_v22 = vmul.f32 %v757_v17, %v715_v3  ;;  %1048 = vmatmul.f32.gmra.mxu2 %v901_v7  ;;  %v902_v23 = vand.u32 4294901760, %v901_v7  ;;  %v814_v17 = vld [vmem:[%s12516_s2] sm:$0xff]  ;;  %v787_v43 = vsel %vm784_vm4, %v786_v56, %v782_v33  ;;  %v800_v47 = vpop.permute.xlu0 %799  ;;  %v1301_v33 = vld [vmem:[%s12515_s3 + $0x198] sm:$0xff] }
  0xe0   :  { %v634_v10 = vpop.f32.mrf.mxu1  ;;  %v681_v25 = vpop.f32.mrf.mxu2  ;;  %1252 = vperm.xlu2 %8724, %v814_v17   ;;  %v1349_v17 = vand.u32 4294901760, %v1301_v33 }
  0xe1   :  { %v806_v26 = vsel %vm408_vm7, %v758_v22, %v796_v60  ;;  %v635_v9 = vadd.f32 %v634_v10, %v591_v40  ;;  %1114 = vmatmul.f32.gmra.mxu3 %v902_v23  ;;  %v718_v18 = vpop.f32.mrf.mxu3  ;;  %v903_v31 = vsub.f32 %v901_v7, %v902_v23  ;;  %v816_v60 = vld [vmem:[%s12516_s2 + $0x10] sm:$0xff] }
  0xe2   :  { %v840_v15 = vsel %vm25_vm0, %v806_v26, 0  ;;  %1262 = vperm.xlu1 %8725, %v816_v60   ;;  %v815_v26 = vld [vmem:[%s12516_s2 + $0x8] sm:$0xff]  ;;  %v1455_v60 = vsub.f32 %v1301_v33, %v1349_v17 }
  0xe3   :  { %v9485_v8 = vand.u32 4294901760, %v840_v15  ;;  %v682_v2 = vadd.f32 %v681_v25, %v635_v9  ;;  %v904_v35 = vand.u32 4294901760, %v903_v31  ;;  %v595_v44 = vpop.f32.mrf.mxu0  ;;  %v8677_v9 = vld [vmem:[%s12516_s2 + $0x28] sm:$0xff] }
  0xe4   :  { %v596_v27 = vadd.f32 %v595_v44, %v551_v38 }
  0xe5   :  { %v909_v6 = vsub.f32 %v840_v15, %v9485_v8  ;;  %v719_v59 = vadd.f32 %v718_v18, %v682_v2  ;;  %905 = vmatmul.f32.gmra.mxu0 %v904_v35  ;;  %990 = vmatmul.f32.gmra.mxu1 %v9485_v8  ;;  %v8678_v2 = vld [vmem:[%s12516_s2 + $0x30] sm:$0xff]  ;;  %v8676_v35 = vld [vmem:[%s12516_s2 + $0x20] sm:$0xff] }
  0xe6   :  { %1272 = vperm.xlu0 %8726, %v8676_v35  }
  0xe7   :  { %v773_v34 = vmul.f32 %v772_v4, %v719_v59  ;;  %1053 = vmatmul.f32.gmra.mxu2 %v909_v6  ;;  %v910_v49 = vand.u32 4294901760, %v909_v6 }
  0xe8   :  { %v640_v51 = vpop.f32.mrf.mxu1  ;;  %v685_v52 = vpop.f32.mrf.mxu2  ;;  %1257 = vperm.xlu2 %8724, %v815_v26  }
  0xe9   :  { %v807_v42 = vsel %vm408_vm7, %v773_v34, %v798_v48  ;;  %v641_v29 = vadd.f32 %v640_v51, %v596_v27  ;;  %1120 = vmatmul.f32.gmra.mxu3 %v910_v49  ;;  %v911_v54 = vsub.f32 %v909_v6, %v910_v49  ;;  %v722_v28 = vpop.f32.mrf.mxu3  ;;  %v9568_v6 = vand.u32 4294901760, %v1304_v41  ;;  %v1303_v49 = vld [vmem:[%s12515_s3 + $0x1a8] sm:$0xff] }
  0xea   :  { %v843_v32 = vsel %vm25_vm0, %v807_v42, 0  ;;  %1277 = vperm.xlu1 %8725, %v8677_v9   ;;  %v9587_v21 = vand.u32 4294901760, %v1303_v49 }
  0xeb   :  { %v916_v58 = vand.u32 4294901760, %v843_v32  ;;  %v686_v62 = vadd.f32 %v685_v52, %v641_v29  ;;  %v912_v5 = vand.u32 4294901760, %v911_v54  ;;  %v9572_v4 = vsub.f32 %v1304_v41, %v9568_v6  ;;  %v1302_v29 = vld [vmem:[%s12515_s3 + $0x1a0] sm:$0xff] }
  0xec   :  { %v9591_v51 = vsub.f32 %v1303_v49, %v9587_v21 }
  0xed   :  { %v917_v3 = vsub.f32 %v843_v32, %v916_v58  ;;  %v723_v7 = vadd.f32 %v722_v28, %v686_v62  ;;  %913 = vmatmul.f32.gmra.mxu0 %v912_v5  ;;  %994 = vmatmul.f32.gmra.mxu1 %v916_v58  ;;  %v1438_v48 = vand.u32 4294901760, %v9572_v4  ;;  %v9606_v28 = vand.u32 4294901760, %v1302_v29 }
  0xee   :  { %v1444_v52 = vand.u32 4294901760, %v9591_v51 }
  0xef   :  { %v788_v14 = vmul.f32 %v787_v43, %v723_v7  ;;  %1058 = vmatmul.f32.gmra.mxu2 %v917_v3  ;;  %v918_v1 = vand.u32 4294901760, %v917_v3  ;;  %v1439_v46 = vsub.f32 %v9572_v4, %v1438_v48  ;;  %v1449_v56 = vsub.f32 %v1302_v29, %v9606_v28  ;;  %v1300_v43 = vld [vmem:[%s12515_s3 + $0x190] sm:$0xff] }
  0xf0   :  { %1267 = vperm.xlu2 %8724, %v817_v24   ;;  %v1445_v42 = vsub.f32 %v9591_v51, %v1444_v52  ;;  %v1351_v13 = vand.u32 4294901760, %v1300_v43 }
  0xf1   :  { %v808_v40 = vsel %vm408_vm7, %v788_v14, %v800_v47  ;;  %1126 = vmatmul.f32.gmra.mxu3 %v918_v1  ;;  %v919_v22 = vsub.f32 %v917_v3, %v918_v1  ;;  %v1440_v27 = vand.u32 4294901760, %v1439_v46  ;;  %v1456_v47 = vand.u32 4294901760, %v1455_v60  ;;  %v1299_v14 = vld [vmem:[%s12515_s3 + $0x188] sm:$0xff] }
  0xf2   :  { %v846_v23 = vsel %vm25_vm0, %v808_v40, 0  ;;  %1287 = vperm.xlu1 %8725, %v8679_v19   ;;  %v1446_v32 = vand.u32 4294901760, %v1445_v42  ;;  %v1461_v40 = vsub.f32 %v1300_v43, %v1351_v13 }
  0xf3   :  { %v924_v0 = vand.u32 4294901760, %v846_v23  ;;  %v920_v10 = vand.u32 4294901760, %v919_v22  ;;  %v1457_v1 = vsub.f32 %v1455_v60, %v1456_v47  ;;  %v1353_v22 = vand.u32 4294901760, %v1299_v14 }
  0xf4   :  { %v1462_v26 = vand.u32 4294901760, %v1461_v40 }
  0xf5   :  { %v925_v25 = vsub.f32 %v846_v23, %v924_v0  ;;  %921 = vmatmul.f32.gmra.mxu0 %v920_v10  ;;  %998 = vmatmul.f32.gmra.mxu1 %v924_v0  ;;  %v1298_v23 = vld [vmem:[%s12515_s3 + $0x180] sm:$0xff]  ;;  %v1467_v9 = vsub.f32 %v1299_v14, %v1353_v22 }
  0xf7   :  { %1063 = vmatmul.f32.gmra.mxu2 %v925_v25  ;;  %v926_v18 = vand.u32 4294901760, %v925_v25 }
  0xf8   :  { %1282 = vperm.xlu2 %8724, %v8678_v2  }
  0xf9   :  { %1132 = vmatmul.f32.gmra.mxu3 %v926_v18  ;;  %v927_v31 = vsub.f32 %v925_v25, %v926_v18  ;;  %v1458_v25 = vand.u32 4294901760, %v1457_v1  ;;  %v1355_v18 = vand.u32 4294901760, %v1298_v23 }
  0xfb   :  { %v928_v15 = vand.u32 4294901760, %v927_v31  ;;  %v1463_v31 = vsub.f32 %v1461_v40, %v1462_v26  ;;  %v1473_v24 = vsub.f32 %v1298_v23, %v1355_v18 }
  0xfd   :  { %929 = vmatmul.f32.gmra.mxu0 %v928_v15  ;;  %1218 = vmatmul.f32.vlgmr.msra.gmra.mxu1 %v9299_v11  ;;  %v1468_v15 = vand.u32 4294901760, %v1467_v9  ;;  %v1464_v19 = vand.u32 4294901760, %v1463_v31  ;;  %v1474_v35 = vand.u32 4294901760, %v1473_v24 }
  0xff   :  { %v1469_v2 = vsub.f32 %v1467_v9, %v1468_v15 }
 0x105   :  { %1165 = vmatmul.f32.vlgmr.msra.gmra.mxu0 %v9299_v11  ;;  %1222 = vmatmul.f32.gmra.mxu1 %v9347_v39  ;;  %v1305_v11 = vld [vmem:[%s12515_s3 + $0x1b8] sm:$0xff] }
 0x10d   :  { %1169 = vmatmul.f32.gmra.mxu0 %v9347_v39  ;;  %1226 = vmatmul.f32.gmra.mxu1 %v9389_v45 }
 0x115   :  { %1173 = vmatmul.f32.gmra.mxu0 %v9389_v45  ;;  %1230 = vmatmul.f32.gmra.mxu1 %v9422_v16  ;;  %v9549_v45 = vand.u32 4294901760, %v1305_v11 }
 0x117   :  { %1342 = vmatpush.msra.mxu2 %v9549_v45  ;;  %1593 = vmatpush.msrb.mxu1 %v9549_v45 }
 0x119   :  { %1344 = vmatpush.msra.mxu2 %v9568_v6  ;;  %1595 = vmatpush.msrb.mxu1 %v9568_v6 }
 0x11b   :  { %1346 = vmatpush.msra.mxu2 %v9587_v21  ;;  %1597 = vmatpush.msrb.mxu1 %v9587_v21 }
 0x11d   :  { %1177 = vmatmul.f32.gmra.mxu0 %v9422_v16  ;;  %1234 = vmatmul.f32.gmra.mxu1 %v9461_v63  ;;  %v9553_v16 = vsub.f32 %v1305_v11, %v9549_v45  ;;  %v1470_v11 = vand.u32 4294901760, %v1469_v2 }
 0x11e   :  { %1348 = vmatpush.msra.mxu2 %v9606_v28  ;;  %1599 = vmatpush.msrb.mxu1 %v9606_v28 }
 0x11f   :  { %1521 = vmatpush.msrb.mxu0 %v9553_v16 }
 0x120   :  { %1350 = vmatpush.msra.mxu2 %v1349_v17  ;;  %1601 = vmatpush.msrb.mxu1 %v1349_v17 }
 0x121   :  { %1524 = vmatpush.msrb.mxu0 %v9572_v4 }
 0x122   :  { %1352 = vmatpush.msra.mxu2 %v1351_v13  ;;  %1603 = vmatpush.msrb.mxu1 %v1351_v13 }
 0x123   :  { %1527 = vmatpush.msrb.mxu0 %v9591_v51 }
 0x124   :  { %1354 = vmatpush.msra.mxu2 %v1353_v22  ;;  %1605 = vmatpush.msrb.mxu1 %v1353_v22 }
 0x125   :  { %1181 = vmatmul.f32.gmra.mxu0 %v9461_v63  ;;  %1238 = vmatmul.f32.gmra.mxu1 %v9485_v8  ;;  %v1432_v63 = vand.u32 4294901760, %v9553_v16 }
 0x126   :  { %1530 = vmatpush.msrb.mxu0 %v1449_v56  ;;  %1356 = vmatpush.msra.mxu2 %v1355_v18 }
 0x127   :  { %1607 = vmatpush.msrb.mxu1 %v1355_v18 }
 0x128   :  { %1533 = vmatpush.msrb.mxu0 %v1455_v60  ;;  %1668 = vmatpush.msrb.mxu2 %v1432_v63 }
 0x12a   :  { %1536 = vmatpush.msrb.mxu0 %v1461_v40  ;;  %1672 = vmatpush.msrb.mxu2 %v1438_v48 }
 0x12c   :  { %1539 = vmatpush.msrb.mxu0 %v1467_v9  ;;  %1676 = vmatpush.msrb.mxu2 %v1444_v52 }
 0x12d   :  { %1185 = vmatmul.f32.gmra.mxu0 %v9485_v8  ;;  %1242 = vmatmul.f32.gmra.mxu1 %v916_v58  ;;  %v1433_v8 = vsub.f32 %v9553_v16, %v1432_v63  ;;  %v9646_v63 = vld [vmem:[%s12515_s3 + $0x160] ss:$0 sm:$0xff] }
 0x12e   :  { %1542 = vmatpush.msrb.mxu0 %v1473_v24 }
 0x12f   :  { %v1434_v59 = vand.u32 4294901760, %v1433_v8  ;;  %v1475_v8 = vsub.f32 %v1473_v24, %v1474_v35 }
 0x131   :  { %1435 = vmatpush.msra.mxu3 %v1434_v59  ;;  %v1476_v46 = vand.u32 4294901760, %v1475_v8 }
 0x133   :  { %1441 = vmatpush.msra.mxu3 %v1440_v27 }
 0x135   :  { %1189 = vmatmul.f32.gmra.mxu0 %v916_v58  ;;  %1246 = vmatmul.f32.gmra.mxu1 %v924_v0  ;;  %v1450_v58 = vand.u32 4294901760, %v1449_v56 }
 0x136   :  { %v9547_v39 = vpop.f32.mrf.mxu1  ;;  %1447 = vmatpush.msra.mxu3 %v1446_v32 }
 0x137   :  { %v1451_v62 = vsub.f32 %v1449_v56, %v1450_v58  ;;  %1680 = vmatpush.msrb.mxu2 %v1450_v58 }
 0x139   :  { %v1452_v7 = vand.u32 4294901760, %v1451_v62  ;;  %1684 = vmatpush.msrb.mxu2 %v1456_v47 }
 0x13a   :  { %v9662_v33 = vpop.permute.xlu2 %1252 }
 0x13b   :  { %1453 = vmatpush.msra.mxu3 %v1452_v7  ;;  %1688 = vmatpush.msrb.mxu2 %v1462_v26 }
 0x13d   :  { %1193 = vmatmul.f32.gmra.mxu0 %v924_v0  ;;  %1459 = vmatpush.msra.mxu3 %v1458_v25 }
 0x13e   :  { %v9564_v38 = vpop.f32.mrf.mxu0  ;;  %v9566_v44 = vpop.f32.mrf.mxu1  ;;  %1692 = vmatpush.msrb.mxu2 %v1468_v15 }
 0x13f   :  { %1465 = vmatpush.msra.mxu3 %v1464_v19  ;;  %v1029_v16 = vpop.f32.mrf.mxu2 }
 0x140   :  { %1696 = vmatpush.msrb.mxu2 %v1474_v35 }
 0x141   :  { %1471 = vmatpush.msra.mxu3 %v1470_v11 }
 0x142   :  { %v9675_v9 = vpop.permute.xlu2 %1257 }
 0x143   :  { %1477 = vmatpush.msra.mxu3 %v1476_v46 }
 0x145   :  { %1739 = vmatpush.msrb.mxu3 %v9549_v45  ;;  %v1091_v45 = vpop.f32.mrf.mxu3 }
 0x146   :  { %v9580_v50 = vpop.f32.mrf.mxu0  ;;  %v9582_v34 = vpop.f32.mrf.mxu1 }
 0x147   :  { %1741 = vmatpush.msrb.mxu3 %v9568_v6  ;;  %v875_v6 = vadd.f32 %v9646_v63, %v9564_v38  ;;  %v1034_v49 = vpop.f32.mrf.mxu2  ;;  %v883_v42 = vadd.f32 %v9646_v63, %v9580_v50 }
 0x149   :  { %1743 = vmatpush.msrb.mxu3 %v9587_v21  ;;  %v972_v27 = vadd.f32 %v9547_v39, %v875_v6 }
 0x14b   :  { %1745 = vmatpush.msrb.mxu3 %v9606_v28  ;;  %v1030_v52 = vadd.f32 %v1029_v16, %v972_v27  ;;  %v976_v28 = vadd.f32 %v9566_v44, %v883_v42 }
 0x14d   :  { %1747 = vmatpush.msrb.mxu3 %v1349_v17  ;;  %v1097_v29 = vpop.f32.mrf.mxu3  ;;  %v1092_v32 = vadd.f32 %v1091_v45, %v1030_v52  ;;  %v1035_v39 = vadd.f32 %v1034_v49, %v976_v28 }
 0x14e   :  { %v9596_v53 = vpop.f32.mrf.mxu0  ;;  %v9604_v54 = vpop.f32.mrf.mxu1 }
 0x14f   :  { %1749 = vmatpush.msrb.mxu3 %v1351_v13  ;;  %v1039_v62 = vpop.f32.mrf.mxu2  ;;  %v891_v7 = vadd.f32 %v9646_v63, %v9596_v53  ;;  %v1098_v50 = vadd.f32 %v1097_v29, %v1035_v39 }
 0x151   :  { %1751 = vmatpush.msrb.mxu3 %v1353_v22  ;;  %v980_v47 = vadd.f32 %v9582_v34, %v891_v7 }
 0x153   :  { %1753 = vmatpush.msrb.mxu3 %v1355_v18  ;;  %v1040_v53 = vadd.f32 %v1039_v62, %v980_v47  ;;  %v9699_v47 = vpop.permute.xlu2 %1267 }
 0x154   :  { %v9686_v49 = vpop.permute.xlu1 %1262 }
 0x155   :  { %v1103_v43 = vpop.f32.mrf.mxu3 }
 0x156   :  { %v9614_v5 = vpop.f32.mrf.mxu0  ;;  %v1104_v15 = vadd.f32 %v1103_v43, %v1040_v53 }
 0x157   :  { %v899_v23 = vadd.f32 %v9646_v63, %v9614_v5  ;;  %v1044_v26 = vpop.f32.mrf.mxu2 }
 0x159   :  { %v984_v24 = vadd.f32 %v9604_v54, %v899_v23 }
 0x15a   :  { %v9616_v3 = vpop.f32.mrf.mxu1 }
 0x15b   :  { %v1045_v45 = vadd.f32 %v1044_v26, %v984_v24 }
 0x15d   :  { %v1109_v2 = vpop.f32.mrf.mxu3 }
 0x15e   :  { %v1110_v29 = vadd.f32 %v1109_v2, %v1045_v45 }
 0x162   :  { %v9627_v0 = vpop.f32.mrf.mxu0  ;;  %v9629_v10 = vpop.f32.mrf.mxu1 }
 0x163   :  { %v907_v6 = vadd.f32 %v9646_v63, %v9627_v0  ;;  %v1049_v54 = vpop.f32.mrf.mxu2 }
 0x16a   :  { %v9635_v41 = vpop.f32.mrf.mxu0  ;;  %v9637_v59 = vpop.f32.mrf.mxu1 }
 0x16b   :  { %v915_v7 = vadd.f32 %v9646_v63, %v9635_v41  ;;  %v1054_v53 = vpop.f32.mrf.mxu2 }
 0x172   :  { %v9649_v4 = vpop.f32.mrf.mxu0  ;;  %v9651_v48 = vpop.f32.mrf.mxu1 }
 0x173   :  { %v923_v45 = vadd.f32 %v9646_v63, %v9649_v4 }
 0x17a   :  { %v9657_v51 = vpop.f32.mrf.mxu0  ;;  %v1219_v21 = vpop.f32.mrf.mxu1 }
 0x182   :  { %v1166_v56 = vpop.f32.mrf.mxu0  ;;  %v1223_v38 = vpop.f32.mrf.mxu1 }
 0x183   :  { %v1167_v58 = vadd.f32 %v1166_v56, %v1092_v32  ;;  %v988_v32 = vadd.f32 %v9616_v3, %v907_v6  ;;  %v1115_v56 = vpop.f32.mrf.mxu3 }
 0x185   :  { %v1220_v17 = vadd.f32 %v1219_v21, %v1167_v58  ;;  %v1050_v43 = vadd.f32 %v1049_v54, %v988_v32 }
 0x187   :  { %v1290_v60 = vmul.f32 %v9662_v33, %v1220_v17  ;;  %v1116_v26 = vadd.f32 %v1115_v56, %v1050_v43 }
 0x189   :  { %v1310_v44 = vsel %vm1308_vm5, %v1290_v60, 0 }
 0x18a   :  { %v1170_v13 = vpop.f32.mrf.mxu0  ;;  %v1227_v14 = vpop.f32.mrf.mxu1  ;;  %v9669_v1 = vand.u32 4294901760, %v1310_v44 }
 0x18b   :  { %v1171_v40 = vadd.f32 %v1170_v13, %v1098_v50 }
 0x18c   :  { %1479 = vmatmul.f32.vlgmr.msra.gmra.mxu3 %v9669_v1  ;;  %v1358_v22 = vsub.f32 %v1310_v44, %v9669_v1  ;;  %v1883_v44 = vmul.f32 %v1290_v60, %v9662_v33 }
 0x18d   :  { %v1224_v25 = vadd.f32 %v1223_v38, %v1171_v40 }
 0x18e   :  { %1545 = vmatmul.f32.vlgmr.msrb.gmra.mxu0 %v1358_v22  ;;  %v1359_v34 = vand.u32 4294901760, %v1358_v22 }
 0x18f   :  { %v1291_v18 = vmul.f32 %v9675_v9, %v1224_v25 }
 0x190   :  { %1611 = vmatmul.f32.vlgmr.msrb.gmra.mxu1 %v1359_v34  ;;  %v1360_v31 = vsub.f32 %v1358_v22, %v1359_v34  ;;  %v992_v22 = vadd.f32 %v9629_v10, %v915_v7 }
 0x191   :  { %v1313_v19 = vsel %vm1308_vm5, %v1291_v18, 0  ;;  %v1884_v17 = vmul.f32 %v1291_v18, %v9675_v9 }
 0x192   :  { %v1174_v35 = vpop.f32.mrf.mxu0  ;;  %v1361_v11 = vand.u32 4294901760, %v1360_v31  ;;  %v9680_v8 = vand.u32 4294901760, %v1313_v19  ;;  %v1231_v46 = vpop.f32.mrf.mxu1 }
 0x193   :  { %v1175_v5 = vadd.f32 %v1174_v35, %v1104_v15  ;;  %v9706_v25 = vand.u32 4294901760, %v1884_v17  ;;  %v1055_v35 = vadd.f32 %v1054_v53, %v992_v22  ;;  %v931_v22 = vadd.f32 %v9646_v63, %v9657_v51 }
 0x194   :  { %1362 = vmatmul.f32.vlgmr.msra.gmra.mxu2 %v1361_v11  ;;  %1483 = vmatmul.f32.gmra.mxu3 %v9680_v8  ;;  %v1366_v16 = vsub.f32 %v1313_v19, %v9680_v8  ;;  %v9715_v19 = vand.u32 4294901760, %v1883_v44  ;;  %v1121_v11 = vpop.f32.mrf.mxu3 }
 0x195   :  { %v1228_v27 = vadd.f32 %v1227_v14, %v1175_v5  ;;  %v9720_v5 = vpop.permute.xlu0 %1272  ;;  %v1122_v56 = vadd.f32 %v1121_v11, %v1055_v35 }
 0x196   :  { %1550 = vmatmul.f32.gmra.mxu0 %v1366_v16  ;;  %v1367_v21 = vand.u32 4294901760, %v1366_v16 }
 0x197   :  { %v1292_v52 = vmul.f32 %v9686_v49, %v1228_v27 }
 0x198   :  { %1617 = vmatmul.f32.gmra.mxu1 %v1367_v21  ;;  %v1368_v42 = vsub.f32 %v1366_v16, %v1367_v21  ;;  %v9724_v16 = vsub.f32 %v1884_v17, %v9706_v25  ;;  %v9732_v21 = vsub.f32 %v1883_v44, %v9715_v19 }
 0x199   :  { %v1316_v28 = vsel %vm1308_vm5, %v1292_v52, 0  ;;  %v1885_v38 = vmul.f32 %v1292_v52, %v9686_v49 }
 0x19a   :  { %v1178_v58 = vpop.f32.mrf.mxu0  ;;  %v1369_v0 = vand.u32 4294901760, %v1368_v42  ;;  %v9692_v62 = vand.u32 4294901760, %v1316_v28  ;;  %v1235_v13 = vpop.f32.mrf.mxu1 }
 0x19b   :  { %v1179_v39 = vadd.f32 %v1178_v58, %v1110_v29  ;;  %v9702_v40 = vand.u32 4294901760, %v1885_v38 }
 0x19c   :  { %1370 = vmatmul.f32.gmra.mxu2 %v1369_v0  ;;  %1487 = vmatmul.f32.gmra.mxu3 %v9692_v62  ;;  %v1374_v3 = vsub.f32 %v1316_v28, %v9692_v62  ;;  %v1992_v28 = vand.u32 4294901760, %v9724_v16 }
 0x19d   :  { %v1232_v50 = vadd.f32 %v1231_v46, %v1179_v39  ;;  %v9713_v24 = vsub.f32 %v1885_v38, %v9702_v40  ;;  %v996_v38 = vadd.f32 %v9637_v59, %v923_v45  ;;  %v1059_v39 = vpop.f32.mrf.mxu2 }
 0x19e   :  { %1555 = vmatmul.f32.gmra.mxu0 %v1374_v3  ;;  %v1375_v14 = vand.u32 4294901760, %v1374_v3 }
 0x19f   :  { %v1293_v41 = vmul.f32 %v9699_v47, %v1232_v50  ;;  %v1986_v52 = vand.u32 4294901760, %v9713_v24  ;;  %v1998_v50 = vand.u32 4294901760, %v9732_v21 }
 0x1a0   :  { %1623 = vmatmul.f32.gmra.mxu1 %v1375_v14  ;;  %v1376_v23 = vsub.f32 %v1374_v3, %v1375_v14  ;;  %v1993_v14 = vsub.f32 %v9724_v16, %v1992_v28 }
 0x1a1   :  { %v1319_v34 = vsel %vm1308_vm5, %v1293_v41, 0  ;;  %v1886_v18 = vmul.f32 %v1293_v41, %v9699_v47  ;;  %v1987_v43 = vsub.f32 %v9713_v24, %v1986_v52  ;;  %v1060_v41 = vadd.f32 %v1059_v39, %v996_v38 }
 0x1a2   :  { %v1182_v60 = vpop.f32.mrf.mxu0  ;;  %v1377_v31 = vand.u32 4294901760, %v1376_v23  ;;  %v9710_v15 = vand.u32 4294901760, %v1319_v34  ;;  %v1239_v29 = vpop.f32.mrf.mxu1  ;;  %v1994_v63 = vand.u32 4294901760, %v1993_v14 }
 0x1a3   :  { %v1183_v10 = vadd.f32 %v1182_v60, %v1116_v26  ;;  %v9717_v2 = vand.u32 4294901760, %v1886_v18  ;;  %v1127_v23 = vpop.f32.mrf.mxu3  ;;  %v9759_v26 = vpop.permute.xlu1 %1277  ;;  %v1999_v60 = vsub.f32 %v9732_v21, %v1998_v50 }
 0x1a4   :  { %1378 = vmatmul.f32.gmra.mxu2 %v1377_v31  ;;  %1491 = vmatmul.f32.gmra.mxu3 %v9710_v15  ;;  %v1382_v46 = vsub.f32 %v1319_v34, %v9710_v15  ;;  %v1988_v34 = vand.u32 4294901760, %v1987_v43 }
 0x1a5   :  { %v1236_v6 = vadd.f32 %v1235_v13, %v1183_v10  ;;  %1942 = vmatpush.msra.mxu0 %v9717_v2  ;;  %2059 = vmatpush.msra.mxu3 %v9717_v2  ;;  %v1979_v27 = vsub.f32 %v1886_v18, %v9717_v2  ;;  %v1000_v10 = vadd.f32 %v9651_v48, %v931_v22  ;;  %v9769_v48 = vpop.permute.xlu2 %1282 }
 0x1a6   :  { %1560 = vmatmul.f32.gmra.mxu0 %v1382_v46  ;;  %v1383_v54 = vand.u32 4294901760, %v1382_v46 }
 0x1a7   :  { %v9736_v42 = vmul.f32 %v9720_v5, %v1236_v6  ;;  %1944 = vmatpush.msra.mxu0 %v9702_v40  ;;  %2025 = vmatpush.msra.mxu2 %v1979_v27  ;;  %v1980_v4 = vand.u32 4294901760, %v1979_v27 }
 0x1a8   :  { %2061 = vmatpush.msra.mxu3 %v9702_v40  ;;  %1629 = vmatmul.f32.gmra.mxu1 %v1383_v54  ;;  %v1384_v32 = vsub.f32 %v1382_v46, %v1383_v54  ;;  %v1064_v54 = vpop.f32.mrf.mxu2 }
 0x1a9   :  { %v1322_v58 = vsel %vm1308_vm5, %v9736_v42, 0  ;;  %1946 = vmatpush.msra.mxu0 %v9706_v25  ;;  %2028 = vmatpush.msra.mxu2 %v9713_v24  ;;  %v1981_v0 = vsub.f32 %v1979_v27, %v1980_v4  ;;  %v1128_v24 = vadd.f32 %v1127_v23, %v1060_v41 }
 0x1aa   :  { %v9746_v7 = vand.u32 4294901760, %v1322_v58  ;;  %2063 = vmatpush.msra.mxu3 %v9706_v25  ;;  %v1186_v17 = vpop.f32.mrf.mxu0  ;;  %v1385_v3 = vand.u32 4294901760, %v1384_v32  ;;  %v1243_v11 = vpop.f32.mrf.mxu1 }
 0x1ab   :  { %v1187_v59 = vadd.f32 %v1186_v17, %v1122_v56  ;;  %1948 = vmatpush.msra.mxu0 %v9715_v19  ;;  %2031 = vmatpush.msra.mxu2 %v9724_v16  ;;  %v1982_v44 = vand.u32 4294901760, %v1981_v0  ;;  %v2000_v16 = vand.u32 4294901760, %v1999_v60 }
 0x1ac   :  { %2065 = vmatpush.msra.mxu3 %v9715_v19  ;;  %1386 = vmatmul.f32.gmra.mxu2 %v1385_v3  ;;  %v1390_v13 = vsub.f32 %v1322_v58, %v9746_v7 }
 0x1ad   :  { %v1240_v53 = vadd.f32 %v1239_v29, %v1187_v59  ;;  %1495 = vmatmul.f32.gmra.mxu3 %v9746_v7  ;;  %2094 = vmatpush.msrb.mxu0 %v1980_v4 }
 0x1ae   :  { %1983 = vmatpush.msra.mxu1 %v1982_v44  ;;  %2034 = vmatpush.msra.mxu2 %v9732_v21  ;;  %v1391_v18 = vand.u32 4294901760, %v1390_v13 }
 0x1af   :  { %v9764_v31 = vmul.f32 %v9759_v26, %v1240_v53  ;;  %1565 = vmatmul.f32.gmra.mxu0 %v1390_v13 }
 0x1b0   :  { %2098 = vmatpush.msrb.mxu0 %v1986_v52  ;;  %1989 = vmatpush.msra.mxu1 %v1988_v34  ;;  %v1392_v51 = vsub.f32 %v1390_v13, %v1391_v18  ;;  %v1065_v52 = vadd.f32 %v1064_v54, %v1000_v10 }
 0x1b1   :  { %v1325_v35 = vsel %vm1308_vm5, %v9764_v31, 0  ;;  %1635 = vmatmul.f32.gmra.mxu1 %v1391_v18 }
 0x1b2   :  { %2102 = vmatpush.msrb.mxu0 %v1992_v28  ;;  %1995 = vmatpush.msra.mxu1 %v1994_v63  ;;  %v1190_v46 = vpop.f32.mrf.mxu0  ;;  %v1393_v45 = vand.u32 4294901760, %v1392_v51  ;;  %v1397_v6 = vand.u32 4294901760, %v1325_v35  ;;  %v1133_v28 = vpop.f32.mrf.mxu3 }
 0x1b3   :  { %v1191_v27 = vadd.f32 %v1190_v46, %v1128_v24  ;;  %v1134_v38 = vadd.f32 %v1133_v28, %v1065_v52  ;;  %v1247_v3 = vpop.f32.mrf.mxu1 }
 0x1b4   :  { %2106 = vmatpush.msrb.mxu0 %v1998_v50  ;;  %2001 = vmatpush.msra.mxu1 %v2000_v16  ;;  %v1398_v21 = vsub.f32 %v1325_v35, %v1397_v6 }
 0x1b5   :  { %v1244_v4 = vadd.f32 %v1243_v11, %v1191_v27  ;;  %1394 = vmatmul.f32.gmra.mxu2 %v1393_v45  ;;  %1499 = vmatmul.f32.gmra.mxu3 %v1397_v6  ;;  %v9810_v11 = vld [vmem:[%s12515_s3 + $0x240] ss:$0 sm:$0xff] }
 0x1b6   :  { %2129 = vmatpush.msrb.mxu1 %v9717_v2  ;;  %v1399_v29 = vand.u32 4294901760, %v1398_v21 }
 0x1b7   :  { %v9773_v32 = vmul.f32 %v9769_v48, %v1244_v4  ;;  %1570 = vmatmul.f32.gmra.mxu0 %v1398_v21 }
 0x1b8   :  { %2131 = vmatpush.msrb.mxu1 %v9702_v40  ;;  %v1400_v56 = vsub.f32 %v1398_v21, %v1399_v29  ;;  %v9780_v40 = vpop.permute.xlu1 %1287 }
 0x1b9   :  { %v1328_v58 = vsel %vm1308_vm5, %v9773_v32, 0  ;;  %1641 = vmatmul.f32.gmra.mxu1 %v1399_v29 }
 0x1ba   :  { %2133 = vmatpush.msrb.mxu1 %v9706_v25  ;;  %v1194_v0 = vpop.f32.mrf.mxu0  ;;  %v1401_v39 = vand.u32 4294901760, %v1400_v56  ;;  %v1405_v17 = vand.u32 4294901760, %v1328_v58 }
 0x1bb   :  { %v1195_v2 = vadd.f32 %v1194_v0, %v1134_v38 }
 0x1bc   :  { %2135 = vmatpush.msrb.mxu1 %v9715_v19  ;;  %v1406_v43 = vsub.f32 %v1328_v58, %v1405_v17 }
 0x1bd   :  { %v1248_v50 = vadd.f32 %v1247_v3, %v1195_v2  ;;  %1402 = vmatmul.f32.gmra.mxu2 %v1401_v39  ;;  %1503 = vmatmul.f32.gmra.mxu3 %v1405_v17 }
 0x1be   :  { %v1407_v59 = vand.u32 4294901760, %v1406_v43 }
 0x1bf   :  { %v9783_v44 = vmul.f32 %v9780_v40, %v1248_v50  ;;  %1575 = vmatmul.f32.gmra.mxu0 %v1406_v43 }
 0x1c0   :  { %v1408_v13 = vsub.f32 %v1406_v43, %v1407_v59 }
 0x1c1   :  { %v1331_v25 = vsel %vm1308_vm5, %v9783_v44, 0  ;;  %1647 = vmatmul.f32.gmra.mxu1 %v1407_v59 }
 0x1c2   :  { %v1409_v14 = vand.u32 4294901760, %v1408_v13  ;;  %v1413_v41 = vand.u32 4294901760, %v1331_v25 }
 0x1c4   :  { %v1414_v22 = vsub.f32 %v1331_v25, %v1413_v41 }
 0x1c5   :  { %1410 = vmatmul.f32.gmra.mxu2 %v1409_v14  ;;  %1507 = vmatmul.f32.gmra.mxu3 %v1413_v41 }
 0x1c6   :  { %v1415_v19 = vand.u32 4294901760, %v1414_v22 }
 0x1c7   :  { %1580 = vmatmul.f32.gmra.mxu0 %v1414_v22 }
 0x1c8   :  { %v1416_v53 = vsub.f32 %v1414_v22, %v1415_v19 }
 0x1c9   :  { %1653 = vmatmul.f32.gmra.mxu1 %v1415_v19 }
 0x1ca   :  { %v1417_v23 = vand.u32 4294901760, %v1416_v53 }
 0x1cd   :  { %1418 = vmatmul.f32.gmra.mxu2 %v1417_v23  ;;  %1755 = vmatmul.f32.vlgmr.msrb.gmra.mxu3 %v9669_v1 }
 0x1d5   :  { %1698 = vmatmul.f32.vlgmr.msrb.gmra.mxu2 %v9669_v1  ;;  %1759 = vmatmul.f32.gmra.mxu3 %v9680_v8 }
 0x1dd   :  { %1702 = vmatmul.f32.gmra.mxu2 %v9680_v8  ;;  %1763 = vmatmul.f32.gmra.mxu3 %v9692_v62 }
 0x1e5   :  { %1706 = vmatmul.f32.gmra.mxu2 %v9692_v62  ;;  %1767 = vmatmul.f32.gmra.mxu3 %v9710_v15 }
 0x1ed   :  { %1710 = vmatmul.f32.gmra.mxu2 %v9710_v15  ;;  %1771 = vmatmul.f32.gmra.mxu3 %v9746_v7 }
 0x1f5   :  { %1714 = vmatmul.f32.gmra.mxu2 %v9746_v7  ;;  %1775 = vmatmul.f32.gmra.mxu3 %v1397_v6 }
 0x1fd   :  { %1718 = vmatmul.f32.gmra.mxu2 %v1397_v6  ;;  %1779 = vmatmul.f32.gmra.mxu3 %v1405_v17 }
 0x205   :  { %1722 = vmatmul.f32.gmra.mxu2 %v1405_v17  ;;  %1783 = vmatmul.f32.gmra.mxu3 %v1413_v41 }
 0x20b   :  { %v1546_v6 = vpop.f32.mrf.mxu0 }
 0x20d   :  { %1726 = vmatmul.f32.gmra.mxu2 %v1413_v41  ;;  %v1612_v54 = vpop.f32.mrf.mxu1 }
 0x20f   :  { %v1480_v1 = vpop.f32.mrf.mxu3 }
 0x213   :  { %v1551_v28 = vpop.f32.mrf.mxu0 }
 0x215   :  { %v1618_v39 = vpop.f32.mrf.mxu1 }
 0x217   :  { %v1363_v8 = vpop.f32.mrf.mxu2  ;;  %v1484_v34 = vpop.f32.mrf.mxu3 }
 0x218   :  { %v1364_v45 = vadd.f32 %v9810_v11, %v1363_v8 }
 0x21a   :  { %v1481_v27 = vadd.f32 %v1480_v1, %v1364_v45 }
 0x21b   :  { %v1556_v25 = vpop.f32.mrf.mxu0 }
 0x21c   :  { %v1547_v4 = vadd.f32 %v1546_v6, %v1481_v27 }
 0x21d   :  { %v1624_v23 = vpop.f32.mrf.mxu1 }
 0x21e   :  { %v1613_v38 = vadd.f32 %v1612_v54, %v1547_v4 }
 0x21f   :  { %v1371_v18 = vpop.f32.mrf.mxu2  ;;  %v1488_v60 = vpop.f32.mrf.mxu3 }
 0x220   :  { %v1372_v52 = vadd.f32 %v9810_v11, %v1371_v18 }
 0x222   :  { %v1485_v56 = vadd.f32 %v1484_v34, %v1372_v52 }
 0x223   :  { %v1561_v6 = vpop.f32.mrf.mxu0 }
 0x224   :  { %v1552_v3 = vadd.f32 %v1551_v28, %v1485_v56 }
 0x225   :  { %v1630_v52 = vpop.f32.mrf.mxu1 }
 0x226   :  { %v1619_v13 = vadd.f32 %v1618_v39, %v1552_v3 }
 0x227   :  { %v1379_v62 = vpop.f32.mrf.mxu2  ;;  %v1492_v63 = vpop.f32.mrf.mxu3 }
 0x228   :  { %v1380_v17 = vadd.f32 %v9810_v11, %v1379_v62 }
 0x22a   :  { %v1489_v59 = vadd.f32 %v1488_v60, %v1380_v17 }
 0x22c   :  { %v1557_v53 = vadd.f32 %v1556_v25, %v1489_v59  ;;  %v1566_v39 = vpop.f32.mrf.mxu0 }
 0x22e   :  { %v1625_v34 = vadd.f32 %v1624_v23, %v1557_v53 }
 0x22f   :  { %v1387_v51 = vpop.f32.mrf.mxu2 }
 0x230   :  { %v9797_v24 = vpop.f32.mrf.mxu3  ;;  %v1388_v22 = vadd.f32 %v9810_v11, %v1387_v51 }
 0x232   :  { %v1493_v8 = vadd.f32 %v1492_v63, %v1388_v22 }
 0x234   :  { %v1562_v60 = vadd.f32 %v1561_v6, %v1493_v8 }
 0x236   :  { %v1631_v4 = vadd.f32 %v1630_v52, %v1562_v60 }
 0x238   :  { %v9799_v15 = vpop.f32.mrf.mxu2  ;;  %v9801_v10 = vpop.f32.mrf.mxu3 }
 0x240   :  { %v9803_v7 = vpop.f32.mrf.mxu2  ;;  %v9805_v35 = vpop.f32.mrf.mxu3 }
 0x248   :  { %v9812_v46 = vpop.f32.mrf.mxu2  ;;  %v9814_v16 = vpop.f32.mrf.mxu3 }
 0x250   :  { %v9817_v21 = vpop.f32.mrf.mxu2  ;;  %v1756_v29 = vpop.f32.mrf.mxu3 }
 0x258   :  { %v1699_v58 = vpop.f32.mrf.mxu2  ;;  %v1760_v50 = vpop.f32.mrf.mxu3 }
 0x259   :  { %v1700_v0 = vadd.f32 %v1699_v58, %v1613_v38 }
 0x25b   :  { %v1757_v2 = vadd.f32 %v1756_v29, %v1700_v0 }
 0x25d   :  { %v1787_v43 = vsel %vm408_vm7, %v1757_v2, -inf }
 0x25e   :  { %1788 = vmax.xlane.f32.xlu2 %v1787_v43 }
 0x260   :  { %v1703_v14 = vpop.f32.mrf.mxu2  ;;  %v1764_v18 = vpop.f32.mrf.mxu3 }
 0x261   :  { %v1704_v41 = vadd.f32 %v1703_v14, %v1619_v13  ;;  %v1396_v14 = vadd.f32 %v9810_v11, %v9799_v15  ;;  %v1412_v15 = vadd.f32 %v9810_v11, %v9812_v46  ;;  %v1420_v46 = vadd.f32 %v9810_v11, %v9817_v21 }
 0x263   :  { %v1761_v19 = vadd.f32 %v1760_v50, %v1704_v41  ;;  %v1636_v50 = vpop.f32.mrf.mxu1  ;;  %v1497_v23 = vadd.f32 %v9797_v24, %v1396_v14  ;;  %v1505_v60 = vadd.f32 %v9805_v35, %v1412_v15 }
 0x265   :  { %v1790_v1 = vsel %vm408_vm7, %v1761_v19, -inf }
 0x266   :  { %1791 = vmax.xlane.f32.xlu0 %v1790_v1 }
 0x268   :  { %v1707_v62 = vpop.f32.mrf.mxu2  ;;  %v1768_v28 = vpop.f32.mrf.mxu3 }
 0x269   :  { %v1708_v45 = vadd.f32 %v1707_v62, %v1625_v34  ;;  %v1404_v62 = vadd.f32 %v9810_v11, %v9803_v7 }
 0x26b   :  { %v1765_v27 = vadd.f32 %v1764_v18, %v1708_v45  ;;  %v1642_v34 = vpop.f32.mrf.mxu1  ;;  %v1567_v45 = vadd.f32 %v1566_v39, %v1497_v23  ;;  %v1501_v24 = vadd.f32 %v9801_v10, %v1404_v62 }
 0x26d   :  { %v1793_v54 = vsel %vm408_vm7, %v1765_v27, -inf }
 0x26e   :  { %1794 = vmax.xlane.f32.xlu1 %v1793_v54  ;;  %v1637_v54 = vadd.f32 %v1636_v50, %v1567_v45 }
 0x270   :  { %v1711_v51 = vpop.f32.mrf.mxu2  ;;  %v1772_v22 = vpop.f32.mrf.mxu3 }
 0x271   :  { %v1712_v29 = vadd.f32 %v1711_v51, %v1631_v4 }
 0x273   :  { %v1769_v56 = vadd.f32 %v1768_v28, %v1712_v29  ;;  %v1648_v10 = vpop.f32.mrf.mxu1 }
 0x275   :  { %v1796_v38 = vsel %vm408_vm7, %v1769_v56, -inf }
 0x276   :  { %1797 = vmax.xlane.f32.xlu2 %v1796_v38 }
 0x278   :  { %v1715_v59 = vpop.f32.mrf.mxu2  ;;  %v1776_v51 = vpop.f32.mrf.mxu3 }
 0x279   :  { %v1716_v28 = vadd.f32 %v1715_v59, %v1637_v54 }
 0x27b   :  { %v9849_v35 = vadd.f32 %v1772_v22, %v1716_v28 }
 0x27d   :  { %v3050_v59 = vsel %vm408_vm7, %v9849_v35, -inf }
 0x280   :  { %v1719_v18 = vpop.f32.mrf.mxu2 }
 0x2d1   :  { %v1789_v63 = vpop.xlane.xlu2 %1788 }
 0x2d2   :  { %v1799_v58 = vsub.f32 %v1757_v2, %v1789_v63  ;;  %v1571_v2 = vpop.f32.mrf.mxu0  ;;  %v1723_v63 = vpop.f32.mrf.mxu2 }
 0x2d4   :  { %v1803_v0 = vmul.f32 1.442695, %v1799_v58  ;;  %v1509_v58 = vadd.f32 %v9814_v16, %v1420_v46 }
 0x2d6   :  { %8750 = vpow2.f32 %v1803_v0 }
 0x2d9   :  { %v1792_v17 = vpop.xlane.xlu0 %1791 }
 0x2da   :  { %v1800_v3 = vsub.f32 %v1761_v19, %v1792_v17  ;;  %v1576_v4 = vpop.f32.mrf.mxu0 }
 0x2db   :  { %v1577_v38 = vadd.f32 %v1576_v4, %v1505_v60 }
 0x2dc   :  { %v9826_v43 = vpop.eup %8750  ;;  %v1805_v13 = vmul.f32 1.442695, %v1800_v3 }
 0x2dd   :  { %v1811_v25 = vsel %vm408_vm7, %v9826_v43, 0.0  ;;  %v1649_v39 = vadd.f32 %v1648_v10, %v1577_v38 }
 0x2de   :  { %8752 = vpow2.f32 %v1805_v13  ;;  %1812 = vadd.xlane.f32.xlu0 %v1811_v25  ;;  %v1780_v13 = vpop.f32.mrf.mxu3 }
 0x2df   :  { %v1724_v50 = vadd.f32 %v1723_v63, %v1649_v39 }
 0x2e1   :  { %v1795_v41 = vpop.xlane.xlu1 %1794  ;;  %v9858_v14 = vadd.f32 %v1780_v13, %v1724_v50 }
 0x2e2   :  { %v1801_v53 = vsub.f32 %v1765_v27, %v1795_v41  ;;  %v1581_v21 = vpop.f32.mrf.mxu0  ;;  %v1654_v41 = vpop.f32.mrf.mxu1 }
 0x2e3   :  { %v1582_v25 = vadd.f32 %v1581_v21, %v1509_v58  ;;  %v3056_v23 = vsel %vm408_vm7, %v9858_v14, -inf }
 0x2e4   :  { %v9833_v19 = vpop.eup %8752  ;;  %v1807_v1 = vmul.f32 1.442695, %v1801_v53 }
 0x2e5   :  { %v1814_v8 = vsel %vm408_vm7, %v9833_v19, 0.0  ;;  %v1655_v22 = vadd.f32 %v1654_v41, %v1582_v25 }
 0x2e6   :  { %8754 = vpow2.f32 %v1807_v1  ;;  %1815 = vadd.xlane.f32.xlu1 %v1814_v8  ;;  %v1784_v8 = vpop.f32.mrf.mxu3 }
 0x2e9   :  { %v1798_v6 = vpop.xlane.xlu2 %1797 }
 0x2ea   :  { %v1802_v27 = vsub.f32 %v1769_v56, %v1798_v6  ;;  %v1572_v56 = vadd.f32 %v1571_v2, %v1501_v24  ;;  %v1727_v2 = vpop.f32.mrf.mxu2 }
 0x2eb   :  { %v1728_v53 = vadd.f32 %v1727_v2, %v1655_v22 }
 0x2ec   :  { %v9843_v52 = vpop.eup %8754  ;;  %v1809_v29 = vmul.f32 1.442695, %v1802_v27  ;;  %v1643_v0 = vadd.f32 %v1642_v34, %v1572_v56 }
 0x2ed   :  { %v1817_v7 = vsel %vm408_vm7, %v9843_v52, 0.0  ;;  %v9866_v34 = vadd.f32 %v1784_v8, %v1728_v53 }
 0x2ee   :  { %8756 = vpow2.f32 %v1809_v29  ;;  %1818 = vadd.xlane.f32.xlu2 %v1817_v7  ;;  %v1720_v3 = vadd.f32 %v1719_v18, %v1643_v0 }
 0x2ef   :  { %v3059_v18 = vsel %vm408_vm7, %v9866_v34, -inf }
 0x2f0   :  { %v9860_v16 = vadd.f32 %v1776_v51, %v1720_v3 }
 0x2f2   :  { %v3053_v1 = vsel %vm408_vm7, %v9860_v16, -inf }
 0x2f4   :  { %v9852_v17 = vpop.eup %8756 }
 0x2f5   :  { %v1820_v11 = vsel %vm408_vm7, %v9852_v17, 0.0 }
 0x2f6   :  { %3051 = vmax.xlane.f32.xlu2 %v3050_v59  ;;  %1821 = vadd.xlane.f32.xlu0 %v1820_v11 }
 0x2fe   :  { %3057 = vmax.xlane.f32.xlu2 %v3056_v23  ;;  %3054 = vmax.xlane.f32.xlu0 %v3053_v1 }
 0x306   :  { %3060 = vmax.xlane.f32.xlu0 %v3059_v18 }
 0x351   :  { %v1813_v62 = vpop.xlane.xlu0 %1812 }
 0x352   :  { %8758 = vrcp.f32 %v1813_v62  ;;  %v1834_v24 = vand.u32 2147483648, %v1813_v62  ;;  %v1832_v54 = vand.u32 2147483647, %v1813_v62  ;;  %vm1828_vm8 = vweird.f32 %v1813_v62 }
 0x354   :  { %v1835_v29 = vor.u32 1.1754944e-38, %v1834_v24  ;;  %vm1833_vm10 = vcmp.eq.f32.partialorder %v1832_v54, 8.507059e+37 }
 0x358   :  { %v8759_v15 = vpop.eup %8758 }
 0x359   :  { %v1824_v45 = vmul.f32 %v8759_v15, %v1813_v62  ;;  %v1816_v6 = vpop.xlane.xlu1 %1815  ;;  %vm1829_vm6 = vweird.f32 %v8759_v15 }
 0x35a   :  { %8760 = vrcp.f32 %v1816_v6  ;;  %vm1830_vm9 = vmor %vm1828_vm8, %vm1829_vm6  ;;  %v1849_v63 = vand.u32 2147483648, %v1816_v6  ;;  %v1847_v0 = vand.u32 2147483647, %v1816_v6  ;;  %vm1843_vm12 = vweird.f32 %v1816_v6 }
 0x35b   :  { %v1825_v27 = vsub.f32 1.0, %v1824_v45 }
 0x35c   :  { %v1850_v59 = vor.u32 1.1754944e-38, %v1849_v63  ;;  %vm1848_vm14 = vcmp.eq.f32.partialorder %v1847_v0, 8.507059e+37 }
 0x35d   :  { %v1826_v60 = vmul.f32 %v8759_v15, %v1825_v27 }
 0x35f   :  { %v1827_v4 = vadd.f32 %v8759_v15, %v1826_v60 }
 0x360   :  { %v8761_v51 = vpop.eup %8760 }
 0x361   :  { %v1831_v28 = vsel %vm1830_vm9, %v8759_v15, %v1827_v4  ;;  %v1839_v7 = vmul.f32 %v8761_v51, %v1816_v6  ;;  %v1819_v46 = vpop.xlane.xlu2 %1818  ;;  %vm1844_vm11 = vweird.f32 %v8761_v51 }
 0x362   :  { %v1836_v56 = vsel %vm1833_vm10, %v1835_v29, %v1831_v28  ;;  %8762 = vrcp.f32 %v1819_v46  ;;  %vm1845_vm13 = vmor %vm1843_vm12, %vm1844_vm11  ;;  %v1862_v22 = vand.u32 2147483647, %v1819_v46  ;;  %v1864_v53 = vand.u32 2147483648, %v1819_v46 }
 0x363   :  { %v1837_v38 = vmul.f32 %v9826_v43, %v1836_v56  ;;  %v1840_v10 = vsub.f32 1.0, %v1839_v7  ;;  %vm1858_vm1 = vweird.f32 %v1819_v46 }
 0x364   :  { %v1865_v15 = vor.u32 1.1754944e-38, %v1864_v53  ;;  %vm1863_vm3 = vcmp.eq.f32.partialorder %v1862_v22, 8.507059e+37 }
 0x365   :  { %v1841_v58 = vmul.f32 %v8761_v51, %v1840_v10  ;;  %v9872_v39 = vmul.f32 %v1837_v38, %v9662_v33 }
 0x367   :  { %v1842_v3 = vadd.f32 %v8761_v51, %v1841_v58  ;;  %1891 = vxpose.xlu1.b32.start [1/4] (short) (narrow) %v9872_v39, 16  ;;  %v2833_v23 = vmul.f32 %v9872_v39, %v9200_v57 }
 0x368   :  { %v8763_v50 = vpop.eup %8762 }
 0x369   :  { %v1846_v11 = vsel %vm1845_vm13, %v8761_v51, %v1842_v3  ;;  %v1854_v21 = vmul.f32 %v8763_v50, %v1819_v46  ;;  %v1822_v13 = vpop.xlane.xlu0 %1821  ;;  %v3052_v43 = vpop.xlane.xlu2 %3051  ;;  %vm1859_vm15 = vweird.f32 %v8763_v50  ;;  %v2837_v45 = vmul.f32 %v2833_v23, %v9872_v39 }
 0x36a   :  { %v1851_v25 = vsel %vm1848_vm14, %v1850_v59, %v1846_v11  ;;  %8764 = vrcp.f32 %v1822_v13  ;;  %v3062_v33 = vsub.f32 %v9849_v35, %v3052_v43  ;;  %vm1860_vm2 = vmor %vm1858_vm1, %vm1859_vm15  ;;  %v1877_v29 = vand.u32 2147483647, %v1822_v13 }
 0x36b   :  { %v1852_v41 = vmul.f32 %v9833_v19, %v1851_v25  ;;  %v1855_v2 = vsub.f32 1.0, %v1854_v21  ;;  %v1879_v28 = vand.u32 2147483648, %v1822_v13  ;;  %v2841_v56 = vsel %vm408_vm7, %v2837_v45, 0.0 }
 0x36c   :  { %v3066_v8 = vmul.f32 1.442695, %v3062_v33  ;;  %vm1873_vm6 = vweird.f32 %v1822_v13  ;;  %vm1878_vm9 = vcmp.eq.f32.partialorder %v1877_v29, 8.507059e+37 }
 0x36d   :  { %v1856_v1 = vmul.f32 %v8763_v50, %v1855_v2  ;;  %v9880_v18 = vmul.f32 %v1852_v41, %v9675_v9  ;;  %v1880_v0 = vor.u32 1.1754944e-38, %v1879_v28 }
 0x36e   :  { %8766 = vpow2.f32 %v3066_v8 }
 0x36f   :  { %v1857_v62 = vadd.f32 %v8763_v50, %v1856_v1  ;;  %1892 = vxpose.xlu1.b32.cont [2/4] (short) (narrow) %v9880_v18, 16  ;;  %v2834_v19 = vmul.f32 %v9880_v18, %v9211_v30 }
 0x370   :  { %v8765_v35 = vpop.eup %8764 }
 0x371   :  { %v1861_v57 = vsel %vm1860_vm2, %v8763_v50, %v1857_v62  ;;  %v1869_v6 = vmul.f32 %v8765_v35, %v1822_v13  ;;  %v3055_v27 = vpop.xlane.xlu0 %3054  ;;  %v3058_v24 = vpop.xlane.xlu2 %3057  ;;  %v2838_v4 = vmul.f32 %v2834_v19, %v9880_v18  ;;  %vm1874_vm4 = vweird.f32 %v8765_v35  ;;  %v8878_v19 = vld [vmem:[%s12513_s1 + $0x18] sm:$0xff] }
 0x372   :  { %v1866_v9 = vsel %vm1863_vm3, %v1865_v15, %v1861_v57  ;;  %v3063_v60 = vsub.f32 %v9860_v16, %v3055_v27  ;;  %v3064_v54 = vsub.f32 %v9858_v14, %v3058_v24  ;;  %vm1875_vm8 = vmor %vm1873_vm6, %vm1874_vm4  ;;  %v8880_v24 = vld [vmem:[%s12513_s1 + $0x8] sm:$0xff] }
 0x373   :  { %v1867_v51 = vmul.f32 %v9843_v52, %v1866_v9  ;;  %v1870_v30 = vsub.f32 1.0, %v1869_v6  ;;  %v2842_v38 = vsel %vm408_vm7, %v2838_v4, 0.0  ;;  %v9949_v9 = vand.u32 4294901760, %v8880_v24 }
 0x374   :  { %v3068_v7 = vmul.f32 1.442695, %v3063_v60  ;;  %v3070_v46 = vmul.f32 1.442695, %v3064_v54  ;;  %v9892_v10 = vpop.eup %8766  ;;  %v2843_v14 = vadd.f32 %v2842_v38, %v2841_v56 }
 0x375   :  { %v1871_v63 = vmul.f32 %v8765_v35, %v1870_v30  ;;  %v9895_v16 = vmul.f32 %v1867_v51, %v9686_v49  ;;  %v3074_v52 = vsel %vm408_vm7, %v9892_v10, 0.0 }
 0x376   :  { %8768 = vpow2.f32 %v3068_v7  ;;  %3075 = vadd.xlane.f32.xlu2 %v3074_v52  ;;  %v8881_v7 = vld [vmem:[%s12513_s1] sm:$0xff]  ;;  %v9973_v52 = vsub.f32 %v8880_v24, %v9949_v9 }
 0x377   :  { %v1872_v58 = vadd.f32 %v8765_v35, %v1871_v63  ;;  %8770 = vpow2.f32 %v3070_v46  ;;  %1893 = vxpose.xlu1.b32.cont [3/4] (short) (narrow) %v9895_v16, 16  ;;  %v2835_v3 = vmul.f32 %v9895_v16, %v9221_v12  ;;  %v9966_v46 = vand.u32 4294901760, %v8881_v7 }
 0x379   :  { %v1876_v50 = vsel %vm1875_vm8, %v8765_v35, %v1872_v58  ;;  %v3061_v49 = vpop.xlane.xlu0 %3060  ;;  %v2839_v21 = vmul.f32 %v2835_v3, %v9895_v16  ;;  %v9931_v35 = vand.u32 4294901760, %v8878_v19 }
 0x37a   :  { %v1881_v59 = vsel %vm1878_vm9, %v1880_v0, %v1876_v50  ;;  %v3065_v11 = vsub.f32 %v9866_v34, %v3061_v49 }
 0x37b   :  { %v1882_v43 = vmul.f32 %v9852_v17, %v1881_v59  ;;  %v2844_v41 = vsel %vm408_vm7, %v2839_v21, 0.0  ;;  %2158 = vmatpush.msrb.mxu2 %v9931_v35  ;;  %v9940_v45 = vsub.f32 %v8878_v19, %v9931_v35  ;;  %v2208_v21 = vand.u32 4294901760, %v9973_v52 }
 0x37c   :  { %v9905_v13 = vpop.eup %8768  ;;  %v3072_v25 = vmul.f32 1.442695, %v3065_v11  ;;  %v2845_v22 = vadd.f32 %v2844_v41, %v2843_v14 }
 0x37d   :  { %v9908_v2 = vpop.eup %8770  ;;  %v3077_v12 = vsel %vm408_vm7, %v9905_v13, 0.0  ;;  %v9913_v33 = vmul.f32 %v1882_v43, %v9699_v47  ;;  %v2196_v27 = vand.u32 4294901760, %v9940_v45  ;;  %v9980_v43 = vsub.f32 %v8881_v7, %v9966_v46 }
 0x37e   :  { %8772 = vpow2.f32 %v3072_v25  ;;  %3078 = vadd.xlane.f32.xlu0 %v3077_v12  ;;  %v3080_v34 = vsel %vm408_vm7, %v9908_v2, 0.0 }
 0x37f   :  { %3081 = vadd.xlane.f32.xlu2 %v3080_v34  ;;  %1894 = vxpose.xlu1.b32.end [4/4] (short) (narrow) %v9913_v33, 16  ;;  %v2836_v17 = vmul.f32 %v9913_v33, %v9237_v36  ;;  %v8879_v36 = vld [vmem:[%s12513_s1 + $0x10] sm:$0xff]  ;;  %v2197_v29 = vsub.f32 %v9940_v45, %v2196_v27 }
 0x380   :  { %v9937_v15 = vand.u32 4294901760, %v8879_v36 }
 0x381   :  { %v2840_v53 = vmul.f32 %v2836_v17, %v9913_v33  ;;  %v2198_v63 = vand.u32 4294901760, %v2197_v29 }
 0x382   :  { %2160 = vmatpush.msrb.mxu2 %v9937_v15  ;;  %v9952_v60 = vsub.f32 %v8879_v36, %v9937_v15 }
 0x383   :  { %v2846_v23 = vsel %vm408_vm7, %v2840_v53, 0.0  ;;  %2199 = vmatpush.msrb.mxu3 %v2198_v63 }
 0x384   :  { %v9922_v1 = vpop.eup %8772  ;;  %v9924_v47 = vadd.f32 %v2846_v23, %v2845_v22  ;;  %2162 = vmatpush.msrb.mxu2 %v9949_v9  ;;  %v2202_v28 = vand.u32 4294901760, %v9952_v60 }
 0x385   :  { %v3083_v8 = vsel %vm408_vm7, %v9922_v1, 0.0 }
 0x386   :  { %12581 = vst [vmem:[#allocation2_spill] sm:$0xff] %v9924_v47  ;;  %3084 = vadd.xlane.f32.xlu0 %v3083_v8  ;;  %v2203_v14 = vsub.f32 %v9952_v60, %v2202_v28  ;;  %2164 = vmatpush.msrb.mxu2 %v9966_v46 }
 0x388   :  { %v2204_v11 = vand.u32 4294901760, %v2203_v14 }
 0x38a   :  { %2205 = vmatpush.msrb.mxu3 %v2204_v11 }
 0x3e9   :  { %v3076_v62 = vpop.xlane.xlu2 %3075 }
 0x3ea   :  { %8774 = vrcp.f32 %v3076_v62  ;;  %v3097_v30 = vand.u32 2147483648, %v3076_v62  ;;  %v3095_v38 = vand.u32 2147483647, %v3076_v62  ;;  %vm3091_vm11 = vweird.f32 %v3076_v62 }
 0x3ec   :  { %v3098_v3 = vor.u32 1.1754944e-38, %v3097_v30  ;;  %vm3096_vm13 = vcmp.eq.f32.partialorder %v3095_v38, 8.507059e+37 }
 0x3f0   :  { %v8775_v57 = vpop.eup %8774 }
 0x3f1   :  { %v9942_v6 = vpop.xlane.xlu0 %3078  ;;  %v3087_v54 = vmul.f32 %v8775_v57, %v3076_v62  ;;  %vm3092_vm10 = vweird.f32 %v8775_v57  ;;  %v2209_v62 = vsub.f32 %v9973_v52, %v2208_v21 }
 0x3f2   :  { %8776 = vrcp.f32 %v9942_v6  ;;  %v9955_v4 = vpop.xlane.xlu2 %3081  ;;  %vm3093_vm12 = vmor %vm3091_vm11, %vm3092_vm10  ;;  %v3110_v34 = vand.u32 2147483647, %v9942_v6  ;;  %v3112_v17 = vand.u32 2147483648, %v9942_v6  ;;  %vm3106_vm1 = vweird.f32 %v9942_v6 }
 0x3f3   :  { %8778 = vrcp.f32 %v9955_v4  ;;  %v3088_v51 = vsub.f32 1.0, %v3087_v54  ;;  %v3125_v8 = vand.u32 2147483647, %v9955_v4  ;;  %v3127_v36 = vand.u32 2147483648, %v9955_v4 }
 0x3f4   :  { %vm3111_vm3 = vcmp.eq.f32.partialorder %v3110_v34, 8.507059e+37  ;;  %v3113_v7 = vor.u32 1.1754944e-38, %v3112_v17  ;;  %vm3121_vm4 = vweird.f32 %v9955_v4 }
 0x3f5   :  { %v3089_v56 = vmul.f32 %v8775_v57, %v3088_v51  ;;  %v2210_v51 = vand.u32 4294901760, %v2209_v62  ;;  %v3128_v63 = vor.u32 1.1754944e-38, %v3127_v36  ;;  %vm3126_vm8 = vcmp.eq.f32.partialorder %v3125_v8, 8.507059e+37 }
 0x3f7   :  { %v3090_v0 = vadd.f32 %v8775_v57, %v3089_v56  ;;  %2211 = vmatpush.msrb.mxu3 %v2210_v51 }
 0x3f8   :  { %v8777_v58 = vpop.eup %8776 }
 0x3f9   :  { %v8779_v50 = vpop.eup %8778  ;;  %v3102_v49 = vmul.f32 %v8777_v58, %v9942_v6  ;;  %v9976_v59 = vpop.xlane.xlu0 %3084  ;;  %v3094_v25 = vsel %vm3093_vm12, %v8775_v57, %v3090_v0  ;;  %vm3107_vm14 = vweird.f32 %v8777_v58  ;;  %v2214_v57 = vand.u32 4294901760, %v9980_v43 }
 0x3fa   :  { %v3117_v41 = vmul.f32 %v8779_v50, %v9955_v4  ;;  %8780 = vrcp.f32 %v9976_v59  ;;  %v3099_v12 = vsel %vm3096_vm13, %v3098_v3, %v3094_v25  ;;  %vm3122_vm15 = vweird.f32 %v8779_v50  ;;  %vm3108_vm2 = vmor %vm3106_vm1, %vm3107_vm14 }
 0x3fb   :  { %v3103_v22 = vsub.f32 1.0, %v3102_v49  ;;  %v3100_v53 = vmul.f32 %v9892_v10, %v3099_v12  ;;  %v2215_v30 = vsub.f32 %v9980_v43, %v2214_v57  ;;  %vm3123_vm6 = vmor %vm3121_vm4, %vm3122_vm15  ;;  %vm3136_vm10 = vweird.f32 %v9976_v59 }
 0x3fc   :  { %v3118_v23 = vsub.f32 1.0, %v3117_v41 }
 0x3fd   :  { %v3104_v19 = vmul.f32 %v8777_v58, %v3103_v22  ;;  %v9994_v54 = vmul.f32 %v3100_v53, %v9720_v5  ;;  %v2216_v14 = vand.u32 4294901760, %v2215_v30  ;;  %v3140_v22 = vand.u32 2147483647, %v9976_v59 }
 0x3fe   :  { %v3119_v24 = vmul.f32 %v8779_v50, %v3118_v23 }
 0x3ff   :  { %v3105_v10 = vadd.f32 %v8777_v58, %v3104_v19  ;;  %3154 = vxpose.xlu2.b32.start [1/4] (short) (narrow) %v9994_v54, 16  ;;  %2217 = vmatpush.msrb.mxu3 %v2216_v14  ;;  %v4077_v4 = vmul.f32 %v9994_v54, %v9272_v61  ;;  %vm3141_vm12 = vcmp.eq.f32.partialorder %v3140_v22, 8.507059e+37 }
 0x400   :  { %v8781_v29 = vpop.eup %8780  ;;  %v3120_v56 = vadd.f32 %v8779_v50, %v3119_v24 }
 0x401   :  { %v3109_v38 = vsel %vm3108_vm2, %v8777_v58, %v3105_v10  ;;  %v3132_v6 = vmul.f32 %v8781_v29, %v9976_v59  ;;  %v3142_v58 = vand.u32 2147483648, %v9976_v59  ;;  %vm3137_vm9 = vweird.f32 %v8781_v29 }
 0x402   :  { %v3114_v0 = vsel %vm3111_vm3, %v3113_v7, %v3109_v38  ;;  %v3124_v3 = vsel %vm3123_vm6, %v8779_v50, %v3120_v56  ;;  %vm3138_vm11 = vmor %vm3136_vm10, %vm3137_vm9  ;;  %v10036_v7 = vand.u32 4294901760, %v9913_v33  ;;  %vm3019_vm3 = vcmask 130112  }
 0x403   :  { %v3115_v49 = vmul.f32 %v9905_v13, %v3114_v0  ;;  %v3129_v11 = vsel %vm3126_vm8, %v3128_v63, %v3124_v3  ;;  %v3133_v25 = vsub.f32 1.0, %v3132_v6  ;;  %v3143_v17 = vor.u32 1.1754944e-38, %v3142_v58 }
 0x404   :  { %v3130_v41 = vmul.f32 %v9908_v2, %v3129_v11  ;;  %v4081_v2 = vmul.f32 %v4077_v4, %v9994_v54  ;;  %v10045_v63 = vand.u32 4294901760, %v9895_v16  ;;  %v10055_v0 = vand.u32 4294901760, %v9880_v18 }
 0x405   :  { %v3134_v12 = vmul.f32 %v8781_v29, %v3133_v25  ;;  %v10011_v34 = vmul.f32 %v3115_v49, %v9759_v26  ;;  %v10069_v25 = vand.u32 4294901760, %v9872_v39 }
 0x406   :  { %v10014_v50 = vmul.f32 %v3130_v41, %v9769_v48 }
 0x407   :  { %v3135_v13 = vadd.f32 %v8781_v29, %v3134_v12  ;;  %v4078_v61 = vmul.f32 %v10011_v34, %v9318_v37  ;;  %3155 = vxpose.xlu2.b32.cont [2/4] (short) (narrow) %v10011_v34, 16  ;;  %v4085_v37 = vsel %vm408_vm7, %v4081_v2, 0.0 }
 0x408   :  { %v4079_v53 = vmul.f32 %v10014_v50, %v9364_v20 }
 0x409   :  { %v3139_v23 = vsel %vm3138_vm11, %v8781_v29, %v3135_v13  ;;  %v4082_v8 = vmul.f32 %v4078_v61, %v10011_v34 }
 0x40a   :  { %v3144_v62 = vsel %vm3141_vm12, %v3143_v17, %v3139_v23  ;;  %v4083_v19 = vmul.f32 %v4079_v53, %v10014_v50 }
 0x40b   :  { %v3145_v59 = vmul.f32 %v9922_v1, %v3144_v62  ;;  %v1907_v36 = vpop.trf.xlu1  ;;  %v4086_v24 = vsel %vm408_vm7, %v4082_v8, 0.0 }
 0x40c   :  { %v1924_v51 = vsel %vm25_vm0, %v1907_v36, 0  ;;  %v4087_v10 = vadd.f32 %v4086_v24, %v4085_v37  ;;  %v4088_v29 = vsel %vm408_vm7, %v4083_v19, 0.0 }
 0x40d   :  { %v10029_v30 = vand.u32 4294901760, %v1924_v51  ;;  %v10032_v20 = vmul.f32 %v3145_v59, %v9780_v40 }
 0x40e   :  { %v4089_v56 = vadd.f32 %v4088_v29, %v4087_v10 }
 0x40f   :  { %v10039_v1 = vsub.f32 %v1924_v51, %v10029_v30  ;;  %2003 = vmatmul.f32.vlgmr.msra.gmra.mxu1 %v10029_v30  ;;  %v4080_v38 = vmul.f32 %v10032_v20, %v9405_v55  ;;  %3156 = vxpose.xlu2.b32.cont [3/4] (short) (narrow) %v10014_v50, 16  ;;  %v10062_v55 = vsub.f32 %v9913_v33, %v10036_v7 }
 0x410   :  { %2275 = vmatpush.msra.mxu1 %v9931_v35  ;;  %v10077_v33 = vsub.f32 %v9895_v16, %v10045_v63  ;;  %v10094_v16 = vsub.f32 %v9880_v18, %v10055_v0 }
 0x411   :  { %2037 = vmatmul.f32.vlgmr.msra.gmra.mxu2 %v10039_v1  ;;  %v10051_v6 = vand.u32 4294901760, %v10039_v1  ;;  %v4084_v14 = vmul.f32 %v4080_v38, %v10032_v20  ;;  %v10090_v12 = vand.u32 4294901760, %v10062_v55 }
 0x412   :  { %2277 = vmatpush.msra.mxu1 %v9937_v15  ;;  %2310 = vmatpush.msra.mxu2 %v2196_v27 }
 0x413   :  { %2069 = vmatmul.f32.vlgmr.msra.gmra.mxu3 %v10051_v6  ;;  %v1908_v3 = vpop.trf.xlu1  ;;  %v1952_v49 = vsub.f32 %v10039_v1, %v10051_v6  ;;  %v4090_v11 = vsel %vm408_vm7, %v4084_v14, 0.0  ;;  %v2419_v22 = vsub.f32 %v10062_v55, %v10090_v12 }
 0x414   :  { %v1927_v4 = vsel %vm25_vm0, %v1908_v3, 0  ;;  %2279 = vmatpush.msra.mxu1 %v9949_v9  ;;  %2314 = vmatpush.msra.mxu2 %v2202_v28  ;;  %v10079_v27 = vadd.f32 %v4090_v11, %v4089_v56 }
 0x415   :  { %v10081_v41 = vand.u32 4294901760, %v1927_v4  ;;  %v10083_v58 = vand.u32 4294901760, %v1952_v49  ;;  %2345 = vmatpush.msra.mxu3 %v9931_v35  ;;  %v10104_v35 = vand.u32 4294901760, %v10077_v33 }
 0x416   :  { %12582 = vst [vmem:[#allocation3_spill] sm:$0xff] %v10079_v27  ;;  %2281 = vmatpush.msra.mxu1 %v9966_v46  ;;  %2318 = vmatpush.msra.mxu2 %v2208_v21  ;;  %v10108_v21 = vsub.f32 %v9872_v39, %v10069_v25  ;;  %v3148_v27 = vmul.f32 %v9773_v32, %v9769_v48 }
 0x417   :  { %v10097_v28 = vsub.f32 %v1927_v4, %v10081_v41  ;;  %1954 = vmatmul.f32.vlgmr.msra.gmra.mxu0 %v10083_v58  ;;  %2007 = vmatmul.f32.gmra.mxu1 %v10081_v41  ;;  %v3146_v48 = vmul.f32 %v9736_v42, %v9720_v5 }
 0x418   :  { %3157 = vxpose.xlu2.b32.end [4/4] (short) (narrow) %v10032_v20, 16  ;;  %2347 = vmatpush.msra.mxu3 %v9937_v15  ;;  %v10121_v15 = vand.u32 4294901760, %v10094_v16  ;;  %v10131_v13 = vand.u32 4294901760, %v10108_v21  ;;  %v10222_v32 = vand.u32 4294901760, %v3148_v27 }
 0x419   :  { %2042 = vmatmul.f32.gmra.mxu2 %v10097_v28  ;;  %v10112_v18 = vand.u32 4294901760, %v10097_v28  ;;  %2241 = vmatpush.msra.mxu0 %v9940_v45  ;;  %v2425_v45 = vsub.f32 %v10077_v33, %v10104_v35  ;;  %v10234_v5 = vand.u32 4294901760, %v3146_v48 }
 0x41a   :  { %2322 = vmatpush.msra.mxu2 %v2214_v57  ;;  %2349 = vmatpush.msra.mxu3 %v9949_v9  ;;  %v2420_v9 = vand.u32 4294901760, %v2419_v22  ;;  %v2431_v61 = vsub.f32 %v10094_v16, %v10121_v15 }
 0x41b   :  { %2075 = vmatmul.f32.gmra.mxu3 %v10112_v18  ;;  %v1960_v39 = vsub.f32 %v10097_v28, %v10112_v18  ;;  %2244 = vmatpush.msra.mxu0 %v9952_v60  ;;  %v2426_v60 = vand.u32 4294901760, %v2425_v45 }
 0x41c   :  { %2351 = vmatpush.msra.mxu3 %v9966_v46  ;;  %v2437_v46 = vsub.f32 %v10108_v21, %v10131_v13 }
 0x41d   :  { %v10133_v57 = vand.u32 4294901760, %v1960_v39  ;;  %2247 = vmatpush.msra.mxu0 %v9973_v52  ;;  %v2432_v52 = vand.u32 4294901760, %v2431_v61 }
 0x41e   :  { %v2438_v2 = vand.u32 4294901760, %v2437_v46 }
 0x41f   :  { %1962 = vmatmul.f32.gmra.mxu0 %v10133_v57  ;;  %2137 = vmatmul.f32.vlgmr.msrb.gmra.mxu1 %v10029_v30 }
 0x420   :  { %2421 = vmatpush.msrb.mxu1 %v2420_v9  ;;  %2250 = vmatpush.msra.mxu0 %v9980_v43 }
 0x421   :  { %2170 = vmatmul.f32.vlgmr.msrb.gmra.mxu2 %v10083_v58 }
 0x422   :  { %2427 = vmatpush.msrb.mxu1 %v2426_v60  ;;  %2463 = vmatpush.msrb.mxu2 %v10062_v55 }
 0x423   :  { %2219 = vmatmul.f32.vlgmr.msrb.gmra.mxu3 %v10029_v30 }
 0x424   :  { %2433 = vmatpush.msrb.mxu1 %v2432_v52  ;;  %2466 = vmatpush.msrb.mxu2 %v10077_v33 }
 0x425   :  { %2497 = vmatpush.msrb.mxu3 %v10036_v7 }
 0x426   :  { %2439 = vmatpush.msrb.mxu1 %v2438_v2  ;;  %2469 = vmatpush.msrb.mxu2 %v10094_v16 }
 0x427   :  { %2499 = vmatpush.msrb.mxu3 %v10045_v63  ;;  %2108 = vmatmul.f32.vlgmr.msrb.gmra.mxu0 %v10029_v30 }
 0x428   :  { %2141 = vmatmul.f32.gmra.mxu1 %v10081_v41  ;;  %2380 = vmatpush.msrb.mxu0 %v10036_v7 }
 0x429   :  { %2472 = vmatpush.msrb.mxu2 %v10108_v21  ;;  %2501 = vmatpush.msrb.mxu3 %v10055_v0 }
 0x42a   :  { %2178 = vmatmul.f32.gmra.mxu2 %v10133_v57  ;;  %2382 = vmatpush.msrb.mxu0 %v10045_v63 }
 0x42b   :  { %2503 = vmatpush.msrb.mxu3 %v10069_v25 }
 0x42c   :  { %2223 = vmatmul.f32.gmra.mxu3 %v10081_v41  ;;  %2384 = vmatpush.msrb.mxu0 %v10055_v0 }
 0x42e   :  { %2386 = vmatpush.msrb.mxu0 %v10069_v25 }
 0x42f   :  { %2112 = vmatmul.f32.gmra.mxu0 %v10081_v41 }
 0x430   :  { %2285 = vmatmul.f32.vlgmr.msra.gmra.mxu1 %v10051_v6 }
 0x431   :  { %2567 = vmatpush.msra.mxu1 %v10036_v7 }
 0x432   :  { %2324 = vmatmul.f32.vlgmr.msra.gmra.mxu2 %v10029_v30 }
 0x433   :  { %2569 = vmatpush.msra.mxu1 %v10045_v63  ;;  %2596 = vmatpush.msra.mxu2 %v10036_v7 }
 0x434   :  { %2353 = vmatmul.f32.vlgmr.msra.gmra.mxu3 %v10029_v30 }
 0x435   :  { %2571 = vmatpush.msra.mxu1 %v10055_v0  ;;  %2598 = vmatpush.msra.mxu2 %v10045_v63 }
 0x436   :  { %2637 = vmatpush.msra.mxu3 %v2420_v9 }
 0x437   :  { %2573 = vmatpush.msra.mxu1 %v10069_v25  ;;  %2600 = vmatpush.msra.mxu2 %v10055_v0 }
 0x438   :  { %2643 = vmatpush.msra.mxu3 %v2426_v60  ;;  %2253 = vmatmul.f32.vlgmr.msra.gmra.mxu0 %v10039_v1  ;;  %v3149_v60 = vmul.f32 %v9783_v44, %v9780_v40 }
 0x439   :  { %2291 = vmatmul.f32.gmra.mxu1 %v10112_v18  ;;  %2532 = vmatpush.msra.mxu0 %v10090_v12 }
 0x43a   :  { %2602 = vmatpush.msra.mxu2 %v10069_v25  ;;  %2649 = vmatpush.msra.mxu3 %v2432_v52 }
 0x43b   :  { %2328 = vmatmul.f32.gmra.mxu2 %v10081_v41  ;;  %2536 = vmatpush.msra.mxu0 %v10104_v35 }
 0x43c   :  { %2655 = vmatpush.msra.mxu3 %v2438_v2 }
 0x43d   :  { %2357 = vmatmul.f32.gmra.mxu3 %v10081_v41  ;;  %2540 = vmatpush.msra.mxu0 %v10121_v15 }
 0x43f   :  { %2544 = vmatpush.msra.mxu0 %v10131_v13 }
 0x440   :  { %2258 = vmatmul.f32.gmra.mxu0 %v10097_v28 }
 0x48c   :  { %v10182_v43 = vpop.f32.mrf.mxu1 }
 0x494   :  { %v10184_v17 = vpop.f32.mrf.mxu0  ;;  %v10186_v53 = vpop.f32.mrf.mxu2 }
 0x495   :  { %v10190_v8 = vpop.f32.mrf.mxu1 }
 0x496   :  { %v10188_v23 = vpop.f32.mrf.mxu3 }
 0x49c   :  { %v10192_v62 = vpop.f32.mrf.mxu0  ;;  %v10194_v19 = vpop.f32.mrf.mxu2 }
 0x49d   :  { %v10198_v36 = vpop.f32.mrf.mxu1 }
 0x49e   :  { %v10196_v59 = vpop.f32.mrf.mxu3 }
 0x4a4   :  { %v10200_v37 = vpop.f32.mrf.mxu0  ;;  %v2171_v24 = vpop.f32.mrf.mxu2 }
 0x4a5   :  { %v10202_v10 = vpop.f32.mrf.mxu1 }
 0x4a6   :  { %v2220_v51 = vpop.f32.mrf.mxu3 }
 0x4a7   :  { %v2221_v14 = vadd.f32 %v2220_v51, %v2171_v24 }
 0x4ac   :  { %v10204_v29 = vpop.f32.mrf.mxu0 }
 0x4ad   :  { %v2179_v56 = vpop.f32.mrf.mxu2  ;;  %v2286_v3 = vpop.f32.mrf.mxu1 }
 0x4af   :  { %v2224_v38 = vpop.f32.mrf.mxu3 }
 0x4b0   :  { %v2225_v9 = vadd.f32 %v2224_v38, %v2179_v56 }
 0x4b5   :  { %v2254_v49 = vpop.f32.mrf.mxu0  ;;  %v2325_v4 = vpop.f32.mrf.mxu2 }
 0x4b6   :  { %v2255_v11 = vadd.f32 %v2254_v49, %v2221_v14  ;;  %v2292_v24 = vpop.f32.mrf.mxu1  ;;  %v10215_v49 = vand.u32 4294901760, %v3149_v60 }
 0x4b7   :  { %v2354_v39 = vpop.f32.mrf.mxu3 }
 0x4b8   :  { %v2287_v22 = vadd.f32 %v2286_v3, %v2255_v11  ;;  %v3147_v3 = vmul.f32 %v9764_v31, %v9759_v26  ;;  %v10229_v31 = vsub.f32 %v3149_v60, %v10215_v49 }
 0x4ba   :  { %v2326_v45 = vadd.f32 %v2325_v4, %v2287_v22  ;;  %v10226_v26 = vand.u32 4294901760, %v3147_v3 }
 0x4bc   :  { %v2355_v61 = vadd.f32 %v2354_v39, %v2326_v45 }
 0x4bd   :  { %v2259_v46 = vpop.f32.mrf.mxu0 }
 0x4be   :  { %v2362_v52 = vsel %vm25_vm0, %v2355_v61, 0  ;;  %v2260_v2 = vadd.f32 %v2259_v46, %v2225_v9  ;;  %v2329_v38 = vpop.f32.mrf.mxu2  ;;  %v10248_v61 = vsub.f32 %v3147_v3, %v10226_v26 }
 0x4bf   :  { %v10211_v51 = vand.u32 4294901760, %v2362_v52 }
 0x4c0   :  { %v2293_v14 = vadd.f32 %v2292_v24, %v2260_v2  ;;  %v2358_v11 = vpop.f32.mrf.mxu3  ;;  %v3255_v60 = vand.u32 4294901760, %v10248_v61  ;;  %v8882_v2 = vld [vmem:[%s12513_s1 + $0x38] sm:$0xff] }
 0x4c1   :  { %v2388_v56 = vsub.f32 %v2362_v52, %v10211_v51  ;;  %2441 = vmatmul.f32.vlgmr.msrb.gmra.mxu1 %v10211_v51  ;;  %v10282_v24 = vand.u32 4294901760, %v8882_v2 }
 0x4c2   :  { %v2330_v40 = vadd.f32 %v2329_v38, %v2293_v14  ;;  %2713 = vmatpush.msrb.mxu1 %v10036_v7  ;;  %v8884_v38 = vld [vmem:[%s12513_s1 + $0x28] sm:$0xff] }
 0x4c3   :  { %v2389_v44 = vand.u32 4294901760, %v2388_v56  ;;  %2475 = vmatmul.f32.vlgmr.msrb.gmra.mxu2 %v2388_v56 }
 0x4c4   :  { %v2359_v4 = vadd.f32 %v2358_v11, %v2330_v40  ;;  %2715 = vmatpush.msrb.mxu1 %v10045_v63  ;;  %2748 = vmatpush.msrb.mxu2 %v10090_v12  ;;  %v10240_v12 = vsub.f32 %v3148_v27, %v10222_v32  ;;  %v10301_v40 = vand.u32 4294901760, %v8884_v38 }
 0x4c5   :  { %v2390_v22 = vsub.f32 %v2388_v56, %v2389_v44  ;;  %2507 = vmatmul.f32.vlgmr.msrb.gmra.mxu3 %v2389_v44  ;;  %v10294_v56 = vsub.f32 %v8882_v2, %v10282_v24 }
 0x4c6   :  { %v2365_v39 = vsel %vm25_vm0, %v2359_v4, 0  ;;  %2717 = vmatpush.msrb.mxu1 %v10055_v0  ;;  %2752 = vmatpush.msrb.mxu2 %v10104_v35  ;;  %v3243_v35 = vand.u32 4294901760, %v10229_v31  ;;  %v3249_v27 = vand.u32 4294901760, %v10240_v12  ;;  %v10320_v4 = vsub.f32 %v8884_v38, %v10301_v40 }
 0x4c7   :  { %v2391_v42 = vand.u32 4294901760, %v2390_v22  ;;  %v10236_v45 = vand.u32 4294901760, %v2365_v39  ;;  %2783 = vmatpush.msrb.mxu3 %v10036_v7  ;;  %v10253_v7 = vsub.f32 %v3146_v48, %v10234_v5  ;;  %v3459_v11 = vand.u32 4294901760, %v10294_v56  ;;  %v3170_v22 = vpop.trf.xlu2 }
 0x4c8   :  { %2719 = vmatpush.msrb.mxu1 %v10069_v25  ;;  %2756 = vmatpush.msrb.mxu2 %v10121_v15 }
 0x4c9   :  { %2785 = vmatpush.msrb.mxu3 %v10045_v63  ;;  %2392 = vmatmul.f32.vlgmr.msrb.gmra.mxu0 %v2391_v42  ;;  %v2396_v9 = vsub.f32 %v2365_v39, %v10236_v45  ;;  %v3261_v46 = vand.u32 4294901760, %v10253_v7 }
 0x4ca   :  { %2445 = vmatmul.f32.gmra.mxu1 %v10236_v45  ;;  %2679 = vmatpush.msrb.mxu0 %v10062_v55  ;;  %v3244_v55 = vsub.f32 %v10229_v31, %v3243_v35 }
 0x4cb   :  { %2760 = vmatpush.msrb.mxu2 %v10131_v13  ;;  %2787 = vmatpush.msrb.mxu3 %v10055_v0  ;;  %v2397_v63 = vand.u32 4294901760, %v2396_v9  ;;  %v3250_v0 = vsub.f32 %v10240_v12, %v3249_v27 }
 0x4cc   :  { %2480 = vmatmul.f32.gmra.mxu2 %v2396_v9  ;;  %2682 = vmatpush.msrb.mxu0 %v10077_v33  ;;  %v3256_v33 = vsub.f32 %v10248_v61, %v3255_v60 }
 0x4cd   :  { %2789 = vmatpush.msrb.mxu3 %v10069_v25  ;;  %v2398_v15 = vsub.f32 %v2396_v9, %v2397_v63  ;;  %v3245_v25 = vand.u32 4294901760, %v3244_v55  ;;  %v3251_v52 = vand.u32 4294901760, %v3250_v0  ;;  %v3471_v9 = vand.u32 4294901760, %v10320_v4 }
 0x4ce   :  { %2513 = vmatmul.f32.gmra.mxu3 %v2397_v63  ;;  %2685 = vmatpush.msrb.mxu0 %v10094_v16  ;;  %v3262_v16 = vsub.f32 %v10253_v7, %v3261_v46  ;;  %v3187_v55 = vsel %vm25_vm0, %v3170_v22, 0  ;;  %v2799_v22 = vlaneseq }
 0x4cf   :  { %v2399_v13 = vand.u32 4294901760, %v2398_v15 }
 0x4d0   :  { %2688 = vmatpush.msrb.mxu0 %v10108_v21  ;;  %v3257_v21 = vand.u32 4294901760, %v3256_v33  ;;  %v3263_v14 = vand.u32 4294901760, %v3262_v16 }
 0x4d1   :  { %2400 = vmatmul.f32.gmra.mxu0 %v2399_v13 }
 0x4d2   :  { %2575 = vmatmul.f32.vlgmr.msra.gmra.mxu1 %v10211_v51 }
 0x4d3   :  { %3246 = vmatpush.msra.mxu1 %v3245_v25 }
 0x4d4   :  { %2608 = vmatmul.f32.vlgmr.msra.gmra.mxu2 %v10083_v58  ;;  %v8883_v58 = vld [vmem:[%s12513_s1 + $0x30] sm:$0xff] }
 0x4d5   :  { %3252 = vmatpush.msra.mxu1 %v3251_v52  ;;  %3288 = vmatpush.msra.mxu2 %v10229_v31  ;;  %v10290_v3 = vand.u32 4294901760, %v8883_v58 }
 0x4d6   :  { %2657 = vmatmul.f32.vlgmr.msra.gmra.mxu3 %v10029_v30 }
 0x4d7   :  { %3258 = vmatpush.msra.mxu1 %v3257_v21  ;;  %3291 = vmatpush.msra.mxu2 %v10240_v12  ;;  %v10308_v48 = vsub.f32 %v8883_v58, %v10290_v3 }
 0x4d8   :  { %3322 = vmatpush.msra.mxu3 %v10215_v49 }
 0x4d9   :  { %3264 = vmatpush.msra.mxu1 %v3263_v14  ;;  %3294 = vmatpush.msra.mxu2 %v10248_v61  ;;  %v3465_v39 = vand.u32 4294901760, %v10308_v48  ;;  %v10391_v61 = vand.u32 4294901760, %v10011_v34 }
 0x4da   :  { %3324 = vmatpush.msra.mxu3 %v10222_v32  ;;  %2546 = vmatmul.f32.vlgmr.msra.gmra.mxu0 %v10211_v51  ;;  %v8885_v51 = vld [vmem:[%s12513_s1 + $0x20] sm:$0xff]  ;;  %s8889_s1 = smov 64  }
 0x4db   :  { %2579 = vmatmul.f32.gmra.mxu1 %v10236_v45  ;;  %3205 = vmatpush.msra.mxu0 %v10215_v49  ;;  %v10313_v44 = vand.u32 4294901760, %v8885_v51  ;;  %v3466_v63 = vsub.f32 %v10308_v48, %v3465_v39  ;;  %v10420_v33 = vsub.f32 %v10011_v34, %v10391_v61 }
 0x4dc   :  { %3297 = vmatpush.msra.mxu2 %v10253_v7  ;;  %3326 = vmatpush.msra.mxu3 %v10226_v26  ;;  %v10400_v7 = vand.u32 4294901760, %v9994_v54 }
 0x4dd   :  { %2616 = vmatmul.f32.gmra.mxu2 %v10133_v57  ;;  %3207 = vmatpush.msra.mxu0 %v10222_v32  ;;  %v10326_v42 = vsub.f32 %v8885_v51, %v10313_v44  ;;  %v3460_v57 = vsub.f32 %v10294_v56, %v3459_v11  ;;  %v10443_v21 = vand.u32 4294901760, %v10420_v33 }
 0x4de   :  { %3328 = vmatpush.msra.mxu3 %v10234_v5  ;;  %v10434_v16 = vsub.f32 %v9994_v54, %v10400_v7 }
 0x4df   :  { %2661 = vmatmul.f32.gmra.mxu3 %v10081_v41  ;;  %3209 = vmatpush.msra.mxu0 %v10226_v26  ;;  %v3477_v15 = vand.u32 4294901760, %v10326_v42  ;;  %v3461_v13 = vand.u32 4294901760, %v3460_v57  ;;  %v3694_v58 = vsub.f32 %v10420_v33, %v10443_v21  ;;  %v10502_v57 = vshrl.u32 %v2799_v22, 7 }
 0x4e1   :  { %3211 = vmatpush.msra.mxu0 %v10234_v5  ;;  %v3478_v0 = vsub.f32 %v10326_v42, %v3477_v15  ;;  %v3695_v38 = vand.u32 4294901760, %v3694_v58  ;;  %12583 = vst [vmem:[#allocation4_spill] sm:$0xff] %v10502_v57 }
 0x4e2   :  { %2550 = vmatmul.f32.gmra.mxu0 %v10236_v45  ;;  %v3472_v45 = vsub.f32 %v10320_v4, %v3471_v9 }
 0x4e3   :  { %2723 = vmatmul.f32.vlgmr.msrb.gmra.mxu1 %v10051_v6  ;;  %v10345_v6 = vand.u32 4294901760, %v3187_v55 }
 0x4e4   :  { %3392 = vmatpush.msrb.mxu1 %v10215_v49  ;;  %v3467_v49 = vand.u32 4294901760, %v3466_v63  ;;  %v3473_v25 = vand.u32 4294901760, %v3472_v45  ;;  %v12518_v45 = vmov 0.0  }
 0x4e5   :  { %2762 = vmatmul.f32.vlgmr.msrb.gmra.mxu2 %v10029_v30 }
 0x4e6   :  { %3394 = vmatpush.msrb.mxu1 %v10222_v32  ;;  %3421 = vmatpush.msrb.mxu2 %v10282_v24  ;;  %v3171_v32 = vpop.trf.xlu2 }
 0x4e7   :  { %2791 = vmatmul.f32.vlgmr.msrb.gmra.mxu3 %v10029_v30  ;;  %v10357_v30 = vsub.f32 %v3187_v55, %v10345_v6 }
 0x4e8   :  { %3396 = vmatpush.msrb.mxu1 %v10226_v26  ;;  %3423 = vmatpush.msrb.mxu2 %v10290_v3  ;;  %v3479_v26 = vand.u32 4294901760, %v3478_v0 }
 0x4e9   :  { %3462 = vmatpush.msrb.mxu3 %v3461_v13  ;;  %v10371_v31 = vand.u32 4294901760, %v10357_v30 }
 0x4ea   :  { %3398 = vmatpush.msrb.mxu1 %v10234_v5  ;;  %2691 = vmatmul.f32.vlgmr.msrb.gmra.mxu0 %v10039_v1  ;;  %v3190_v1 = vsel %vm25_vm0, %v3171_v32, 0  ;;  %v10376_v5 = vand.u32 4294901760, %v10032_v20 }
 0x4eb   :  { %2729 = vmatmul.f32.gmra.mxu1 %v10112_v18  ;;  %3357 = vmatpush.msrb.mxu0 %v3243_v35  ;;  %v10368_v18 = vand.u32 4294901760, %v3190_v1  ;;  %v3215_v35 = vsub.f32 %v10357_v30, %v10371_v31 }
 0x4ec   :  { %3425 = vmatpush.msrb.mxu2 %v10301_v40  ;;  %3468 = vmatpush.msrb.mxu3 %v3467_v49 }
 0x4ed   :  { %2766 = vmatmul.f32.gmra.mxu2 %v10081_v41  ;;  %3361 = vmatpush.msrb.mxu0 %v3249_v27  ;;  %v10384_v12 = vsub.f32 %v3190_v1, %v10368_v18  ;;  %v10402_v27 = vand.u32 4294901760, %v3215_v35 }
 0x4ee   :  { %3427 = vmatpush.msrb.mxu2 %v10313_v44  ;;  %3474 = vmatpush.msrb.mxu3 %v3473_v25  ;;  %v10515_v25 = vadd.s32 8, %v10502_v57 }
 0x4ef   :  { %2795 = vmatmul.f32.gmra.mxu3 %v10081_v41  ;;  %3365 = vmatpush.msrb.mxu0 %v3255_v60  ;;  %v10381_v41 = vand.u32 4294901760, %v10014_v50  ;;  %v10405_v60 = vand.u32 4294901760, %v10384_v12 }
 0x4f0   :  { %3480 = vmatpush.msrb.mxu3 %v3479_v26  ;;  %12586 = vst [vmem:[#allocation7_spill] sm:$0xff] %v10515_v25 }
 0x4f1   :  { %3369 = vmatpush.msrb.mxu0 %v3261_v46  ;;  %v10410_v46 = vsub.f32 %v10014_v50, %v10381_v41  ;;  %v3223_v50 = vsub.f32 %v10384_v12, %v10405_v60 }
 0x4f2   :  { %2696 = vmatmul.f32.gmra.mxu0 %v10097_v28  ;;  %v10396_v28 = vsub.f32 %v10032_v20, %v10376_v5 }
 0x4f3   :  { %3266 = vmatmul.f32.vlgmr.msra.gmra.mxu1 %v10345_v6  ;;  %v10430_v52 = vand.u32 4294901760, %v10410_v46  ;;  %v10447_v2 = vand.u32 4294901760, %v3223_v50 }
 0x4f4   :  { %3538 = vmatpush.msra.mxu1 %v10282_v24  ;;  %v10416_v20 = vand.u32 4294901760, %v10396_v28 }
 0x4f5   :  { %3300 = vmatmul.f32.vlgmr.msra.gmra.mxu2 %v10357_v30  ;;  %v3688_v54 = vsub.f32 %v10410_v46, %v10430_v52 }
 0x4f6   :  { %3540 = vmatpush.msra.mxu1 %v10290_v3  ;;  %3573 = vmatpush.msra.mxu2 %v3459_v11  ;;  %v3682_v34 = vsub.f32 %v10396_v28, %v10416_v20 }
 0x4f7   :  { %3332 = vmatmul.f32.vlgmr.msra.gmra.mxu3 %v10371_v31 }
 0x4f8   :  { %3542 = vmatpush.msra.mxu1 %v10301_v40  ;;  %3577 = vmatpush.msra.mxu2 %v3465_v39  ;;  %v3683_v14 = vand.u32 4294901760, %v3682_v34 }
 0x4f9   :  { %3608 = vmatpush.msra.mxu3 %v10282_v24  ;;  %v10453_v24 = vand.u32 4294901760, %v10434_v16 }
 0x4fa   :  { %3217 = vmatmul.f32.vlgmr.msra.gmra.mxu0 %v10402_v27  ;;  %3544 = vmatpush.msra.mxu1 %v10313_v44 }
 0x4fb   :  { %3270 = vmatmul.f32.gmra.mxu1 %v10368_v18  ;;  %3581 = vmatpush.msra.mxu2 %v3471_v9  ;;  %v10504_v9 = vand.u32 127, %v2799_v22 }
 0x4fc   :  { %3610 = vmatpush.msra.mxu3 %v10290_v3  ;;  %3504 = vmatpush.msra.mxu0 %v10294_v56  ;;  %v3689_v3 = vand.u32 4294901760, %v3688_v54  ;;  %v3700_v56 = vsub.f32 %v10434_v16, %v10453_v24 }
 0x4fd   :  { %3305 = vmatmul.f32.gmra.mxu2 %v10384_v12  ;;  %12584 = vst [vmem:[#allocation5_spill] sm:$0xff] %v10504_v9  ;;  %vm2804_vm13 = vcmp.eq.s32.totalorder %v10502_v57, %v10504_v9  ;;  %vm2805_vm14 = vcmp.eq.s32.totalorder %v10515_v25, %v10504_v9 }
 0x4fe   :  { %3585 = vmatpush.msra.mxu2 %v3477_v15  ;;  %3612 = vmatpush.msra.mxu3 %v10301_v40  ;;  %v3701_v40 = vand.u32 4294901760, %v3700_v56  ;;  %v10512_v49 = vsel %vm2804_vm13, 1.0, %v12518_v45  ;;  %v10533_v56 = vsel %vm2805_vm14, 1.0, %v12518_v45 }
 0x4ff   :  { %3338 = vmatmul.f32.gmra.mxu3 %v10405_v60  ;;  %3507 = vmatpush.msra.mxu0 %v10308_v48  ;;  %12585 = vst [vmem:[#allocation6_spill] sm:$0xff] %v10512_v49  ;;  %v10520_v34 = vsub.f32 1.0, %v10512_v49 }
 0x500   :  { %3614 = vmatpush.msra.mxu3 %v10313_v44  ;;  %12590 = vst [vmem:[#allocation11_spill] sm:$0xff] %v10533_v56 }
 0x501   :  { %3510 = vmatpush.msra.mxu0 %v10320_v4  ;;  %12588 = vst [vmem:[#allocation9_spill] sm:$0xff] %v10520_v34 }
 0x502   :  { %3225 = vmatmul.f32.gmra.mxu0 %v10447_v2 }
 0x503   :  { %3400 = vmatmul.f32.vlgmr.msrb.gmra.mxu1 %v10345_v6  ;;  %3513 = vmatpush.msra.mxu0 %v10326_v42 }
 0x504   :  { %3684 = vmatpush.msrb.mxu1 %v3683_v14 }
 0x505   :  { %3433 = vmatmul.f32.vlgmr.msrb.gmra.mxu2 %v10402_v27 }
 0x506   :  { %3690 = vmatpush.msrb.mxu1 %v3689_v3  ;;  %3726 = vmatpush.msrb.mxu2 %v10396_v28 }
 0x507   :  { %3482 = vmatmul.f32.vlgmr.msrb.gmra.mxu3 %v10345_v6 }
 0x508   :  { %3696 = vmatpush.msrb.mxu1 %v3695_v38  ;;  %3729 = vmatpush.msrb.mxu2 %v10410_v46 }
 0x509   :  { %3760 = vmatpush.msrb.mxu3 %v10376_v5 }
 0x50a   :  { %3702 = vmatpush.msrb.mxu1 %v3701_v40  ;;  %3732 = vmatpush.msrb.mxu2 %v10420_v33 }
 0x50b   :  { %3762 = vmatpush.msrb.mxu3 %v10381_v41  ;;  %3371 = vmatmul.f32.vlgmr.msrb.gmra.mxu0 %v10345_v6 }
 0x50c   :  { %3404 = vmatmul.f32.gmra.mxu1 %v10368_v18  ;;  %3643 = vmatpush.msrb.mxu0 %v10376_v5 }
 0x50d   :  { %3735 = vmatpush.msrb.mxu2 %v10434_v16  ;;  %3764 = vmatpush.msrb.mxu3 %v10391_v61 }
 0x50e   :  { %3441 = vmatmul.f32.gmra.mxu2 %v10447_v2  ;;  %3645 = vmatpush.msrb.mxu0 %v10381_v41 }
 0x50f   :  { %3766 = vmatpush.msrb.mxu3 %v10400_v7 }
 0x510   :  { %3486 = vmatmul.f32.gmra.mxu3 %v10368_v18  ;;  %3647 = vmatpush.msrb.mxu0 %v10391_v61 }
 0x512   :  { %3649 = vmatpush.msrb.mxu0 %v10400_v7 }
 0x513   :  { %3375 = vmatmul.f32.gmra.mxu0 %v10368_v18 }
 0x514   :  { %3548 = vmatmul.f32.vlgmr.msra.gmra.mxu1 %v10371_v31 }
 0x515   :  { %3830 = vmatpush.msra.mxu1 %v10376_v5 }
 0x516   :  { %3587 = vmatmul.f32.vlgmr.msra.gmra.mxu2 %v10345_v6 }
 0x517   :  { %3832 = vmatpush.msra.mxu1 %v10381_v41  ;;  %3859 = vmatpush.msra.mxu2 %v10376_v5 }
 0x518   :  { %3616 = vmatmul.f32.vlgmr.msra.gmra.mxu3 %v10345_v6 }
 0x519   :  { %3834 = vmatpush.msra.mxu1 %v10391_v61  ;;  %3861 = vmatpush.msra.mxu2 %v10381_v41 }
 0x51a   :  { %3900 = vmatpush.msra.mxu3 %v3683_v14 }
 0x51b   :  { %3836 = vmatpush.msra.mxu1 %v10400_v7  ;;  %3863 = vmatpush.msra.mxu2 %v10391_v61 }
 0x51c   :  { %3906 = vmatpush.msra.mxu3 %v3689_v3  ;;  %3516 = vmatmul.f32.vlgmr.msra.gmra.mxu0 %v10357_v30 }
 0x51d   :  { %3554 = vmatmul.f32.gmra.mxu1 %v10405_v60  ;;  %3795 = vmatpush.msra.mxu0 %v10416_v20 }
 0x51e   :  { %3865 = vmatpush.msra.mxu2 %v10400_v7  ;;  %3912 = vmatpush.msra.mxu3 %v3695_v38 }
 0x51f   :  { %3591 = vmatmul.f32.gmra.mxu2 %v10368_v18  ;;  %3799 = vmatpush.msra.mxu0 %v10430_v52 }
 0x520   :  { %3918 = vmatpush.msra.mxu3 %v3701_v40 }
 0x521   :  { %3620 = vmatmul.f32.gmra.mxu3 %v10368_v18  ;;  %3803 = vmatpush.msra.mxu0 %v10443_v21 }
 0x523   :  { %3807 = vmatpush.msra.mxu0 %v10453_v24 }
 0x524   :  { %3521 = vmatmul.f32.gmra.mxu0 %v10384_v12 }
 0x53e   :  { %v2442_v48 = vpop.f32.mrf.mxu1 }
 0x546   :  { %v2393_v51 = vpop.f32.mrf.mxu0  ;;  %v2476_v44 = vpop.f32.mrf.mxu2 }
 0x547   :  { %v2446_v11 = vpop.f32.mrf.mxu1  ;;  %v2443_v39 = vadd.f32 %v2442_v48, %v2393_v51 }
 0x548   :  { %v2508_v4 = vpop.f32.mrf.mxu3 }
 0x549   :  { %v2477_v13 = vadd.f32 %v2476_v44, %v2443_v39 }
 0x54b   :  { %v2509_v0 = vadd.f32 %v2508_v4, %v2477_v13  ;;  %v12520_v4 = vsub.f32 1.0, %v10533_v56 }
 0x54e   :  { %v2401_v42 = vpop.f32.mrf.mxu0 }
 0x54f   :  { %v2481_v63 = vpop.f32.mrf.mxu2  ;;  %v2576_v15 = vpop.f32.mrf.mxu1  ;;  %v2447_v32 = vadd.f32 %v2446_v11, %v2401_v42 }
 0x551   :  { %v2514_v55 = vpop.f32.mrf.mxu3  ;;  %v2482_v14 = vadd.f32 %v2481_v63, %v2447_v32 }
 0x553   :  { %v2515_v38 = vadd.f32 %v2514_v55, %v2482_v14 }
 0x557   :  { %v2547_v26 = vpop.f32.mrf.mxu0  ;;  %v10517_v1 = vpop.f32.mrf.mxu2 }
 0x558   :  { %12587 = vst [vmem:[#allocation8_spill] sm:$0xff] %v10517_v1  ;;  %v2548_v35 = vadd.f32 %v2547_v26, %v2509_v0  ;;  %v2580_v50 = vpop.f32.mrf.mxu1 }
 0x559   :  { %v10522_v54 = vpop.f32.mrf.mxu3 }
 0x55a   :  { %12589 = vst [vmem:[#allocation10_spill] sm:$0xff] %v10522_v54  ;;  %v2577_v58 = vadd.f32 %v2576_v15, %v2548_v35 }
 0x55c   :  { %v10527_v3 = vmul.f32 %v10520_v34, %v2577_v58  ;;  %v2818_v42 = vmul.f32 %v10512_v49, %v2577_v58 }
 0x55e   :  { %v2952_v40 = vsel %vm408_vm7, %v10527_v3, 0.0  ;;  %v2820_v13 = vsel %vm408_vm7, %v2818_v42, 0.0 }
 0x55f   :  { %v2551_v48 = vpop.f32.mrf.mxu0  ;;  %2953 = vadd.xlane.f32.xlu0 %v2952_v40 }
 0x560   :  { %v2552_v51 = vadd.f32 %v2551_v48, %v2515_v38  ;;  %v10537_v44 = vpop.f32.mrf.mxu2  ;;  %v10539_v11 = vpop.f32.mrf.mxu1 }
 0x561   :  { %12591 = vst [vmem:[#allocation12_spill] sm:$0xff] %v10537_v44 }
 0x562   :  { %12592 = vst [vmem:[#allocation13_spill] sm:$0xff] %v10539_v11  ;;  %v2581_v22 = vadd.f32 %v2580_v50, %v2552_v51  ;;  %v10542_v39 = vpop.f32.mrf.mxu3 }
 0x563   :  { %12593 = vst [vmem:[#allocation14_spill] sm:$0xff] %v10542_v39 }
 0x564   :  { %v10547_v63 = vmul.f32 %v12520_v4, %v2581_v22  ;;  %v2819_v15 = vmul.f32 %v10533_v56, %v2581_v22 }
 0x566   :  { %v2955_v55 = vsel %vm408_vm7, %v10547_v63, 0.0  ;;  %v2821_v0 = vsel %vm408_vm7, %v2819_v15, 0.0 }
 0x567   :  { %v10554_v32 = vpop.f32.mrf.mxu0  ;;  %2956 = vadd.xlane.f32.xlu0 %v2955_v55  ;;  %v10556_v26 = vadd.f32 %v2821_v0, %v2820_v13 }
 0x568   :  { %12594 = vst [vmem:[#allocation15_spill] sm:$0xff] %v10554_v32  ;;  %v10558_v35 = vpop.f32.mrf.mxu1  ;;  %v10560_v50 = vpop.f32.mrf.mxu2 }
 0x569   :  { %12595 = vst [vmem:[#allocation16_spill] sm:$0xff] %v10556_v26 }
 0x56a   :  { %12596 = vst [vmem:[#allocation17_spill] sm:$0xff] %v10558_v35  ;;  %v10562_v14 = vpop.f32.mrf.mxu3  ;;  %v2005_v35 = vadd.f32 %v10182_v43, %v10184_v17 }
 0x56b   :  { %12597 = vst [vmem:[#allocation18_spill] sm:$0xff] %v10560_v50 }
 0x56c   :  { %12598 = vst [vmem:[#allocation19_spill] sm:$0xff] %v10562_v14  ;;  %v2039_v54 = vadd.f32 %v10186_v53, %v2005_v35 }
 0x56e   :  { %v2071_v49 = vadd.f32 %v10188_v23, %v2039_v54 }
 0x56f   :  { %v10564_v58 = vpop.f32.mrf.mxu0 }
 0x570   :  { %12599 = vst [vmem:[#allocation20_spill] sm:$0xff] %v10564_v58  ;;  %v10566_v38 = vpop.f32.mrf.mxu2  ;;  %v3267_v40 = vpop.f32.mrf.mxu1  ;;  %v2110_v43 = vadd.f32 %v10200_v37, %v2071_v49 }
 0x571   :  { %12600 = vst [vmem:[#allocation21_spill] sm:$0xff] %v10566_v38  ;;  %v2009_v38 = vadd.f32 %v10190_v8, %v10192_v62 }
 0x572   :  { %v10568_v48 = vpop.f32.mrf.mxu3 }
 0x573   :  { %12601 = vst [vmem:[#allocation22_spill] sm:$0xff] %v10568_v48  ;;  %v2044_v32 = vadd.f32 %v10194_v19, %v2009_v38 }
 0x575   :  { %v2077_v57 = vadd.f32 %v10196_v59, %v2044_v32  ;;  %v10599_v59 = vadd.f32 %v10198_v36, %v2110_v43 }
 0x577   :  { %v3218_v51 = vpop.f32.mrf.mxu0  ;;  %v2114_v8 = vadd.f32 %v10204_v29, %v2077_v57 }
 0x578   :  { %v10570_v22 = vpop.f32.mrf.mxu2  ;;  %v3271_v15 = vpop.f32.mrf.mxu1 }
 0x57a   :  { %v10572_v42 = vpop.f32.mrf.mxu3 }
 0x57f   :  { %v3226_v55 = vpop.f32.mrf.mxu0 }
 0x580   :  { %v3306_v13 = vpop.f32.mrf.mxu2  ;;  %v10576_v45 = vpop.f32.mrf.mxu1  ;;  %v3272_v36 = vadd.f32 %v3271_v15, %v3226_v55 }
 0x582   :  { %v10574_v0 = vpop.f32.mrf.mxu3  ;;  %v3307_v38 = vadd.f32 %v3306_v13, %v3272_v36 }
 0x584   :  { %v3340_v15 = vadd.f32 %v10574_v0, %v3307_v38 }
 0x588   :  { %v10578_v4 = vpop.f32.mrf.mxu0  ;;  %v3434_v47 = vpop.f32.mrf.mxu2 }
 0x589   :  { %v10580_v50 = vpop.f32.mrf.mxu1 }
 0x58a   :  { %v3483_v14 = vpop.f32.mrf.mxu3 }
 0x58b   :  { %v3484_v58 = vadd.f32 %v3483_v14, %v3434_v47  ;;  %v10595_v47 = vadd.f32 %v10202_v10, %v2114_v8 }
 0x58d   :  { %v10604_v57 = vand.u32 4294901760, %v10595_v47 }
 0x590   :  { %v10582_v26 = vpop.f32.mrf.mxu0 }
 0x591   :  { %v3442_v48 = vpop.f32.mrf.mxu2  ;;  %v3549_v1 = vpop.f32.mrf.mxu1 }
 0x593   :  { %v3487_v11 = vpop.f32.mrf.mxu3 }
 0x594   :  { %v3488_v17 = vadd.f32 %v3487_v11, %v3442_v48  ;;  %v3268_v11 = vadd.f32 %v3267_v40, %v3218_v51 }
 0x596   :  { %v3302_v40 = vadd.f32 %v10570_v22, %v3268_v11  ;;  %v3377_v22 = vadd.f32 %v10582_v26, %v3340_v15 }
 0x599   :  { %v3517_v39 = vpop.f32.mrf.mxu0  ;;  %v3588_v25 = vpop.f32.mrf.mxu2 }
 0x59a   :  { %v3518_v44 = vadd.f32 %v3517_v39, %v3484_v58 }
 0x59b   :  { %v3617_v62 = vpop.f32.mrf.mxu3 }
 0x59c   :  { %v3550_v56 = vadd.f32 %v3549_v1, %v3518_v44  ;;  %v3555_v1 = vpop.f32.mrf.mxu1  ;;  %v10616_v44 = vsub.f32 %v10595_v47, %v10604_v57 }
 0x59e   :  { %v3589_v34 = vadd.f32 %v3588_v25, %v3550_v56  ;;  %v10610_v25 = vand.u32 4294901760, %v10599_v59 }
 0x5a0   :  { %v3618_v19 = vadd.f32 %v3617_v62, %v3589_v34  ;;  %v10623_v58 = vsub.f32 %v10599_v59, %v10610_v25 }
 0x5a1   :  { %v3522_v53 = vpop.f32.mrf.mxu0 }
 0x5a2   :  { %v3625_v39 = vsel %vm25_vm0, %v3618_v19, 0  ;;  %v3523_v35 = vadd.f32 %v3522_v53, %v3488_v17  ;;  %v3592_v49 = vpop.f32.mrf.mxu2 }
 0x5a3   :  { %v10601_v23 = vand.u32 4294901760, %v3625_v39 }
 0x5a4   :  { %v3556_v29 = vadd.f32 %v3555_v1, %v3523_v35  ;;  %v3621_v54 = vpop.f32.mrf.mxu3 }
 0x5a5   :  { %v3651_v37 = vsub.f32 %v3625_v39, %v10601_v23  ;;  %3704 = vmatmul.f32.vlgmr.msrb.gmra.mxu1 %v10601_v23 }
 0x5a6   :  { %v3593_v10 = vadd.f32 %v3592_v49, %v3556_v29  ;;  %3976 = vmatpush.msrb.mxu1 %v10376_v5 }
 0x5a7   :  { %v3652_v34 = vand.u32 4294901760, %v3651_v37  ;;  %3738 = vmatmul.f32.vlgmr.msrb.gmra.mxu2 %v3651_v37 }
 0x5a8   :  { %v3622_v56 = vadd.f32 %v3621_v54, %v3593_v10  ;;  %3978 = vmatpush.msrb.mxu1 %v10381_v41  ;;  %4011 = vmatpush.msrb.mxu2 %v10416_v20  ;;  %v10698_v54 = vadd.s32 4294967288, %v10504_v9 }
 0x5a9   :  { %v3653_v32 = vsub.f32 %v3651_v37, %v3652_v34  ;;  %3770 = vmatmul.f32.vlgmr.msrb.gmra.mxu3 %v3652_v34 }
 0x5aa   :  { %v3628_v14 = vsel %vm25_vm0, %v3622_v56, 0  ;;  %3980 = vmatpush.msrb.mxu1 %v10391_v61  ;;  %4015 = vmatpush.msrb.mxu2 %v10430_v52  ;;  %v4352_v52 = vand.u32 4294901760, %v10616_v44 }
 0x5ab   :  { %v3654_v48 = vand.u32 4294901760, %v3653_v32  ;;  %v3658_v20 = vand.u32 4294901760, %v3628_v14  ;;  %4046 = vmatpush.msrb.mxu3 %v10376_v5 }
 0x5ac   :  { %3982 = vmatpush.msrb.mxu1 %v10400_v7  ;;  %4019 = vmatpush.msrb.mxu2 %v10443_v21  ;;  %v4358_v21 = vand.u32 4294901760, %v10623_v58 }
 0x5ad   :  { %4048 = vmatpush.msrb.mxu3 %v10381_v41  ;;  %3655 = vmatmul.f32.vlgmr.msrb.gmra.mxu0 %v3654_v48  ;;  %v3659_v51 = vsub.f32 %v3628_v14, %v3658_v20  ;;  %v3334_v41 = vadd.f32 %v10572_v42, %v3302_v40 }
 0x5ae   :  { %3708 = vmatmul.f32.gmra.mxu1 %v3658_v20  ;;  %3942 = vmatpush.msrb.mxu0 %v10396_v28  ;;  %v4353_v28 = vsub.f32 %v10616_v44, %v4352_v52  ;;  %v4359_v13 = vsub.f32 %v10623_v58, %v4358_v21 }
 0x5af   :  { %4023 = vmatpush.msrb.mxu2 %v10453_v24  ;;  %4050 = vmatpush.msrb.mxu3 %v10391_v61  ;;  %v3660_v5 = vand.u32 4294901760, %v3659_v51  ;;  %v3373_v61 = vadd.f32 %v10578_v4, %v3334_v41 }
 0x5b0   :  { %3743 = vmatmul.f32.gmra.mxu2 %v3659_v51  ;;  %3945 = vmatpush.msrb.mxu0 %v10410_v46  ;;  %v10646_v46 = vadd.f32 %v10580_v50, %v3377_v22  ;;  %v4354_v26 = vand.u32 4294901760, %v4353_v28  ;;  %v4360_v42 = vand.u32 4294901760, %v4359_v13 }
 0x5b1   :  { %4052 = vmatpush.msrb.mxu3 %v10400_v7  ;;  %v3661_v55 = vsub.f32 %v3659_v51, %v3660_v5  ;;  %v10650_v7 = vadd.f32 %v10576_v45, %v3373_v61 }
 0x5b2   :  { %3776 = vmatmul.f32.gmra.mxu3 %v3660_v5  ;;  %3948 = vmatpush.msrb.mxu0 %v10420_v33  ;;  %v10655_v33 = vand.u32 4294901760, %v10646_v46 }
 0x5b3   :  { %v3662_v24 = vand.u32 4294901760, %v3661_v55 }
 0x5b4   :  { %3951 = vmatpush.msrb.mxu0 %v10434_v16  ;;  %v10661_v16 = vand.u32 4294901760, %v10650_v7 }
 0x5b5   :  { %3663 = vmatmul.f32.gmra.mxu0 %v3662_v24 }
 0x5b6   :  { %3838 = vmatmul.f32.vlgmr.msra.gmra.mxu1 %v10601_v23  ;;  %v10672_v45 = vsub.f32 %v10650_v7, %v10661_v16 }
 0x5b7   :  { %4355 = vmatpush.msra.mxu1 %v4354_v26 }
 0x5b8   :  { %3871 = vmatmul.f32.vlgmr.msra.gmra.mxu2 %v10402_v27  ;;  %v10667_v27 = vsub.f32 %v10646_v46, %v10655_v33  ;;  %v4602_v50 = vand.u32 4294901760, %v10672_v45 }
 0x5b9   :  { %4361 = vmatpush.msra.mxu1 %v4360_v42  ;;  %4387 = vmatpush.msra.mxu2 %v10616_v44 }
 0x5ba   :  { %3920 = vmatmul.f32.vlgmr.msra.gmra.mxu3 %v10345_v6  ;;  %v4596_v4 = vand.u32 4294901760, %v10667_v27 }
 0x5bb   :  { %4390 = vmatpush.msra.mxu2 %v10623_v58  ;;  %4417 = vmatpush.msra.mxu3 %v10604_v57 }
 0x5bc   :  { %v4597_v0 = vsub.f32 %v10667_v27, %v4596_v4 }
 0x5bd   :  { %4419 = vmatpush.msra.mxu3 %v10610_v25  ;;  %3809 = vmatmul.f32.vlgmr.msra.gmra.mxu0 %v10601_v23 }
 0x5be   :  { %3842 = vmatmul.f32.gmra.mxu1 %v3658_v20  ;;  %4316 = vmatpush.msra.mxu0 %v10604_v57  ;;  %v4598_v8 = vand.u32 4294901760, %v4597_v0 }
 0x5c0   :  { %3879 = vmatmul.f32.gmra.mxu2 %v10447_v2  ;;  %4318 = vmatpush.msra.mxu0 %v10610_v25  ;;  %v4603_v2 = vsub.f32 %v10672_v45, %v4602_v50 }
 0x5c2   :  { %3924 = vmatmul.f32.gmra.mxu3 %v10368_v18  ;;  %v4604_v62 = vand.u32 4294901760, %v4603_v2 }
 0x5c5   :  { %3813 = vmatmul.f32.gmra.mxu0 %v3658_v20 }
 0x5c6   :  { %3986 = vmatmul.f32.vlgmr.msrb.gmra.mxu1 %v10371_v31 }
 0x5c7   :  { %4479 = vmatpush.msrb.mxu1 %v10604_v57 }
 0x5c8   :  { %4025 = vmatmul.f32.vlgmr.msrb.gmra.mxu2 %v10345_v6 }
 0x5c9   :  { %4481 = vmatpush.msrb.mxu1 %v10610_v25  ;;  %4560 = vmatpush.msrb.mxu2 %v10655_v33 }
 0x5ca   :  { %4054 = vmatmul.f32.vlgmr.msrb.gmra.mxu3 %v10345_v6 }
 0x5cb   :  { %4562 = vmatpush.msrb.mxu2 %v10661_v16  ;;  %4599 = vmatpush.msrb.mxu3 %v4598_v8 }
 0x5cd   :  { %4605 = vmatpush.msrb.mxu3 %v4604_v62  ;;  %3954 = vmatmul.f32.vlgmr.msrb.gmra.mxu0 %v10357_v30 }
 0x5ce   :  { %3992 = vmatmul.f32.gmra.mxu1 %v10405_v60  ;;  %4450 = vmatpush.msrb.mxu0 %v4352_v52 }
 0x5d0   :  { %4029 = vmatmul.f32.gmra.mxu2 %v10368_v18  ;;  %4454 = vmatpush.msrb.mxu0 %v4358_v21 }
 0x5d2   :  { %4058 = vmatmul.f32.gmra.mxu3 %v10368_v18  ;;  %v2954_v31 = vpop.xlane.xlu0 %2953 }
 0x5d3   :  { %8782 = vrsqrt.f32 %v2954_v31  ;;  %vm2965_vm0 = vcmp.eq.f32.partialorder %v2954_v31, inf  ;;  %v2968_v29 = vand.u32 2147483648, %v2954_v31  ;;  %vm2967_vm15 = vcmp.eq.f32.partialorder %v2954_v31, 0.0 }
 0x5d5   :  { %3959 = vmatmul.f32.gmra.mxu0 %v10384_v12 }
 0x5d9   :  { %v8783_v6 = vpop.eup %8782 }
 0x5da   :  { %v2959_v43 = vmul.f32 %v8783_v6, %v2954_v31  ;;  %v2957_v17 = vpop.xlane.xlu0 %2956 }
 0x5db   :  { %8784 = vrsqrt.f32 %v2957_v17  ;;  %vm2977_vm1 = vcmp.eq.f32.partialorder %v2957_v17, inf  ;;  %v2980_v36 = vand.u32 2147483648, %v2957_v17  ;;  %vm2979_vm2 = vcmp.eq.f32.partialorder %v2957_v17, 0.0 }
 0x5dc   :  { %v2960_v19 = vmul.f32 %v8783_v6, %v2959_v43 }
 0x5de   :  { %v2961_v53 = vmul.f32 0.5, %v2960_v19 }
 0x5e0   :  { %v2962_v39 = vsub.f32 1.5, %v2961_v53 }
 0x5e1   :  { %v8785_v30 = vpop.eup %8784 }
 0x5e2   :  { %v2963_v35 = vmul.f32 %v8783_v6, %v2962_v39  ;;  %v2971_v60 = vmul.f32 %v8785_v30, %v2957_v17 }
 0x5e4   :  { %v2964_v1 = vmul.f32 %v2963_v35, %v2954_v31  ;;  %v2972_v23 = vmul.f32 %v8785_v30, %v2971_v60 }
 0x5e6   :  { %v2966_v57 = vsel %vm2965_vm0, %v2954_v31, %v2964_v1  ;;  %v2973_v18 = vmul.f32 0.5, %v2972_v23 }
 0x5e7   :  { %v2969_v37 = vsel %vm2967_vm15, %v2968_v29, %v2966_v57 }
 0x5e8   :  { %v2982_v49 = vadd.f32 1e-15, %v2969_v37  ;;  %v2974_v12 = vsub.f32 1.5, %v2973_v18 }
 0x5ea   :  { %8786 = vrcp.f32 %v2982_v49  ;;  %v2975_v10 = vmul.f32 %v8785_v30, %v2974_v12  ;;  %v3016_v14 = vperm.slane %v2982_v49, %v10504_v9  ;;  %v2993_v15 = vand.u32 2147483647, %v2982_v49 }
 0x5eb   :  { %v2995_v21 = vand.u32 2147483648, %v2982_v49  ;;  %vm2989_vm6 = vweird.f32 %v2982_v49 }
 0x5ec   :  { %v2976_v25 = vmul.f32 %v2975_v10, %v2957_v17  ;;  %vm2994_vm10 = vcmp.eq.f32.partialorder %v2993_v15, 8.507059e+37 }
 0x5ed   :  { %v2996_v42 = vor.u32 1.1754944e-38, %v2995_v21 }
 0x5ee   :  { %v2978_v34 = vsel %vm2977_vm1, %v2957_v17, %v2976_v25 }
 0x5ef   :  { %v2981_v56 = vsel %vm2979_vm2, %v2980_v36, %v2978_v34 }
 0x5f0   :  { %v8787_v44 = vpop.eup %8786  ;;  %v2983_v11 = vadd.f32 1e-15, %v2981_v56 }
 0x5f1   :  { %v2985_v32 = vmul.f32 %v8787_v44, %v2982_v49  ;;  %vm2990_vm4 = vweird.f32 %v8787_v44 }
 0x5f2   :  { %8788 = vrcp.f32 %v2983_v11  ;;  %v3018_v58 = vperm.slane %v2983_v11, %v10698_v54  ;;  %v3010_v55 = vand.u32 2147483648, %v2983_v11  ;;  %vm10703_vm8 = vmor %vm2989_vm6, %vm2990_vm4  ;;  %v3008_v24 = vand.u32 2147483647, %v2983_v11 }
 0x5f3   :  { %v2986_v38 = vsub.f32 1.0, %v2985_v32  ;;  %vm3004_vm11 = vweird.f32 %v2983_v11 }
 0x5f4   :  { %v3020_v48 = vsel %vm3019_vm3, %v3018_v58, %v3016_v14  ;;  %v3011_v31 = vor.u32 1.1754944e-38, %v3010_v55  ;;  %vm3009_vm15 = vcmp.eq.f32.partialorder %v3008_v24, 8.507059e+37 }
 0x5f5   :  { %8790 = vrcp.f32 %v3020_v48  ;;  %v2987_v20 = vmul.f32 %v8787_v44, %v2986_v38  ;;  %v3045_v0 = vand.u32 2147483648, %v3020_v48  ;;  %v3043_v62 = vand.u32 2147483647, %v3020_v48 }
 0x5f6   :  { %vm3039_vm1 = vweird.f32 %v3020_v48 }
 0x5f7   :  { %v2988_v52 = vadd.f32 %v8787_v44, %v2987_v20  ;;  %v3046_v53 = vor.u32 1.1754944e-38, %v3045_v0  ;;  %vm3044_vm4 = vcmp.eq.f32.partialorder %v3043_v62, 8.507059e+37 }
 0x5f8   :  { %v8789_v40 = vpop.eup %8788 }
 0x5f9   :  { %v3000_v51 = vmul.f32 %v8789_v40, %v2983_v11  ;;  %vm3005_vm9 = vweird.f32 %v8789_v40  ;;  %v2992_v13 = vsel %vm10703_vm8, %v8787_v44, %v2988_v52 }
 0x5fa   :  { %vm3006_vm0 = vmor %vm3004_vm11, %vm3005_vm9  ;;  %v2997_v6 = vsel %vm2994_vm10, %v2996_v42, %v2992_v13  ;;  %v12606_v13 = vld [vmem:[#allocation11_spill] sm:$0xff] }
 0x5fb   :  { %v8791_v5 = vpop.eup %8790  ;;  %v3001_v41 = vsub.f32 1.0, %v3000_v51  ;;  %v2998_v30 = vmul.f32 %v2997_v6, %v10527_v3  ;;  %v12604_v51 = vld [vmem:[#allocation9_spill] sm:$0xff] }
 0x5fc   :  { %v3035_v22 = vmul.f32 %v8791_v5, %v3020_v48  ;;  %vm3040_vm12 = vweird.f32 %v8791_v5 }
 0x5fd   :  { %v3002_v61 = vmul.f32 %v8789_v40, %v3001_v41  ;;  %vm3041_vm2 = vmor %vm3039_vm1, %vm3040_vm12 }
 0x5fe   :  { %v3036_v26 = vsub.f32 1.0, %v3035_v22 }
 0x5ff   :  { %v3003_v2 = vadd.f32 %v8789_v40, %v3002_v61  ;;  %v12605_v61 = vld [vmem:[#allocation6_spill] sm:$0xff] }
 0x600   :  { %v3037_v8 = vmul.f32 %v8791_v5, %v3036_v26  ;;  %v12607_v26 = vsub.f32 1.0, %v12606_v13 }
 0x601   :  { %v3007_v43 = vsel %vm3006_vm0, %v8789_v40, %v3003_v2 }
 0x602   :  { %v3038_v17 = vadd.f32 %v8791_v5, %v3037_v8  ;;  %v3012_v19 = vsel %vm3009_vm15, %v3011_v31, %v3007_v43 }
 0x603   :  { %v3013_v39 = vmul.f32 %v3012_v19, %v10547_v63 }
 0x604   :  { %v3042_v35 = vsel %vm3041_vm2, %v8791_v5, %v3038_v17 }
 0x605   :  { %v3047_v60 = vsel %vm3044_vm4, %v3046_v53, %v3042_v35 }
 0x606   :  { %v10711_v1 = vmul.f32 %v3047_v60, %v2998_v30  ;;  %v10713_v23 = vmul.f32 %v3047_v60, %v3013_v39 }
 0x608   :  { %v4296_v29 = vsel %vm408_vm7, %v10711_v1, 0  ;;  %v4299_v57 = vsel %vm408_vm7, %v10713_v23, 0  ;;  %v4289_v6 = vsel %vm408_vm7, %v10711_v1, 0.0  ;;  %v4292_v43 = vsel %vm408_vm7, %v10713_v23, 0.0 }
 0x609   :  { %v4319_v18 = vand.u32 4294901760, %v4296_v29  ;;  %v4327_v37 = vand.u32 4294901760, %v4299_v57 }
 0x60b   :  { %4363 = vmatmul.f32.vlgmr.msra.gmra.mxu1 %v4319_v18  ;;  %v4320_v49 = vsub.f32 %v4296_v29, %v4319_v18  ;;  %v4328_v63 = vsub.f32 %v4299_v57, %v4327_v37 }
 0x60c   :  { %4661 = vmatpush.msra.mxu1 %v10655_v33 }
 0x60d   :  { %4393 = vmatmul.f32.vlgmr.msra.gmra.mxu2 %v4320_v49  ;;  %v4321_v3 = vand.u32 4294901760, %v4320_v49  ;;  %v4329_v25 = vand.u32 4294901760, %v4328_v63 }
 0x60e   :  { %4663 = vmatpush.msra.mxu1 %v10661_v16  ;;  %4694 = vmatpush.msra.mxu2 %v4596_v4 }
 0x60f   :  { %4423 = vmatmul.f32.vlgmr.msra.gmra.mxu3 %v4321_v3  ;;  %v4322_v12 = vsub.f32 %v4320_v49, %v4321_v3  ;;  %v4330_v36 = vsub.f32 %v4328_v63, %v4329_v25 }
 0x610   :  { %4698 = vmatpush.msra.mxu2 %v4602_v50  ;;  %4723 = vmatpush.msra.mxu3 %v10655_v33 }
 0x611   :  { %v4323_v10 = vand.u32 4294901760, %v4322_v12  ;;  %v4331_v4 = vand.u32 4294901760, %v4330_v36 }
 0x612   :  { %4725 = vmatpush.msra.mxu3 %v10661_v16 }
 0x613   :  { %4324 = vmatmul.f32.vlgmr.msra.gmra.mxu0 %v4323_v10  ;;  %4367 = vmatmul.f32.gmra.mxu1 %v4327_v37  ;;  %v4791_v10 = vld [vmem:[%s12515_s3 + $0x90] sm:$0xff] }
 0x614   :  { %4631 = vmatpush.msra.mxu0 %v10667_v27 }
 0x615   :  { %4398 = vmatmul.f32.gmra.mxu2 %v4328_v63 }
 0x616   :  { %4634 = vmatpush.msra.mxu0 %v10672_v45 }
 0x617   :  { %4429 = vmatmul.f32.gmra.mxu3 %v4329_v25 }
 0x61b   :  { %4332 = vmatmul.f32.gmra.mxu0 %v4331_v4  ;;  %4483 = vmatmul.f32.vlgmr.msrb.gmra.mxu1 %v4319_v18 }
 0x622   :  { %v3705_v50 = vpop.f32.mrf.mxu1 }
 0x623   :  { %4456 = vmatmul.f32.vlgmr.msrb.gmra.mxu0 %v4319_v18  ;;  %4487 = vmatmul.f32.gmra.mxu1 %v4327_v37 }
 0x62a   :  { %v3656_v33 = vpop.f32.mrf.mxu0  ;;  %v3739_v16 = vpop.f32.mrf.mxu2 }
 0x62b   :  { %4460 = vmatmul.f32.gmra.mxu0 %v4327_v37  ;;  %v3709_v34 = vpop.f32.mrf.mxu1  ;;  %v3706_v56 = vadd.f32 %v3705_v50, %v3656_v33  ;;  %v4792_v37 = vld [vmem:[%s12515_s3 + $0x98] sm:$0xff]  ;;  %v10800_v50 = vand.u32 4294901760, %v4791_v10 }
 0x62c   :  { %v3771_v32 = vpop.f32.mrf.mxu3  ;;  %v10788_v63 = vand.u32 4294901760, %v4792_v37 }
 0x62d   :  { %v3740_v11 = vadd.f32 %v3739_v16, %v3706_v56 }
 0x62e   :  { %4796 = vmatpush.msrb.mxu0 %v10788_v63  ;;  %v10798_v4 = vsub.f32 %v4792_v37, %v10788_v63 }
 0x62f   :  { %v3772_v27 = vadd.f32 %v3771_v32, %v3740_v11  ;;  %v10811_v32 = vsub.f32 %v4791_v10, %v10800_v50 }
 0x630   :  { %4798 = vmatpush.msrb.mxu0 %v10800_v50 }
 0x632   :  { %v3664_v44 = vpop.f32.mrf.mxu0 }
 0x633   :  { %v3710_v14 = vadd.f32 %v3709_v34, %v3664_v44  ;;  %v3839_v58 = vpop.f32.mrf.mxu1  ;;  %v3744_v48 = vpop.f32.mrf.mxu2  ;;  %v4790_v34 = vld [vmem:[%s12515_s3 + $0x88] sm:$0xff]  ;;  %v12536_v44 = vand.u32 4294901760, %v10798_v4 }
 0x634   :  { %v10808_v11 = vand.u32 4294901760, %v4790_v34 }
 0x635   :  { %v3745_v20 = vadd.f32 %v3744_v48, %v3710_v14  ;;  %v3777_v15 = vpop.f32.mrf.mxu3 }
 0x636   :  { %4800 = vmatpush.msrb.mxu0 %v10808_v11 }
 0x637   :  { %v3778_v5 = vadd.f32 %v3777_v15, %v3745_v20  ;;  %v10824_v20 = vsub.f32 %v4790_v34, %v10808_v11 }
 0x63a   :  { %v3810_v38 = vpop.f32.mrf.mxu0 }
 0x63b   :  { %v3811_v45 = vadd.f32 %v3810_v38, %v3772_v27  ;;  %v3843_v55 = vpop.f32.mrf.mxu1  ;;  %v10758_v17 = vpop.f32.mrf.mxu2  ;;  %v4789_v27 = vld [vmem:[%s12515_s3 + $0x80] sm:$0xff]  ;;  %v12535_v38 = vand.u32 4294901760, %v10811_v32 }
 0x63c   :  { %12609 = vst [vmem:[#allocation11_spill] sm:$0xff] %v10758_v17 }
 0x63d   :  { %v3840_v40 = vadd.f32 %v3839_v58, %v3811_v45  ;;  %v10760_v19 = vpop.f32.mrf.mxu3  ;;  %v4863_v58 = vsub.f32 %v10798_v4, %v12536_v44  ;;  %v10821_v45 = vand.u32 4294901760, %v4789_v27 }
 0x63e   :  { %12610 = vst [vmem:[#allocation23_spill] sm:$0xff] %v10760_v19 }
 0x63f   :  { %v10730_v52 = vmul.f32 %v3840_v40, %v12604_v51  ;;  %v4062_v24 = vmul.f32 %v12605_v61, %v3840_v40  ;;  %v4788_v40 = vld [vmem:[%s12515_s3 + $0x78] sm:$0xff]  ;;  %4802 = vmatpush.msrb.mxu0 %v10821_v45 }
 0x641   :  { %v4192_v21 = vsel %vm408_vm7, %v10730_v52, 0.0  ;;  %v4064_v8 = vsel %vm408_vm7, %v4062_v24, 0.0 }
 0x642   :  { %v3814_v41 = vpop.f32.mrf.mxu0  ;;  %4193 = vadd.xlane.f32.xlu0 %v4192_v21 }
 0x643   :  { %v3815_v22 = vadd.f32 %v3814_v41, %v3778_v5  ;;  %v10764_v39 = vpop.f32.mrf.mxu2  ;;  %v10766_v30 = vpop.f32.mrf.mxu1  ;;  %v4864_v41 = vand.u32 4294901760, %v4863_v58 }
 0x644   :  { %12612 = vst [vmem:[#allocation25_spill] sm:$0xff] %v10764_v39 }
 0x645   :  { %v3844_v28 = vadd.f32 %v3843_v55, %v3815_v22  ;;  %12613 = vst [vmem:[#allocation26_spill] sm:$0xff] %v10766_v30  ;;  %v4869_v22 = vsub.f32 %v10811_v32, %v12535_v38  ;;  %v10833_v55 = vand.u32 4294901760, %v4788_v40  ;;  %4865 = vmatpush.msrb.mxu1 %v4864_v41  ;;  %v10875_v41 = vld [vmem:[%s12515_s3 + $0x60] sm:$0xff] }
 0x647   :  { %v10737_v42 = vmul.f32 %v3844_v28, %v12607_v26  ;;  %v4063_v0 = vmul.f32 %v12606_v13, %v3844_v28  ;;  %v12533_v13 = vand.u32 4294901760, %v10824_v20  ;;  %v10837_v26 = vsub.f32 %v4789_v27, %v10821_v45  ;;  %4804 = vmatpush.msrb.mxu0 %v10833_v55 }
 0x649   :  { %v4195_v2 = vsel %vm408_vm7, %v10737_v42, 0.0  ;;  %v4065_v62 = vsel %vm408_vm7, %v4063_v0, 0.0  ;;  %v4787_v0 = vld [vmem:[%s12515_s3 + $0x70] sm:$0xff]  ;;  %v4875_v37 = vsub.f32 %v10824_v20, %v12533_v13 }
 0x64a   :  { %4196 = vadd.xlane.f32.xlu0 %v4195_v2  ;;  %v10744_v31 = vadd.f32 %v4065_v62, %v4064_v8  ;;  %v10762_v53 = vpop.f32.mrf.mxu0 }
 0x64b   :  { %12611 = vst [vmem:[#allocation24_spill] sm:$0xff] %v10762_v53  ;;  %v4876_v58 = vand.u32 4294901760, %v4875_v37 }
 0x64c   :  { %12608 = vst [vmem:[#allocation9_spill] sm:$0xff] %v10744_v31 }
 0x652   :  { %4290 = vadd.xlane.f32.xlu0 %v4289_v6  ;;  %v10770_v35 = vpop.f32.mrf.mxu0 }
 0x653   :  { %12615 = vst [vmem:[#allocation28_spill] sm:$0xff] %v10770_v35 }
 0x65a   :  { %4293 = vadd.xlane.f32.xlu0 %v4292_v43  ;;  %v4870_v43 = vand.u32 4294901760, %v4869_v22 }
 0x65c   :  { %4871 = vmatpush.msrb.mxu1 %v4870_v43 }
 0x65e   :  { %4877 = vmatpush.msrb.mxu1 %v4876_v58 }
 0x66e   :  { %4525 = vrot.lane.b32.xlu0 %v10599_v59, %s8889_s1  ;;  %v10768_v59 = vpop.f32.mrf.mxu3 }
 0x66f   :  { %12614 = vst [vmem:[#allocation27_spill] sm:$0xff] %v10768_v59 }
 0x676   :  { %4527 = vrot.lane.b32.xlu0 %v10595_v47, %s8889_s1  ;;  %v10772_v47 = vpop.f32.mrf.mxu2  ;;  %v10776_v60 = vpop.f32.mrf.mxu3 }
 0x677   :  { %12616 = vst [vmem:[#allocation29_spill] sm:$0xff] %v10772_v47 }
 0x678   :  { %12618 = vst [vmem:[#allocation31_spill] sm:$0xff] %v10776_v60 }
 0x67e   :  { %4769 = vrot.lane.b32.xlu0 %v10650_v7, %s8889_s1  ;;  %v10774_v7 = vpop.f32.mrf.mxu1  ;;  %v10781_v57 = vpop.f32.mrf.mxu2 }
 0x67f   :  { %12617 = vst [vmem:[#allocation30_spill] sm:$0xff] %v10774_v7  ;;  %v10786_v49 = vpop.f32.mrf.mxu3 }
 0x680   :  { %12619 = vst [vmem:[#allocation32_spill] sm:$0xff] %v10781_v57 }
 0x681   :  { %12620 = vst [vmem:[#allocation33_spill] sm:$0xff] %v10786_v49 }
 0x686   :  { %4771 = vrot.lane.b32.xlu0 %v10646_v46, %s8889_s1 }
 0x688   :  { %v4364_v18 = vpop.f32.mrf.mxu1 }
 0x690   :  { %v4325_v46 = vpop.f32.mrf.mxu0  ;;  %v4394_v56 = vpop.f32.mrf.mxu2 }
 0x691   :  { %v4365_v33 = vadd.f32 %v4364_v18, %v4325_v46  ;;  %v4368_v15 = vpop.f32.mrf.mxu1  ;;  %v10846_v46 = vand.u32 4294901760, %v4787_v0 }
 0x692   :  { %v4424_v5 = vpop.f32.mrf.mxu3 }
 0x693   :  { %v4395_v48 = vadd.f32 %v4394_v56, %v4365_v33  ;;  %4806 = vmatpush.msrb.mxu0 %v10846_v46  ;;  %v4786_v56 = vld [vmem:[%s12515_s3 + $0x68] sm:$0xff] }
 0x695   :  { %v4425_v10 = vadd.f32 %v4424_v5, %v4395_v48 }
 0x698   :  { %v4333_v3 = vpop.f32.mrf.mxu0 }
 0x699   :  { %v4369_v24 = vadd.f32 %v4368_v15, %v4333_v3  ;;  %v12532_v3 = vand.u32 4294901760, %v10837_v26 }
 0x69a   :  { %v4430_v43 = vpop.f32.mrf.mxu3 }
 0x69b   :  { %v4881_v48 = vsub.f32 %v10837_v26, %v12532_v3 }
 0x6a0   :  { %v4457_v2 = vpop.f32.mrf.mxu0 }
 0x6a1   :  { %v4458_v15 = vadd.f32 %v4457_v2, %v4425_v10  ;;  %v10887_v2 = vld [vmem:[%s12515_s3 + $0x58] sm:$0xff] }
 0x6b5   :  { %v10778_v29 = vpop.xlane.xlu0 %4193 }
 0x6b6   :  { %8792 = vrsqrt.f32 %v10778_v29  ;;  %vm4205_vm6 = vcmp.eq.f32.partialorder %v10778_v29, inf  ;;  %vm4207_vm8 = vcmp.eq.f32.partialorder %v10778_v29, 0.0  ;;  %v4208_v34 = vand.u32 2147483648, %v10778_v29 }
 0x6bc   :  { %v8793_v12 = vpop.eup %8792 }
 0x6bd   :  { %v4199_v25 = vmul.f32 %v8793_v12, %v10778_v29  ;;  %v10794_v36 = vpop.xlane.xlu0 %4196 }
 0x6be   :  { %8794 = vrsqrt.f32 %v10794_v36  ;;  %vm4217_vm9 = vcmp.eq.f32.partialorder %v10794_v36, inf  ;;  %vm4219_vm10 = vcmp.eq.f32.partialorder %v10794_v36, 0.0 }
 0x6bf   :  { %v4200_v16 = vmul.f32 %v8793_v12, %v4199_v25 }
 0x6c1   :  { %v4201_v14 = vmul.f32 0.5, %v4200_v16  ;;  %v4399_v16 = vpop.f32.mrf.mxu2 }
 0x6c3   :  { %v4202_v21 = vsub.f32 1.5, %v4201_v14 }
 0x6c4   :  { %v8795_v28 = vpop.eup %8794 }
 0x6c5   :  { %v4203_v8 = vmul.f32 %v8793_v12, %v4202_v21  ;;  %v4211_v62 = vmul.f32 %v8795_v28, %v10794_v36  ;;  %v10843_v6 = vpop.xlane.xlu0 %4290  ;;  %v10856_v12 = vsub.f32 %v4788_v40, %v10833_v55  ;;  %v4400_v40 = vadd.f32 %v4399_v16, %v4369_v24  ;;  %v4484_v16 = vpop.f32.mrf.mxu1 }
 0x6c6   :  { %v10849_v18 = vmax.f32 %v10843_v6, 1.0 }
 0x6c7   :  { %v4204_v25 = vmul.f32 %v4203_v8, %v10778_v29  ;;  %v4212_v33 = vmul.f32 %v8795_v28, %v4211_v62  ;;  %v12531_v21 = vand.u32 4294901760, %v10856_v12  ;;  %v10879_v62 = vand.u32 4294901760, %v4786_v56 }
 0x6c8   :  { %8796 = vrcp.f32 %v10849_v18  ;;  %vm4498_vm11 = vweird.f32 %v10849_v18  ;;  %v4504_v3 = vand.u32 2147483648, %v10849_v18 }
 0x6c9   :  { %v4206_v27 = vsel %vm4205_vm6, %v10778_v29, %v4204_v25  ;;  %v4213_v14 = vmul.f32 0.5, %v4212_v33  ;;  %v4882_v29 = vand.u32 4294901760, %v4881_v48  ;;  %v4887_v24 = vsub.f32 %v10856_v12, %v12531_v21  ;;  %4808 = vmatpush.msrb.mxu0 %v10879_v62  ;;  %v4461_v48 = vpop.f32.mrf.mxu0 }
 0x6ca   :  { %v4209_v5 = vsel %vm4207_vm8, %v4208_v34, %v4206_v27  ;;  %v10894_v25 = vsub.f32 %v4787_v0, %v10846_v46  ;;  %v10897_v33 = vand.u32 4294901760, %v10875_v41  ;;  %v4431_v27 = vadd.f32 %v4430_v43, %v4400_v40 }
 0x6cb   :  { %v10877_v22 = vadd.f32 1e-15, %v4209_v5  ;;  %v4214_v8 = vsub.f32 1.5, %v4213_v14  ;;  %4883 = vmatpush.msrb.mxu1 %v4882_v29  ;;  %v4888_v58 = vand.u32 4294901760, %v4887_v24  ;;  %v4220_v40 = vand.u32 2147483648, %v10794_v36 }
 0x6cc   :  { %4810 = vmatpush.msrb.mxu0 %v10897_v33  ;;  %v12534_v43 = vand.u32 4294901760, %v10894_v25 }
 0x6cd   :  { %8798 = vrcp.f32 %v10877_v22  ;;  %v4215_v37 = vmul.f32 %v8795_v28, %v4214_v8  ;;  %v10890_v10 = vpop.xlane.xlu0 %4293  ;;  %v10904_v28 = vadd.f32 %v4484_v16, %v4458_v15  ;;  %v10911_v8 = vand.u32 4294901760, %v10887_v2  ;;  %4889 = vmatpush.msrb.mxu1 %v4888_v58 }
 0x6ce   :  { %v10899_v34 = vpop.eup %8796  ;;  %v10902_v14 = vmax.f32 %v10890_v10, 1.0  ;;  %v4502_v15 = vand.u32 2147483647, %v10849_v18  ;;  %v10926_v16 = vadd.f32 %v4461_v48, %v4431_v27  ;;  %v10930_v58 = vsub.f32 %v4786_v56, %v10879_v62 }
 0x6cf   :  { %v4216_v5 = vmul.f32 %v4215_v37, %v10794_v36  ;;  %v4494_v0 = vmul.f32 %v10899_v34, %v10849_v18  ;;  %4812 = vmatpush.msrb.mxu0 %v10911_v8  ;;  %v10924_v37 = vld [vmem:[%s12515_s3 + $0x50] sm:$0xff]  ;;  %v4893_v13 = vsub.f32 %v10894_v25, %v12534_v43  ;;  %v4256_v48 = vperm.slane %v10877_v22, %v10504_v9 }
 0x6d0   :  { %8800 = vrcp.f32 %v10902_v14  ;;  %vm10941_vm12 = vcmp.eq.f32.partialorder %v4502_v15, 8.507059e+37  ;;  %vm4499_vm0 = vweird.f32 %v10899_v34  ;;  %v4235_v43 = vand.u32 2147483648, %v10877_v22 }
 0x6d1   :  { %v4218_v29 = vsel %vm4217_vm9, %v10794_v36, %v4216_v5  ;;  %v4495_v24 = vsub.f32 1.0, %v4494_v0  ;;  %v4894_v38 = vand.u32 4294901760, %v4893_v13  ;;  %vm10974_vm15 = vmor %vm4498_vm11, %vm4499_vm0  ;;  %vm4229_vm1 = vweird.f32 %v10877_v22 }
 0x6d2   :  { %v4221_v21 = vsel %vm4219_vm10, %v4220_v40, %v4218_v29  ;;  %v12625_v47 = vand.u32 4294901760, %v10930_v58  ;;  %v11019_v27 = vsub.f32 %v10887_v2, %v10911_v8  ;;  %vm4513_vm11 = vweird.f32 %v10902_v14 }
 0x6d3   :  { %v10932_v5 = vpop.eup %8798  ;;  %v10934_v36 = vadd.f32 1e-15, %v4221_v21  ;;  %v4496_v0 = vmul.f32 %v10899_v34, %v4495_v24  ;;  %v10950_v21 = vand.u32 4294901760, %v10924_v37  ;;  %4895 = vmatpush.msrb.mxu1 %v4894_v38 }
 0x6d4   :  { %v4225_v56 = vmul.f32 %v10932_v5, %v10877_v22  ;;  %v4899_v31 = vsub.f32 %v10930_v58, %v12625_v47 }
 0x6d5   :  { %8802 = vrcp.f32 %v10934_v36  ;;  %v4497_v40 = vadd.f32 %v10899_v34, %v4496_v0  ;;  %v4257_v15 = vperm.slane %v10934_v36, %v10698_v54  ;;  %4814 = vmatpush.msrb.mxu0 %v10950_v21  ;;  %v4233_v0 = vand.u32 2147483647, %v10877_v22 }
 0x6d6   :  { %v10957_v29 = vpop.eup %8800  ;;  %v4226_v24 = vsub.f32 1.0, %v4225_v56  ;;  %v10970_v54 = vsub.f32 %v10875_v41, %v10897_v33  ;;  %v4505_v56 = vor.u32 1.1754944e-38, %v4504_v3  ;;  %v4236_v3 = vor.u32 1.1754944e-38, %v4235_v43  ;;  %v4782_v43 = vld [vmem:[%s12515_s3 + $0x48] sm:$0xff] }
 0x6d7   :  { %v4509_v60 = vmul.f32 %v10957_v29, %v10902_v14  ;;  %v10966_v49 = vsel %vm3019_vm3, %v4257_v15, %v4256_v48  ;;  %v4501_v48 = vsel %vm10974_vm15, %v10899_v34, %v4497_v40  ;;  %v4248_v15 = vand.u32 2147483647, %v10934_v36 }
 0x6d8   :  { %8804 = vrcp.f32 %v10966_v49  ;;  %v4227_v18 = vmul.f32 %v10932_v5, %v4226_v24  ;;  %vm4230_vm3 = vweird.f32 %v10932_v5  ;;  %v4250_v44 = vand.u32 2147483648, %v10934_v36 }
 0x6d9   :  { %v4510_v57 = vsub.f32 1.0, %v4509_v60  ;;  %vm10992_vm2 = vcmp.eq.f32.partialorder %v4233_v0, 8.507059e+37  ;;  %v4275_v34 = vand.u32 2147483647, %v10966_v49  ;;  %vm4244_vm4 = vweird.f32 %v10934_v36 }
 0x6da   :  { %v12537_v40 = vand.u32 4294901760, %v10970_v54  ;;  %v11004_v24 = vsel %vm10941_vm12, %v4505_v56, %v4501_v48  ;;  %v4277_v47 = vand.u32 2147483648, %v10966_v49  ;;  %v4900_v0 = vand.u32 4294901760, %v4899_v31  ;;  %vm11042_vm12 = vmor %vm4229_vm1, %vm4230_vm3 }
 0x6db   :  { %v8803_v38 = vpop.eup %8802  ;;  %v4228_v41 = vadd.f32 %v10932_v5, %v4227_v18  ;;  %vm4271_vm6 = vweird.f32 %v10966_v49  ;;  %vm11010_vm8 = vcmp.eq.f32.partialorder %v4248_v15, 8.507059e+37  ;;  %vm4514_vm9 = vweird.f32 %v10957_v29 }
 0x6dc   :  { %v4240_v60 = vmul.f32 %v8803_v38, %v10934_v36  ;;  %v4905_v7 = vsub.f32 %v10970_v54, %v12537_v40  ;;  %v4251_v48 = vor.u32 1.1754944e-38, %v4250_v44  ;;  %4901 = vmatpush.msrb.mxu1 %v4900_v0  ;;  %v11022_v18 = vand.u32 4294901760, %v4782_v43  ;;  %v4781_v40 = vld [vmem:[%s12515_s3 + $0x40] sm:$0xff] }
 0x6dd   :  { %v11026_v15 = vsub.f32 %v10924_v37, %v10950_v21  ;;  %v4511_v53 = vmul.f32 %v10957_v29, %v4510_v57  ;;  %vm11033_vm10 = vcmp.eq.f32.partialorder %v4275_v34, 8.507059e+37  ;;  %vm4245_vm0 = vweird.f32 %v8803_v38 }
 0x6de   :  { %v8805_v56 = vpop.eup %8804  ;;  %v4241_v31 = vsub.f32 1.0, %v4240_v60  ;;  %v4906_v44 = vand.u32 4294901760, %v4905_v7  ;;  %v12539_v57 = vand.u32 4294901760, %v11019_v27  ;;  %4816 = vmatpush.msrb.mxu0 %v11022_v18  ;;  %v4780_v7 = vld [vmem:[%s12515_s3 + $0x38] sm:$0xff]  ;;  %v4232_v22 = vsel %vm11042_vm12, %v10932_v5, %v4228_v41  ;;  %vm4246_vm1 = vmor %vm4244_vm4, %vm4245_vm0 }
 0x6df   :  { %v4267_v2 = vmul.f32 %v8805_v56, %v10966_v49  ;;  %v12538_v34 = vand.u32 4294901760, %v11026_v15  ;;  %v4278_v19 = vor.u32 1.1754944e-38, %v4277_v47  ;;  %v11055_v17 = vand.u32 4294901760, %v4781_v40 }
 0x6e0   :  { %v4242_v60 = vmul.f32 %v8803_v38, %v4241_v31  ;;  %4907 = vmatpush.msrb.mxu1 %v4906_v44  ;;  %vm4272_vm15 = vweird.f32 %v8805_v56  ;;  %v4911_v59 = vsub.f32 %v11019_v27, %v12539_v57  ;;  %v11068_v5 = vsub.f32 %v4782_v43, %v11022_v18  ;;  %v4778_v57 = vld [vmem:[%s12515_s3 + $0x28] sm:$0xff]  ;;  %v4526_v9 = vpop.permute.xlu0 %4525 }
 0x6e1   :  { %v4268_v0 = vsub.f32 1.0, %v4267_v2  ;;  %v4917_v39 = vsub.f32 %v11026_v15, %v12538_v34  ;;  %4818 = vmatpush.msrb.mxu0 %v11055_v17  ;;  %v11070_v41 = vand.u32 4294901760, %v4780_v7  ;;  %v11073_v47 = vsub.f32 %v4781_v40, %v11055_v17  ;;  %v4779_v2 = vld [vmem:[%s12515_s3 + $0x30] sm:$0xff]  ;;  %vm4273_vm3 = vmor %vm4271_vm6, %vm4272_vm15 }
 0x6e2   :  { %v4243_v31 = vadd.f32 %v8803_v38, %v4242_v60  ;;  %v4237_v44 = vsel %vm10992_vm2, %v4236_v3, %v4232_v22  ;;  %v4912_v36 = vand.u32 4294901760, %v4911_v59  ;;  %v4922_v34 = vand.u32 4294901760, %v11068_v5  ;;  %vm11117_vm2 = vmor %vm4513_vm11, %vm4514_vm9 }
 0x6e3   :  { %v4269_v61 = vmul.f32 %v8805_v56, %v4268_v0  ;;  %v4918_v60 = vand.u32 4294901760, %v4917_v39  ;;  %4820 = vmatpush.msrb.mxu0 %v11070_v41  ;;  %v4928_v40 = vand.u32 4294901760, %v11073_v47  ;;  %v4512_v3 = vadd.f32 %v10957_v29, %v4511_v53 }
 0x6e4   :  { %v4247_v37 = vsel %vm4246_vm1, %v8803_v38, %v4243_v31  ;;  %4913 = vmatpush.msrb.mxu1 %v4912_v36  ;;  %v11093_v39 = vand.u32 4294901760, %v4779_v2  ;;  %v11096_v30 = vsub.f32 %v4780_v7, %v11070_v41  ;;  %v4238_v59 = vmul.f32 %v4237_v44, %v10730_v52 }
 0x6e5   :  { %v4270_v0 = vadd.f32 %v8805_v56, %v4269_v61  ;;  %v4252_v43 = vsel %vm11010_vm8, %v4251_v48, %v4247_v37  ;;  %v4923_v13 = vsub.f32 %v11068_v5, %v4922_v34  ;;  %v4929_v53 = vsub.f32 %v11073_v47, %v4928_v40  ;;  %v4777_v37 = vld [vmem:[%s12515_s3 + $0x20] sm:$0xff] }
 0x6e6   :  { %v4253_v61 = vmul.f32 %v4252_v43, %v10737_v42  ;;  %v4507_v42 = vmul.f32 %v11004_v24, %v10904_v28  ;;  %4919 = vmatpush.msrb.mxu1 %v4918_v60  ;;  %4822 = vmatpush.msrb.mxu0 %v11093_v39  ;;  %v4934_v52 = vand.u32 4294901760, %v11096_v30  ;;  %v11126_v35 = vsub.f32 %v4779_v2, %v11093_v39 }
 0x6e7   :  { %v4274_v38 = vsel %vm4273_vm3, %v8805_v56, %v4270_v0  ;;  %v11111_v56 = vand.u32 4294901760, %v4778_v57  ;;  %v4516_v22 = vsel %vm11117_vm2, %v10957_v29, %v4512_v3  ;;  %v4930_v31 = vand.u32 4294901760, %v4929_v53 }
 0x6e8   :  { %v4279_v49 = vsel %vm11033_vm10, %v4278_v19, %v4274_v38  ;;  %v4924_v19 = vand.u32 4294901760, %v4923_v13  ;;  %v4531_v24 = vsel %vm1308_vm5, %v4507_v42, %v4526_v9  ;;  %v4935_v44 = vsub.f32 %v11096_v30, %v4934_v52  ;;  %v4488_v42 = vpop.f32.mrf.mxu1 }
 0x6e9   :  { %v11121_v7 = vmul.f32 %v4279_v49, %v4238_v59  ;;  %v11123_v28 = vmul.f32 %v4279_v49, %v4253_v61  ;;  %4824 = vmatpush.msrb.mxu0 %v11111_v56  ;;  %v12636_v60 = vand.u32 2147483648, %v10902_v14  ;;  %v12637_v59 = vand.u32 2147483647, %v10902_v14 }
 0x6ea   :  { %4925 = vmatpush.msrb.mxu1 %v4924_v19  ;;  %v4936_v61 = vand.u32 4294901760, %v4935_v44  ;;  %v4940_v38 = vand.u32 4294901760, %v11126_v35  ;;  %v11156_v13 = vand.u32 4294901760, %v4777_v37  ;;  %v11159_v53 = vsub.f32 %v4778_v57, %v11111_v56 }
 0x6eb   :  { %v4533_v2 = vsel %vm408_vm7, %v11121_v7, 0.0  ;;  %v4536_v9 = vsel %vm408_vm7, %v11123_v28, 0.0  ;;  %v4540_v29 = vsel %vm408_vm7, %v11121_v7, 0  ;;  %v4543_v36 = vsel %vm408_vm7, %v11123_v28, 0 }
 0x6ec   :  { %v4520_v0 = vor.u32 1.1754944e-38, %v12636_v60  ;;  %4534 = vadd.xlane.f32.xlu1 %v4533_v2  ;;  %4537 = vadd.xlane.f32.xlu2 %v4536_v9  ;;  %v11149_v43 = vand.u32 4294901760, %v4540_v29  ;;  %v11151_v3 = vand.u32 4294901760, %v4543_v36  ;;  %vm4518_vm4 = vcmp.eq.f32.partialorder %v12637_v59, 8.507059e+37  ;;  %v4528_v2 = vpop.permute.xlu0 %4527 }
 0x6ed   :  { %4931 = vmatpush.msrb.mxu1 %v4930_v31  ;;  %v11161_v49 = vand.u32 4294901760, %v4531_v24  ;;  %v4489_v44 = vadd.f32 %v4488_v42, %v10926_v16  ;;  %v4941_v14 = vsub.f32 %v11126_v35, %v4940_v38  ;;  %v4946_v57 = vand.u32 4294901760, %v11159_v53  ;;  %4826 = vmatpush.msrb.mxu0 %v11156_v13 }
 0x6ee   :  { %v4521_v48 = vsel %vm4518_vm4, %v4520_v0, %v4516_v22  ;;  %4607 = vmatmul.f32.vlgmr.msrb.gmra.mxu3 %v11149_v43  ;;  %v4564_v19 = vsub.f32 %v4540_v29, %v11149_v43  ;;  %v11172_v31 = vsub.f32 %v4777_v37, %v11156_v13  ;;  %v4572_v9 = vsub.f32 %v4543_v36, %v11151_v3 }
 0x6ef   :  { %5043 = vmatpush.msrb.mxu3 %v10788_v63  ;;  %4937 = vmatpush.msrb.mxu1 %v4936_v61  ;;  %v4522_v29 = vmul.f32 %v4521_v48, %v4489_v44  ;;  %v4942_v16 = vand.u32 4294901760, %v4941_v14  ;;  %v4947_v60 = vsub.f32 %v11159_v53, %v4946_v57  ;;  %v11182_v37 = vsub.f32 %v4531_v24, %v11161_v49 }
 0x6f0   :  { %4637 = vmatmul.f32.vlgmr.msra.gmra.mxu0 %v4564_v19  ;;  %v4565_v22 = vand.u32 4294901760, %v4564_v19  ;;  %v4952_v0 = vand.u32 4294901760, %v11172_v31  ;;  %v12638_v59 = vand.u32 4294901760, %v10798_v4  ;;  %v4573_v14 = vand.u32 4294901760, %v4572_v9 }
 0x6f1   :  { %5045 = vmatpush.msrb.mxu3 %v10800_v50  ;;  %v4532_v36 = vsel %vm1308_vm5, %v4522_v29, %v4528_v2  ;;  %4943 = vmatpush.msrb.mxu1 %v4942_v16  ;;  %v4948_v42 = vand.u32 4294901760, %v4947_v60  ;;  %v12639_v24 = vand.u32 4294901760, %v10811_v32  ;;  %vm5581_vm3 = vcmask 64512  }
 0x6f2   :  { %4667 = vmatmul.f32.vlgmr.msra.gmra.mxu1 %v4565_v22  ;;  %v4566_v61 = vsub.f32 %v4564_v19, %v4565_v22  ;;  %5102 = vmatpush.msra.mxu0 %v12638_v59  ;;  %v4953_v48 = vsub.f32 %v11172_v31, %v4952_v0  ;;  %v4829_v22 = vand.u32 4294901760, %v11182_v37  ;;  %v11195_v2 = vand.u32 4294901760, %v4532_v36 }
 0x6f3   :  { %5047 = vmatpush.msrb.mxu3 %v10808_v11  ;;  %4949 = vmatpush.msrb.mxu1 %v4948_v42  ;;  %v4574_v29 = vsub.f32 %v4572_v9, %v4573_v14 }
 0x6f4   :  { %v4567_v44 = vand.u32 4294901760, %v4566_v61  ;;  %5106 = vmatpush.msra.mxu0 %v12639_v24  ;;  %v4954_v19 = vand.u32 4294901760, %v4953_v48  ;;  %v4830_v16 = vsub.f32 %v11182_v37, %v4829_v22  ;;  %v11204_v60 = vsub.f32 %v4532_v36, %v11195_v2  ;;  %v4770_v48 = vpop.permute.xlu0 %4769 }
 0x6f5   :  { %5049 = vmatpush.msrb.mxu3 %v10821_v45  ;;  %v12640_v61 = vand.u32 4294901760, %v10824_v20 }
 0x6f6   :  { %4568 = vmatmul.f32.vlgmr.msrb.gmra.mxu2 %v4567_v44  ;;  %4611 = vmatmul.f32.gmra.mxu3 %v11151_v3  ;;  %v4837_v59 = vand.u32 4294901760, %v11204_v60 }
 0x6f7   :  { %4975 = vmatpush.msrb.mxu2 %v10798_v4  ;;  %5051 = vmatpush.msrb.mxu3 %v10833_v55  ;;  %v4575_v4 = vand.u32 4294901760, %v4574_v29 }
 0x6f8   :  { %4642 = vmatmul.f32.gmra.mxu0 %v4572_v9  ;;  %4955 = vmatpush.msrb.mxu1 %v4954_v19  ;;  %v4831_v9 = vand.u32 4294901760, %v4830_v16 }
 0x6f9   :  { %4978 = vmatpush.msrb.mxu2 %v10811_v32  ;;  %5053 = vmatpush.msrb.mxu3 %v10846_v46  ;;  %v12641_v32 = vand.u32 4294901760, %v10837_v26 }
 0x6fa   :  { %4673 = vmatmul.f32.gmra.mxu1 %v4573_v14  ;;  %5110 = vmatpush.msra.mxu0 %v12640_v61 }
 0x6fb   :  { %4981 = vmatpush.msrb.mxu2 %v10824_v20  ;;  %5055 = vmatpush.msrb.mxu3 %v10879_v62  ;;  %v12642_v20 = vand.u32 4294901760, %v10856_v12 }
 0x6fc   :  { %5181 = vmatpush.msra.mxu1 %v10788_v63  ;;  %5114 = vmatpush.msra.mxu0 %v12641_v32  ;;  %v4838_v63 = vsub.f32 %v11204_v60, %v4837_v59 }
 0x6fd   :  { %4984 = vmatpush.msrb.mxu2 %v10837_v26  ;;  %5057 = vmatpush.msrb.mxu3 %v10897_v33  ;;  %v12643_v26 = vand.u32 4294901760, %v10894_v25 }
 0x6fe   :  { %4576 = vmatmul.f32.gmra.mxu2 %v4575_v4  ;;  %4727 = vmatmul.f32.vlgmr.msra.gmra.mxu3 %v11149_v43 }
 0x6ff   :  { %4987 = vmatpush.msrb.mxu2 %v10856_v12  ;;  %5059 = vmatpush.msrb.mxu3 %v10911_v8  ;;  %v12645_v12 = vand.u32 4294901760, %v10970_v54 }
 0x700   :  { %4832 = vmatmul.f32.vlgmr.msrb.gmra.mxu0 %v4831_v9  ;;  %5183 = vmatpush.msra.mxu1 %v10800_v50  ;;  %v4839_v50 = vand.u32 4294901760, %v4838_v63 }
 0x701   :  { %4990 = vmatpush.msrb.mxu2 %v10894_v25  ;;  %5061 = vmatpush.msrb.mxu3 %v10950_v21 }
 0x702   :  { %4957 = vmatmul.f32.vlgmr.msrb.gmra.mxu1 %v11161_v49  ;;  %5118 = vmatpush.msra.mxu0 %v12642_v20 }
 0x703   :  { %4993 = vmatpush.msrb.mxu2 %v10930_v58  ;;  %5063 = vmatpush.msrb.mxu3 %v11022_v18 }
 0x704   :  { %5185 = vmatpush.msra.mxu1 %v10808_v11  ;;  %5122 = vmatpush.msra.mxu0 %v12643_v26  ;;  %v12644_v11 = vand.u32 4294901760, %v10930_v58 }
 0x705   :  { %4996 = vmatpush.msrb.mxu2 %v10970_v54  ;;  %5065 = vmatpush.msrb.mxu3 %v11055_v17 }
 0x706   :  { %4700 = vmatmul.f32.vlgmr.msra.gmra.mxu2 %v11149_v43  ;;  %4731 = vmatmul.f32.gmra.mxu3 %v11151_v3 }
 0x707   :  { %4999 = vmatpush.msrb.mxu2 %v11019_v27  ;;  %5067 = vmatpush.msrb.mxu3 %v11070_v41 }
 0x708   :  { %4840 = vmatmul.f32.gmra.mxu0 %v4839_v50  ;;  %5187 = vmatpush.msra.mxu1 %v10821_v45  ;;  %v12646_v45 = vand.u32 4294901760, %v11019_v27 }
 0x709   :  { %5002 = vmatpush.msrb.mxu2 %v11026_v15  ;;  %5069 = vmatpush.msrb.mxu3 %v11093_v39 }
 0x70a   :  { %4961 = vmatmul.f32.gmra.mxu1 %v11195_v2  ;;  %5126 = vmatpush.msra.mxu0 %v12644_v11 }
 0x70b   :  { %5005 = vmatpush.msrb.mxu2 %v11068_v5  ;;  %5071 = vmatpush.msrb.mxu3 %v11111_v56 }
 0x70c   :  { %5189 = vmatpush.msra.mxu1 %v10833_v55  ;;  %5130 = vmatpush.msra.mxu0 %v12645_v12  ;;  %v12647_v55 = vand.u32 4294901760, %v11026_v15 }
 0x70d   :  { %5008 = vmatpush.msrb.mxu2 %v11073_v47  ;;  %5073 = vmatpush.msrb.mxu3 %v11156_v13 }
 0x70e   :  { %4704 = vmatmul.f32.gmra.mxu2 %v11151_v3  ;;  %5077 = vmatmul.f32.vlgmr.msrb.gmra.mxu3 %v4829_v22 }
 0x70f   :  { %5011 = vmatpush.msrb.mxu2 %v11096_v30  ;;  %5191 = vmatpush.msra.mxu1 %v10846_v46 }
 0x710   :  { %5134 = vmatpush.msra.mxu0 %v12646_v45  ;;  %v4772_v45 = vpop.permute.xlu0 %4771 }
 0x711   :  { %5014 = vmatpush.msrb.mxu2 %v11126_v35  ;;  %5193 = vmatpush.msra.mxu1 %v10879_v62 }
 0x712   :  { %5138 = vmatpush.msra.mxu0 %v12647_v55 }
 0x713   :  { %5017 = vmatpush.msrb.mxu2 %v11159_v53  ;;  %5195 = vmatpush.msra.mxu1 %v10897_v33 }
 0x714   :  { %5142 = vmatpush.msra.mxu0 %v4922_v34 }
 0x715   :  { %5020 = vmatpush.msrb.mxu2 %v11172_v31  ;;  %5197 = vmatpush.msra.mxu1 %v10911_v8 }
 0x716   :  { %5023 = vmatmul.f32.vlgmr.msrb.gmra.mxu2 %v11182_v37  ;;  %5083 = vmatmul.f32.gmra.mxu3 %v4837_v59 }
 0x717   :  { %5199 = vmatpush.msra.mxu1 %v10950_v21  ;;  %5146 = vmatpush.msra.mxu0 %v4928_v40 }
 0x719   :  { %5201 = vmatpush.msra.mxu1 %v11022_v18  ;;  %5150 = vmatpush.msra.mxu0 %v4934_v52 }
 0x71b   :  { %5203 = vmatpush.msra.mxu1 %v11055_v17  ;;  %5154 = vmatpush.msra.mxu0 %v4940_v38 }
 0x71d   :  { %5205 = vmatpush.msra.mxu1 %v11070_v41  ;;  %5158 = vmatpush.msra.mxu0 %v4946_v57 }
 0x71e   :  { %5028 = vmatmul.f32.gmra.mxu2 %v11204_v60 }
 0x71f   :  { %5207 = vmatpush.msra.mxu1 %v11093_v39  ;;  %5162 = vmatpush.msra.mxu0 %v4952_v0 }
 0x721   :  { %5209 = vmatpush.msra.mxu1 %v11111_v56 }
 0x723   :  { %5211 = vmatpush.msra.mxu1 %v11156_v13 }
 0x75f   :  { %v11284_v17 = vpop.xlane.xlu1 %4534  ;;  %v11287_v62 = vpop.xlane.xlu2 %4537 }
 0x760   :  { %v4735_v46 = vmax.f32 %v11284_v17, 1.0  ;;  %v4736_v25 = vmax.f32 %v11287_v62, 1.0 }
 0x762   :  { %8806 = vrcp.f32 %v4735_v46  ;;  %v4748_v56 = vand.u32 2147483648, %v4735_v46  ;;  %vm4742_vm8 = vweird.f32 %v4735_v46  ;;  %v4746_v3 = vand.u32 2147483647, %v4735_v46 }
 0x763   :  { %8808 = vrcp.f32 %v4736_v25  ;;  %v4763_v22 = vand.u32 2147483648, %v4736_v25  ;;  %vm4757_vm12 = vweird.f32 %v4736_v25  ;;  %v4761_v16 = vand.u32 2147483647, %v4736_v25 }
 0x764   :  { %v4749_v37 = vor.u32 1.1754944e-38, %v4748_v56  ;;  %vm4747_vm10 = vcmp.eq.f32.partialorder %v4746_v3, 8.507059e+37 }
 0x765   :  { %v4764_v63 = vor.u32 1.1754944e-38, %v4763_v22  ;;  %vm4762_vm15 = vcmp.eq.f32.partialorder %v4761_v16, 8.507059e+37  ;;  %v5229_v16 = vld [vmem:[%s12515_s3 + $0x1c0] sm:$0xff] }
 0x768   :  { %v8807_v8 = vpop.eup %8806 }
 0x769   :  { %v4738_v21 = vmul.f32 %v8807_v8, %v4735_v46  ;;  %v8809_v27 = vpop.eup %8808  ;;  %vm4743_vm6 = vweird.f32 %v8807_v8 }
 0x76a   :  { %v4753_v41 = vmul.f32 %v8809_v27, %v4736_v25  ;;  %vm4744_vm9 = vmor %vm4742_vm8, %vm4743_vm6  ;;  %vm4758_vm11 = vweird.f32 %v8809_v27 }
 0x76b   :  { %v4739_v54 = vsub.f32 1.0, %v4738_v21  ;;  %vm4759_vm0 = vmor %vm4757_vm12, %vm4758_vm11 }
 0x76c   :  { %v4754_v30 = vsub.f32 1.0, %v4753_v41 }
 0x76d   :  { %v4638_v34 = vpop.f32.mrf.mxu0  ;;  %v4740_v47 = vmul.f32 %v8807_v8, %v4739_v54 }
 0x76e   :  { %v4755_v31 = vmul.f32 %v8809_v27, %v4754_v30 }
 0x76f   :  { %v4668_v39 = vpop.f32.mrf.mxu1  ;;  %v4741_v52 = vadd.f32 %v8807_v8, %v4740_v47 }
 0x770   :  { %v4756_v24 = vadd.f32 %v8809_v27, %v4755_v31 }
 0x771   :  { %v4608_v33 = vpop.f32.mrf.mxu3  ;;  %v4745_v57 = vsel %vm4744_vm9, %v8807_v8, %v4741_v52 }
 0x772   :  { %v4750_v44 = vsel %vm4747_vm10, %v4749_v37, %v4745_v57  ;;  %v4760_v9 = vsel %vm4759_vm0, %v8809_v27, %v4756_v24  ;;  %v5236_v27 = vld [vmem:[%s12515_s3 + $0x1f8] sm:$0xff]  ;;  %v5231_v57 = vld [vmem:[%s12515_s3 + $0x1d0] sm:$0xff] }
 0x773   :  { %v4765_v50 = vsel %vm4762_vm15, %v4764_v63, %v4760_v9 }
 0x775   :  { %v4643_v0 = vpop.f32.mrf.mxu0 }
 0x777   :  { %v4674_v19 = vpop.f32.mrf.mxu1 }
 0x779   :  { %v4569_v58 = vpop.f32.mrf.mxu2  ;;  %v4612_v18 = vpop.f32.mrf.mxu3 }
 0x77a   :  { %v4609_v15 = vadd.f32 %v4608_v33, %v4569_v58 }
 0x77c   :  { %v4639_v40 = vadd.f32 %v4638_v34, %v4609_v15  ;;  %v5235_v15 = vld [vmem:[%s12515_s3 + $0x1f0] sm:$0xff]  ;;  %v5234_v34 = vld [vmem:[%s12515_s3 + $0x1e8] sm:$0xff] }
 0x77d   :  { %v11319_v47 = vand.u32 4294901760, %v5234_v34 }
 0x77e   :  { %v4669_v43 = vadd.f32 %v4668_v39, %v4639_v40  ;;  %v5233_v40 = vld [vmem:[%s12515_s3 + $0x1e0] sm:$0xff] }
 0x77f   :  { %v11331_v52 = vsub.f32 %v5234_v34, %v11319_v47  ;;  %v11334_v56 = vand.u32 4294901760, %v5233_v40  ;;  %v11354_v31 = vpop.f32.mrf.mxu1 }
 0x781   :  { %v4577_v5 = vpop.f32.mrf.mxu2  ;;  %v4728_v38 = vpop.f32.mrf.mxu3 }
 0x782   :  { %v4613_v35 = vadd.f32 %v4612_v18, %v4577_v5  ;;  %v11299_v18 = vand.u32 4294901760, %v5236_v27 }
 0x784   :  { %v4644_v36 = vadd.f32 %v4643_v0, %v4613_v35  ;;  %5260 = vmatpush.msra.mxu2 %v11299_v18  ;;  %5443 = vmatpush.msrb.mxu1 %v11299_v18  ;;  %v5232_v35 = vld [vmem:[%s12515_s3 + $0x1d8] sm:$0xff] }
 0x786   :  { %v4675_v29 = vadd.f32 %v4674_v19, %v4644_v36 }
 0x789   :  { %v4701_v13 = vpop.f32.mrf.mxu2  ;;  %v4732_v59 = vpop.f32.mrf.mxu3 }
 0x78a   :  { %v4702_v53 = vadd.f32 %v4701_v13, %v4669_v43  ;;  %v5335_v13 = vsub.f32 %v5233_v40, %v11334_v56 }
 0x78c   :  { %v4729_v42 = vadd.f32 %v4728_v38, %v4702_v53  ;;  %v5330_v38 = vand.u32 4294901760, %v11331_v52  ;;  %v11348_v53 = vand.u32 4294901760, %v5232_v35  ;;  %v5336_v36 = vand.u32 4294901760, %v5335_v13 }
 0x78e   :  { %v4751_v14 = vmul.f32 %v4750_v44, %v4729_v42  ;;  %v5331_v37 = vsub.f32 %v11331_v52, %v5330_v38  ;;  %v5269_v42 = vand.u32 4294901760, %v5231_v57  ;;  %v5230_v44 = vld [vmem:[%s12515_s3 + $0x1c8] sm:$0xff]  ;;  %v5337_v24 = vsub.f32 %v5335_v13, %v5336_v36 }
 0x78f   :  { %v5271_v22 = vand.u32 4294901760, %v5230_v44 }
 0x790   :  { %v4775_v60 = vsel %vm1308_vm5, %v4751_v14, %v4770_v48  ;;  %v5341_v48 = vsub.f32 %v5232_v35, %v11348_v53  ;;  %v5332_v14 = vand.u32 4294901760, %v5331_v37  ;;  %v5347_v19 = vsub.f32 %v5231_v57, %v5269_v42 }
 0x791   :  { %v4705_v61 = vpop.f32.mrf.mxu2  ;;  %v4843_v4 = vand.u32 4294901760, %v4775_v60  ;;  %v5078_v34 = vpop.f32.mrf.mxu3 }
 0x792   :  { %v4706_v32 = vadd.f32 %v4705_v61, %v4675_v29  ;;  %v5342_v29 = vand.u32 4294901760, %v5341_v48  ;;  %v5348_v61 = vand.u32 4294901760, %v5347_v19 }
 0x793   :  { %4965 = vmatmul.f32.gmra.mxu1 %v4843_v4  ;;  %v4844_v20 = vsub.f32 %v4775_v60, %v4843_v4  ;;  %v5338_v60 = vand.u32 4294901760, %v5337_v24  ;;  %v12649_v24 = vmov 0.0  }
 0x794   :  { %v4733_v26 = vadd.f32 %v4732_v59, %v4706_v32  ;;  %v5273_v32 = vand.u32 4294901760, %v5229_v16  ;;  %v5343_v9 = vsub.f32 %v5341_v48, %v5342_v29  ;;  %v5349_v59 = vsub.f32 %v5347_v19, %v5348_v61 }
 0x795   :  { %5033 = vmatmul.f32.gmra.mxu2 %v4844_v20  ;;  %v4845_v11 = vand.u32 4294901760, %v4844_v20 }
 0x796   :  { %v4766_v12 = vmul.f32 %v4765_v50, %v4733_v26  ;;  %v5344_v26 = vand.u32 4294901760, %v5343_v9  ;;  %v4833_v50 = vpop.f32.mrf.mxu0 }
 0x797   :  { %5089 = vmatmul.f32.gmra.mxu3 %v4845_v11  ;;  %v4846_v55 = vsub.f32 %v4844_v20, %v4845_v11  ;;  %v5359_v20 = vsub.f32 %v5229_v16, %v5273_v32  ;;  %v5350_v11 = vand.u32 4294901760, %v5349_v59 }
 0x798   :  { %v4776_v46 = vsel %vm1308_vm5, %v4766_v12, %v4772_v45 }
 0x799   :  { %v4847_v25 = vand.u32 4294901760, %v4846_v55  ;;  %v4851_v33 = vand.u32 4294901760, %v4776_v46  ;;  %v5360_v45 = vand.u32 4294901760, %v5359_v20  ;;  %v4962_v55 = vpop.f32.mrf.mxu1 }
 0x79b   :  { %4848 = vmatmul.f32.gmra.mxu0 %v4847_v25  ;;  %4969 = vmatmul.f32.gmra.mxu1 %v4851_v33  ;;  %v4852_v8 = vsub.f32 %v4776_v46, %v4851_v33  ;;  %v5361_v25 = vsub.f32 %v5359_v20, %v5360_v45 }
 0x79d   :  { %5038 = vmatmul.f32.gmra.mxu2 %v4852_v8  ;;  %v4853_v58 = vand.u32 4294901760, %v4852_v8 }
 0x79f   :  { %5095 = vmatmul.f32.gmra.mxu3 %v4853_v58  ;;  %v4854_v21 = vsub.f32 %v4852_v8, %v4853_v58  ;;  %v4841_v8 = vpop.f32.mrf.mxu0 }
 0x7a1   :  { %v4855_v54 = vand.u32 4294901760, %v4854_v21 }
 0x7a3   :  { %4856 = vmatmul.f32.gmra.mxu0 %v4855_v54  ;;  %5213 = vmatmul.f32.vlgmr.msra.gmra.mxu1 %v11161_v49  ;;  %v8729_v54 = vld [vmem:[%s12515_s3 + $0x168] ss:$0 sm:$0xff] }
 0x7ab   :  { %5164 = vmatmul.f32.vlgmr.msra.gmra.mxu0 %v11161_v49  ;;  %5217 = vmatmul.f32.gmra.mxu1 %v11195_v2  ;;  %v11306_v49 = vsub.f32 %v5236_v27, %v11299_v18 }
 0x7ad   :  { %v5318_v5 = vand.u32 4294901760, %v11306_v49  ;;  %5391 = vmatpush.msrb.mxu0 %v11306_v49 }
 0x7af   :  { %v5319_v39 = vsub.f32 %v11306_v49, %v5318_v5 }
 0x7b1   :  { %v5320_v43 = vand.u32 4294901760, %v5319_v39 }
 0x7b3   :  { %5168 = vmatmul.f32.gmra.mxu0 %v11195_v2  ;;  %5221 = vmatmul.f32.gmra.mxu1 %v4843_v4  ;;  %v11308_v2 = vand.u32 4294901760, %v5235_v15 }
 0x7b4   :  { %5321 = vmatpush.msra.mxu3 %v5320_v43 }
 0x7b5   :  { %5262 = vmatpush.msra.mxu2 %v11308_v2  ;;  %v11317_v41 = vsub.f32 %v5235_v15, %v11308_v2  ;;  %5445 = vmatpush.msrb.mxu1 %v11308_v2  ;;  %v5024_v15 = vpop.f32.mrf.mxu2 }
 0x7b7   :  { %v5324_v30 = vand.u32 4294901760, %v11317_v41  ;;  %5264 = vmatpush.msra.mxu2 %v11319_v47  ;;  %5394 = vmatpush.msrb.mxu0 %v11317_v41 }
 0x7b8   :  { %5447 = vmatpush.msrb.mxu1 %v11319_v47 }
 0x7b9   :  { %v5325_v3 = vsub.f32 %v11317_v41, %v5324_v30  ;;  %5266 = vmatpush.msra.mxu2 %v11334_v56  ;;  %5397 = vmatpush.msrb.mxu0 %v11331_v52 }
 0x7ba   :  { %5449 = vmatpush.msrb.mxu1 %v11334_v56 }
 0x7bb   :  { %5172 = vmatmul.f32.gmra.mxu0 %v4843_v4  ;;  %5225 = vmatmul.f32.gmra.mxu1 %v4851_v33  ;;  %v5326_v0 = vand.u32 4294901760, %v5325_v3  ;;  %v5353_v4 = vsub.f32 %v5230_v44, %v5271_v22 }
 0x7bc   :  { %5400 = vmatpush.msrb.mxu0 %v5335_v13  ;;  %5268 = vmatpush.msra.mxu2 %v11348_v53 }
 0x7bd   :  { %5451 = vmatpush.msrb.mxu1 %v11348_v53  ;;  %5327 = vmatpush.msra.mxu3 %v5326_v0  ;;  %v5354_v63 = vand.u32 4294901760, %v5353_v4  ;;  %v5029_v39 = vpop.f32.mrf.mxu2 }
 0x7be   :  { %5270 = vmatpush.msra.mxu2 %v5269_v42  ;;  %5403 = vmatpush.msrb.mxu0 %v5341_v48 }
 0x7bf   :  { %5333 = vmatpush.msra.mxu3 %v5332_v14  ;;  %5453 = vmatpush.msrb.mxu1 %v5269_v42  ;;  %v5355_v12 = vsub.f32 %v5353_v4, %v5354_v63 }
 0x7c0   :  { %5272 = vmatpush.msra.mxu2 %v5271_v22  ;;  %5406 = vmatpush.msrb.mxu0 %v5347_v19 }
 0x7c1   :  { %5339 = vmatpush.msra.mxu3 %v5338_v60  ;;  %5455 = vmatpush.msrb.mxu1 %v5271_v22  ;;  %v5356_v46 = vand.u32 4294901760, %v5355_v12 }
 0x7c2   :  { %5274 = vmatpush.msra.mxu2 %v5273_v32  ;;  %5409 = vmatpush.msrb.mxu0 %v5353_v4 }
 0x7c3   :  { %5176 = vmatmul.f32.gmra.mxu0 %v4851_v33  ;;  %5457 = vmatpush.msrb.mxu1 %v5273_v32  ;;  %v5362_v33 = vand.u32 4294901760, %v5361_v25 }
 0x7c4   :  { %5494 = vmatpush.msrb.mxu2 %v5318_v5  ;;  %5345 = vmatpush.msra.mxu3 %v5344_v26 }
 0x7c5   :  { %5412 = vmatpush.msrb.mxu0 %v5359_v20 }
 0x7c6   :  { %5498 = vmatpush.msrb.mxu2 %v5324_v30  ;;  %5351 = vmatpush.msra.mxu3 %v5350_v11 }
 0x7c8   :  { %5502 = vmatpush.msrb.mxu2 %v5330_v38  ;;  %5357 = vmatpush.msra.mxu3 %v5356_v46  ;;  %v5084_v38 = vpop.f32.mrf.mxu3 }
 0x7ca   :  { %5506 = vmatpush.msrb.mxu2 %v5336_v36  ;;  %5363 = vmatpush.msra.mxu3 %v5362_v33 }
 0x7cc   :  { %5549 = vmatpush.msrb.mxu3 %v11299_v18  ;;  %5510 = vmatpush.msrb.mxu2 %v5342_v29  ;;  %v4834_v18 = vadd.f32 %v8729_v54, %v4833_v50 }
 0x7ce   :  { %5551 = vmatpush.msrb.mxu3 %v11308_v2  ;;  %5514 = vmatpush.msrb.mxu2 %v5348_v61  ;;  %v4959_v2 = vadd.f32 %v11354_v31, %v4834_v18  ;;  %v12648_v31 = vld [vmem:[#allocation7_spill] sm:$0xff] }
 0x7cf   :  { %vm2811_vm1 = vcmp.lt.s32.totalorder %v12648_v31, 13 }
 0x7d0   :  { %5553 = vmatpush.msrb.mxu3 %v11319_v47  ;;  %5518 = vmatpush.msrb.mxu2 %v5354_v63  ;;  %v5025_v5 = vadd.f32 %v5024_v15, %v4959_v2  ;;  %v4842_v47 = vadd.f32 %v8729_v54, %v4841_v8  ;;  %v11390_v19 = vsel %vm2811_vm1, 1.0, %v12649_v24 }
 0x7d2   :  { %5555 = vmatpush.msrb.mxu3 %v11334_v56  ;;  %5522 = vmatpush.msrb.mxu2 %v5360_v45  ;;  %v5079_v40 = vadd.f32 %v5078_v34, %v5025_v5  ;;  %v4963_v52 = vadd.f32 %v4962_v55, %v4842_v47 }
 0x7d4   :  { %5557 = vmatpush.msrb.mxu3 %v11348_v53  ;;  %v5030_v35 = vadd.f32 %v5029_v39, %v4963_v52  ;;  %v11406_v39 = vand.u32 4294901760, %v10713_v23 }
 0x7d6   :  { %5559 = vmatpush.msrb.mxu3 %v5269_v42  ;;  %v5085_v37 = vadd.f32 %v5084_v38, %v5030_v35 }
 0x7d8   :  { %5561 = vmatpush.msrb.mxu3 %v5271_v22 }
 0x7da   :  { %5563 = vmatpush.msrb.mxu3 %v5273_v32 }
 0x810   :  { %v4966_v58 = vpop.f32.mrf.mxu1 }
 0x818   :  { %v4849_v21 = vpop.f32.mrf.mxu0  ;;  %v4970_v27 = vpop.f32.mrf.mxu1 }
 0x819   :  { %v4850_v43 = vadd.f32 %v8729_v54, %v4849_v21  ;;  %v5034_v36 = vpop.f32.mrf.mxu2 }
 0x81a   :  { %v5090_v61 = vpop.f32.mrf.mxu3 }
 0x81b   :  { %v4967_v0 = vadd.f32 %v4966_v58, %v4850_v43  ;;  %v11409_v43 = vand.u32 4294901760, %v10711_v1 }
 0x81d   :  { %v5035_v29 = vadd.f32 %v5034_v36, %v4967_v0  ;;  %v11421_v36 = vsub.f32 %v10711_v1, %v11409_v43 }
 0x81f   :  { %v5091_v26 = vadd.f32 %v5090_v61, %v5035_v29 }
 0x820   :  { %v4857_v49 = vpop.f32.mrf.mxu0  ;;  %v5214_v41 = vpop.f32.mrf.mxu1 }
 0x821   :  { %v4858_v16 = vadd.f32 %v8729_v54, %v4857_v49  ;;  %v5039_v8 = vpop.f32.mrf.mxu2 }
 0x822   :  { %v5096_v34 = vpop.f32.mrf.mxu3 }
 0x823   :  { %v4971_v50 = vadd.f32 %v4970_v27, %v4858_v16 }
 0x825   :  { %v5040_v21 = vadd.f32 %v5039_v8, %v4971_v50 }
 0x827   :  { %v5097_v47 = vadd.f32 %v5096_v34, %v5040_v21 }
 0x828   :  { %v5165_v30 = vpop.f32.mrf.mxu0  ;;  %v5218_v57 = vpop.f32.mrf.mxu1 }
 0x829   :  { %v5166_v56 = vadd.f32 %v5165_v30, %v5079_v40 }
 0x82b   :  { %v5215_v3 = vadd.f32 %v5214_v41, %v5166_v56 }
 0x82d   :  { %v5240_v13 = vsel %vm1308_vm5, %v5215_v3, 0  ;;  %v11385_v14 = vand.u32 4294901760, %v5215_v3 }
 0x82e   :  { %v11380_v53 = vand.u32 4294901760, %v5240_v13 }
 0x82f   :  { %v5717_v59 = vsub.f32 %v5215_v3, %v11385_v14 }
 0x830   :  { %v5276_v42 = vsub.f32 %v5240_v13, %v11380_v53  ;;  %v5169_v48 = vpop.f32.mrf.mxu0  ;;  %5365 = vmatmul.f32.vlgmr.msra.gmra.mxu3 %v11380_v53  ;;  %v5222_v12 = vpop.f32.mrf.mxu1 }
 0x831   :  { %v5170_v44 = vadd.f32 %v5169_v48, %v5085_v37  ;;  %v5718_v33 = vand.u32 4294901760, %v5717_v59 }
 0x832   :  { %5415 = vmatmul.f32.vlgmr.msrb.gmra.mxu0 %v5276_v42  ;;  %v5277_v22 = vand.u32 4294901760, %v5276_v42 }
 0x833   :  { %v5219_v60 = vadd.f32 %v5218_v57, %v5170_v44  ;;  %v5719_v2 = vsub.f32 %v5717_v59, %v5718_v33  ;;  %v11415_v57 = vsub.f32 %v10713_v23, %v11406_v39 }
 0x834   :  { %5461 = vmatmul.f32.vlgmr.msrb.gmra.mxu1 %v5277_v22  ;;  %v5278_v4 = vsub.f32 %v5276_v42, %v5277_v22  ;;  %v5877_v22 = vand.u32 4294901760, %v11421_v36 }
 0x835   :  { %v5243_v32 = vsel %vm1308_vm5, %v5219_v60, 0  ;;  %v5631_v9 = vmul.f32 %v11390_v19, %v5219_v60  ;;  %v5720_v35 = vand.u32 4294901760, %v5719_v2  ;;  %v5871_v44 = vand.u32 4294901760, %v11415_v57 }
 0x836   :  { %v11395_v63 = vand.u32 4294901760, %v5243_v32  ;;  %v5279_v20 = vand.u32 4294901760, %v5278_v4  ;;  %v5878_v60 = vsub.f32 %v11421_v36, %v5877_v22 }
 0x837   :  { %v5683_v11 = vand.u32 4294901760, %v5631_v9  ;;  %v5872_v16 = vsub.f32 %v11415_v57, %v5871_v44 }
 0x838   :  { %v5173_v45 = vpop.f32.mrf.mxu0  ;;  %5280 = vmatmul.f32.vlgmr.msra.gmra.mxu2 %v5279_v20  ;;  %5369 = vmatmul.f32.gmra.mxu3 %v11395_v63  ;;  %v5284_v55 = vsub.f32 %v5243_v32, %v11395_v63  ;;  %v5226_v3 = vpop.f32.mrf.mxu1  ;;  %v5879_v4 = vand.u32 4294901760, %v5878_v60 }
 0x839   :  { %v5174_v46 = vadd.f32 %v5173_v45, %v5091_v26  ;;  %5684 = vmatpush.msra.mxu0 %v5683_v11  ;;  %5768 = vmatpush.msra.mxu3 %v5683_v11  ;;  %v5711_v25 = vsub.f32 %v5631_v9, %v5683_v11  ;;  %v5873_v61 = vand.u32 4294901760, %v5872_v16 }
 0x83a   :  { %5420 = vmatmul.f32.gmra.mxu0 %v5284_v55  ;;  %v5285_v58 = vand.u32 4294901760, %v5284_v55 }
 0x83b   :  { %v11399_v54 = vadd.f32 %v5222_v12, %v5174_v46  ;;  %5686 = vmatpush.msra.mxu0 %v11385_v14  ;;  %5743 = vmatpush.msra.mxu2 %v5711_v25  ;;  %v5712_v27 = vand.u32 4294901760, %v5711_v25 }
 0x83c   :  { %5770 = vmatpush.msra.mxu3 %v11385_v14  ;;  %5467 = vmatmul.f32.gmra.mxu1 %v5285_v58  ;;  %v5286_v18 = vsub.f32 %v5284_v55, %v5285_v58 }
 0x83d   :  { %v5246_v15 = vsel %vm1308_vm5, %v11399_v54, 0  ;;  %5746 = vmatpush.msra.mxu2 %v5717_v59  ;;  %5795 = vmatpush.msrb.mxu0 %v5712_v27  ;;  %v5713_v49 = vsub.f32 %v5711_v25, %v5712_v27 }
 0x83e   :  { %v5287_v5 = vand.u32 4294901760, %v5286_v18  ;;  %v5291_v41 = vand.u32 4294901760, %v5246_v15 }
 0x83f   :  { %5799 = vmatpush.msrb.mxu0 %v5718_v33  ;;  %v5714_v40 = vand.u32 4294901760, %v5713_v49 }
 0x840   :  { %v5177_v30 = vpop.f32.mrf.mxu0  ;;  %5288 = vmatmul.f32.gmra.mxu2 %v5287_v5  ;;  %5373 = vmatmul.f32.gmra.mxu3 %v5291_v41  ;;  %v5292_v52 = vsub.f32 %v5246_v15, %v5291_v41 }
 0x841   :  { %v5178_v56 = vadd.f32 %v5177_v30, %v5097_v47  ;;  %5715 = vmatpush.msra.mxu1 %v5714_v40 }
 0x842   :  { %5425 = vmatmul.f32.gmra.mxu0 %v5292_v52  ;;  %v5293_v38 = vand.u32 4294901760, %v5292_v52 }
 0x843   :  { %v11411_v13 = vadd.f32 %v5226_v3, %v5178_v56  ;;  %5721 = vmatpush.msra.mxu1 %v5720_v35 }
 0x844   :  { %5473 = vmatmul.f32.gmra.mxu1 %v5293_v38  ;;  %v5294_v0 = vsub.f32 %v5292_v52, %v5293_v38 }
 0x845   :  { %v5249_v37 = vsel %vm1308_vm5, %v11411_v13, 0  ;;  %5820 = vmatpush.msrb.mxu1 %v5683_v11 }
 0x846   :  { %v5299_v42 = vand.u32 4294901760, %v5249_v37  ;;  %v5295_v48 = vand.u32 4294901760, %v5294_v0 }
 0x847   :  { %5822 = vmatpush.msrb.mxu1 %v11385_v14 }
 0x848   :  { %5296 = vmatmul.f32.gmra.mxu2 %v5295_v48  ;;  %5377 = vmatmul.f32.gmra.mxu3 %v5299_v42  ;;  %v5300_v23 = vsub.f32 %v5249_v37, %v5299_v42 }
 0x84a   :  { %5430 = vmatmul.f32.gmra.mxu0 %v5300_v23  ;;  %v5301_v29 = vand.u32 4294901760, %v5300_v23 }
 0x84c   :  { %5479 = vmatmul.f32.gmra.mxu1 %v5301_v29  ;;  %v5302_v1 = vsub.f32 %v5300_v23, %v5301_v29 }
 0x84e   :  { %v5303_v14 = vand.u32 4294901760, %v5302_v1 }
 0x850   :  { %5304 = vmatmul.f32.gmra.mxu2 %v5303_v14  ;;  %5565 = vmatmul.f32.vlgmr.msrb.gmra.mxu3 %v11380_v53 }
 0x851   :  { %5874 = vmatpush.msrb.mxu3 %v5873_v61 }
 0x853   :  { %5880 = vmatpush.msrb.mxu3 %v5879_v4 }
 0x858   :  { %5524 = vmatmul.f32.vlgmr.msrb.gmra.mxu2 %v11380_v53  ;;  %5569 = vmatmul.f32.gmra.mxu3 %v11395_v63  ;;  %v8730_v53 = vld [vmem:[%s12515_s3 + $0x248] ss:$0 sm:$0xff] }
 0x859   :  { %5843 = vmatpush.msrb.mxu2 %v11406_v39 }
 0x85b   :  { %5845 = vmatpush.msrb.mxu2 %v11409_v43 }
 0x860   :  { %5528 = vmatmul.f32.gmra.mxu2 %v11395_v63  ;;  %5573 = vmatmul.f32.gmra.mxu3 %v5291_v41 }
 0x868   :  { %5532 = vmatmul.f32.gmra.mxu2 %v5291_v41  ;;  %5577 = vmatmul.f32.gmra.mxu3 %v5299_v42 }
 0x870   :  { %5536 = vmatmul.f32.gmra.mxu2 %v5299_v42 }
 0x8af   :  { %v5416_v55 = vpop.f32.mrf.mxu0 }
 0x8b1   :  { %v5462_v33 = vpop.f32.mrf.mxu1 }
 0x8b3   :  { %v5366_v32 = vpop.f32.mrf.mxu3 }
 0x8b7   :  { %v5421_v15 = vpop.f32.mrf.mxu0 }
 0x8b9   :  { %v5468_v5 = vpop.f32.mrf.mxu1 }
 0x8bb   :  { %v5281_v9 = vpop.f32.mrf.mxu2  ;;  %v5370_v59 = vpop.f32.mrf.mxu3 }
 0x8bc   :  { %v5282_v11 = vadd.f32 %v8730_v53, %v5281_v9 }
 0x8be   :  { %v5367_v45 = vadd.f32 %v5366_v32, %v5282_v11 }
 0x8bf   :  { %v5426_v29 = vpop.f32.mrf.mxu0 }
 0x8c0   :  { %v5417_v25 = vadd.f32 %v5416_v55, %v5367_v45 }
 0x8c1   :  { %v5474_v61 = vpop.f32.mrf.mxu1 }
 0x8c2   :  { %v5463_v58 = vadd.f32 %v5462_v33, %v5417_v25 }
 0x8c3   :  { %v5289_v20 = vpop.f32.mrf.mxu2  ;;  %v5374_v26 = vpop.f32.mrf.mxu3 }
 0x8c4   :  { %v5290_v63 = vadd.f32 %v8730_v53, %v5289_v20 }
 0x8c6   :  { %v5371_v8 = vadd.f32 %v5370_v59, %v5290_v63 }
 0x8c7   :  { %v5431_v11 = vpop.f32.mrf.mxu0 }
 0x8c8   :  { %v5422_v2 = vadd.f32 %v5421_v15, %v5371_v8 }
 0x8c9   :  { %v5480_v63 = vpop.f32.mrf.mxu1 }
 0x8ca   :  { %v5469_v41 = vadd.f32 %v5468_v5, %v5422_v2 }
 0x8cb   :  { %v5297_v50 = vpop.f32.mrf.mxu2  ;;  %v5378_v12 = vpop.f32.mrf.mxu3 }
 0x8cc   :  { %v5298_v0 = vadd.f32 %v8730_v53, %v5297_v50 }
 0x8ce   :  { %v5375_v48 = vadd.f32 %v5374_v26, %v5298_v0 }
 0x8d0   :  { %v5427_v14 = vadd.f32 %v5426_v29, %v5375_v48 }
 0x8d2   :  { %v5475_v9 = vadd.f32 %v5474_v61, %v5427_v14 }
 0x8d3   :  { %v5305_v46 = vpop.f32.mrf.mxu2  ;;  %v5566_v21 = vpop.f32.mrf.mxu3 }
 0x8d4   :  { %v5306_v60 = vadd.f32 %v8730_v53, %v5305_v46 }
 0x8d6   :  { %v5379_v32 = vadd.f32 %v5378_v12, %v5306_v60 }
 0x8d8   :  { %v5432_v26 = vadd.f32 %v5431_v11, %v5379_v32 }
 0x8da   :  { %v5481_v33 = vadd.f32 %v5480_v63, %v5432_v26 }
 0x8db   :  { %v5525_v27 = vpop.f32.mrf.mxu2  ;;  %v5570_v30 = vpop.f32.mrf.mxu3 }
 0x8dc   :  { %v5526_v18 = vadd.f32 %v5525_v27, %v5463_v58 }
 0x8de   :  { %v5567_v49 = vadd.f32 %v5566_v21, %v5526_v18 }
 0x8e0   :  { %v5582_v34 = vsel %vm5581_vm3, %v5567_v49, -inf }
 0x8e1   :  { %5583 = vmax.xlane.f32.xlu0 %v5582_v34 }
 0x8e3   :  { %v5529_v47 = vpop.f32.mrf.mxu2  ;;  %v5574_v45 = vpop.f32.mrf.mxu3 }
 0x8e4   :  { %v5530_v40 = vadd.f32 %v5529_v47, %v5469_v41 }
 0x8e6   :  { %v5571_v52 = vadd.f32 %v5570_v30, %v5530_v40 }
 0x8e8   :  { %v5585_v56 = vsel %vm5581_vm3, %v5571_v52, -inf }
 0x8e9   :  { %5586 = vmax.xlane.f32.xlu0 %v5585_v56 }
 0x8eb   :  { %v5533_v4 = vpop.f32.mrf.mxu2  ;;  %v5578_v46 = vpop.f32.mrf.mxu3 }
 0x8ec   :  { %v5534_v20 = vadd.f32 %v5533_v4, %v5475_v9 }
 0x8ee   :  { %v5575_v55 = vadd.f32 %v5574_v45, %v5534_v20 }
 0x8f0   :  { %v6477_v53 = vsel %vm5581_vm3, %v5575_v55, -inf }
 0x8f3   :  { %v5537_v25 = vpop.f32.mrf.mxu2 }
 0x8f4   :  { %v5538_v8 = vadd.f32 %v5537_v25, %v5481_v33 }
 0x8f6   :  { %v5579_v58 = vadd.f32 %v5578_v46, %v5538_v8 }
 0x8f8   :  { %v6480_v12 = vsel %vm5581_vm3, %v5579_v58, -inf }
 0x954   :  { %v5584_v35 = vpop.xlane.xlu0 %5583 }
 0x955   :  { %v5588_v3 = vsub.f32 %v5567_v49, %v5584_v35 }
 0x957   :  { %v5590_v38 = vmul.f32 1.442695, %v5588_v3 }
 0x959   :  { %8810 = vpow2.f32 %v5590_v38 }
 0x95c   :  { %v5587_v37 = vpop.xlane.xlu0 %5586 }
 0x95d   :  { %v5589_v42 = vsub.f32 %v5571_v52, %v5587_v37 }
 0x95f   :  { %v8811_v23 = vpop.eup %8810  ;;  %v5592_v16 = vmul.f32 1.442695, %v5589_v42 }
 0x960   :  { %v5594_v1 = vsel %vm5581_vm3, %v8811_v23, 0.0 }
 0x961   :  { %8812 = vpow2.f32 %v5592_v16  ;;  %5595 = vadd.xlane.f32.xlu1 %v5594_v1 }
 0x967   :  { %v8813_v59 = vpop.eup %8812 }
 0x968   :  { %v5597_v50 = vsel %vm5581_vm3, %v8813_v59, 0.0 }
 0x969   :  { %5598 = vadd.xlane.f32.xlu0 %v5597_v50 }
 0x971   :  { %6478 = vmax.xlane.f32.xlu0 %v6477_v53 }
 0x979   :  { %6481 = vmax.xlane.f32.xlu0 %v6480_v12 }
 0x9d4   :  { %v5596_v21 = vpop.xlane.xlu1 %5595 }
 0x9d5   :  { %8814 = vrcp.f32 %v5596_v21  ;;  %v5611_v2 = vand.u32 2147483648, %v5596_v21  ;;  %v5609_v5 = vand.u32 2147483647, %v5596_v21  ;;  %vm5605_vm4 = vweird.f32 %v5596_v21 }
 0x9d7   :  { %v5612_v40 = vor.u32 1.1754944e-38, %v5611_v2  ;;  %vm5610_vm8 = vcmp.eq.f32.partialorder %v5609_v5, 8.507059e+37 }
 0x9db   :  { %v8815_v27 = vpop.eup %8814 }
 0x9dc   :  { %v5601_v18 = vmul.f32 %v8815_v27, %v5596_v21  ;;  %v5599_v15 = vpop.xlane.xlu0 %5598  ;;  %vm5606_vm2 = vweird.f32 %v8815_v27 }
 0x9dd   :  { %8816 = vrcp.f32 %v5599_v15  ;;  %vm5607_vm6 = vmor %vm5605_vm4, %vm5606_vm2  ;;  %v5626_v37 = vand.u32 2147483648, %v5599_v15  ;;  %v5624_v29 = vand.u32 2147483647, %v5599_v15  ;;  %vm5620_vm10 = vweird.f32 %v5599_v15 }
 0x9de   :  { %v5602_v49 = vsub.f32 1.0, %v5601_v18 }
 0x9df   :  { %v5627_v1 = vor.u32 1.1754944e-38, %v5626_v37  ;;  %vm5625_vm12 = vcmp.eq.f32.partialorder %v5624_v29, 8.507059e+37 }
 0x9e0   :  { %v5603_v34 = vmul.f32 %v8815_v27, %v5602_v49 }
 0x9e2   :  { %v5604_v41 = vadd.f32 %v8815_v27, %v5603_v34 }
 0x9e3   :  { %v8817_v47 = vpop.eup %8816 }
 0x9e4   :  { %v5608_v30 = vsel %vm5607_vm6, %v8815_v27, %v5604_v41  ;;  %v5616_v52 = vmul.f32 %v8817_v47, %v5599_v15  ;;  %v6479_v56 = vpop.xlane.xlu0 %6478  ;;  %vm5621_vm9 = vweird.f32 %v8817_v47 }
 0x9e5   :  { %v5613_v35 = vsel %vm5610_vm8, %v5612_v40, %v5608_v30  ;;  %v6483_v3 = vsub.f32 %v5575_v55, %v6479_v56  ;;  %vm5622_vm11 = vmor %vm5620_vm10, %vm5621_vm9 }
 0x9e6   :  { %v5617_v38 = vsub.f32 1.0, %v5616_v52  ;;  %v11447_v0 = vmul.f32 %v8811_v23, %v5613_v35 }
 0x9e7   :  { %v6485_v42 = vmul.f32 1.442695, %v6483_v3 }
 0x9e8   :  { %v5618_v48 = vmul.f32 %v8817_v47, %v5617_v38  ;;  %5634 = vxpose.xlu1.b32.start [1/2] (short) (narrow) %v11447_v0, 8  ;;  %v6323_v23 = vmul.f32 %v11447_v0, %v10843_v6 }
 0x9e9   :  { %8818 = vpow2.f32 %v6485_v42 }
 0x9ea   :  { %v5619_v16 = vadd.f32 %v8817_v47, %v5618_v48  ;;  %v6325_v26 = vmul.f32 %v6323_v23, %v11447_v0 }
 0x9ec   :  { %v5623_v60 = vsel %vm5622_vm11, %v8817_v47, %v5619_v16  ;;  %v6482_v14 = vpop.xlane.xlu0 %6481  ;;  %v6327_v63 = vsel %vm5581_vm3, %v6325_v26, 0.0 }
 0x9ed   :  { %v5628_v61 = vsel %vm5625_vm12, %v5627_v1, %v5623_v60  ;;  %v6484_v4 = vsub.f32 %v5579_v58, %v6482_v14 }
 0x9ee   :  { %v5629_v32 = vmul.f32 %v8813_v59, %v5628_v61 }
 0x9ef   :  { %v8819_v9 = vpop.eup %8818  ;;  %v6487_v20 = vmul.f32 1.442695, %v6484_v4 }
 0x9f0   :  { %v6489_v50 = vsel %vm5581_vm3, %v8819_v9, 0.0  ;;  %v5633_v11 = vmul.f32 %v11390_v19, %v5629_v32 }
 0x9f1   :  { %8820 = vpow2.f32 %v6487_v20  ;;  %6490 = vadd.xlane.f32.xlu0 %v6489_v50 }
 0x9f2   :  { %5635 = vxpose.xlu1.b32.end [2/2] (short) (narrow) %v5633_v11, 8  ;;  %v6324_v45 = vmul.f32 %v5633_v11, %v10890_v10  ;;  %v11478_v4 = vand.u32 4294901760, %v5633_v11 }
 0x9f4   :  { %v6326_v55 = vmul.f32 %v6324_v45, %v5633_v11  ;;  %v11484_v32 = vsub.f32 %v5633_v11, %v11478_v4 }
 0x9f6   :  { %v6328_v59 = vsel %vm5581_vm3, %v6326_v55, 0.0  ;;  %v11494_v50 = vand.u32 4294901760, %v11484_v32 }
 0x9f7   :  { %v8821_v25 = vpop.eup %8820  ;;  %v11458_v6 = vadd.f32 %v6328_v59, %v6327_v63 }
 0x9f8   :  { %v6492_v33 = vsel %vm5581_vm3, %v8821_v25, 0.0  ;;  %v6034_v26 = vsub.f32 %v11484_v32, %v11494_v50 }
 0x9f9   :  { %6493 = vadd.xlane.f32.xlu0 %v6492_v33 }
 0xa64   :  { %v6491_v8 = vpop.xlane.xlu0 %6490 }
 0xa65   :  { %8822 = vrcp.f32 %v6491_v8  ;;  %v6506_v12 = vand.u32 2147483648, %v6491_v8  ;;  %v6504_v27 = vand.u32 2147483647, %v6491_v8  ;;  %vm6500_vm15 = vweird.f32 %v6491_v8 }
 0xa67   :  { %v6507_v49 = vor.u32 1.1754944e-38, %v6506_v12  ;;  %vm6505_vm4 = vcmp.eq.f32.partialorder %v6504_v27, 8.507059e+37  ;;  %v6526_v27 = vmul.f32 %v11390_v19, %v11411_v13 }
 0xa6b   :  { %v8823_v53 = vpop.eup %8822 }
 0xa6c   :  { %v6496_v46 = vmul.f32 %v8823_v53, %v6491_v8  ;;  %v6494_v58 = vpop.xlane.xlu0 %6493  ;;  %vm6501_vm0 = vweird.f32 %v8823_v53 }
 0xa6d   :  { %8824 = vrcp.f32 %v6494_v58  ;;  %vm6502_vm2 = vmor %vm6500_vm15, %vm6501_vm0  ;;  %v6521_v40 = vand.u32 2147483648, %v6494_v58  ;;  %v6519_v52 = vand.u32 2147483647, %v6494_v58  ;;  %vm6515_vm8 = vweird.f32 %v6494_v58 }
 0xa6e   :  { %v6497_v10 = vsub.f32 1.0, %v6496_v46 }
 0xa6f   :  { %v6522_v35 = vor.u32 1.1754944e-38, %v6521_v40  ;;  %vm6520_vm10 = vcmp.eq.f32.partialorder %v6519_v52, 8.507059e+37  ;;  %v6580_v40 = vand.u32 4294901760, %v11399_v54 }
 0xa70   :  { %v6498_v21 = vmul.f32 %v8823_v53, %v6497_v10 }
 0xa72   :  { %v6499_v18 = vadd.f32 %v8823_v53, %v6498_v21 }
 0xa73   :  { %v8825_v15 = vpop.eup %8824 }
 0xa74   :  { %v6503_v2 = vsel %vm6502_vm2, %v8823_v53, %v6499_v18  ;;  %v6511_v34 = vmul.f32 %v8825_v15, %v6494_v58  ;;  %vm6516_vm6 = vweird.f32 %v8825_v15 }
 0xa75   :  { %v6508_v5 = vsel %vm6505_vm4, %v6507_v49, %v6503_v2  ;;  %vm6517_vm9 = vmor %vm6515_vm8, %vm6516_vm6 }
 0xa76   :  { %v6512_v41 = vsub.f32 1.0, %v6511_v34  ;;  %v11461_v47 = vmul.f32 %v8819_v9, %v6508_v5  ;;  %v6578_v34 = vand.u32 4294901760, %v6526_v27 }
 0xa78   :  { %v6513_v30 = vmul.f32 %v8825_v15, %v6512_v41  ;;  %6529 = vxpose.xlu2.b32.start [1/2] (short) (narrow) %v11461_v47, 8  ;;  %v7215_v42 = vmul.f32 %v11461_v47, %v11284_v17  ;;  %v11481_v17 = vand.u32 4294901760, %v11447_v0 }
 0xa7a   :  { %v6514_v56 = vadd.f32 %v8825_v15, %v6513_v30  ;;  %v7217_v16 = vmul.f32 %v7215_v42, %v11461_v47  ;;  %v11489_v9 = vsub.f32 %v11447_v0, %v11481_v17 }
 0xa7c   :  { %v6518_v3 = vsel %vm6517_vm9, %v8825_v15, %v6514_v56  ;;  %v7219_v60 = vsel %vm5581_vm3, %v7217_v16, 0.0  ;;  %v11502_v11 = vand.u32 4294901760, %v11489_v9  ;;  %v11554_v56 = vsub.f32 %v6526_v27, %v6578_v34 }
 0xa7d   :  { %v6523_v38 = vsel %vm6520_vm10, %v6522_v35, %v6518_v3  ;;  %v11557_v3 = vsub.f32 %v11399_v54, %v6580_v40  ;;  %v11569_v16 = vand.u32 4294901760, %v11123_v28 }
 0xa7e   :  { %v6524_v37 = vmul.f32 %v8821_v25, %v6523_v38  ;;  %v6040_v63 = vsub.f32 %v11489_v9, %v11502_v11  ;;  %v6607_v13 = vand.u32 4294901760, %v11554_v56 }
 0xa7f   :  { %v6613_v42 = vand.u32 4294901760, %v11557_v3 }
 0xa80   :  { %v11467_v48 = vmul.f32 %v11390_v19, %v6524_v37  ;;  %v6041_v25 = vand.u32 4294901760, %v6040_v63  ;;  %v6608_v54 = vsub.f32 %v11554_v56, %v6607_v13  ;;  %v11602_v63 = vand.u32 4294901760, %v11461_v47 }
 0xa82   :  { %6530 = vxpose.xlu2.b32.end [2/2] (short) (narrow) %v11467_v48, 8  ;;  %v7216_v29 = vmul.f32 %v11467_v48, %v11287_v62 }
 0xa84   :  { %v7218_v1 = vmul.f32 %v7216_v29, %v11467_v48 }
 0xa86   :  { %v7220_v14 = vsel %vm5581_vm3, %v7218_v1, 0.0 }
 0xa87   :  { %v11476_v61 = vadd.f32 %v7220_v14, %v7219_v60  ;;  %v6614_v60 = vsub.f32 %v11557_v3, %v6613_v42  ;;  %v11577_v14 = vand.u32 4294901760, %v11121_v7 }
 0xa89   :  { %12650 = vst [vmem:[#allocation7_spill] sm:$0xff] %v11476_v61 }
 0xa8e   :  { %v5650_v23 = vpop.trf.xlu1 }
 0xa8f   :  { %v5667_v62 = vsel %vm408_vm7, %v5650_v23, 0 }
 0xa90   :  { %v11491_v20 = vand.u32 4294901760, %v5667_v62 }
 0xa92   :  { %v11497_v45 = vsub.f32 %v5667_v62, %v11491_v20  ;;  %5723 = vmatmul.f32.vlgmr.msra.gmra.mxu1 %v11491_v20  ;;  %v6609_v62 = vand.u32 4294901760, %v6608_v54 }
 0xa93   :  { %5927 = vmatpush.msra.mxu1 %v11406_v39 }
 0xa94   :  { %5749 = vmatmul.f32.vlgmr.msra.gmra.mxu2 %v11497_v45  ;;  %v11506_v0 = vand.u32 4294901760, %v11497_v45 }
 0xa95   :  { %5929 = vmatpush.msra.mxu1 %v11409_v43  ;;  %5954 = vmatpush.msra.mxu2 %v5871_v44  ;;  %v6035_v44 = vand.u32 4294901760, %v6034_v26  ;;  %v6771_v26 = vsub.f32 %v11121_v7, %v11577_v14  ;;  %v11597_v7 = vand.u32 4294901760, %v11467_v48 }
 0xa96   :  { %5774 = vmatmul.f32.vlgmr.msra.gmra.mxu3 %v11506_v0  ;;  %v5690_v55 = vsub.f32 %v11497_v45, %v11506_v0 }
 0xa97   :  { %5958 = vmatpush.msra.mxu2 %v5877_v22  ;;  %5979 = vmatpush.msra.mxu3 %v11406_v39 }
 0xa98   :  { %v11521_v59 = vand.u32 4294901760, %v5690_v55 }
 0xa99   :  { %5981 = vmatpush.msra.mxu3 %v11409_v43 }
 0xa9a   :  { %5692 = vmatmul.f32.vlgmr.msra.gmra.mxu0 %v11521_v59  ;;  %5824 = vmatmul.f32.vlgmr.msrb.gmra.mxu1 %v11491_v20 }
 0xa9b   :  { %5902 = vmatpush.msra.mxu0 %v11415_v57  ;;  %6036 = vmatpush.msrb.mxu1 %v6035_v44 }
 0xa9c   :  { %5851 = vmatmul.f32.vlgmr.msrb.gmra.mxu2 %v11521_v59 }
 0xa9d   :  { %5905 = vmatpush.msra.mxu0 %v11421_v36  ;;  %6042 = vmatpush.msrb.mxu1 %v6041_v25 }
 0xa9e   :  { %6064 = vmatpush.msrb.mxu2 %v11484_v32  ;;  %5882 = vmatmul.f32.vlgmr.msrb.gmra.mxu3 %v11491_v20 }
 0xa9f   :  { %6089 = vmatpush.msrb.mxu3 %v11478_v4 }
 0xaa0   :  { %6067 = vmatpush.msrb.mxu2 %v11489_v9 }
 0xaa1   :  { %6091 = vmatpush.msrb.mxu3 %v11481_v17 }
 0xaa2   :  { %5801 = vmatmul.f32.vlgmr.msrb.gmra.mxu0 %v11491_v20  ;;  %5933 = vmatmul.f32.vlgmr.msra.gmra.mxu1 %v11506_v0 }
 0xaa3   :  { %6005 = vmatpush.msrb.mxu0 %v11478_v4  ;;  %6141 = vmatpush.msra.mxu1 %v11478_v4 }
 0xaa4   :  { %5960 = vmatmul.f32.vlgmr.msra.gmra.mxu2 %v11491_v20 }
 0xaa5   :  { %6007 = vmatpush.msrb.mxu0 %v11481_v17  ;;  %6143 = vmatpush.msra.mxu1 %v11481_v17 }
 0xaa6   :  { %6164 = vmatpush.msra.mxu2 %v11478_v4  ;;  %5983 = vmatmul.f32.vlgmr.msra.gmra.mxu3 %v11491_v20 }
 0xaa7   :  { %6195 = vmatpush.msra.mxu3 %v6035_v44 }
 0xaa8   :  { %6166 = vmatpush.msra.mxu2 %v11481_v17 }
 0xaa9   :  { %6201 = vmatpush.msra.mxu3 %v6041_v25 }
 0xaaa   :  { %5908 = vmatmul.f32.vlgmr.msra.gmra.mxu0 %v11497_v45 }
 0xaab   :  { %6116 = vmatpush.msra.mxu0 %v11494_v50 }
 0xaad   :  { %6120 = vmatpush.msra.mxu0 %v11502_v11 }
 0xb0f   :  { %v5724_v39 = vpop.f32.mrf.mxu1 }
 0xb17   :  { %v5693_v43 = vpop.f32.mrf.mxu0  ;;  %v5750_v57 = vpop.f32.mrf.mxu2 }
 0xb18   :  { %v5725_v36 = vadd.f32 %v5724_v39, %v5693_v43  ;;  %v5825_v53 = vpop.f32.mrf.mxu1  ;;  %v11610_v39 = vsub.f32 %v11467_v48, %v11597_v7  ;;  %v11616_v43 = vsub.f32 %v11461_v47, %v11602_v63 }
 0xb19   :  { %v5775_v22 = vpop.f32.mrf.mxu3 }
 0xb1a   :  { %v5751_v33 = vadd.f32 %v5750_v57, %v5725_v36  ;;  %v11623_v36 = vand.u32 4294901760, %v11610_v39  ;;  %v11631_v47 = vand.u32 4294901760, %v11616_v43 }
 0xb1c   :  { %v5776_v8 = vadd.f32 %v5775_v22, %v5751_v33 }
 0xb1f   :  { %v5802_v46 = vpop.f32.mrf.mxu0  ;;  %v5852_v10 = vpop.f32.mrf.mxu2 }
 0xb20   :  { %v5803_v58 = vadd.f32 %v5802_v46, %v5776_v8  ;;  %v5934_v2 = vpop.f32.mrf.mxu1 }
 0xb21   :  { %v5883_v21 = vpop.f32.mrf.mxu3 }
 0xb22   :  { %v11547_v12 = vadd.f32 %v5825_v53, %v5803_v58  ;;  %v5884_v18 = vadd.f32 %v5883_v21, %v5852_v10 }
 0xb24   :  { %7537 = vrot.lane.b32.xlu2 %v11547_v12, %s8889_s1 }
 0xb27   :  { %v5909_v15 = vpop.f32.mrf.mxu0  ;;  %v5961_v41 = vpop.f32.mrf.mxu2 }
 0xb28   :  { %v5910_v49 = vadd.f32 %v5909_v15, %v5884_v18 }
 0xb29   :  { %v5984_v52 = vpop.f32.mrf.mxu3 }
 0xb2a   :  { %v5935_v5 = vadd.f32 %v5934_v2, %v5910_v49 }
 0xb2c   :  { %v5962_v30 = vadd.f32 %v5961_v41, %v5935_v5 }
 0xb2e   :  { %v5985_v35 = vadd.f32 %v5984_v52, %v5962_v30 }
 0xb30   :  { %v5988_v38 = vsel %vm408_vm7, %v5985_v35, 0 }
 0xb31   :  { %v6008_v19 = vand.u32 4294901760, %v5988_v38 }
 0xb33   :  { %v6009_v37 = vsub.f32 %v5988_v38, %v6008_v19  ;;  %6044 = vmatmul.f32.vlgmr.msrb.gmra.mxu1 %v6008_v19 }
 0xb34   :  { %6248 = vmatpush.msrb.mxu1 %v11478_v4 }
 0xb35   :  { %v6010_v29 = vand.u32 4294901760, %v6009_v37  ;;  %6070 = vmatmul.f32.vlgmr.msrb.gmra.mxu2 %v6009_v37 }
 0xb36   :  { %6250 = vmatpush.msrb.mxu1 %v11481_v17  ;;  %6275 = vmatpush.msrb.mxu2 %v11494_v50  ;;  %v11582_v50 = vsub.f32 %v11123_v28, %v11569_v16 }
 0xb37   :  { %v6011_v1 = vsub.f32 %v6009_v37, %v6010_v29  ;;  %6095 = vmatmul.f32.vlgmr.msrb.gmra.mxu3 %v6010_v29 }
 0xb38   :  { %6279 = vmatpush.msrb.mxu2 %v11502_v11  ;;  %6300 = vmatpush.msrb.mxu3 %v11478_v4  ;;  %v6545_v11 = vpop.trf.xlu2  ;;  %v6615_v4 = vand.u32 4294901760, %v6614_v60  ;;  %v6766_v28 = vand.u32 4294901760, %v11582_v50 }
 0xb39   :  { %v6012_v23 = vand.u32 4294901760, %v6011_v1 }
 0xb3a   :  { %6302 = vmatpush.msrb.mxu3 %v11481_v17  ;;  %v6562_v17 = vsel %vm408_vm7, %v6545_v11, 0 }
 0xb3b   :  { %6013 = vmatmul.f32.vlgmr.msrb.gmra.mxu0 %v6012_v23  ;;  %6145 = vmatmul.f32.vlgmr.msra.gmra.mxu1 %v6008_v19  ;;  %v11594_v55 = vand.u32 4294901760, %v6562_v17 }
 0xb3c   :  { %6223 = vmatpush.msrb.mxu0 %v11484_v32  ;;  %6610 = vmatpush.msra.mxu1 %v6609_v62  ;;  %v6772_v32 = vand.u32 4294901760, %v6771_v26 }
 0xb3d   :  { %6172 = vmatmul.f32.vlgmr.msra.gmra.mxu2 %v11521_v59  ;;  %v11605_v44 = vsub.f32 %v6562_v17, %v11594_v55 }
 0xb3e   :  { %6226 = vmatpush.msrb.mxu0 %v11489_v9  ;;  %6616 = vmatpush.msra.mxu1 %v6615_v4  ;;  %v6767_v9 = vsub.f32 %v11582_v50, %v6766_v28  ;;  %v6773_v59 = vsub.f32 %v6771_v26, %v6772_v32 }
 0xb3f   :  { %6638 = vmatpush.msra.mxu2 %v11554_v56  ;;  %6203 = vmatmul.f32.vlgmr.msra.gmra.mxu3 %v11491_v20  ;;  %v11620_v57 = vand.u32 4294901760, %v11605_v44 }
 0xb40   :  { %6663 = vmatpush.msra.mxu3 %v6578_v34  ;;  %v6768_v25 = vand.u32 4294901760, %v6767_v9 }
 0xb41   :  { %6641 = vmatpush.msra.mxu2 %v11557_v3  ;;  %v6585_v48 = vsub.f32 %v11605_v44, %v11620_v57 }
 0xb42   :  { %6665 = vmatpush.msra.mxu3 %v6580_v40 }
 0xb43   :  { %6122 = vmatmul.f32.vlgmr.msra.gmra.mxu0 %v6008_v19  ;;  %6254 = vmatmul.f32.vlgmr.msrb.gmra.mxu1 %v11506_v0  ;;  %v6774_v0 = vand.u32 4294901760, %v6773_v59 }
 0xb44   :  { %6579 = vmatpush.msra.mxu0 %v6578_v34  ;;  %6715 = vmatpush.msrb.mxu1 %v6578_v34 }
 0xb45   :  { %6281 = vmatmul.f32.vlgmr.msrb.gmra.mxu2 %v11491_v20 }
 0xb46   :  { %6581 = vmatpush.msra.mxu0 %v6580_v40  ;;  %6717 = vmatpush.msrb.mxu1 %v6580_v40 }
 0xb47   :  { %6738 = vmatpush.msrb.mxu2 %v11569_v16  ;;  %6304 = vmatmul.f32.vlgmr.msrb.gmra.mxu3 %v11491_v20  ;;  %v6929_v20 = vsub.f32 %v11610_v39, %v11623_v36 }
 0xb48   :  { %6769 = vmatpush.msrb.mxu3 %v6768_v25 }
 0xb49   :  { %6740 = vmatpush.msrb.mxu2 %v11577_v14  ;;  %v6930_v22 = vand.u32 4294901760, %v6929_v20 }
 0xb4a   :  { %6775 = vmatpush.msrb.mxu3 %v6774_v0 }
 0xb4b   :  { %6229 = vmatmul.f32.vlgmr.msrb.gmra.mxu0 %v11497_v45  ;;  %6618 = vmatmul.f32.vlgmr.msra.gmra.mxu1 %v11594_v55  ;;  %v11646_v45 = vand.u32 4294901760, %v6585_v48 }
 0xb4c   :  { %6690 = vmatpush.msrb.mxu0 %v6607_v13  ;;  %6822 = vmatpush.msra.mxu1 %v11569_v16 }
 0xb4d   :  { %6330 = vadd.xlane.f32.xlu2 %v11458_v6  ;;  %6644 = vmatmul.f32.vlgmr.msra.gmra.mxu2 %v11605_v44  ;;  %v6935_v6 = vsub.f32 %v11616_v43, %v11631_v47 }
 0xb4e   :  { %6694 = vmatpush.msrb.mxu0 %v6613_v42  ;;  %6824 = vmatpush.msra.mxu1 %v11577_v14 }
 0xb4f   :  { %6849 = vmatpush.msra.mxu2 %v6766_v28  ;;  %6669 = vmatmul.f32.vlgmr.msra.gmra.mxu3 %v11620_v57  ;;  %v6936_v33 = vand.u32 4294901760, %v6935_v6  ;;  %v7389_v28 = vand.u32 4294901760, %v11547_v12 }
 0xb50   :  { %6874 = vmatpush.msra.mxu3 %v11569_v16 }
 0xb51   :  { %6853 = vmatpush.msra.mxu2 %v6772_v32  ;;  %v7416_v48 = vsub.f32 %v11547_v12, %v7389_v28 }
 0xb52   :  { %6876 = vmatpush.msra.mxu3 %v11577_v14 }
 0xb53   :  { %6587 = vmatmul.f32.vlgmr.msra.gmra.mxu0 %v11646_v45  ;;  %6719 = vmatmul.f32.vlgmr.msrb.gmra.mxu1 %v11594_v55 }
 0xb54   :  { %6797 = vmatpush.msra.mxu0 %v11582_v50  ;;  %6931 = vmatpush.msrb.mxu1 %v6930_v22 }
 0xb55   :  { %6746 = vmatmul.f32.vlgmr.msrb.gmra.mxu2 %v11646_v45 }
 0xb56   :  { %6800 = vmatpush.msra.mxu0 %v6771_v26  ;;  %6937 = vmatpush.msrb.mxu1 %v6936_v33 }
 0xb57   :  { %6959 = vmatpush.msrb.mxu2 %v11610_v39  ;;  %6777 = vmatmul.f32.vlgmr.msrb.gmra.mxu3 %v11594_v55 }
 0xb58   :  { %6984 = vmatpush.msrb.mxu3 %v11597_v7 }
 0xb59   :  { %6962 = vmatpush.msrb.mxu2 %v11616_v43 }
 0xb5a   :  { %6986 = vmatpush.msrb.mxu3 %v11602_v63 }
 0xb5b   :  { %6696 = vmatmul.f32.vlgmr.msrb.gmra.mxu0 %v11594_v55  ;;  %6828 = vmatmul.f32.vlgmr.msra.gmra.mxu1 %v11620_v57 }
 0xb5c   :  { %6900 = vmatpush.msrb.mxu0 %v11597_v7  ;;  %7036 = vmatpush.msra.mxu1 %v11597_v7 }
 0xb5d   :  { %6855 = vmatmul.f32.vlgmr.msra.gmra.mxu2 %v11594_v55 }
 0xb5e   :  { %6902 = vmatpush.msrb.mxu0 %v11602_v63  ;;  %7038 = vmatpush.msra.mxu1 %v11602_v63 }
 0xb5f   :  { %7059 = vmatpush.msra.mxu2 %v11597_v7  ;;  %6878 = vmatmul.f32.vlgmr.msra.gmra.mxu3 %v11594_v55 }
 0xb60   :  { %7090 = vmatpush.msra.mxu3 %v6930_v22 }
 0xb61   :  { %7061 = vmatpush.msra.mxu2 %v11602_v63 }
 0xb62   :  { %7096 = vmatpush.msra.mxu3 %v6936_v33 }
 0xb63   :  { %6803 = vmatmul.f32.vlgmr.msra.gmra.mxu0 %v11605_v44 }
 0xb64   :  { %7011 = vmatpush.msra.mxu0 %v11623_v36 }
 0xb66   :  { %7015 = vmatpush.msra.mxu0 %v11631_v47 }
 0xbb0   :  { %v6045_v8 = vpop.f32.mrf.mxu1 }
 0xbb8   :  { %v6014_v53 = vpop.f32.mrf.mxu0  ;;  %v6071_v46 = vpop.f32.mrf.mxu2 }
 0xbb9   :  { %v6046_v58 = vadd.f32 %v6045_v8, %v6014_v53  ;;  %v6146_v10 = vpop.f32.mrf.mxu1  ;;  %v7417_v53 = vand.u32 4294901760, %v7416_v48 }
 0xbba   :  { %v6096_v21 = vpop.f32.mrf.mxu3 }
 0xbbb   :  { %v6072_v27 = vadd.f32 %v6071_v46, %v6046_v58  ;;  %v7418_v12 = vsub.f32 %v7416_v48, %v7417_v53 }
 0xbbd   :  { %v6097_v18 = vadd.f32 %v6096_v21, %v6072_v27 }
 0xbc0   :  { %v6123_v15 = vpop.f32.mrf.mxu0  ;;  %v6173_v49 = vpop.f32.mrf.mxu2 }
 0xbc1   :  { %v6124_v2 = vadd.f32 %v6123_v15, %v6097_v18  ;;  %v6255_v40 = vpop.f32.mrf.mxu1  ;;  %v7419_v15 = vand.u32 4294901760, %v7418_v12 }
 0xbc2   :  { %v6204_v34 = vpop.f32.mrf.mxu3 }
 0xbc3   :  { %v11671_v5 = vadd.f32 %v6146_v10, %v6124_v2  ;;  %v6205_v41 = vadd.f32 %v6204_v34, %v6173_v49 }
 0xbc5   :  { %v11675_v30 = vmul.f32 %v11671_v5, %v12604_v51 }
 0xbc7   :  { %v6422_v52 = vsel %vm5581_vm3, %v11675_v30, 0.0 }
 0xbc8   :  { %v6230_v56 = vpop.f32.mrf.mxu0  ;;  %v6282_v35 = vpop.f32.mrf.mxu2  ;;  %6423 = vadd.xlane.f32.xlu0 %v6422_v52 }
 0xbc9   :  { %v6231_v3 = vadd.f32 %v6230_v56, %v6205_v41  ;;  %v6619_v37 = vpop.f32.mrf.mxu1 }
 0xbca   :  { %v6305_v38 = vpop.f32.mrf.mxu3 }
 0xbcb   :  { %v6256_v19 = vadd.f32 %v6255_v40, %v6231_v3 }
 0xbcd   :  { %v6283_v13 = vadd.f32 %v6282_v35, %v6256_v19 }
 0xbcf   :  { %v11679_v42 = vadd.f32 %v6305_v38, %v6283_v13 }
 0xbd0   :  { %v6588_v29 = vpop.f32.mrf.mxu0  ;;  %v6645_v54 = vpop.f32.mrf.mxu2 }
 0xbd1   :  { %v6720_v1 = vpop.f32.mrf.mxu1  ;;  %v6620_v62 = vadd.f32 %v6619_v37, %v6588_v29 }
 0xbd2   :  { %v6670_v16 = vpop.f32.mrf.mxu3 }
 0xbd3   :  { %v6646_v4 = vadd.f32 %v6645_v54, %v6620_v62 }
 0xbd5   :  { %v6671_v59 = vadd.f32 %v6670_v16, %v6646_v4 }
 0xbd8   :  { %v6697_v60 = vpop.f32.mrf.mxu0  ;;  %v6747_v14 = vpop.f32.mrf.mxu2 }
 0xbd9   :  { %v6829_v17 = vpop.f32.mrf.mxu1  ;;  %v6698_v20 = vadd.f32 %v6697_v60, %v6671_v59 }
 0xbda   :  { %v6778_v23 = vpop.f32.mrf.mxu3 }
 0xbdb   :  { %v6779_v50 = vadd.f32 %v6778_v23, %v6747_v14  ;;  %v11684_v8 = vadd.f32 %v6720_v1, %v6698_v20 }
 0xbdd   :  { %v11688_v10 = vand.u32 4294901760, %v11684_v8 }
 0xbdf   :  { %v11696_v18 = vsub.f32 %v11684_v8, %v11688_v10 }
 0xbe0   :  { %v6804_v11 = vpop.f32.mrf.mxu0  ;;  %v6856_v9 = vpop.f32.mrf.mxu2 }
 0xbe1   :  { %v6805_v26 = vadd.f32 %v6804_v11, %v6779_v50 }
 0xbe2   :  { %v6879_v0 = vpop.f32.mrf.mxu3 }
 0xbe3   :  { %v6830_v32 = vadd.f32 %v6829_v17, %v6805_v26 }
 0xbe5   :  { %v6857_v25 = vadd.f32 %v6856_v9, %v6830_v32 }
 0xbe7   :  { %v6880_v6 = vadd.f32 %v6879_v0, %v6857_v25 }
 0xbe9   :  { %v6883_v22 = vsel %vm408_vm7, %v6880_v6, 0 }
 0xbea   :  { %v6903_v33 = vand.u32 4294901760, %v6883_v22 }
 0xbec   :  { %v6904_v46 = vsub.f32 %v6883_v22, %v6903_v33  ;;  %6939 = vmatmul.f32.vlgmr.msrb.gmra.mxu1 %v6903_v33 }
 0xbed   :  { %7143 = vmatpush.msrb.mxu1 %v11597_v7 }
 0xbee   :  { %v6905_v58 = vand.u32 4294901760, %v6904_v46  ;;  %6965 = vmatmul.f32.vlgmr.msrb.gmra.mxu2 %v6904_v46 }
 0xbef   :  { %7145 = vmatpush.msrb.mxu1 %v11602_v63  ;;  %7170 = vmatpush.msrb.mxu2 %v11623_v36 }
 0xbf0   :  { %v6906_v21 = vsub.f32 %v6904_v46, %v6905_v58  ;;  %6990 = vmatmul.f32.vlgmr.msrb.gmra.mxu3 %v6905_v58 }
 0xbf1   :  { %7174 = vmatpush.msrb.mxu2 %v11631_v47  ;;  %7195 = vmatpush.msrb.mxu3 %v11597_v7  ;;  %v7590_v7 = vand.u32 4294901760, %v11696_v18 }
 0xbf2   :  { %v6907_v27 = vand.u32 4294901760, %v6906_v21 }
 0xbf3   :  { %7197 = vmatpush.msrb.mxu3 %v11602_v63  ;;  %v7591_v63 = vsub.f32 %v11696_v18, %v7590_v7 }
 0xbf4   :  { %6908 = vmatmul.f32.vlgmr.msrb.gmra.mxu0 %v6907_v27  ;;  %7040 = vmatmul.f32.vlgmr.msra.gmra.mxu1 %v6903_v33 }
 0xbf5   :  { %7118 = vmatpush.msrb.mxu0 %v11610_v39  ;;  %7420 = vmatpush.msra.mxu1 %v7419_v15  ;;  %v7592_v39 = vand.u32 4294901760, %v7591_v63 }
 0xbf6   :  { %7067 = vmatmul.f32.vlgmr.msra.gmra.mxu2 %v11646_v45 }
 0xbf7   :  { %7121 = vmatpush.msrb.mxu0 %v11616_v43  ;;  %7443 = vmatpush.msra.mxu2 %v7416_v48 }
 0xbf8   :  { %7098 = vmatmul.f32.vlgmr.msra.gmra.mxu3 %v11594_v55 }
 0xbf9   :  { %7466 = vmatpush.msra.mxu3 %v7389_v28 }
 0xbfc   :  { %7017 = vmatmul.f32.vlgmr.msra.gmra.mxu0 %v6903_v33  ;;  %7149 = vmatmul.f32.vlgmr.msrb.gmra.mxu1 %v11620_v57 }
 0xbfd   :  { %7390 = vmatpush.msra.mxu0 %v7389_v28  ;;  %7514 = vmatpush.msrb.mxu1 %v7389_v28 }
 0xbfe   :  { %7176 = vmatmul.f32.vlgmr.msrb.gmra.mxu2 %v11594_v55 }
 0xbff   :  { %7563 = vmatpush.msrb.mxu2 %v11688_v10 }
 0xc00   :  { %7199 = vmatmul.f32.vlgmr.msrb.gmra.mxu3 %v11594_v55  ;;  %v12651_v55 = vld [vmem:[#allocation5_spill] sm:$0xff] }
 0xc01   :  { %7593 = vmatpush.msrb.mxu3 %v7592_v39 }
 0xc04   :  { %7124 = vmatmul.f32.vlgmr.msrb.gmra.mxu0 %v11605_v44 }
 0xc05   :  { %7492 = vmatpush.msrb.mxu0 %v7417_v53 }
 0xc3b   :  { %v6424_v43 = vpop.xlane.xlu0 %6423 }
 0xc3c   :  { %8826 = vrsqrt.f32 %v6424_v43  ;;  %vm6432_vm11 = vcmp.eq.f32.partialorder %v6424_v43, inf  ;;  %v6435_v41 = vand.u32 2147483648, %v6424_v43  ;;  %vm6434_vm12 = vcmp.eq.f32.partialorder %v6424_v43, 0.0 }
 0xc42   :  { %v8827_v36 = vpop.eup %8826 }
 0xc43   :  { %v6426_v47 = vmul.f32 %v8827_v36, %v6424_v43 }
 0xc45   :  { %v6427_v45 = vmul.f32 %v8827_v36, %v6426_v47  ;;  %v12655_v47 = vld [vmem:[#allocation12_spill] sm:$0xff] }
 0xc47   :  { %v6428_v49 = vmul.f32 0.5, %v6427_v45  ;;  %v12656_v45 = vld [vmem:[#allocation14_spill] sm:$0xff] }
 0xc49   :  { %v6429_v57 = vsub.f32 1.5, %v6428_v49  ;;  %v2663_v49 = vadd.f32 %v12656_v45, %v12655_v47 }
 0xc4b   :  { %v6430_v2 = vmul.f32 %v8827_v36, %v6429_v57 }
 0xc4d   :  { %v6431_v34 = vmul.f32 %v6430_v2, %v6424_v43  ;;  %v12658_v2 = vld [vmem:[#allocation10_spill] sm:$0xff] }
 0xc4f   :  { %v6433_v40 = vsel %vm6432_vm11, %v6424_v43, %v6431_v34 }
 0xc50   :  { %v6436_v52 = vsel %vm6434_vm12, %v6435_v41, %v6433_v40  ;;  %v12659_v41 = vld [vmem:[#allocation20_spill] sm:$0xff] }
 0xc51   :  { %v6437_v56 = vadd.f32 1e-15, %v6436_v52  ;;  %v2698_v40 = vadd.f32 %v12659_v41, %v2663_v49 }
 0xc53   :  { %8828 = vrcp.f32 %v6437_v56  ;;  %v6454_v35 = vperm.slane %v6437_v56, %v12651_v55  ;;  %v6449_v13 = vand.u32 2147483648, %v6437_v56  ;;  %v6447_v54 = vand.u32 2147483647, %v6437_v56 }
 0xc54   :  { %vm6443_vm15 = vweird.f32 %v6437_v56 }
 0xc55   :  { %8830 = vrcp.f32 %v6454_v35  ;;  %v6473_v60 = vand.u32 2147483648, %v6454_v35  ;;  %v6450_v14 = vor.u32 1.1754944e-38, %v6449_v13  ;;  %v6471_v62 = vand.u32 2147483647, %v6454_v35  ;;  %v12663_v13 = vld [vmem:[#allocation21_spill] sm:$0xff] }
 0xc56   :  { %vm6448_vm6 = vcmp.eq.f32.partialorder %v6447_v54, 8.507059e+37  ;;  %vm6467_vm8 = vweird.f32 %v6454_v35  ;;  %v12665_v54 = vld [vmem:[#allocation18_spill] sm:$0xff] }
 0xc57   :  { %v6474_v17 = vor.u32 1.1754944e-38, %v6473_v60  ;;  %vm6472_vm10 = vcmp.eq.f32.partialorder %v6471_v62, 8.507059e+37 }
 0xc59   :  { %v8829_v44 = vpop.eup %8828 }
 0xc5a   :  { %v6439_v3 = vmul.f32 %v8829_v44, %v6437_v56  ;;  %vm6444_vm0 = vweird.f32 %v8829_v44 }
 0xc5b   :  { %v8831_v38 = vpop.eup %8830  ;;  %vm6445_vm2 = vmor %vm6443_vm15, %vm6444_vm0 }
 0xc5c   :  { %v6440_v19 = vsub.f32 1.0, %v6439_v3  ;;  %v6463_v37 = vmul.f32 %v8831_v38, %v6454_v35  ;;  %vm6468_vm4 = vweird.f32 %v8831_v38  ;;  %v12660_v35 = vld [vmem:[#allocation15_spill] sm:$0xff]  ;;  %v12661_v3 = vld [vmem:[#allocation17_spill] sm:$0xff] }
 0xc5d   :  { %vm6469_vm9 = vmor %vm6467_vm8, %vm6468_vm4 }
 0xc5e   :  { %v6441_v29 = vmul.f32 %v8829_v44, %v6440_v19  ;;  %v6464_v16 = vsub.f32 1.0, %v6463_v37 }
 0xc60   :  { %v6442_v1 = vadd.f32 %v8829_v44, %v6441_v29  ;;  %v6465_v23 = vmul.f32 %v8831_v38, %v6464_v16  ;;  %v12664_v29 = vld [vmem:[#allocation16_spill] sm:$0xff] }
 0xc62   :  { %v6446_v50 = vsel %vm6445_vm2, %v8829_v44, %v6442_v1  ;;  %v6466_v4 = vadd.f32 %v8831_v38, %v6465_v23  ;;  %v12666_v1 = vld [vmem:[#allocation22_spill] sm:$0xff] }
 0xc63   :  { %v6451_v11 = vsel %vm6448_vm6, %v6450_v14, %v6446_v50  ;;  %v12667_v14 = vld [vmem:[#allocation19_spill] sm:$0xff]  ;;  %v12668_v50 = vld [vmem:[#allocation2_spill] sm:$0xff] }
 0xc64   :  { %v6452_v26 = vmul.f32 %v6451_v11, %v11675_v30  ;;  %v6470_v28 = vsel %vm6469_vm9, %v8831_v38, %v6466_v4  ;;  %v2731_v38 = vadd.f32 %v12661_v3, %v2698_v40 }
 0xc65   :  { %v6475_v32 = vsel %vm6472_vm10, %v6474_v17, %v6470_v28 }
 0xc66   :  { %v6476_v9 = vmul.f32 %v6475_v32, %v6452_v26  ;;  %v2768_v37 = vadd.f32 %v12663_v13, %v2731_v38 }
 0xc68   :  { %v7368_v59 = vsel %vm5581_vm3, %v6476_v9, 0.0  ;;  %v7372_v25 = vsel %vm5581_vm3, %v6476_v9, 0  ;;  %v11747_v60 = vadd.f32 %v12666_v1, %v2768_v37  ;;  %v7729_v9 = vld [vmem:[%s12515_s3 + $0x118] sm:$0xff] }
 0xc69   :  { %v7391_v0 = vand.u32 4294901760, %v7372_v25  ;;  %7369 = vadd.xlane.f32.xlu1 %v7368_v59  ;;  %v6940_v30 = vpop.f32.mrf.mxu1  ;;  %v11765_v59 = vand.u32 4294901760, %v7729_v9 }
 0xc6a   :  { %v2875_v62 = vmul.f32 %v11747_v60, %v11747_v60 }
 0xc6b   :  { %v7392_v48 = vsub.f32 %v7372_v25, %v7391_v0  ;;  %7422 = vmatmul.f32.vlgmr.msra.gmra.mxu1 %v7391_v0  ;;  %v7728_v25 = vld [vmem:[%s12515_s3 + $0x110] sm:$0xff] }
 0xc6c   :  { %7639 = vmatpush.msra.mxu1 %v11688_v10  ;;  %v2877_v4 = vsel %vm408_vm7, %v2875_v62, 0.0 }
 0xc6d   :  { %v7393_v20 = vand.u32 4294901760, %v7392_v48  ;;  %7446 = vmatmul.f32.vlgmr.msra.gmra.mxu2 %v7392_v48 }
 0xc6e   :  { %7665 = vmatpush.msra.mxu2 %v7590_v7 }
 0xc6f   :  { %v7394_v6 = vsub.f32 %v7392_v48, %v7393_v20  ;;  %7470 = vmatmul.f32.vlgmr.msra.gmra.mxu3 %v7393_v20  ;;  %v11774_v48 = vand.u32 4294901760, %v7728_v25  ;;  %v7727_v20 = vld [vmem:[%s12515_s3 + $0x108] sm:$0xff] }
 0xc70   :  { %7687 = vmatpush.msra.mxu3 %v11688_v10  ;;  %v12654_v10 = vld [vmem:[#allocation4_spill] sm:$0xff] }
 0xc71   :  { %v6909_v22 = vpop.f32.mrf.mxu0  ;;  %v6966_v33 = vpop.f32.mrf.mxu2  ;;  %v7395_v53 = vand.u32 4294901760, %v7394_v6  ;;  %vm4286_vm11 = vcmp.lt.s32.totalorder %v12654_v10, 6  ;;  %v11781_v6 = vand.u32 4294901760, %v7727_v20 }
 0xc72   :  { %v6941_v46 = vadd.f32 %v6940_v30, %v6909_v22  ;;  %v7041_v15 = vpop.f32.mrf.mxu1  ;;  %v8685_v56 = vsel %vm4286_vm11, 1.0, %v12649_v24  ;;  %v11784_v22 = vsub.f32 %v7728_v25, %v11774_v48 }
 0xc73   :  { %v6991_v58 = vpop.f32.mrf.mxu3  ;;  %7396 = vmatmul.f32.vlgmr.msra.gmra.mxu0 %v7395_v53  ;;  %7516 = vmatmul.f32.vlgmr.msrb.gmra.mxu1 %v7391_v0  ;;  %v7726_v53 = vld [vmem:[%s12515_s3 + $0x100] sm:$0xff] }
 0xc74   :  { %v6967_v12 = vadd.f32 %v6966_v33, %v6941_v46  ;;  %7616 = vmatpush.msra.mxu0 %v11696_v18  ;;  %v12657_v18 = vld [vmem:[#allocation8_spill] sm:$0xff] }
 0xc75   :  { %v2659_v34 = vadd.f32 %v12658_v2, %v12657_v18  ;;  %v7724_v2 = vld [vmem:[%s12515_s3 + $0xf0] sm:$0xff] }
 0xc76   :  { %v6992_v21 = vadd.f32 %v6991_v58, %v6967_v12  ;;  %v12549_v12 = vand.u32 4294901760, %v11784_v22  ;;  %v11826_v40 = vand.u32 4294901760, %v7724_v2 }
 0xc77   :  { %v2693_v44 = vadd.f32 %v12660_v35, %v2659_v34  ;;  %v7723_v35 = vld [vmem:[%s12515_s3 + $0xe8] sm:$0xff] }
 0xc78   :  { %v11843_v13 = vand.u32 4294901760, %v7723_v35  ;;  %v11846_v37 = vsub.f32 %v7724_v2, %v11826_v40 }
 0xc79   :  { %v7018_v27 = vpop.f32.mrf.mxu0  ;;  %v7068_v7 = vpop.f32.mrf.mxu2 }
 0xc7a   :  { %v7019_v63 = vadd.f32 %v7018_v27, %v6992_v21  ;;  %v11798_v21 = vand.u32 4294901760, %v7726_v53  ;;  %v11800_v27 = vpop.f32.mrf.mxu1 }
 0xc7b   :  { %v7099_v39 = vpop.f32.mrf.mxu3  ;;  %7494 = vmatmul.f32.vlgmr.msrb.gmra.mxu0 %v7391_v0  ;;  %v11772_v0 = vsub.f32 %v7729_v9, %v11765_v59  ;;  %12670 = vst [vmem:[#allocation14_spill] sm:$0xff] %v11800_v27 }
 0xc7c   :  { %v11721_v43 = vadd.f32 %v7041_v15, %v7019_v63  ;;  %v11723_v36 = vadd.f32 %v7099_v39, %v7068_v7  ;;  %7733 = vmatpush.msrb.mxu0 %v11765_v59  ;;  %v11803_v15 = vsub.f32 %v7727_v20, %v11781_v6  ;;  %v7725_v63 = vld [vmem:[%s12515_s3 + $0xf8] sm:$0xff]  ;;  %v7790_v39 = vsub.f32 %v11784_v22, %v12549_v12 }
 0xc7d   :  { %v12550_v30 = vand.u32 4294901760, %v11772_v0  ;;  %v11812_v47 = vand.u32 4294901760, %v7725_v63  ;;  %v11818_v18 = vsub.f32 %v7726_v53, %v11798_v21 }
 0xc7e   :  { %12652 = vst [vmem:[#allocation5_spill] sm:$0xff] %v11721_v43  ;;  %v11730_v57 = vmul.f32 %v11721_v43, %v12604_v51  ;;  %v12662_v51 = vld [vmem:[#allocation13_spill] sm:$0xff]  ;;  %7735 = vmatpush.msrb.mxu0 %v11774_v48  ;;  %v12548_v49 = vand.u32 4294901760, %v11803_v15  ;;  %v7791_v41 = vand.u32 4294901760, %v7790_v39 }
 0xc7f   :  { %12653 = vst [vmem:[#allocation34_spill] sm:$0xff] %v11723_v36  ;;  %v2725_v19 = vadd.f32 %v12662_v51, %v2693_v44  ;;  %v7784_v58 = vsub.f32 %v11772_v0, %v12550_v30  ;;  %v12547_v3 = vand.u32 4294901760, %v11818_v18 }
 0xc80   :  { %v7313_v52 = vsel %vm5581_vm3, %v11730_v57, 0.0  ;;  %7737 = vmatpush.msrb.mxu0 %v11781_v6  ;;  %v7796_v44 = vsub.f32 %v11803_v15, %v12548_v49 }
 0xc81   :  { %7314 = vadd.xlane.f32.xlu0 %v7313_v52  ;;  %v2764_v16 = vadd.f32 %v12665_v54, %v2725_v19  ;;  %v11786_v33 = vpop.f32.mrf.mxu0  ;;  %v7785_v7 = vand.u32 4294901760, %v7784_v58  ;;  %v11829_v52 = vsub.f32 %v7725_v63, %v11812_v47 }
 0xc82   :  { %8106 = vperm.xlu1 %8725, %v8685_v56   ;;  %12669 = vst [vmem:[#allocation12_spill] sm:$0xff] %v11786_v33  ;;  %7739 = vmatpush.msrb.mxu0 %v11798_v21  ;;  %v11831_v56 = vpop.f32.mrf.mxu2  ;;  %v7797_v54 = vand.u32 4294901760, %v7796_v44 }
 0xc83   :  { %v11750_v23 = vadd.f32 %v12667_v14, %v2764_v16  ;;  %7786 = vmatpush.msrb.mxu1 %v7785_v7  ;;  %12671 = vst [vmem:[#allocation8_spill] sm:$0xff] %v11831_v56  ;;  %v12546_v38 = vand.u32 4294901760, %v11829_v52  ;;  %v7802_v16 = vsub.f32 %v11818_v18, %v12547_v3 }
 0xc84   :  { %7741 = vmatpush.msrb.mxu0 %v11812_v47 }
 0xc85   :  { %v2874_v11 = vmul.f32 %v11750_v23, %v11750_v23  ;;  %7792 = vmatpush.msrb.mxu1 %v7791_v41  ;;  %v7808_v1 = vsub.f32 %v11829_v52, %v12546_v38 }
 0xc86   :  { %7743 = vmatpush.msrb.mxu0 %v11826_v40 }
 0xc87   :  { %v2876_v26 = vsel %vm408_vm7, %v2874_v11, 0.0  ;;  %v11862_v11 = vsub.f32 %v7723_v35, %v11843_v13  ;;  %7798 = vmatpush.msrb.mxu1 %v7797_v54  ;;  %v7809_v9 = vand.u32 4294901760, %v7808_v1 }
 0xc88   :  { %v2878_v17 = vadd.f32 %v2877_v4, %v2876_v26  ;;  %7745 = vmatpush.msrb.mxu0 %v11843_v13  ;;  %v7721_v4 = vld [vmem:[%s12515_s3 + $0xd8] sm:$0xff]  ;;  %v7720_v26 = vld [vmem:[%s12515_s3 + $0xd0] sm:$0xff] }
 0xc89   :  { %2823 = vadd.xlane.f32.xlu0 %v12664_v29  ;;  %v7722_v29 = vld [vmem:[%s12515_s3 + $0xe0] sm:$0xff]  ;;  %v11870_v25 = vand.u32 4294901760, %v7721_v4  ;;  %v12542_v58 = vand.u32 4294901760, %v11862_v11  ;;  %v11880_v7 = vand.u32 4294901760, %v7720_v26 }
 0xc8a   :  { %v11857_v14 = vand.u32 4294901760, %v7722_v29 }
 0xc8b   :  { %v11887_v41 = vsub.f32 %v7721_v4, %v11870_v25 }
 0xc8c   :  { %7747 = vmatpush.msrb.mxu0 %v11857_v14  ;;  %v11878_v63 = vsub.f32 %v7722_v29, %v11857_v14  ;;  %v7820_v29 = vsub.f32 %v11862_v11, %v12542_v58 }
 0xc8e   :  { %7749 = vmatpush.msrb.mxu0 %v11870_v25  ;;  %v12544_v54 = vand.u32 4294901760, %v11878_v63 }
 0xc90   :  { %v7826_v58 = vsub.f32 %v11878_v63, %v12544_v54  ;;  %7751 = vmatpush.msrb.mxu0 %v11880_v7 }
 0xc91   :  { %2848 = vadd.xlane.f32.xlu0 %v12668_v50  ;;  %v12543_v50 = vand.u32 4294901760, %v11846_v37 }
 0xc93   :  { %v7814_v53 = vsub.f32 %v11846_v37, %v12543_v50  ;;  %v11907_v50 = vsub.f32 %v7720_v26, %v11880_v7 }
 0xc99   :  { %2879 = vadd.xlane.f32.xlu0 %v2878_v17 }
 0xcdc   :  { %v7370_v28 = vpop.xlane.xlu1 %7369 }
 0xcdd   :  { %v11759_v32 = vmax.f32 %v7370_v28, 1.0  ;;  %v7803_v28 = vand.u32 4294901760, %v7802_v16 }
 0xcdf   :  { %8832 = vrcp.f32 %v11759_v32  ;;  %7804 = vmatpush.msrb.mxu1 %v7803_v28  ;;  %vm7526_vm2 = vweird.f32 %v11759_v32 }
 0xce1   :  { %7810 = vmatpush.msrb.mxu1 %v7809_v9 }
 0xce5   :  { %v11791_v46 = vpop.eup %8832 }
 0xce6   :  { %v7522_v45 = vmul.f32 %v11791_v46, %v11759_v32  ;;  %vm7527_vm15 = vweird.f32 %v11791_v46 }
 0xce7   :  { %vm12007_vm4 = vmor %vm7526_vm2, %vm7527_vm15 }
 0xce8   :  { %v7523_v51 = vsub.f32 1.0, %v7522_v45  ;;  %v7423_v62 = vpop.f32.mrf.mxu1 }
 0xcea   :  { %v11884_v45 = vmul.f32 %v11791_v46, %v7523_v51  ;;  %v7719_v51 = vld [vmem:[%s12515_s3 + $0xc8] sm:$0xff] }
 0xceb   :  { %v11900_v4 = vand.u32 4294901760, %v7719_v51 }
 0xced   :  { %7753 = vmatpush.msrb.mxu0 %v11900_v4 }
 0xcf0   :  { %v7397_v19 = vpop.f32.mrf.mxu0  ;;  %v7447_v35 = vpop.f32.mrf.mxu2 }
 0xcf1   :  { %v7424_v17 = vadd.f32 %v7423_v62, %v7397_v19  ;;  %v7815_v19 = vand.u32 4294901760, %v7814_v53  ;;  %v12545_v62 = vand.u32 4294901760, %v11887_v41  ;;  %v7821_v53 = vand.u32 4294901760, %v7820_v29 }
 0xcf2   :  { %v12551_v29 = vand.u32 4294901760, %v11907_v50 }
 0xcf3   :  { %v11897_v16 = vadd.f32 %v7447_v35, %v7424_v17  ;;  %v7718_v17 = vld [vmem:[%s12515_s3 + $0xc0] sm:$0xff]  ;;  %7816 = vmatpush.msrb.mxu1 %v7815_v19  ;;  %v11918_v35 = vpop.f32.mrf.mxu3  ;;  %v7717_v19 = vld [vmem:[%s12515_s3 + $0xb8] sm:$0xff] }
 0xcf4   :  { %v11823_v34 = vpop.xlane.xlu0 %7314  ;;  %12672 = vst [vmem:[#allocation10_spill] sm:$0xff] %v11918_v35  ;;  %v11929_v38 = vand.u32 4294901760, %v7717_v19 }
 0xcf5   :  { %8834 = vrsqrt.f32 %v11823_v34  ;;  %vm7323_vm12 = vcmp.eq.f32.partialorder %v11823_v34, inf  ;;  %vm7325_vm0 = vcmp.eq.f32.partialorder %v11823_v34, 0.0  ;;  %7822 = vmatpush.msrb.mxu1 %v7821_v53  ;;  %v7326_v3 = vand.u32 2147483648, %v11823_v34  ;;  %v7716_v53 = vld [vmem:[%s12515_s3 + $0xb0] sm:$0xff] }
 0xcf6   :  { %v11943_v30 = vand.u32 4294901760, %v7716_v53 }
 0xcf8   :  { %v11965_v27 = vsub.f32 %v7716_v53, %v11943_v30 }
 0xcfb   :  { %v8835_v20 = vpop.eup %8834 }
 0xcfc   :  { %v7317_v39 = vmul.f32 %v8835_v20, %v11823_v34  ;;  %v2824_v2 = vpop.xlane.xlu0 %2823 }
 0xcfd   :  { %v2825_v44 = vrot.slane %v2824_v2, 4 }
 0xcfe   :  { %v7318_v1 = vmul.f32 %v8835_v20, %v7317_v39  ;;  %v7832_v39 = vsub.f32 %v11887_v41, %v12545_v62  ;;  %v11927_v62 = vsub.f32 %v7719_v51, %v11900_v4 }
 0xcff   :  { %v2826_v28 = vadd.f32 %v2825_v44, %v2824_v2  ;;  %v11916_v2 = vand.u32 4294901760, %v7718_v17  ;;  %v7827_v44 = vand.u32 4294901760, %v7826_v58  ;;  %v7838_v58 = vsub.f32 %v11907_v50, %v12551_v29 }
 0xd00   :  { %v7319_v9 = vmul.f32 0.5, %v7318_v1  ;;  %v7833_v54 = vand.u32 4294901760, %v7832_v39  ;;  %v12554_v39 = vand.u32 4294901760, %v11927_v62 }
 0xd01   :  { %v2827_v26 = vrot.slane %v2826_v28, 2  ;;  %7755 = vmatpush.msrb.mxu0 %v11916_v2  ;;  %v11937_v12 = vsub.f32 %v7718_v17, %v11916_v2  ;;  %7828 = vmatpush.msrb.mxu1 %v7827_v44  ;;  %v7839_v10 = vand.u32 4294901760, %v7838_v58 }
 0xd02   :  { %v7320_v1 = vsub.f32 1.5, %v7319_v9 }
 0xd03   :  { %v2828_v49 = vadd.f32 %v2827_v26, %v2826_v28  ;;  %v11946_v28 = vsub.f32 %v7717_v19, %v11929_v38  ;;  %7757 = vmatpush.msrb.mxu0 %v11929_v38  ;;  %v12553_v17 = vand.u32 4294901760, %v11937_v12  ;;  %7834 = vmatpush.msrb.mxu1 %v7833_v54  ;;  %v7714_v54 = vld [vmem:[%s12515_s3 + $0xa0] sm:$0xff] }
 0xd04   :  { %v7321_v51 = vmul.f32 %v8835_v20, %v7320_v1  ;;  %v2849_v9 = vpop.xlane.xlu0 %2848  ;;  %v7715_v20 = vld [vmem:[%s12515_s3 + $0xa8] sm:$0xff]  ;;  %v7844_v1 = vsub.f32 %v11927_v62, %v12554_v39 }
 0xd05   :  { %v2850_v26 = vrot.slane %v2849_v9, 4  ;;  %v2829_v29 = vrot.slane %v2828_v49, 1  ;;  %v12556_v19 = vand.u32 4294901760, %v11946_v28  ;;  %v11958_v61 = vand.u32 4294901760, %v7715_v20  ;;  %7759 = vmatpush.msrb.mxu0 %v11943_v30  ;;  %7840 = vmatpush.msrb.mxu1 %v7839_v10 }
 0xd06   :  { %v7322_v44 = vmul.f32 %v7321_v51, %v11823_v34  ;;  %v7850_v56 = vsub.f32 %v11937_v12, %v12553_v17  ;;  %v7495_v17 = vpop.f32.mrf.mxu0 }
 0xd07   :  { %v2851_v58 = vadd.f32 %v2850_v26, %v2849_v9  ;;  %v2830_v35 = vadd.f32 %v2829_v29, %v2828_v49  ;;  %v7845_v9 = vand.u32 4294901760, %v7844_v1  ;;  %v7856_v49 = vsub.f32 %v11946_v28, %v12556_v19  ;;  %v7471_v26 = vpop.f32.mrf.mxu3  ;;  %7761 = vmatpush.msrb.mxu0 %v11958_v61 }
 0xd08   :  { %v7324_v51 = vsel %vm7323_vm12, %v11823_v34, %v7322_v44  ;;  %v11976_v29 = vand.u32 4294901760, %v7714_v54  ;;  %v7851_v43 = vand.u32 4294901760, %v7850_v56  ;;  %v12557_v44 = vand.u32 4294901760, %v11965_v27 }
 0xd09   :  { %v7327_v53 = vsel %vm7325_vm0, %v7326_v3, %v7324_v51  ;;  %v2852_v39 = vrot.slane %v2851_v58, 2  ;;  %8687 = vpush %v2830_v35  ;;  %v7472_v10 = vadd.f32 %v7471_v26, %v11897_v16  ;;  %7846 = vmatpush.msrb.mxu1 %v7845_v9  ;;  %v7857_v19 = vand.u32 4294901760, %v7856_v49 }
 0xd0a   :  { %v11983_v1 = vadd.f32 1e-15, %v7327_v53  ;;  %v11986_v33 = vsub.f32 %v7715_v20, %v11958_v61  ;;  %v7862_v34 = vsub.f32 %v11965_v27, %v12557_v44  ;;  %7763 = vmatpush.msrb.mxu0 %v11976_v29  ;;  %v7525_v3 = vadd.f32 %v11791_v46, %v11884_v45 }
 0xd0b   :  { %v2853_v36 = vadd.f32 %v2852_v39, %v2851_v58  ;;  %v7496_v56 = vadd.f32 %v7495_v17, %v7472_v10  ;;  %7852 = vmatpush.msrb.mxu1 %v7851_v43  ;;  %v7532_v51 = vand.u32 2147483648, %v11759_v32  ;;  %v7530_v45 = vand.u32 2147483647, %v11759_v32  ;;  %v7517_v43 = vpop.f32.mrf.mxu1 }
 0xd0c   :  { %8836 = vrcp.f32 %v11983_v1  ;;  %v2880_v16 = vpop.xlane.xlu0 %2879  ;;  %v11998_v39 = vperm.slane %v11983_v1, %v12651_v55  ;;  %v7863_v58 = vand.u32 4294901760, %v7862_v34  ;;  %v12558_v17 = vand.u32 4294901760, %v11986_v33 }
 0xd0d   :  { %v2881_v35 = vrot.slane %v2880_v16, 4  ;;  %v2854_v20 = vrot.slane %v2853_v36, 1  ;;  %7858 = vmatpush.msrb.mxu1 %v7857_v19  ;;  %v7518_v53 = vadd.f32 %v7517_v43, %v7496_v56  ;;  %v7529_v32 = vsel %vm12007_vm4, %v11791_v46, %v7525_v3 }
 0xd0e   :  { %8838 = vrcp.f32 %v11998_v39  ;;  %v7868_v19 = vsub.f32 %v11986_v33, %v12558_v17  ;;  %v12018_v10 = vsub.f32 %v7714_v54, %v11976_v29  ;;  %vm7531_vm6 = vcmp.eq.f32.partialorder %v7530_v45, 8.507059e+37 }
 0xd0f   :  { %v2882_v9 = vadd.f32 %v2881_v35, %v2880_v16  ;;  %v2855_v49 = vadd.f32 %v2854_v20, %v2853_v36  ;;  %7864 = vmatpush.msrb.mxu1 %v7863_v58  ;;  %v7533_v16 = vor.u32 1.1754944e-38, %v7532_v51  ;;  %v7338_v3 = vand.u32 2147483647, %v11983_v1 }
 0xd10   :  { %v7869_v35 = vand.u32 4294901760, %v7868_v19  ;;  %v7873_v44 = vand.u32 4294901760, %v12018_v10  ;;  %v7340_v51 = vand.u32 2147483648, %v11983_v1  ;;  %vm7334_vm9 = vweird.f32 %v11983_v1 }
 0xd11   :  { %v2883_v36 = vrot.slane %v2882_v9, 2  ;;  %8689 = vpush %v2855_v49  ;;  %v7534_v17 = vsel %vm7531_vm6, %v7533_v16, %v7529_v32  ;;  %v7538_v32 = vpop.permute.xlu2 %7537  ;;  %v7364_v16 = vand.u32 2147483648, %v11998_v39  ;;  %vm7339_vm0 = vcmp.eq.f32.partialorder %v7338_v3, 8.507059e+37 }
 0xd12   :  { %v8837_v34 = vpop.eup %8836  ;;  %7870 = vmatpush.msrb.mxu1 %v7869_v35  ;;  %v7535_v43 = vmul.f32 %v7534_v17, %v7518_v53  ;;  %v7874_v54 = vsub.f32 %v12018_v10, %v7873_v44  ;;  %v7341_v35 = vor.u32 1.1754944e-38, %v7340_v51  ;;  %vm7358_vm15 = vweird.f32 %v11998_v39 }
 0xd13   :  { %v2884_v20 = vadd.f32 %v2883_v36, %v2882_v9  ;;  %v7330_v58 = vmul.f32 %v8837_v34, %v11983_v1  ;;  %vm7335_vm8 = vweird.f32 %v8837_v34  ;;  %v7365_v1 = vor.u32 1.1754944e-38, %v7364_v16 }
 0xd14   :  { %v8839_v56 = vpop.eup %8838  ;;  %v7875_v19 = vand.u32 4294901760, %v7874_v54  ;;  %v7540_v17 = vsel %vm1308_vm5, %v7535_v43, %v7538_v32  ;;  %vm7336_vm10 = vmor %vm7334_vm9, %vm7335_vm8 }
 0xd15   :  { %v2885_v26 = vrot.slane %v2884_v20, 1  ;;  %v7331_v46 = vsub.f32 1.0, %v7330_v58  ;;  %v7354_v45 = vmul.f32 %v8839_v56, %v11998_v39  ;;  %vm7359_vm12 = vweird.f32 %v8839_v56 }
 0xd16   :  { %7876 = vmatpush.msrb.mxu1 %v7875_v19  ;;  %v12033_v43 = vand.u32 4294901760, %v7540_v17  ;;  %vm7360_vm2 = vmor %vm7358_vm15, %vm7359_vm12 }
 0xd17   :  { %v2886_v9 = vadd.f32 %v2885_v26, %v2884_v20  ;;  %v7332_v49 = vmul.f32 %v8837_v34, %v7331_v46  ;;  %v7355_v36 = vsub.f32 1.0, %v7354_v45  ;;  %v7362_v20 = vand.u32 2147483647, %v11998_v39  ;;  %vm2813_vm15 = vmand %vm2805_vm14, %vm2811_vm1 }
 0xd18   :  { %v12037_v19 = vsub.f32 %v7540_v17, %v12033_v43 }
 0xd19   :  { %8691 = vpush %v2886_v9  ;;  %v7333_v53 = vadd.f32 %v8837_v34, %v7332_v49  ;;  %v7356_v58 = vmul.f32 %v8839_v56, %v7355_v36  ;;  %vm7363_vm4 = vcmp.eq.f32.partialorder %v7362_v20, 8.507059e+37 }
 0xd1a   :  { %v7766_v36 = vand.u32 4294901760, %v12037_v19 }
 0xd1b   :  { %v7337_v26 = vsel %vm7336_vm10, %v8837_v34, %v7333_v53  ;;  %v7357_v54 = vadd.f32 %v8839_v56, %v7356_v58 }
 0xd1c   :  { %v7342_v46 = vsel %vm7339_vm0, %v7341_v35, %v7337_v26  ;;  %v7767_v53 = vsub.f32 %v12037_v19, %v7766_v36  ;;  %v12676_v35 = vand.u32 4294901760, %v11784_v22 }
 0xd1d   :  { %v7343_v45 = vmul.f32 %v7342_v46, %v11730_v57  ;;  %v7361_v9 = vsel %vm7360_vm2, %v8839_v56, %v7357_v54  ;;  %v12675_v56 = vand.u32 4294901760, %v11772_v0 }
 0xd1e   :  { %v7366_v49 = vsel %vm7363_vm4, %v7365_v1, %v7361_v9  ;;  %v7768_v58 = vand.u32 4294901760, %v7767_v53 }
 0xd1f   :  { %v7367_v51 = vmul.f32 %v7366_v49, %v7343_v45 }
 0xd21   :  { %v7541_v34 = vsel %vm5581_vm3, %v7367_v51, 0.0  ;;  %v7545_v3 = vsel %vm5581_vm3, %v7367_v51, 0 }
 0xd22   :  { %v7564_v32 = vand.u32 4294901760, %v7545_v3  ;;  %7542 = vadd.xlane.f32.xlu0 %v7541_v34 }
 0xd24   :  { %v7565_v39 = vsub.f32 %v7545_v3, %v7564_v32  ;;  %7595 = vmatmul.f32.vlgmr.msrb.gmra.mxu3 %v7564_v32 }
 0xd25   :  { %7946 = vmatpush.msrb.mxu3 %v11765_v59 }
 0xd26   :  { %v7566_v57 = vand.u32 4294901760, %v7565_v39  ;;  %7619 = vmatmul.f32.vlgmr.msra.gmra.mxu0 %v7565_v39 }
 0xd27   :  { %7948 = vmatpush.msrb.mxu3 %v11774_v48  ;;  %7993 = vmatpush.msra.mxu0 %v12675_v56 }
 0xd28   :  { %v7567_v17 = vsub.f32 %v7565_v39, %v7566_v57  ;;  %7643 = vmatmul.f32.vlgmr.msra.gmra.mxu1 %v7566_v57  ;;  %v12690_v39 = vld [vmem:[#allocation6_spill] sm:$0xff] }
 0xd29   :  { %7950 = vmatpush.msrb.mxu3 %v11781_v6  ;;  %8064 = vmatpush.msra.mxu1 %v11765_v59  ;;  %v12677_v59 = vand.u32 4294901760, %v11803_v15 }
 0xd2a   :  { %v7568_v16 = vand.u32 4294901760, %v7567_v17  ;;  %7997 = vmatpush.msra.mxu0 %v12676_v35 }
 0xd2b   :  { %7952 = vmatpush.msrb.mxu3 %v11798_v21  ;;  %8066 = vmatpush.msra.mxu1 %v11774_v48  ;;  %v12679_v48 = vand.u32 4294901760, %v11829_v52 }
 0xd2c   :  { %7569 = vmatmul.f32.vlgmr.msrb.gmra.mxu2 %v7568_v16  ;;  %7689 = vmatmul.f32.vlgmr.msra.gmra.mxu3 %v7564_v32 }
 0xd2d   :  { %7888 = vmatpush.msrb.mxu2 %v11772_v0  ;;  %7954 = vmatpush.msrb.mxu3 %v11812_v47  ;;  %v12678_v0 = vand.u32 4294901760, %v11818_v18 }
 0xd2e   :  { %7769 = vmatmul.f32.vlgmr.msrb.gmra.mxu0 %v7768_v58  ;;  %8068 = vmatpush.msra.mxu1 %v11781_v6  ;;  %v12680_v6 = vand.u32 4294901760, %v11846_v37 }
 0xd2f   :  { %7891 = vmatpush.msrb.mxu2 %v11784_v22  ;;  %7956 = vmatpush.msrb.mxu3 %v11826_v40  ;;  %v12682_v22 = vand.u32 4294901760, %v11878_v63 }
 0xd30   :  { %7878 = vmatmul.f32.vlgmr.msrb.gmra.mxu1 %v12033_v43  ;;  %8001 = vmatpush.msra.mxu0 %v12677_v59  ;;  %v12691_v59 = vld [vmem:[#allocation25_spill] sm:$0xff] }
 0xd31   :  { %7894 = vmatpush.msrb.mxu2 %v11803_v15  ;;  %7958 = vmatpush.msrb.mxu3 %v11843_v13 }
 0xd32   :  { %8070 = vmatpush.msra.mxu1 %v11798_v21  ;;  %8005 = vmatpush.msra.mxu0 %v12678_v0  ;;  %v12683_v21 = vand.u32 4294901760, %v11887_v41  ;;  %v12692_v0 = vld [vmem:[#allocation27_spill] sm:$0xff] }
 0xd33   :  { %7897 = vmatpush.msrb.mxu2 %v11818_v18  ;;  %7960 = vmatpush.msrb.mxu3 %v11857_v14  ;;  %v12685_v18 = vand.u32 4294901760, %v11927_v62 }
 0xd34   :  { %7667 = vmatmul.f32.vlgmr.msra.gmra.mxu2 %v7564_v32  ;;  %8072 = vmatpush.msra.mxu1 %v11812_v47  ;;  %v12684_v47 = vand.u32 4294901760, %v11907_v50 }
 0xd35   :  { %7900 = vmatpush.msrb.mxu2 %v11829_v52  ;;  %7962 = vmatpush.msrb.mxu3 %v11870_v25 }
 0xd36   :  { %7710 = vrot.lane.b32.xlu0 %v11684_v8, %s8889_s1  ;;  %8074 = vmatpush.msra.mxu1 %v11826_v40  ;;  %v12681_v8 = vand.u32 4294901760, %v11862_v11  ;;  %v12686_v40 = vand.u32 4294901760, %v11937_v12 }
 0xd37   :  { %7903 = vmatpush.msrb.mxu2 %v11846_v37  ;;  %7964 = vmatpush.msrb.mxu3 %v11880_v7 }
 0xd38   :  { %8076 = vmatpush.msra.mxu1 %v11843_v13  ;;  %8009 = vmatpush.msra.mxu0 %v12679_v48  ;;  %v3926_v48 = vadd.f32 %v12692_v0, %v12691_v59 }
 0xd39   :  { %7906 = vmatpush.msrb.mxu2 %v11862_v11  ;;  %7966 = vmatpush.msrb.mxu3 %v11900_v4 }
 0xd3a   :  { %8078 = vmatpush.msra.mxu1 %v11857_v14  ;;  %8013 = vmatpush.msra.mxu0 %v12680_v6  ;;  %s12098_s1 = spop %8687  ;;  %v12689_v14 = vand.u32 4294901760, %v11986_v33 }
 0xd3b   :  { %7909 = vmatpush.msrb.mxu2 %v11878_v63  ;;  %7968 = vmatpush.msrb.mxu3 %v11916_v2 }
 0xd3c   :  { %8080 = vmatpush.msra.mxu1 %v11870_v25  ;;  %8017 = vmatpush.msra.mxu0 %v12681_v8 }
 0xd3d   :  { %7912 = vmatpush.msrb.mxu2 %v11887_v41  ;;  %7970 = vmatpush.msrb.mxu3 %v11929_v38 }
 0xd3e   :  { %8082 = vmatpush.msra.mxu1 %v11880_v7  ;;  %8021 = vmatpush.msra.mxu0 %v12682_v22 }
 0xd3f   :  { %7915 = vmatpush.msrb.mxu2 %v11907_v50  ;;  %7972 = vmatpush.msrb.mxu3 %v11943_v30 }
 0xd40   :  { %8084 = vmatpush.msra.mxu1 %v11900_v4  ;;  %8025 = vmatpush.msra.mxu0 %v12683_v21  ;;  %v12693_v21 = vld [vmem:[#allocation11_spill] sm:$0xff] }
 0xd41   :  { %7918 = vmatpush.msrb.mxu2 %v11927_v62  ;;  %7974 = vmatpush.msrb.mxu3 %v11958_v61  ;;  %v2832_v62 = vstv %s12098_s1 }
 0xd42   :  { %s8690_s25 = spop %8689  ;;  %8086 = vmatpush.msra.mxu1 %v11916_v2  ;;  %8029 = vmatpush.msra.mxu0 %v12684_v47 }
 0xd43   :  { %v2857_v15 = vstv %s8690_s25  ;;  %7921 = vmatpush.msrb.mxu2 %v11937_v12  ;;  %7976 = vmatpush.msrb.mxu3 %v11976_v29 }
 0xd44   :  { %8840 = vrcp.f32 %v2857_v15  ;;  %7980 = vmatmul.f32.vlgmr.msrb.gmra.mxu3 %v7766_v36  ;;  %8088 = vmatpush.msra.mxu1 %v11929_v38  ;;  %v12687_v38 = vand.u32 4294901760, %v11946_v28  ;;  %v2867_v11 = vand.u32 2147483647, %v2857_v15  ;;  %vm2863_vm8 = vweird.f32 %v2857_v15 }
 0xd45   :  { %7924 = vmatpush.msrb.mxu2 %v11946_v28  ;;  %8033 = vmatpush.msra.mxu0 %v12685_v18  ;;  %v12143_v36 = vmul.f32 0.2773501, %v12690_v39 }
 0xd46   :  { %8090 = vmatpush.msra.mxu1 %v11943_v30  ;;  %v12688_v30 = vand.u32 4294901760, %v11965_v27  ;;  %vm2868_vm10 = vcmp.eq.f32.partialorder %v2867_v11, 8.507059e+37  ;;  %v12702_v11 = vld [vmem:[#allocation33_spill] sm:$0xff] }
 0xd47   :  { %7927 = vmatpush.msrb.mxu2 %v11965_v27  ;;  %8037 = vmatpush.msra.mxu0 %v12686_v40 }
 0xd48   :  { %8092 = vmatpush.msra.mxu1 %v11958_v61  ;;  %v2869_v61 = vand.u32 2147483648, %v2857_v15 }
 0xd49   :  { %7930 = vmatpush.msrb.mxu2 %v11986_v33  ;;  %8041 = vmatpush.msra.mxu0 %v12687_v38 }
 0xd4a   :  { %v8841_v52 = vpop.eup %8840  ;;  %s8692_s26 = spop %8691  ;;  %8094 = vmatpush.msra.mxu1 %v11976_v29  ;;  %v2870_v27 = vor.u32 1.1754944e-38, %v2869_v61  ;;  %v12700_v61 = vld [vmem:[#allocation9_spill] sm:$0xff] }
 0xd4b   :  { %v2859_v13 = vmul.f32 %v8841_v52, %v2857_v15  ;;  %v2888_v37 = vstv %s8692_s26  ;;  %7933 = vmatpush.msrb.mxu2 %v12018_v10  ;;  %8045 = vmatpush.msra.mxu0 %v12688_v30  ;;  %vm2864_vm6 = vweird.f32 %v8841_v52  ;;  %v12694_v15 = vld [vmem:[#allocation23_spill] sm:$0xff]  ;;  %v12699_v30 = vld [vmem:[#allocation32_spill] sm:$0xff] }
 0xd4c   :  { %8842 = vrsqrt.f32 %v2888_v37  ;;  %7936 = vmatmul.f32.vlgmr.msrb.gmra.mxu2 %v12037_v19  ;;  %vm2865_vm9 = vmor %vm2863_vm8, %vm2864_vm6  ;;  %vm2896_vm12 = vcmp.eq.f32.partialorder %v2888_v37, inf  ;;  %v2899_v10 = vand.u32 2147483648, %v2888_v37  ;;  %vm2898_vm0 = vcmp.eq.f32.partialorder %v2888_v37, 0.0 }
 0xd4d   :  { %v2860_v12 = vsub.f32 1.0, %v2859_v13  ;;  %8049 = vmatpush.msra.mxu0 %v12689_v14  ;;  %v8683_v19 = vsel %vm2813_vm15, 1.0, %v12649_v24  ;;  %v3922_v47 = vadd.f32 %v12694_v15, %v12693_v21  ;;  %v12698_v13 = vld [vmem:[#allocation26_spill] sm:$0xff]  ;;  %v12701_v14 = vld [vmem:[#allocation29_spill] sm:$0xff] }
 0xd4e   :  { %v12145_v57 = vmul.f32 0.2773501, %v8683_v19 }
 0xd4f   :  { %v2861_v50 = vmul.f32 %v8841_v52, %v2860_v12  ;;  %8053 = vmatpush.msra.mxu0 %v7873_v44 }
 0xd51   :  { %v2862_v25 = vadd.f32 %v8841_v52, %v2861_v50 }
 0xd52   :  { %v8843_v63 = vpop.eup %8842 }
 0xd53   :  { %v2866_v7 = vsel %vm2865_vm9, %v8841_v52, %v2862_v25  ;;  %v2890_v41 = vmul.f32 %v8843_v63, %v2888_v37  ;;  %v12697_v52 = vld [vmem:[#allocation30_spill] sm:$0xff] }
 0xd54   :  { %v2871_v4 = vsel %vm2868_vm10, %v2870_v27, %v2866_v7 }
 0xd55   :  { %v12134_v2 = vmul.f32 %v2871_v4, %v2832_v62  ;;  %v2891_v33 = vmul.f32 %v8843_v63, %v2890_v41  ;;  %v12704_v41 = vld [vmem:[#allocation3_spill] sm:$0xff] }
 0xd57   :  { %v2892_v28 = vmul.f32 0.5, %v2891_v33 }
 0xd59   :  { %v2893_v29 = vsub.f32 1.5, %v2892_v28 }
 0xd5b   :  { %v2894_v20 = vmul.f32 %v8843_v63, %v2893_v29  ;;  %v12703_v63 = vld [vmem:[#allocation31_spill] sm:$0xff] }
 0xd5d   :  { %v2895_v26 = vmul.f32 %v2894_v20, %v2888_v37 }
 0xd5f   :  { %v2897_v44 = vsel %vm2896_vm12, %v2888_v37, %v2895_v26 }
 0xd60   :  { %v2900_v46 = vsel %vm2898_vm0, %v2899_v10, %v2897_v44  ;;  %vm8643_vm0 = vcmask 7168  }
 0xd61   :  { %8844 = vrcp.f32 %v2900_v46  ;;  %v2912_v9 = vand.u32 2147483648, %v2900_v46  ;;  %v2910_v51 = vand.u32 2147483647, %v2900_v46  ;;  %vm2906_vm4 = vweird.f32 %v2900_v46 }
 0xd63   :  { %v2913_v3 = vor.u32 1.1754944e-38, %v2912_v9  ;;  %vm2911_vm8 = vcmp.eq.f32.partialorder %v2910_v51, 8.507059e+37 }
 0xd67   :  { %v8845_v54 = vpop.eup %8844 }
 0xd68   :  { %v2902_v45 = vmul.f32 %v8845_v54, %v2900_v46  ;;  %vm2907_vm2 = vweird.f32 %v8845_v54 }
 0xd69   :  { %vm2908_vm6 = vmor %vm2906_vm4, %vm2907_vm2 }
 0xd6a   :  { %v2903_v1 = vsub.f32 1.0, %v2902_v45 }
 0xd6c   :  { %v2904_v49 = vmul.f32 %v8845_v54, %v2903_v1 }
 0xd6e   :  { %v2905_v34 = vadd.f32 %v8845_v54, %v2904_v49 }
 0xd70   :  { %v2909_v32 = vsel %vm2908_vm6, %v8845_v54, %v2905_v34 }
 0xd71   :  { %v2914_v31 = vsel %vm2911_vm8, %v2913_v3, %v2909_v32 }
 0xd72   :  { %v2915_v56 = vmul.f32 %v2914_v31, %v11750_v23  ;;  %v2916_v17 = vmul.f32 %v2914_v31, %v11747_v60  ;;  %v12695_v23 = vld [vmem:[#allocation28_spill] sm:$0xff] }
 0xd73   :  { %v3961_v18 = vadd.f32 %v12695_v23, %v3926_v48  ;;  %v12696_v60 = vld [vmem:[#allocation24_spill] sm:$0xff] }
 0xd74   :  { %v2919_v53 = vsub.f32 %v2915_v56, %v12143_v36  ;;  %v2920_v16 = vsub.f32 %v2916_v17, %v12145_v57  ;;  %v3956_v40 = vadd.f32 %v12696_v60, %v3922_v47 }
 0xd75   :  { %v3994_v38 = vadd.f32 %v12697_v52, %v3961_v18 }
 0xd76   :  { %v2921_v35 = vmul.f32 %v2919_v53, %v2919_v53  ;;  %v2922_v58 = vmul.f32 %v2920_v16, %v2920_v16  ;;  %v3988_v37 = vadd.f32 %v12698_v13, %v3956_v40 }
 0xd77   :  { %v4031_v12 = vadd.f32 %v12699_v30, %v3994_v38 }
 0xd78   :  { %v2923_v6 = vsel %vm408_vm7, %v2921_v35, 0.0  ;;  %v2924_v8 = vsel %vm408_vm7, %v2922_v58, 0.0  ;;  %v4027_v50 = vadd.f32 %v12701_v14, %v3988_v37 }
 0xd79   :  { %v2925_v22 = vadd.f32 %v2924_v8, %v2923_v6  ;;  %v12165_v25 = vadd.f32 %v12702_v11, %v4031_v12 }
 0xd7a   :  { %v12168_v27 = vadd.f32 %v12703_v63, %v4027_v50 }
 0xd7b   :  { %2926 = vadd.xlane.f32.xlu0 %v2925_v22  ;;  %v4119_v7 = vmul.f32 %v12165_v25, %v12165_v25 }
 0xd7c   :  { %v4118_v62 = vmul.f32 %v12168_v27, %v12168_v27 }
 0xd7d   :  { %v4121_v4 = vsel %vm408_vm7, %v4119_v7, 0.0 }
 0xd7e   :  { %v4120_v33 = vsel %vm408_vm7, %v4118_v62, 0.0 }
 0xd7f   :  { %v4122_v28 = vadd.f32 %v4121_v4, %v4120_v33 }
 0xd83   :  { %4067 = vadd.xlane.f32.xlu0 %v12700_v61 }
 0xd8b   :  { %4092 = vadd.xlane.f32.xlu0 %v12704_v41 }
 0xd93   :  { %4123 = vadd.xlane.f32.xlu0 %v4122_v28 }
 0xd95   :  { %v7543_v29 = vpop.xlane.xlu0 %7542 }
 0xd96   :  { %v7693_v20 = vmax.f32 %v7543_v29, 1.0 }
 0xd98   :  { %8846 = vrcp.f32 %v7693_v20  ;;  %v7705_v34 = vand.u32 2147483648, %v7693_v20  ;;  %vm7699_vm1 = vweird.f32 %v7693_v20  ;;  %v7703_v32 = vand.u32 2147483647, %v7693_v20 }
 0xd9a   :  { %v7706_v16 = vor.u32 1.1754944e-38, %v7705_v34  ;;  %vm7704_vm10 = vcmp.eq.f32.partialorder %v7703_v32, 8.507059e+37  ;;  %v12191_v34 = vld [vmem:[%s12515_s3 + $0x170] ss:$0 sm:$0xff] }
 0xd9e   :  { %v8847_v26 = vpop.eup %8846 }
 0xd9f   :  { %v7695_v10 = vmul.f32 %v8847_v26, %v7693_v20  ;;  %vm7700_vm14 = vweird.f32 %v8847_v26 }
 0xda0   :  { %vm7701_vm9 = vmor %vm7699_vm1, %vm7700_vm14 }
 0xda1   :  { %v7696_v44 = vsub.f32 1.0, %v7695_v10 }
 0xda3   :  { %v7697_v1 = vmul.f32 %v8847_v26, %v7696_v44  ;;  %v7620_v9 = vpop.f32.mrf.mxu0 }
 0xda5   :  { %v7698_v51 = vadd.f32 %v8847_v26, %v7697_v1  ;;  %v7644_v19 = vpop.f32.mrf.mxu1 }
 0xda7   :  { %v7596_v46 = vpop.f32.mrf.mxu3  ;;  %v7702_v17 = vsel %vm7701_vm9, %v8847_v26, %v7698_v51 }
 0xda8   :  { %v7707_v58 = vsel %vm7704_vm10, %v7706_v16, %v7702_v17  ;;  %v7711_v0 = vpop.permute.xlu0 %7710  ;;  %v8134_v17 = vld [vmem:[%s12515_s3 + $0x148] sm:$0xff] }
 0xdaf   :  { %v7570_v54 = vpop.f32.mrf.mxu2  ;;  %v7690_v53 = vpop.f32.mrf.mxu3 }
 0xdb0   :  { %v7597_v45 = vadd.f32 %v7596_v46, %v7570_v54 }
 0xdb2   :  { %v7621_v49 = vadd.f32 %v7620_v9, %v7597_v45  ;;  %v8136_v9 = vld [vmem:[%s12515_s3 + $0x158] sm:$0xff] }
 0xdb4   :  { %v7645_v3 = vadd.f32 %v7644_v19, %v7621_v49  ;;  %v12183_v49 = vand.u32 4294901760, %v8136_v9  ;;  %v8135_v19 = vld [vmem:[%s12515_s3 + $0x150] sm:$0xff] }
 0xdb5   :  { %v12196_v32 = vand.u32 4294901760, %v8135_v19 }
 0xdb6   :  { %8359 = vmatpush.msrb.mxu1 %v12183_v49  ;;  %8151 = vmatpush.msra.mxu2 %v12183_v49 }
 0xdb7   :  { %v7668_v31 = vpop.f32.mrf.mxu2  ;;  %v12207_v16 = vsub.f32 %v8135_v19, %v12196_v32 }
 0xdb8   :  { %v7669_v56 = vadd.f32 %v7668_v31, %v7645_v3  ;;  %v12194_v3 = vsub.f32 %v8136_v9, %v12183_v49  ;;  %v7770_v31 = vpop.f32.mrf.mxu0  ;;  %8361 = vmatpush.msrb.mxu1 %v12196_v32  ;;  %8153 = vmatpush.msra.mxu2 %v12196_v32 }
 0xdba   :  { %v7691_v35 = vadd.f32 %v7690_v53, %v7669_v56  ;;  %v8185_v53 = vand.u32 4294901760, %v12194_v3 }
 0xdbc   :  { %v7708_v59 = vmul.f32 %v7707_v58, %v7691_v35  ;;  %v12209_v35 = vand.u32 4294901760, %v8134_v17  ;;  %v2873_v58 = vsub.f32 0.0, %v12134_v2  ;;  %8316 = vmatpush.msrb.mxu0 %v8185_v53  ;;  %v8186_v2 = vsub.f32 %v12194_v3, %v8185_v53 }
 0xdbe   :  { %v7713_v48 = vsel %vm1308_vm5, %v7708_v59, %v7711_v0  ;;  %v7879_v59 = vpop.f32.mrf.mxu1  ;;  %8363 = vmatpush.msrb.mxu1 %v12209_v35  ;;  %8155 = vmatpush.msra.mxu2 %v12209_v35 }
 0xdbf   :  { %v7772_v6 = vand.u32 4294901760, %v7713_v48 }
 0xdc1   :  { %7882 = vmatmul.f32.gmra.mxu1 %v7772_v6  ;;  %v7773_v8 = vsub.f32 %v7713_v48, %v7772_v6 }
 0xdc3   :  { %7941 = vmatmul.f32.gmra.mxu2 %v7773_v8  ;;  %v7774_v22 = vand.u32 4294901760, %v7773_v8 }
 0xdc5   :  { %7986 = vmatmul.f32.gmra.mxu3 %v7774_v22  ;;  %v7775_v21 = vsub.f32 %v7773_v8, %v7774_v22  ;;  %v7771_v8 = vadd.f32 %v12191_v34, %v7770_v31 }
 0xdc7   :  { %v7776_v15 = vand.u32 4294901760, %v7775_v21  ;;  %v8191_v21 = vand.u32 4294901760, %v12207_v16 }
 0xdc9   :  { %7777 = vmatmul.f32.gmra.mxu0 %v7776_v15  ;;  %8096 = vmatmul.f32.vlgmr.msra.gmra.mxu1 %v12033_v43  ;;  %v12225_v15 = vsub.f32 %v8134_v17, %v12209_v35 }
 0xdca   :  { %8320 = vmatpush.msrb.mxu0 %v8191_v21 }
 0xdd1   :  { %8055 = vmatmul.f32.vlgmr.msra.gmra.mxu0 %v12033_v43  ;;  %8100 = vmatmul.f32.gmra.mxu1 %v7772_v6 }
 0xdd9   :  { %8059 = vmatmul.f32.gmra.mxu0 %v7772_v6  ;;  %v8133_v6 = vld [vmem:[%s12515_s3 + $0x140] sm:$0xff] }
 0xdee   :  { %v2927_v47 = vpop.xlane.xlu0 %2926 }
 0xdef   :  { %v2928_v23 = vrot.slane %v2927_v47, 4 }
 0xdf1   :  { %v2929_v18 = vadd.f32 %v2928_v23, %v2927_v47  ;;  %v8132_v47 = vld [vmem:[%s12515_s3 + $0x138] sm:$0xff] }
 0xdf3   :  { %v2930_v60 = vrot.slane %v2929_v18, 2 }
 0xdf5   :  { %v2931_v40 = vadd.f32 %v2930_v60, %v2929_v18  ;;  %v12231_v18 = vand.u32 4294901760, %v8133_v6  ;;  %v12233_v60 = vand.u32 4294901760, %v8132_v47 }
 0xdf6   :  { %v4068_v52 = vpop.xlane.xlu0 %4067 }
 0xdf7   :  { %v4069_v38 = vrot.slane %v4068_v52, 4  ;;  %v2932_v13 = vrot.slane %v2931_v40, 1  ;;  %8365 = vmatpush.msrb.mxu1 %v12231_v18  ;;  %8157 = vmatpush.msra.mxu2 %v12231_v18 }
 0xdf9   :  { %v4070_v37 = vadd.f32 %v4069_v38, %v4068_v52  ;;  %v2933_v30 = vadd.f32 %v2932_v13, %v2931_v40  ;;  %v8187_v52 = vand.u32 4294901760, %v8186_v2  ;;  %v8192_v38 = vsub.f32 %v12207_v16, %v8191_v21  ;;  %8367 = vmatpush.msrb.mxu1 %v12233_v60  ;;  %8159 = vmatpush.msra.mxu2 %v12233_v60  ;;  %v7981_v21 = vpop.f32.mrf.mxu3 }
 0xdfa   :  { %v8197_v13 = vand.u32 4294901760, %v12225_v15 }
 0xdfb   :  { %v4071_v12 = vrot.slane %v4070_v37, 2  ;;  %8693 = vpush %v2933_v30  ;;  %v12241_v30 = vsub.f32 %v8133_v6, %v12231_v18  ;;  %8188 = vmatpush.msra.mxu3 %v8187_v52 }
 0xdfc   :  { %8324 = vmatpush.msrb.mxu0 %v8197_v13 }
 0xdfd   :  { %v4072_v61 = vadd.f32 %v4071_v12, %v4070_v37  ;;  %v8131_v37 = vld [vmem:[%s12515_s3 + $0x130] sm:$0xff]  ;;  %v12244_v12 = vsub.f32 %v8132_v47, %v12233_v60 }
 0xdfe   :  { %v4093_v14 = vpop.xlane.xlu0 %4092 }
 0xdff   :  { %v4094_v50 = vrot.slane %v4093_v14, 4  ;;  %v4073_v11 = vrot.slane %v4072_v61, 1 }
 0xe01   :  { %v4095_v63 = vadd.f32 %v4094_v50, %v4093_v14  ;;  %v4074_v43 = vadd.f32 %v4073_v11, %v4072_v61  ;;  %v12246_v61 = vand.u32 4294901760, %v8131_v37  ;;  %v7880_v50 = vadd.f32 %v7879_v59, %v7771_v8  ;;  %v7937_v11 = vpop.f32.mrf.mxu2 }
 0xe03   :  { %v4096_v7 = vrot.slane %v4095_v63, 2  ;;  %8695 = vpush %v4074_v43  ;;  %v8198_v43 = vsub.f32 %v12225_v15, %v8197_v13  ;;  %8369 = vmatpush.msrb.mxu1 %v12246_v61  ;;  %8161 = vmatpush.msra.mxu2 %v12246_v61 }
 0xe05   :  { %v4097_v41 = vadd.f32 %v4096_v7, %v4095_v63  ;;  %v8193_v63 = vand.u32 4294901760, %v8192_v38  ;;  %v8130_v7 = vld [vmem:[%s12515_s3 + $0x128] sm:$0xff] }
 0xe06   :  { %v4124_v62 = vpop.xlane.xlu0 %4123 }
 0xe07   :  { %v4125_v4 = vrot.slane %v4124_v62, 4  ;;  %v4098_v33 = vrot.slane %v4097_v41, 1  ;;  %8194 = vmatpush.msra.mxu3 %v8193_v63 }
 0xe09   :  { %v4126_v28 = vadd.f32 %v4125_v4, %v4124_v62  ;;  %v4099_v29 = vadd.f32 %v4098_v33, %v4097_v41  ;;  %v8203_v4 = vand.u32 4294901760, %v12241_v30  ;;  %v8209_v33 = vand.u32 4294901760, %v12244_v12 }
 0xe0b   :  { %v4127_v20 = vrot.slane %v4126_v28, 2  ;;  %8697 = vpush %v4099_v29  ;;  %v12264_v29 = vand.u32 4294901760, %v8130_v7  ;;  %8328 = vmatpush.msrb.mxu0 %v8203_v4  ;;  %v8210_v19 = vsub.f32 %v12244_v12, %v8209_v33 }
 0xe0d   :  { %v4128_v26 = vadd.f32 %v4127_v20, %v4126_v28  ;;  %v12262_v28 = vsub.f32 %v8131_v37, %v12246_v61  ;;  %v12285_v17 = vsub.f32 %v8130_v7, %v12264_v29  ;;  %8332 = vmatpush.msrb.mxu0 %v8209_v33  ;;  %8371 = vmatpush.msrb.mxu1 %v12264_v29 }
 0xe0e   :  { %8163 = vmatpush.msra.mxu2 %v12264_v29 }
 0xe0f   :  { %v4129_v10 = vrot.slane %v4128_v26, 1  ;;  %v8215_v31 = vand.u32 4294901760, %v12262_v28 }
 0xe11   :  { %v4130_v44 = vadd.f32 %v4129_v10, %v4128_v26  ;;  %v8216_v6 = vsub.f32 %v12262_v28, %v8215_v31  ;;  %8336 = vmatpush.msrb.mxu0 %v8215_v31 }
 0xe13   :  { %8699 = vpush %v4130_v44  ;;  %v8199_v44 = vand.u32 4294901760, %v8198_v43 }
 0xe15   :  { %8200 = vmatpush.msra.mxu3 %v8199_v44 }
 0xe2c   :  { %s8694_s27 = spop %8693 }
 0xe2d   :  { %v2935_v46 = vstv %s8694_s27 }
 0xe2e   :  { %8848 = vrsqrt.f32 %v2935_v46  ;;  %vm2943_vm12 = vcmp.eq.f32.partialorder %v2935_v46, inf  ;;  %vm2945_vm15 = vcmp.eq.f32.partialorder %v2935_v46, 0.0  ;;  %v2946_v23 = vand.u32 2147483648, %v2935_v46 }
 0xe34   :  { %v8849_v54 = vpop.eup %8848  ;;  %s12200_s8 = spop %8695 }
 0xe35   :  { %v2937_v45 = vmul.f32 %v8849_v54, %v2935_v46  ;;  %v4076_v37 = vstv %s12200_s8 }
 0xe37   :  { %v2938_v1 = vmul.f32 %v8849_v54, %v2937_v45 }
 0xe39   :  { %v2939_v51 = vmul.f32 0.5, %v2938_v1 }
 0xe3b   :  { %v2940_v56 = vsub.f32 1.5, %v2939_v51  ;;  %v8204_v51 = vsub.f32 %v12241_v30, %v8203_v4 }
 0xe3c   :  { %s8698_s11 = spop %8697 }
 0xe3d   :  { %v2941_v0 = vmul.f32 %v8849_v54, %v2940_v56  ;;  %v12214_v48 = vstv %s8698_s11  ;;  %v7938_v54 = vadd.f32 %v7937_v11, %v7880_v50  ;;  %v8205_v59 = vand.u32 4294901760, %v8204_v51 }
 0xe3e   :  { %8850 = vrcp.f32 %v12214_v48  ;;  %v7883_v26 = vpop.f32.mrf.mxu1  ;;  %v4111_v45 = vand.u32 2147483647, %v12214_v48  ;;  %v4113_v56 = vand.u32 2147483648, %v12214_v48  ;;  %vm4107_vm4 = vweird.f32 %v12214_v48 }
 0xe3f   :  { %v2942_v22 = vmul.f32 %v2941_v0, %v2935_v46  ;;  %v8211_v0 = vand.u32 4294901760, %v8210_v19  ;;  %8206 = vmatpush.msra.mxu3 %v8205_v59  ;;  %v7982_v52 = vadd.f32 %v7981_v21, %v7938_v54 }
 0xe40   :  { %vm4112_vm8 = vcmp.eq.f32.partialorder %v4111_v45, 8.507059e+37  ;;  %v8107_v45 = vpop.permute.xlu1 %8106 }
 0xe41   :  { %v2944_v40 = vsel %vm2943_vm12, %v2935_v46, %v2942_v22  ;;  %v8129_v46 = vld [vmem:[%s12515_s3 + $0x120] sm:$0xff]  ;;  %v8221_v22 = vand.u32 4294901760, %v12285_v17  ;;  %8212 = vmatpush.msra.mxu3 %v8211_v0 }
 0xe42   :  { %v2947_v14 = vsel %vm2945_vm15, %v2946_v23, %v2944_v40  ;;  %v12287_v53 = vand.u32 4294901760, %v8129_v46  ;;  %v8217_v23 = vand.u32 4294901760, %v8216_v6  ;;  %vm8127_vm15 = vcmask 1040384  }
 0xe43   :  { %v12255_v41 = vsel %vm8643_vm0, %v2873_v58, %v2947_v14  ;;  %v8222_v38 = vsub.f32 %v12285_v17, %v8221_v22  ;;  %8340 = vmatpush.msrb.mxu0 %v8221_v22 }
 0xe44   :  { %v12257_v62 = vpop.eup %8850  ;;  %s8700_s2 = spop %8699  ;;  %v12296_v2 = vsub.f32 %v8129_v46, %v12287_v53  ;;  %8373 = vmatpush.msrb.mxu1 %v12287_v53  ;;  %8165 = vmatpush.msra.mxu2 %v12287_v53 }
 0xe45   :  { %v4103_v20 = vmul.f32 %v12257_v62, %v12214_v48  ;;  %v12270_v10 = vstv %s8700_s2  ;;  %vm4108_vm2 = vweird.f32 %v12257_v62  ;;  %v8223_v63 = vand.u32 4294901760, %v8222_v38  ;;  %8218 = vmatpush.msra.mxu3 %v8217_v23 }
 0xe46   :  { %8852 = vrsqrt.f32 %v12270_v10  ;;  %v7778_v9 = vpop.f32.mrf.mxu0  ;;  %vm4109_vm6 = vmor %vm4107_vm4, %vm4108_vm2  ;;  %v8227_v13 = vand.u32 4294901760, %v12296_v2  ;;  %8246 = vmatpush.msrb.mxu2 %v12194_v3  ;;  %v8097_v33 = vpop.f32.mrf.mxu1  ;;  %vm4140_vm14 = vcmp.eq.f32.partialorder %v12270_v10, inf  ;;  %vm4142_vm1 = vcmp.eq.f32.partialorder %v12270_v10, 0.0 }
 0xe47   :  { %v4104_v1 = vsub.f32 1.0, %v4103_v20  ;;  %v7779_v8 = vadd.f32 %v12191_v34, %v7778_v9  ;;  %v4114_v34 = vor.u32 1.1754944e-38, %v4113_v56  ;;  %v7942_v46 = vpop.f32.mrf.mxu2  ;;  %8224 = vmatpush.msra.mxu3 %v8223_v63 }
 0xe48   :  { %v8228_v43 = vsub.f32 %v12296_v2, %v8227_v13  ;;  %8344 = vmatpush.msrb.mxu0 %v8227_v13  ;;  %8249 = vmatpush.msrb.mxu2 %v12207_v16  ;;  %v7987_v51 = vpop.f32.mrf.mxu3 }
 0xe49   :  { %v4105_v58 = vmul.f32 %v12257_v62, %v4104_v1  ;;  %v7884_v11 = vadd.f32 %v7883_v26, %v7779_v8 }
 0xe4a   :  { %8252 = vmatpush.msrb.mxu2 %v12225_v15 }
 0xe4b   :  { %v4106_v47 = vadd.f32 %v12257_v62, %v4105_v58  ;;  %v7943_v26 = vadd.f32 %v7942_v46, %v7884_v11  ;;  %v4143_v58 = vand.u32 2147483648, %v12270_v10 }
 0xe4c   :  { %v8853_v40 = vpop.eup %8852  ;;  %8255 = vmatpush.msrb.mxu2 %v12241_v30 }
 0xe4d   :  { %v4110_v48 = vsel %vm4109_vm6, %v12257_v62, %v4106_v47  ;;  %v4134_v14 = vmul.f32 %v8853_v40, %v12270_v10  ;;  %v8229_v62 = vand.u32 4294901760, %v8228_v43  ;;  %v7988_v19 = vadd.f32 %v7987_v51, %v7943_v26  ;;  %v12705_v51 = vld [vmem:[#allocation34_spill] sm:$0xff] }
 0xe4e   :  { %v4115_v50 = vsel %vm4112_vm8, %v4114_v34, %v4110_v48  ;;  %v8056_v3 = vpop.f32.mrf.mxu0  ;;  %8258 = vmatpush.msrb.mxu2 %v12244_v12  ;;  %v8101_v59 = vpop.f32.mrf.mxu1 }
 0xe4f   :  { %v12312_v7 = vmul.f32 %v4115_v50, %v4076_v37  ;;  %v4135_v4 = vmul.f32 %v8853_v40, %v4134_v14  ;;  %v8057_v20 = vadd.f32 %v8056_v3, %v7982_v52  ;;  %8230 = vmatpush.msra.mxu3 %v8229_v62 }
 0xe50   :  { %8261 = vmatpush.msrb.mxu2 %v12262_v28 }
 0xe51   :  { %v4136_v44 = vmul.f32 0.5, %v4135_v4  ;;  %v8098_v54 = vadd.f32 %v8097_v33, %v8057_v20  ;;  %8283 = vmatpush.msrb.mxu3 %v12183_v49 }
 0xe52   :  { %8264 = vmatpush.msrb.mxu2 %v12285_v17 }
 0xe53   :  { %v4137_v1 = vsub.f32 1.5, %v4136_v44  ;;  %v8109_v16 = vmul.f32 %v8107_v45, %v8098_v54  ;;  %8285 = vmatpush.msrb.mxu3 %v12196_v32 }
 0xe54   :  { %8267 = vmatpush.msrb.mxu2 %v12296_v2 }
 0xe55   :  { %v4138_v9 = vmul.f32 %v8853_v40, %v4137_v1  ;;  %v8111_v15 = vsel %vm1308_vm5, %v8109_v16, 0.0  ;;  %8287 = vmatpush.msrb.mxu3 %v12209_v35  ;;  %v6356_v16 = vmul.f32 %v11679_v42, %v11679_v42 }
 0xe56   :  { %v8112_v30 = vrot.slane %v8111_v15, 4  ;;  %v8060_v56 = vpop.f32.mrf.mxu0 }
 0xe57   :  { %v4139_v31 = vmul.f32 %v4138_v9, %v12270_v10  ;;  %v8061_v49 = vadd.f32 %v8060_v56, %v7988_v19  ;;  %8289 = vmatpush.msrb.mxu3 %v12231_v18  ;;  %v6357_v9 = vsel %vm5581_vm3, %v6356_v16, 0.0  ;;  %v12706_v19 = vld [vmem:[#allocation12_spill] sm:$0xff]  ;;  %v12708_v56 = vld [vmem:[#allocation14_spill] sm:$0xff] }
 0xe58   :  { %v8113_v32 = vadd.f32 %v8112_v30, %v8111_v15  ;;  %v7126_v15 = vadd.f32 %v12706_v19, %v12705_v51 }
 0xe59   :  { %v4141_v12 = vsel %vm4140_vm14, %v12270_v10, %v4139_v31  ;;  %v8102_v0 = vadd.f32 %v8101_v59, %v8061_v49  ;;  %8291 = vmatpush.msrb.mxu3 %v12233_v60  ;;  %v12707_v31 = vld [vmem:[#allocation5_spill] sm:$0xff]  ;;  %v12709_v49 = vld [vmem:[#allocation8_spill] sm:$0xff] }
 0xe5a   :  { %v4144_v28 = vsel %vm4142_vm1, %v4143_v58, %v4141_v12  ;;  %v8114_v6 = vrot.slane %v8113_v32, 2  ;;  %v7203_v30 = vmul.f32 %v12690_v39, %v12707_v31  ;;  %vm8645_vm1 = vcmask 15360  }
 0xe5b   :  { %8854 = vrcp.f32 %v4144_v28  ;;  %v8110_v8 = vmul.f32 %v8107_v45, %v8102_v0  ;;  %8293 = vmatpush.msrb.mxu3 %v12246_v61  ;;  %v4156_v34 = vand.u32 2147483648, %v4144_v28  ;;  %v4154_v60 = vand.u32 2147483647, %v4144_v28 }
 0xe5c   :  { %v8115_v17 = vadd.f32 %v8114_v6, %v8113_v32  ;;  %vm4150_vm10 = vweird.f32 %v4144_v28  ;;  %v7204_v58 = vsel %vm5581_vm3, %v7203_v30, 0.0  ;;  %v12710_v32 = vld [vmem:[#allocation10_spill] sm:$0xff] }
 0xe5d   :  { %v8119_v35 = vsel %vm1308_vm5, %v8110_v8, 0.0  ;;  %8295 = vmatpush.msrb.mxu3 %v12264_v29  ;;  %v4157_v29 = vor.u32 1.1754944e-38, %v4156_v34  ;;  %vm4155_vm2 = vcmp.eq.f32.partialorder %v4154_v60, 8.507059e+37  ;;  %v8383_v60 = vld [vmem:[%s12515_s3 + $0x218] sm:$0xff] }
 0xe5e   :  { %v8120_v22 = vrot.slane %v8119_v35, 4  ;;  %v8116_v18 = vrot.slane %v8115_v17, 1 }
 0xe5f   :  { %8297 = vmatpush.msrb.mxu3 %v12287_v53 }
 0xe60   :  { %v8121_v21 = vadd.f32 %v8120_v22, %v8119_v35  ;;  %v8117_v38 = vadd.f32 %v8116_v18, %v8115_v17  ;;  %v8386_v35 = vld [vmem:[%s12515_s3 + $0x230] sm:$0xff] }
 0xe61   :  { %v8855_v10 = vpop.eup %8854  ;;  %v12374_v22 = vand.u32 4294901760, %v8386_v35 }
 0xe62   :  { %v4146_v47 = vmul.f32 %v8855_v10, %v4144_v28  ;;  %v8122_v2 = vrot.slane %v8121_v21, 2  ;;  %vm4151_vm9 = vweird.f32 %v8855_v10  ;;  %v8118_v14 = vmul.f32 0.16666667, %v8117_v38  ;;  %v12711_v28 = vld [vmem:[#allocation7_spill] sm:$0xff] }
 0xe63   :  { %vm4152_vm12 = vmor %vm4150_vm10, %vm4151_vm9 }
 0xe64   :  { %v4147_v23 = vsub.f32 1.0, %v4146_v47  ;;  %v8123_v40 = vadd.f32 %v8122_v2, %v8121_v21  ;;  %v12383_v47 = vsub.f32 %v8386_v35, %v12374_v22  ;;  %v8384_v2 = vld [vmem:[%s12515_s3 + $0x220] sm:$0xff]  ;;  %vm6308_vm10 = vmand %vm2804_vm13, %vm4286_vm11  ;;  %vm8630_vm13 = vcmask 25600  }
 0xe66   :  { %v4148_v52 = vmul.f32 %v8855_v10, %v4147_v23  ;;  %v8124_v13 = vrot.slane %v8123_v40, 1 }
 0xe68   :  { %v4149_v61 = vadd.f32 %v8855_v10, %v4148_v52  ;;  %v8125_v37 = vadd.f32 %v8124_v13, %v8123_v40  ;;  %v8442_v40 = vand.u32 4294901760, %v12383_v47  ;;  %v12400_v52 = vand.u32 4294901760, %v8384_v2 }
 0xe6a   :  { %v4153_v48 = vsel %vm4152_vm12, %v8855_v10, %v4149_v61  ;;  %v8126_v53 = vmul.f32 0.16666667, %v8125_v37  ;;  %v8385_v10 = vld [vmem:[%s12515_s3 + $0x228] sm:$0xff]  ;;  %v8443_v13 = vsub.f32 %v12383_v47, %v8442_v40  ;;  %v12413_v37 = vsub.f32 %v8384_v2, %v12400_v52 }
 0xe6b   :  { %v4158_v50 = vsel %vm4155_vm2, %v4157_v29, %v4153_v48  ;;  %v12385_v18 = vand.u32 4294901760, %v8385_v10  ;;  %v12417_v29 = vand.u32 4294901760, %v8383_v60  ;;  %v8382_v48 = vld [vmem:[%s12515_s3 + $0x210] sm:$0xff] }
 0xe6c   :  { %v4159_v11 = vmul.f32 %v4158_v50, %v12168_v27  ;;  %v4160_v63 = vmul.f32 %v4158_v50, %v12165_v25  ;;  %v8128_v43 = vsel %vm8127_vm15, %v8118_v14, %v8126_v53  ;;  %v8444_v14 = vand.u32 4294901760, %v8443_v13 }
 0xe6d   :  { %v8140_v4 = vsel %vm1308_vm5, %v8128_v43, 0  ;;  %v12398_v34 = vsub.f32 %v8385_v10, %v12385_v18  ;;  %v8454_v50 = vand.u32 4294901760, %v12413_v37  ;;  %v8381_v43 = vld [vmem:[%s12515_s3 + $0x208] sm:$0xff] }
 0xe6e   :  { %v4161_v33 = vsub.f32 %v4159_v11, %v12143_v36  ;;  %v4162_v3 = vsub.f32 %v4160_v63, %v12145_v57  ;;  %v8166_v20 = vand.u32 4294901760, %v8140_v4  ;;  %v6311_v36 = vmul.f32 %v12690_v39, %v11671_v5  ;;  %v8387_v39 = vld [vmem:[%s12515_s3 + $0x238] sm:$0xff] }
 0xe6f   :  { %v7151_v5 = vadd.f32 %v12708_v56, %v7126_v15  ;;  %v12366_v8 = vand.u32 4294901760, %v8387_v39  ;;  %v8448_v61 = vand.u32 4294901760, %v12398_v34  ;;  %v12425_v11 = vand.u32 4294901760, %v8382_v48 }
 0xe70   :  { %v4163_v62 = vmul.f32 %v4161_v33, %v4161_v33  ;;  %v4164_v44 = vmul.f32 %v4162_v3, %v4162_v3  ;;  %v8167_v46 = vsub.f32 %v8140_v4, %v8166_v20  ;;  %8232 = vmatmul.f32.vlgmr.msra.gmra.mxu3 %v8166_v20  ;;  %8346 = vmatmul.f32.vlgmr.msrb.gmra.mxu0 %v8166_v20  ;;  %v6312_v57 = vsel %vm5581_vm3, %v6311_v36, 0.0  ;;  %v6331_v4 = vpop.xlane.xlu2 %6330 }
 0xe71   :  { %8375 = vmatmul.f32.vlgmr.msrb.gmra.mxu1 %v8166_v20  ;;  %v7178_v12 = vadd.f32 %v12709_v49, %v7151_v5  ;;  %v12372_v17 = vsub.f32 %v8387_v39, %v12366_v8  ;;  %v8449_v53 = vsub.f32 %v12398_v34, %v8448_v61  ;;  %v8459_v63 = vsub.f32 %v8383_v60, %v12417_v29 }
 0xe72   :  { %v4165_v26 = vsel %vm408_vm7, %v4163_v62, 0.0  ;;  %v4166_v27 = vsel %vm408_vm7, %v4164_v44, 0.0  ;;  %v8168_v54 = vand.u32 4294901760, %v8167_v46  ;;  %8534 = vmatpush.msra.mxu1 %v12366_v8  ;;  %v8455_v3 = vsub.f32 %v12413_v37, %v8454_v50 }
 0xe73   :  { %v4167_v25 = vadd.f32 %v4166_v27, %v4165_v26  ;;  %v12357_v59 = vadd.f32 %v12710_v32, %v7178_v12  ;;  %v8436_v21 = vand.u32 4294901760, %v12372_v17  ;;  %8497 = vmatpush.msra.mxu0 %v12372_v17  ;;  %v8450_v33 = vand.u32 4294901760, %v8449_v53 }
 0xe74   :  { %v8169_v45 = vsub.f32 %v8167_v46, %v8168_v54  ;;  %8536 = vmatpush.msra.mxu1 %v12374_v22  ;;  %v8465_v20 = vsub.f32 %v8382_v48, %v12425_v11  ;;  %v12436_v62 = vand.u32 4294901760, %v8381_v43  ;;  %v8460_v44 = vand.u32 4294901760, %v8459_v63 }
 0xe75   :  { %4168 = vadd.xlane.f32.xlu0 %v4167_v25  ;;  %v7248_v0 = vmul.f32 %v12357_v59, %v12357_v59  ;;  %v8437_v23 = vsub.f32 %v12372_v17, %v8436_v21  ;;  %8500 = vmatpush.msra.mxu0 %v12383_v47  ;;  %v8456_v26 = vand.u32 4294901760, %v8455_v3 }
 0xe76   :  { %v8170_v1 = vand.u32 4294901760, %v8169_v45  ;;  %8538 = vmatpush.msra.mxu1 %v12385_v18  ;;  %v8466_v27 = vand.u32 4294901760, %v8465_v20  ;;  %v8471_v25 = vsub.f32 %v8381_v43, %v12436_v62  ;;  %v6332_v45 = vrot.slane %v6331_v4, 4 }
 0xe77   :  { %v7249_v6 = vsel %vm5581_vm3, %v7248_v0, 0.0  ;;  %v8438_v38 = vand.u32 4294901760, %v8437_v23  ;;  %8503 = vmatpush.msra.mxu0 %v12398_v34  ;;  %v8461_v36 = vsub.f32 %v8459_v63, %v8460_v44 }
 0xe78   :  { %8171 = vmatmul.f32.vlgmr.msra.gmra.mxu2 %v8170_v1  ;;  %8301 = vmatmul.f32.vlgmr.msrb.gmra.mxu3 %v8168_v54  ;;  %v8467_v16 = vsub.f32 %v8465_v20, %v8466_v27  ;;  %v6333_v5 = vadd.f32 %v6332_v45, %v6331_v4 }
 0xe79   :  { %8402 = vmatpush.msra.mxu2 %v12366_v8  ;;  %8540 = vmatpush.msra.mxu1 %v12400_v52  ;;  %v8462_v19 = vand.u32 4294901760, %v8461_v36 }
 0xe7a   :  { %8439 = vmatpush.msra.mxu3 %v8438_v38  ;;  %8506 = vmatpush.msra.mxu0 %v12413_v37  ;;  %v8468_v31 = vand.u32 4294901760, %v8467_v16  ;;  %v6334_v0 = vrot.slane %v6333_v5, 2 }
 0xe7b   :  { %8404 = vmatpush.msra.mxu2 %v12374_v22  ;;  %8542 = vmatpush.msra.mxu1 %v12417_v29 }
 0xe7c   :  { %8445 = vmatpush.msra.mxu3 %v8444_v14  ;;  %8509 = vmatpush.msra.mxu0 %v8459_v63 }
 0xe7d   :  { %6313 = vadd.xlane.f32.xlu0 %v6312_v57  ;;  %8406 = vmatpush.msra.mxu2 %v12385_v18 }
 0xe7e   :  { %8451 = vmatpush.msra.mxu3 %v8450_v33  ;;  %8544 = vmatpush.msra.mxu1 %v12425_v11 }
 0xe7f   :  { %8408 = vmatpush.msra.mxu2 %v12400_v52  ;;  %8512 = vmatpush.msra.mxu0 %v8465_v20 }
 0xe80   :  { %8270 = vmatmul.f32.vlgmr.msrb.gmra.mxu2 %v8167_v46  ;;  %v8380_v46 = vld [vmem:[%s12515_s3 + $0x200] sm:$0xff]  ;;  %8457 = vmatpush.msra.mxu3 %v8456_v26 }
 0xe81   :  { %8410 = vmatpush.msra.mxu2 %v12417_v29  ;;  %v12443_v54 = vand.u32 4294901760, %v8380_v46  ;;  %8546 = vmatpush.msra.mxu1 %v12436_v62 }
 0xe82   :  { %8515 = vmatpush.msra.mxu0 %v8471_v25  ;;  %8463 = vmatpush.msra.mxu3 %v8462_v19 }
 0xe83   :  { %8412 = vmatpush.msra.mxu2 %v12425_v11  ;;  %v8477_v51 = vsub.f32 %v8380_v46, %v12443_v54  ;;  %8548 = vmatpush.msra.mxu1 %v12443_v54 }
 0xe84   :  { %8469 = vmatpush.msra.mxu3 %v8468_v31 }
 0xe85   :  { %6358 = vadd.xlane.f32.xlu0 %v6357_v9  ;;  %8414 = vmatpush.msra.mxu2 %v12436_v62  ;;  %v8472_v9 = vand.u32 4294901760, %v8471_v25  ;;  %v8478_v56 = vand.u32 4294901760, %v8477_v51 }
 0xe86   :  { %8518 = vmatpush.msra.mxu0 %v8477_v51 }
 0xe87   :  { %8416 = vmatpush.msra.mxu2 %v12443_v54  ;;  %v8473_v30 = vsub.f32 %v8471_v25, %v8472_v9  ;;  %v8479_v12 = vsub.f32 %v8477_v51, %v8478_v56 }
 0xe89   :  { %8567 = vmatpush.msrb.mxu2 %v8436_v21  ;;  %v8474_v49 = vand.u32 4294901760, %v8473_v30  ;;  %v6335_v21 = vadd.f32 %v6334_v0, %v6333_v5 }
 0xe8b   :  { %8571 = vmatpush.msrb.mxu2 %v8442_v40  ;;  %8475 = vmatpush.msra.mxu3 %v8474_v49  ;;  %v6336_v40 = vrot.slane %v6335_v21, 1  ;;  %v4117_v49 = vsub.f32 0.0, %v12312_v7 }
 0xe8d   :  { %7205 = vadd.xlane.f32.xlu0 %v7204_v58  ;;  %8575 = vmatpush.msrb.mxu2 %v8448_v61  ;;  %v6337_v37 = vadd.f32 %v6336_v40, %v6335_v21 }
 0xe8f   :  { %8579 = vmatpush.msrb.mxu2 %v8454_v50 }
 0xe91   :  { %8583 = vmatpush.msrb.mxu2 %v8460_v44 }
 0xe93   :  { %8587 = vmatpush.msrb.mxu2 %v8466_v27 }
 0xe95   :  { %7222 = vadd.xlane.f32.xlu0 %v12711_v28  ;;  %v8480_v28 = vand.u32 4294901760, %v8479_v12  ;;  %8591 = vmatpush.msrb.mxu2 %v8472_v9 }
 0xe97   :  { %8481 = vmatpush.msra.mxu3 %v8480_v28  ;;  %8595 = vmatpush.msrb.mxu2 %v8478_v56 }
 0xe99   :  { %8610 = vmatpush.msrb.mxu3 %v12366_v8  ;;  %v8732_v8 = vld [vmem:[%s12515_s3 + $0x178] ss:$0 sm:$0xff] }
 0xe9b   :  { %8612 = vmatpush.msrb.mxu3 %v12374_v22 }
 0xe9d   :  { %7250 = vadd.xlane.f32.xlu0 %v7249_v6  ;;  %8614 = vmatpush.msrb.mxu3 %v12385_v18 }
 0xe9f   :  { %8616 = vmatpush.msrb.mxu3 %v12400_v52 }
 0xea1   :  { %8618 = vmatpush.msrb.mxu3 %v12417_v29 }
 0xea3   :  { %8620 = vmatpush.msrb.mxu3 %v12425_v11 }
 0xea5   :  { %8622 = vmatpush.msrb.mxu3 %v12436_v62 }
 0xea7   :  { %8624 = vmatpush.msrb.mxu3 %v12443_v54 }
 0xee8   :  { %v4169_v1 = vpop.xlane.xlu0 %4168 }
 0xee9   :  { %v4170_v57 = vrot.slane %v4169_v1, 4 }
 0xeeb   :  { %v4171_v15 = vadd.f32 %v4170_v57, %v4169_v1 }
 0xeed   :  { %v4172_v58 = vrot.slane %v4171_v15, 2  ;;  %v8347_v33 = vpop.f32.mrf.mxu0 }
 0xeee   :  { %v8376_v20 = vpop.f32.mrf.mxu1 }
 0xeef   :  { %v4173_v32 = vadd.f32 %v4172_v58, %v4171_v15 }
 0xef0   :  { %v6314_v6 = vpop.xlane.xlu0 %6313 }
 0xef1   :  { %v6315_v39 = vrot.slane %v6314_v6, 4  ;;  %v4174_v35 = vrot.slane %v4173_v32, 1 }
 0xef3   :  { %v6316_v17 = vadd.f32 %v6315_v39, %v6314_v6  ;;  %v4175_v10 = vadd.f32 %v4174_v35, %v4173_v32  ;;  %v8233_v22 = vpop.f32.mrf.mxu3 }
 0xef5   :  { %v6317_v2 = vrot.slane %v6316_v17, 2  ;;  %8701 = vpush %v4175_v10 }
 0xef7   :  { %v6318_v47 = vadd.f32 %v6317_v2, %v6316_v17 }
 0xef8   :  { %v6359_v23 = vpop.xlane.xlu0 %6358 }
 0xef9   :  { %v6360_v34 = vrot.slane %v6359_v23, 4  ;;  %v6319_v60 = vrot.slane %v6318_v47, 1 }
 0xefb   :  { %v6361_v38 = vadd.f32 %v6360_v34, %v6359_v23  ;;  %v6320_v13 = vadd.f32 %v6319_v60, %v6318_v47  ;;  %v8172_v61 = vpop.f32.mrf.mxu2  ;;  %v8302_v29 = vpop.f32.mrf.mxu3 }
 0xefc   :  { %v8173_v48 = vadd.f32 %v8732_v8, %v8172_v61 }
 0xefd   :  { %v6362_v18 = vrot.slane %v6361_v38, 2  ;;  %8703 = vpush %v6320_v13 }
 0xefe   :  { %8705 = vpush %v6337_v37  ;;  %v8234_v53 = vadd.f32 %v8233_v22, %v8173_v48 }
 0xeff   :  { %v6363_v14 = vadd.f32 %v6362_v18, %v6361_v38 }
 0xf01   :  { %v6364_v52 = vrot.slane %v6363_v14, 1 }
 0xf03   :  { %v6365_v50 = vadd.f32 %v6364_v52, %v6363_v14  ;;  %v8271_v63 = vpop.f32.mrf.mxu2 }
 0xf04   :  { %v8272_v43 = vadd.f32 %v8271_v63, %v8234_v53 }
 0xf05   :  { %8707 = vpush %v6365_v50 }
 0xf06   :  { %v8303_v4 = vadd.f32 %v8302_v29, %v8272_v43  ;;  %v8686_v43 = vsel %vm6308_vm10, 1.0, %v12649_v24  ;;  %v8733_v24 = vld [vmem:[%s12515_s3 + $0x250] ss:$0 sm:$0xff] }
 0xf08   :  { %v8348_v3 = vadd.f32 %v8347_v33, %v8303_v4 }
 0xf0a   :  { %v8377_v44 = vadd.f32 %v8376_v20, %v8348_v3  ;;  %v12484_v3 = vmul.f32 0.4082483, %v8686_v43 }
 0xf0c   :  { %v8379_v11 = vmax.f32 %v8377_v44, 0.0 }
 0xf0e   :  { %v8391_v46 = vsel %vm1308_vm5, %v8379_v11, 0 }
 0xf0f   :  { %v8417_v26 = vand.u32 4294901760, %v8391_v46 }
 0xf11   :  { %v8418_v27 = vsub.f32 %v8391_v46, %v8417_v26  ;;  %8483 = vmatmul.f32.vlgmr.msra.gmra.mxu3 %v8417_v26 }
 0xf13   :  { %8521 = vmatmul.f32.vlgmr.msra.gmra.mxu0 %v8418_v27  ;;  %v8419_v62 = vand.u32 4294901760, %v8418_v27 }
 0xf15   :  { %8552 = vmatmul.f32.vlgmr.msra.gmra.mxu1 %v8419_v62  ;;  %v8420_v25 = vsub.f32 %v8418_v27, %v8419_v62 }
 0xf17   :  { %v8421_v54 = vand.u32 4294901760, %v8420_v25 }
 0xf19   :  { %8422 = vmatmul.f32.vlgmr.msra.gmra.mxu2 %v8421_v54  ;;  %8626 = vmatmul.f32.vlgmr.msrb.gmra.mxu3 %v8417_v26 }
 0xf21   :  { %8597 = vmatmul.f32.vlgmr.msrb.gmra.mxu2 %v8417_v26 }
 0xf26   :  { %s8702_s12 = spop %8701 }
 0xf27   :  { %v4177_v45 = vstv %s8702_s12 }
 0xf28   :  { %8856 = vrsqrt.f32 %v4177_v45  ;;  %vm4185_vm7 = vcmp.eq.f32.partialorder %v4177_v45, inf  ;;  %v4188_v5 = vand.u32 2147483648, %v4177_v45  ;;  %vm4187_vm5 = vcmp.eq.f32.partialorder %v4177_v45, 0.0 }
 0xf2e   :  { %v8857_v1 = vpop.eup %8856  ;;  %s12467_s13 = spop %8703 }
 0xf2f   :  { %v4179_v36 = vmul.f32 %v8857_v1, %v4177_v45  ;;  %s8706_s14 = spop %8705  ;;  %v6322_v7 = vstv %s12467_s13 }
 0xf30   :  { %v6339_v57 = vstv %s8706_s14 }
 0xf31   :  { %v4180_v16 = vmul.f32 %v8857_v1, %v4179_v36  ;;  %8858 = vrcp.f32 %v6339_v57  ;;  %v6351_v32 = vand.u32 2147483648, %v6339_v57  ;;  %v6349_v0 = vand.u32 2147483647, %v6339_v57 }
 0xf32   :  { %vm6345_vm6 = vweird.f32 %v6339_v57 }
 0xf33   :  { %v4181_v9 = vmul.f32 0.5, %v4180_v16  ;;  %v6352_v10 = vor.u32 1.1754944e-38, %v6351_v32  ;;  %vm6350_vm14 = vcmp.eq.f32.partialorder %v6349_v0, 8.507059e+37 }
 0xf35   :  { %v4182_v51 = vsub.f32 1.5, %v4181_v9 }
 0xf36   :  { %s8708_s0 = spop %8707 }
 0xf37   :  { %v8859_v19 = vpop.eup %8858  ;;  %v4183_v15 = vmul.f32 %v8857_v1, %v4182_v51  ;;  %v6367_v31 = vstv %s8708_s0 }
 0xf38   :  { %v6341_v30 = vmul.f32 %v8859_v19, %v6339_v57  ;;  %8860 = vrsqrt.f32 %v6367_v31  ;;  %vm6346_vm4 = vweird.f32 %v8859_v19  ;;  %v6378_v61 = vand.u32 2147483648, %v6367_v31 }
 0xf39   :  { %v4184_v56 = vmul.f32 %v4183_v15, %v4177_v45  ;;  %vm6347_vm8 = vmor %vm6345_vm6, %vm6346_vm4  ;;  %vm6377_vm9 = vcmp.eq.f32.partialorder %v6367_v31, 0.0 }
 0xf3a   :  { %v6342_v58 = vsub.f32 1.0, %v6341_v30 }
 0xf3b   :  { %v4186_v12 = vsel %vm4185_vm7, %v4177_v45, %v4184_v56 }
 0xf3c   :  { %v6343_v28 = vmul.f32 %v8859_v19, %v6342_v58  ;;  %v4189_v6 = vsel %vm4187_vm5, %v4188_v5, %v4186_v12 }
 0xf3d   :  { %v12471_v39 = vsel %vm8643_vm0, %v4117_v49, %v4189_v6  ;;  %vm6375_vm0 = vcmp.eq.f32.partialorder %v6367_v31, inf }
 0xf3e   :  { %v8861_v35 = vpop.eup %8860  ;;  %v6344_v17 = vadd.f32 %v8859_v19, %v6343_v28 }
 0xf3f   :  { %v6369_v21 = vmul.f32 %v8861_v35, %v6367_v31 }
 0xf40   :  { %v6348_v2 = vsel %vm6347_vm8, %v8859_v19, %v6344_v17  ;;  %v7206_v19 = vpop.xlane.xlu0 %7205  ;;  %vm8647_vm8 = vcmask 23552  }
 0xf41   :  { %v6353_v47 = vsel %vm6350_vm14, %v6352_v10, %v6348_v2  ;;  %v6370_v23 = vmul.f32 %v8861_v35, %v6369_v21  ;;  %v7207_v30 = vrot.slane %v7206_v19, 4 }
 0xf42   :  { %v6354_v40 = vmul.f32 %v6353_v47, %v6322_v7 }
 0xf43   :  { %v6371_v34 = vmul.f32 0.5, %v6370_v23  ;;  %v7208_v58 = vadd.f32 %v7207_v30, %v7206_v19 }
 0xf44   :  { %v6355_v60 = vsub.f32 0.0, %v6354_v40 }
 0xf45   :  { %v6372_v38 = vsub.f32 1.5, %v6371_v34  ;;  %v7209_v32 = vrot.slane %v7208_v58, 2 }
 0xf46   :  { %v12476_v8 = vsel %vm8645_vm1, %v12255_v41, %v6355_v60 }
 0xf47   :  { %v6373_v13 = vmul.f32 %v8861_v35, %v6372_v38  ;;  %v7210_v10 = vadd.f32 %v7209_v32, %v7208_v58 }
 0xf48   :  { %v7223_v15 = vpop.xlane.xlu0 %7222 }
 0xf49   :  { %v6374_v22 = vmul.f32 %v6373_v13, %v6367_v31  ;;  %v7224_v56 = vrot.slane %v7223_v15, 4  ;;  %v7211_v23 = vrot.slane %v7210_v10, 1 }
 0xf4b   :  { %v6376_v37 = vsel %vm6375_vm0, %v6367_v31, %v6374_v22  ;;  %v7225_v49 = vadd.f32 %v7224_v56, %v7223_v15  ;;  %v7212_v13 = vadd.f32 %v7211_v23, %v7210_v10 }
 0xf4c   :  { %v6379_v18 = vsel %vm6377_vm9, %v6378_v61, %v6376_v37 }
 0xf4d   :  { %8862 = vrcp.f32 %v6379_v18  ;;  %v6391_v50 = vand.u32 2147483648, %v6379_v18  ;;  %v6389_v63 = vand.u32 2147483647, %v6379_v18  ;;  %vm6385_vm2 = vweird.f32 %v6379_v18 }
 0xf4e   :  { %v7226_v0 = vrot.slane %v7225_v49, 2 }
 0xf4f   :  { %v6392_v4 = vor.u32 1.1754944e-38, %v6391_v50  ;;  %vm6390_vm5 = vcmp.eq.f32.partialorder %v6389_v63, 8.507059e+37 }
 0xf50   :  { %v7251_v31 = vpop.xlane.xlu0 %7250  ;;  %v7227_v2 = vadd.f32 %v7226_v0, %v7225_v49 }
 0xf51   :  { %v7252_v5 = vrot.slane %v7251_v31, 4 }
 0xf52   :  { %v7228_v34 = vrot.slane %v7227_v2, 1 }
 0xf53   :  { %v8863_v48 = vpop.eup %8862  ;;  %v7253_v12 = vadd.f32 %v7252_v5, %v7251_v31 }
 0xf54   :  { %v6381_v14 = vmul.f32 %v8863_v48, %v6379_v18  ;;  %vm6386_vm12 = vweird.f32 %v8863_v48  ;;  %v7229_v22 = vadd.f32 %v7228_v34, %v7227_v2 }
 0xf55   :  { %vm6387_vm7 = vmor %vm6385_vm2, %vm6386_vm12  ;;  %v7254_v35 = vrot.slane %v7253_v12, 2 }
 0xf56   :  { %v6382_v53 = vsub.f32 1.0, %v6381_v14 }
 0xf57   :  { %v7255_v7 = vadd.f32 %v7254_v35, %v7253_v12 }
 0xf58   :  { %v6383_v41 = vmul.f32 %v8863_v48, %v6382_v53 }
 0xf59   :  { %v7256_v60 = vrot.slane %v7255_v7, 1 }
 0xf5a   :  { %v6384_v29 = vadd.f32 %v8863_v48, %v6383_v41 }
 0xf5b   :  { %v7257_v61 = vadd.f32 %v7256_v60, %v7255_v7 }
 0xf5c   :  { %v6388_v33 = vsel %vm6387_vm7, %v8863_v48, %v6384_v29 }
 0xf5d   :  { %v6393_v20 = vsel %vm6390_vm5, %v6392_v4, %v6388_v33 }
 0xf5e   :  { %v6394_v44 = vmul.f32 %v6393_v20, %v11679_v42 }
 0xf60   :  { %v6396_v55 = vsub.f32 %v6394_v44, %v12484_v3 }
 0xf62   :  { %v6397_v11 = vmul.f32 %v6396_v55, %v6396_v55 }
 0xf64   :  { %v6398_v46 = vsel %vm5581_vm3, %v6397_v11, 0.0 }
 0xf65   :  { %6399 = vadd.xlane.f32.xlu1 %v6398_v46 }
 0xf90   :  { %v8522_v54 = vpop.f32.mrf.mxu0 }
 0xf92   :  { %v8553_v1 = vpop.f32.mrf.mxu1 }
 0xf94   :  { %v8484_v26 = vpop.f32.mrf.mxu3 }
 0xf9c   :  { %v8423_v27 = vpop.f32.mrf.mxu2  ;;  %v8627_v16 = vpop.f32.mrf.mxu3 }
 0xf9d   :  { %v8424_v62 = vadd.f32 %v8733_v24, %v8423_v27 }
 0xf9f   :  { %v8485_v25 = vadd.f32 %v8484_v26, %v8424_v62 }
 0xfa1   :  { %v8523_v45 = vadd.f32 %v8522_v54, %v8485_v25 }
 0xfa3   :  { %v8554_v36 = vadd.f32 %v8553_v1, %v8523_v45 }
 0xfa4   :  { %v8598_v57 = vpop.f32.mrf.mxu2 }
 0xfa5   :  { %v8599_v42 = vadd.f32 %v8598_v57, %v8554_v36 }
 0xfa7   :  { %v12492_v9 = vadd.f32 %v8627_v16, %v8599_v42 }
 0xfa9   :  { %v8631_v51 = vsel %vm8630_vm13, %v12492_v9, -inf }
 0xfaa   :  { %8632 = vmax.xlane.f32.xlu2 %v8631_v51 }
 0xfd8   :  { %v6400_v28 = vpop.xlane.xlu1 %6399 }
 0xfd9   :  { %v6401_v6 = vrot.slane %v6400_v28, 4 }
 0xfdb   :  { %v6402_v17 = vadd.f32 %v6401_v6, %v6400_v28 }
 0xfdd   :  { %v6403_v21 = vrot.slane %v6402_v17, 2 }
 0xfdf   :  { %v6404_v47 = vadd.f32 %v6403_v21, %v6402_v17 }
 0xfe1   :  { %v6405_v40 = vrot.slane %v6404_v47, 1 }
 0xfe3   :  { %v6406_v38 = vadd.f32 %v6405_v40, %v6404_v47 }
 0xfe5   :  { %8709 = vpush %v6406_v38 }
 0xfe6   :  { %8711 = vpush %v7212_v13 }
 0xfe7   :  { %8713 = vpush %v7229_v22 }
 0xfe8   :  { %8715 = vpush %v7257_v61 }
0x1016   :  { %s8710_s3 = spop %8709 }
0x1017   :  { %v6408_v37 = vstv %s8710_s3  ;;  %s12496_s17 = spop %8711 }
0x1018   :  { %8864 = vrsqrt.f32 %v6408_v37  ;;  %s8714_s18 = spop %8713  ;;  %v7214_v45 = vstv %s12496_s17  ;;  %vm6416_vm0 = vcmp.eq.f32.partialorder %v6408_v37, inf  ;;  %v6419_v36 = vand.u32 2147483648, %v6408_v37 }
0x1019   :  { %v7231_v18 = vstv %s8714_s18  ;;  %s8716_s2 = spop %8715  ;;  %vm6418_vm9 = vcmp.eq.f32.partialorder %v6408_v37, 0.0 }
0x101a   :  { %8866 = vrcp.f32 %v7231_v18  ;;  %v7259_v48 = vstv %s8716_s2  ;;  %v7241_v33 = vand.u32 2147483647, %v7231_v18  ;;  %v7243_v20 = vand.u32 2147483648, %v7231_v18 }
0x101b   :  { %8868 = vrsqrt.f32 %v7259_v48  ;;  %vm7237_vm4 = vweird.f32 %v7231_v18  ;;  %vm7267_vm10 = vcmp.eq.f32.partialorder %v7259_v48, inf  ;;  %v7270_v30 = vand.u32 2147483648, %v7259_v48 }
0x101c   :  { %v7244_v27 = vor.u32 1.1754944e-38, %v7243_v20  ;;  %vm7242_vm14 = vcmp.eq.f32.partialorder %v7241_v33, 8.507059e+37  ;;  %vm7269_vm12 = vcmp.eq.f32.partialorder %v7259_v48, 0.0 }
0x101d   :  { %v8633_v0 = vpop.xlane.xlu2 %8632 }
0x101e   :  { %v8865_v14 = vpop.eup %8864 }
0x101f   :  { %v6410_v52 = vmul.f32 %v8865_v14, %v6408_v37 }
0x1020   :  { %v8867_v53 = vpop.eup %8866 }
0x1021   :  { %v6411_v50 = vmul.f32 %v8865_v14, %v6410_v52  ;;  %v7233_v41 = vmul.f32 %v8867_v53, %v7231_v18  ;;  %v8869_v63 = vpop.eup %8868  ;;  %vm7238_vm11 = vweird.f32 %v8867_v53 }
0x1022   :  { %v7261_v4 = vmul.f32 %v8869_v63, %v7259_v48  ;;  %vm7239_vm6 = vmor %vm7237_vm4, %vm7238_vm11  ;;  %vm8662_vm4 = vcmask 58368  }
0x1023   :  { %v6412_v43 = vmul.f32 0.5, %v6411_v50  ;;  %v7234_v29 = vsub.f32 1.0, %v7233_v41 }
0x1024   :  { %v7262_v11 = vmul.f32 %v8869_v63, %v7261_v4 }
0x1025   :  { %v6413_v44 = vsub.f32 1.5, %v6412_v43  ;;  %v7235_v55 = vmul.f32 %v8867_v53, %v7234_v29 }
0x1026   :  { %v7263_v26 = vmul.f32 0.5, %v7262_v11 }
0x1027   :  { %v6414_v46 = vmul.f32 %v8865_v14, %v6413_v44  ;;  %v7236_v24 = vadd.f32 %v8867_v53, %v7235_v55 }
0x1028   :  { %v7264_v54 = vsub.f32 1.5, %v7263_v26 }
0x1029   :  { %v6415_v62 = vmul.f32 %v6414_v46, %v6408_v37  ;;  %v7240_v25 = vsel %vm7239_vm6, %v8867_v53, %v7236_v24 }
0x102a   :  { %v7245_v1 = vsel %vm7242_vm14, %v7244_v27, %v7240_v25  ;;  %v7265_v42 = vmul.f32 %v8869_v63, %v7264_v54 }
0x102b   :  { %v7246_v57 = vmul.f32 %v7245_v1, %v7214_v45  ;;  %v6417_v16 = vsel %vm6416_vm0, %v6408_v37, %v6415_v62 }
0x102c   :  { %v6420_v51 = vsel %vm6418_vm9, %v6419_v36, %v6417_v16  ;;  %v7266_v15 = vmul.f32 %v7265_v42, %v7259_v48 }
0x102d   :  { %v7247_v19 = vsub.f32 0.0, %v7246_v57  ;;  %v8648_v31 = vsel %vm8647_vm8, %v12476_v8, %v6420_v51  ;;  %v8634_v8 = vsub.f32 %v12492_v9, %v8633_v0 }
0x102e   :  { %v7268_v56 = vsel %vm7267_vm10, %v7259_v48, %v7266_v15 }
0x102f   :  { %v8650_v5 = vsel %vm8645_vm1, %v12471_v39, %v7247_v19  ;;  %v7271_v58 = vsel %vm7269_vm12, %v7270_v30, %v7268_v56  ;;  %v8635_v7 = vmul.f32 1.442695, %v8634_v8 }
0x1030   :  { %8870 = vrcp.f32 %v7271_v58  ;;  %v7283_v28 = vand.u32 2147483648, %v7271_v58  ;;  %v7281_v35 = vand.u32 2147483647, %v7271_v58  ;;  %vm7277_vm7 = vweird.f32 %v7271_v58 }
0x1031   :  { %8872 = vpow2.f32 %v8635_v7 }
0x1032   :  { %v7284_v10 = vor.u32 1.1754944e-38, %v7283_v28  ;;  %vm7282_vm11 = vcmp.eq.f32.partialorder %v7281_v35, 8.507059e+37 }
0x1036   :  { %v8871_v49 = vpop.eup %8870 }
0x1037   :  { %v7273_v12 = vmul.f32 %v8871_v49, %v7271_v58  ;;  %vm7278_vm2 = vweird.f32 %v8871_v49  ;;  %v8873_v34 = vpop.eup %8872 }
0x1038   :  { %vm7279_vm5 = vmor %vm7277_vm7, %vm7278_vm2  ;;  %v8637_v60 = vsel %vm8630_vm13, %v8873_v34, 0.0  ;;  %vm8660_vm13 = vcmask 31744  }
0x1039   :  { %v7274_v32 = vsub.f32 1.0, %v7273_v12 }
0x103b   :  { %v7275_v6 = vmul.f32 %v8871_v49, %v7274_v32 }
0x103d   :  { %v7276_v17 = vadd.f32 %v8871_v49, %v7275_v6 }
0x103f   :  { %v7280_v21 = vsel %vm7279_vm5, %v8871_v49, %v7276_v17 }
0x1040   :  { %v7285_v2 = vsel %vm7282_vm11, %v7284_v10, %v7280_v21 }
0x1041   :  { %v7286_v39 = vmul.f32 %v7285_v2, %v12357_v59 }
0x1043   :  { %v7287_v47 = vsub.f32 %v7286_v39, %v12484_v3 }
0x1045   :  { %v7288_v23 = vmul.f32 %v7287_v47, %v7287_v47 }
0x1047   :  { %v7289_v40 = vsel %vm5581_vm3, %v7288_v23, 0.0 }
0x1048   :  { %7290 = vadd.xlane.f32.xlu0 %v7289_v40 }
0x1050   :  { %8638 = vadd.xlane.f32.xlu0 %v8637_v60 }
0x10bb   :  { %v7291_v9 = vpop.xlane.xlu0 %7290 }
0x10bc   :  { %v7292_v38 = vrot.slane %v7291_v9, 4 }
0x10be   :  { %v7293_v13 = vadd.f32 %v7292_v38, %v7291_v9 }
0x10c0   :  { %v7294_v22 = vrot.slane %v7293_v13, 2 }
0x10c2   :  { %v7295_v61 = vadd.f32 %v7294_v22, %v7293_v13 }
0x10c3   :  { %v8639_v44 = vpop.xlane.xlu0 %8638 }
0x10c4   :  { %v7296_v37 = vrot.slane %v7295_v61, 1 }
0x10c6   :  { %v7297_v18 = vadd.f32 %v7296_v37, %v7295_v61 }
0x10c8   :  { %8717 = vpush %v7297_v18 }
0x10f9   :  { %s8718_s19 = spop %8717 }
0x10fa   :  { %v7299_v59 = vstv %s8718_s19 }
0x10fb   :  { %8874 = vrsqrt.f32 %v7299_v59  ;;  %vm7307_vm3 = vcmp.eq.f32.partialorder %v7299_v59, inf  ;;  %v7310_v63 = vand.u32 2147483648, %v7299_v59  ;;  %vm7309_vm1 = vcmp.eq.f32.partialorder %v7299_v59, 0.0 }
0x10fc   :  { %8876 = vlog2.f32 %v8639_v44 }
0x1101   :  { %v8875_v3 = vpop.eup %8874 }
0x1102   :  { %v7301_v48 = vmul.f32 %v8875_v3, %v7299_v59  ;;  %v8877_v55 = vpop.eup %8876 }
0x1103   :  { %v8641_v11 = vmul.f32 0.6931472, %v8877_v55 }
0x1104   :  { %v7302_v14 = vmul.f32 %v8875_v3, %v7301_v48 }
0x1105   :  { %v8642_v46 = vsub.f32 %v8634_v8, %v8641_v11 }
0x1106   :  { %v7303_v52 = vmul.f32 0.5, %v7302_v14 }
0x1108   :  { %v7304_v53 = vsub.f32 1.5, %v7303_v52 }
0x110a   :  { %v7305_v50 = vmul.f32 %v8875_v3, %v7304_v53 }
0x110c   :  { %v7306_v41 = vmul.f32 %v7305_v50, %v7299_v59 }
0x110e   :  { %v7308_v43 = vsel %vm7307_vm3, %v7299_v59, %v7306_v41 }
0x110f   :  { %v7311_v29 = vsel %vm7309_vm1, %v7310_v63, %v7308_v43 }
0x1110   :  { %v8651_v4 = vsel %vm8647_vm8, %v8650_v5, %v7311_v29 }
0x1111   :  { %v8653_v33 = vrot.slane %v8651_v4, 7 }
0x1113   :  { %v8655_v20 = vsel %vm8127_vm15, %v8648_v31, %v8653_v33 }
0x1114   :  { %8657 = vrot.lane.b32.xlu1 %v8655_v20, %s8890_s20 }
0x1186   :  { %v8658_v24 = vpop.permute.xlu1 %8657 }
0x1187   :  { %v8661_v26 = vsel %vm8660_vm13, %v8642_v46, %v8658_v24 }
0x1188   :  { %8663 = vst.msk [vmem:[%s12517_s4] sm:$0x3] %vm8662_vm4, %v8661_v26 }

</bundles_post_ra>
